<compile_context>
chip_gen: v7x
topology: tpu7x:2x2x1
jax: 0.10.0
libtpu: 0.0.40
codegen_flags: <defaults>
</compile_context>

<pallas_src>
import functools

import numpy as np

import jax
import jax.numpy as jnp
from jax import lax
from jax.experimental import pallas as pl
from jax.experimental.pallas import tpu as pltpu

CHANNEL = 32  # `channel` in Net.py


# ----------------------------------------------------------------------------
# Parameters (PyTorch layout: w (Cout, Cin, k, k), b (Cout,))
# ----------------------------------------------------------------------------
def _conv_init(key, cout, cin, k):
    wk, bk = jax.random.split(key)
    bound = (cin * k * k) ** -0.5
    return {
        "w": jax.random.uniform(wk, (cout, cin, k, k), jnp.float32, -bound, bound),
        "b": jax.random.uniform(bk, (cout,), jnp.float32, -bound, bound),
    }


def init_led_params(key):
    ks = jax.random.split(key, 6)
    g = CHANNEL // 2

    def rdb_p(k):
        k1, k2, k3 = jax.random.split(k, 3)
        return {
            "dense1": _conv_init(k1, g, CHANNEL, 3),
            "dense2": _conv_init(k2, g, CHANNEL + g, 3),
            "conv1x1": _conv_init(k3, CHANNEL, CHANNEL + 2 * g, 1),
        }

    return {
        "baseConv1": _conv_init(ks[0], CHANNEL, 3, 5),
        "baseConv2": _conv_init(ks[1], 3, CHANNEL, 5),
        "secondConv1": _conv_init(ks[2], 3 + 3, 3 + 3, 3)["w"].shape and  # noqa: unused trick avoided below
        _conv_init(ks[2], CHANNEL, 3 + 3, 3),
        "RBD1": rdb_p(ks[3]),
        "RBD2": rdb_p(ks[4]),
        # RBD3 is constructed in the PyTorch __init__ but never used in forward().
        "RBD3": rdb_p(ks[5]),
    }


# ----------------------------------------------------------------------------
# Weight packing: torch (Cout, Cin, k, k) -> kernel (Cout', k*k*Cin') bf16
# (tap-major, channel-minor; optional zero padding of Cin/Cout to 8)
# ----------------------------------------------------------------------------
def _pack_w(w, pad_cin_to=0, pad_cout_to=0):
    cout, cin, k, _ = w.shape
    cin_p = max(cin, pad_cin_to)
    cout_p = max(cout, pad_cout_to)
    w = jnp.pad(w, ((0, cout_p - cout), (0, cin_p - cin), (0, 0), (0, 0)))
    w = jnp.transpose(w, (0, 2, 3, 1)).reshape(cout_p, k * k * cin_p)
    return w.astype(jnp.bfloat16)


def _pack_b(b, pad_to=0):
    n = max(b.shape[0], pad_to)
    return jnp.pad(b, (0, n - b.shape[0])).reshape(n, 1).astype(jnp.float32)


def pack_led_params(params):
    def rdb_pack(p):
        w2 = p["dense2"]["w"]  # (16, 48, 3, 3), Cin order = [x(32), d1(16)]
        return [
            _pack_w(p["dense1"]["w"]), _pack_b(p["dense1"]["b"]),
            _pack_w(w2[:, :CHANNEL]),          # dense2, x-part   (16, 288)
            _pack_w(w2[:, CHANNEL:]),          # dense2, d1-part  (16, 144)
            _pack_b(p["dense2"]["b"]),
            _pack_w(p["conv1x1"]["w"]), _pack_b(p["conv1x1"]["b"]),
        ]

    # secondConv1 consumes concat([base, x]); both are 3-channel tensors padded
    # to 8 channels in the kernel, so spread its 6 input channels onto channel
    # slots [0:3] (base) and [8:11] (x) with zeros elsewhere.
    w_sc = params["secondConv1"]["w"]  # (32, 6, 3, 3)
    w_sc16 = jnp.concatenate(
        [jnp.pad(w_sc[:, 0:3], ((0, 0), (0, 5), (0, 0), (0, 0))),
         jnp.pad(w_sc[:, 3:6], ((0, 0), (0, 5), (0, 0), (0, 0)))], axis=1)

    return (
        [_pack_w(params["baseConv1"]["w"], pad_cin_to=8),
         _pack_b(params["baseConv1"]["b"])]
        + rdb_pack(params["RBD1"])
        + rdb_pack(params["RBD2"])
        + [_pack_w(params["baseConv2"]["w"], pad_cout_to=8),
           _pack_b(params["baseConv2"]["b"], pad_to=8)]
        + [_pack_w(w_sc16), _pack_b(params["secondConv1"]["b"])]
    )


# ----------------------------------------------------------------------------
# The fused Pallas kernel (one batch element per grid step)
# ----------------------------------------------------------------------------
def _make_led_kernel(Wp, P):
    def patches(a, k):
        # im2col for a k x k stride-1 conv on the flattened padded layout:
        # tap (kh, kw) is a pure lane rotation by d = (kh-p)*Wp + (kw-p).
        # pltpu.roll follows jnp.roll semantics: roll(x, s)[j] == x[(j - s) % P].
        p = (k - 1) // 2
        parts = []
        for kh in range(k):
            for kw in range(k):
                d = (kh - p) * Wp + (kw - p)
                parts.append(a if d == 0 else pltpu.roll(a, (-d) % P, 1))
        # sublane-aligned concat (all channel counts are multiples of 8),
        # then a single f32 -> bf16 cast for the MXU.
        return jnp.concatenate(parts, axis=0).astype(jnp.bfloat16)

    def kernel(x_ref, mask_ref, *refs):
        (w_b1, b_b1,
         w1_d1, b1_d1, w1_d2x, w1_d2d, b1_d2, w1_11, b1_11,
         w2_d1, b2_d1, w2_d2x, w2_d2d, b2_d2, w2_11, b2_11,
         w_b2, b_b2, w_sc, b_sc) = refs[:-2]
        sc_out, base_out = refs[-2:]

        interior = mask_ref[...]   # (1, P) {0,1}; re-zeroes the halo ring
        x_in = x_ref[...]          # (8, P) f32; channels 3..7 and the ring are 0

        def mm(w, pats):
            # one MXU matmul per conv: bf16 operands, f32 accumulation
            return jnp.dot(w[...], pats, preferred_element_type=jnp.float32)

        # baseConv1: 5x5, 3(->8) -> 32, ReLU
        h = jnp.maximum(mm(w_b1, patches(x_in, 5)) + b_b1[...], 0.0) * interior

        def rdb(x, wd1, bd1, wd2x, wd2d, bd2, w11, b11):
            px = patches(x, 3)                                    # (288, P), reused
            d1 = jnp.maximum(mm(wd1, px) + bd1[...], 0.0) * interior
            # conv(concat([x, d1])) == Wx@patches(x) + Wd1@patches(d1)
            d2 = jnp.maximum(mm(wd2x, px) + mm(wd2d, patches(d1, 3)) + bd2[...],
                             0.0) * interior
            cat = jnp.concatenate([x, d1, d2], axis=0).astype(jnp.bfloat16)  # (64, P)
            return (mm(w11, cat) + b11[...] + x) * interior       # 1x1 conv + residual

        h = rdb(h, w1_d1, b1_d1, w1_d2x, w1_d2d, b1_d2, w1_11, b1_11)
        h = rdb(h, w2_d1, b2_d1, w2_d2x, w2_d2d, b2_d2, w2_11, b2_11)

        # baseConv2: 5x5, 32 -> 3(->8), plus input residual
        base = (mm(w_b2, patches(h, 5)) + b_b2[...] + x_in) * interior       # (8, P)

        # secondConv1: 3x3 on concat([base, x]) -> 32, ReLU
        cat2 = jnp.concatenate([base, x_in], axis=0)                         # (16, P)
        sc = jnp.maximum(mm(w_sc, patches(cat2, 3)) + b_sc[...], 0.0) * interior

        sc_out[...] = sc
        base_out[...] = base

    return kernel


# ----------------------------------------------------------------------------
# Public forward (NCHW in / NCHW out, like the PyTorch module)
# ----------------------------------------------------------------------------
def led_forward(x_nchw, params):
    N, C, H, W = x_nchw.shape
    assert C == 3
    pad = 2                                  # halo ring = max conv pad (5x5)
    Hp, Wp = H + 2 * pad, W + 2 * pad
    P = ((Hp * Wp + 127) // 128) * 128       # lane-dense flattened spatial extent

    # One-time layout transform of the (tiny, 3-channel) network input:
    # channels 3 -> 8, 2-wide spatial zero ring, flatten, pad lanes to P.
    x = x_nchw.astype(jnp.float32)
    x = jnp.pad(x, ((0, 0), (0, 8 - C), (pad, pad), (pad, pad)))
    x = x.reshape(N, 8, Hp * Wp)
    x = jnp.pad(x, ((0, 0), (0, 0), (0, P - Hp * Wp)))

    # {0,1} interior mask (host constant).
    m2 = np.zeros((Hp, Wp), np.float32)
    m2[pad:pad + H, pad:pad + W] = 1.0
    m = np.zeros((1, P), np.float32)
    m[0, :Hp * Wp] = m2.reshape(-1)
    interior = jnp.asarray(m)

    packed = pack_led_params(params)
    kernel = _make_led_kernel(Wp, P)

    def io_spec(c):
        return pl.BlockSpec((None, c, P), lambda n: (n, 0, 0))

    def const_spec(a):
        nd = a.ndim
        return pl.BlockSpec(a.shape, lambda n: (0,) * nd)

    sc, base = pl.pallas_call(
        kernel,
        grid=(N,),
        in_specs=[io_spec(8), const_spec(interior)] + [const_spec(a) for a in packed],
        out_specs=[io_spec(CHANNEL), io_spec(8)],
        out_shape=[jax.ShapeDtypeStruct((N, CHANNEL, P), jnp.float32),
                   jax.ShapeDtypeStruct((N, 8, P), jnp.float32)],
        compiler_params=pltpu.CompilerParams(dimension_semantics=("parallel",)),
    )(x, interior, *packed)

    def crop(a, c):
        a = a[:, :c, :Hp * Wp].reshape(N, c, Hp, Wp)
        return a[:, :, pad:pad + H, pad:pad + W]

    return crop(sc, CHANNEL), crop(base, 3)


# ----------------------------------------------------------------------------
# Pure-JAX reference (same bf16-operand / f32-accumulate quantization points)
# ----------------------------------------------------------------------------
def _conv_ref(x, p, k):
    pd = (k - 1) // 2
    y = lax.conv_general_dilated(
        x.astype(jnp.bfloat16), p["w"].astype(jnp.bfloat16),
        window_strides=(1, 1), padding=[(pd, pd), (pd, pd)],
        dimension_numbers=("NCHW", "OIHW", "NCHW"),
        preferred_element_type=jnp.float32)
    return y + p["b"].reshape(1, -1, 1, 1)


def led_reference(x, params):
    x = x.astype(jnp.float32)
    h = jax.nn.relu(_conv_ref(x, params["baseConv1"], 5))

    def rdb(h, p):
        d1 = jax.nn.relu(_conv_ref(h, p["dense1"], 3))
        h1 = jnp.concatenate([h, d1], axis=1)
        d2 = jax.nn.relu(_conv_ref(h1, p["dense2"], 3))
        h2 = jnp.concatenate([h1, d2], axis=1)
        return _conv_ref(h2, p["conv1x1"], 1) + h

    h = rdb(h, params["RBD1"])
    h = rdb(h, params["RBD2"])
    base = _conv_ref(h, params["baseConv2"], 5) + x
    sc = jax.nn.relu(_conv_ref(jnp.concatenate([base, x], axis=1),
                               params["secondConv1"], 3))
    return sc, base


# ----------------------------------------------------------------------------
if __name__ == "__main__":
    key = jax.random.PRNGKey(0)
    kp, kx = jax.random.split(key)

    params = init_led_params(kp)
    x = jax.random.normal(kx, (2, 3, 16, 16), jnp.float32)  # NCHW, like PyTorch

    led = jax.jit(functools.partial(led_forward, params=params))
    sc, base = led(x)
    jax.block_until_ready((sc, base))

    assert sc.shape == (2, CHANNEL, 16, 16), sc.shape
    assert base.shape == (2, 3, 16, 16), base.shape
    assert sc.dtype == jnp.float32 and base.dtype == jnp.float32
    assert float(jnp.min(sc)) >= 0.0  # ReLU output must be non-negative

    # Reference uses the same bf16 quantization of weights/activations with f32
    # accumulation; only accumulation order differs, so tolerance is generous.
    sc_ref, base_ref = jax.jit(functools.partial(led_reference, params=params))(x)
    jax.block_until_ready((sc_ref, base_ref))
    err = max(float(jnp.max(jnp.abs(sc - sc_ref))),
              float(jnp.max(jnp.abs(base - base_ref))))
    assert err < 1e-1, f"max abs error vs reference: {err}"

    print("KERNEL_OK")
</pallas_src>

<mosaic_0001>
module attributes {stable_mosaic.version = 11 : i64} {
  func.func @kernel(%arg0: i32, %arg1: memref<1x8x512xf32, #tpu.memory_space<vmem>>, %arg2: memref<1x512xf32, #tpu.memory_space<vmem>>, %arg3: memref<32x200xbf16, #tpu.memory_space<vmem>>, %arg4: memref<32x1xf32, #tpu.memory_space<vmem>>, %arg5: memref<16x288xbf16, #tpu.memory_space<vmem>>, %arg6: memref<16x1xf32, #tpu.memory_space<vmem>>, %arg7: memref<16x288xbf16, #tpu.memory_space<vmem>>, %arg8: memref<16x144xbf16, #tpu.memory_space<vmem>>, %arg9: memref<16x1xf32, #tpu.memory_space<vmem>>, %arg10: memref<32x64xbf16, #tpu.memory_space<vmem>>, %arg11: memref<32x1xf32, #tpu.memory_space<vmem>>, %arg12: memref<16x288xbf16, #tpu.memory_space<vmem>>, %arg13: memref<16x1xf32, #tpu.memory_space<vmem>>, %arg14: memref<16x288xbf16, #tpu.memory_space<vmem>>, %arg15: memref<16x144xbf16, #tpu.memory_space<vmem>>, %arg16: memref<16x1xf32, #tpu.memory_space<vmem>>, %arg17: memref<32x64xbf16, #tpu.memory_space<vmem>>, %arg18: memref<32x1xf32, #tpu.memory_space<vmem>>, %arg19: memref<8x800xbf16, #tpu.memory_space<vmem>>, %arg20: memref<8x1xf32, #tpu.memory_space<vmem>>, %arg21: memref<32x144xbf16, #tpu.memory_space<vmem>>, %arg22: memref<32x1xf32, #tpu.memory_space<vmem>>, %arg23: memref<1x32x512xf32, #tpu.memory_space<vmem>>, %arg24: memref<1x8x512xf32, #tpu.memory_space<vmem>>) attributes {dimension_semantics = [#tpu.dimension_semantics<parallel>], iteration_bounds = array<i64: 2>, scalar_prefetch = 0 : i64, scratch_operands = 0 : i64, tpu.core_type = #tpu.core_type<tc>, window_params = [{transform_indices = @transform_0, window_bounds = array<i64: 1, 8, 512>}, {pipeline_mode = #tpu.pipeline_mode<synchronous>, transform_indices = @transform_1, window_bounds = array<i64: 1, 512>}, {pipeline_mode = #tpu.pipeline_mode<synchronous>, transform_indices = @transform_2, window_bounds = array<i64: 32, 200>}, {pipeline_mode = #tpu.pipeline_mode<synchronous>, transform_indices = @transform_3, window_bounds = array<i64: 32, 1>}, {pipeline_mode = #tpu.pipeline_mode<synchronous>, transform_indices = @transform_4, window_bounds = array<i64: 16, 288>}, {pipeline_mode = #tpu.pipeline_mode<synchronous>, transform_indices = @transform_5, window_bounds = array<i64: 16, 1>}, {pipeline_mode = #tpu.pipeline_mode<synchronous>, transform_indices = @transform_6, window_bounds = array<i64: 16, 288>}, {pipeline_mode = #tpu.pipeline_mode<synchronous>, transform_indices = @transform_7, window_bounds = array<i64: 16, 144>}, {pipeline_mode = #tpu.pipeline_mode<synchronous>, transform_indices = @transform_8, window_bounds = array<i64: 16, 1>}, {pipeline_mode = #tpu.pipeline_mode<synchronous>, transform_indices = @transform_9, window_bounds = array<i64: 32, 64>}, {pipeline_mode = #tpu.pipeline_mode<synchronous>, transform_indices = @transform_10, window_bounds = array<i64: 32, 1>}, {pipeline_mode = #tpu.pipeline_mode<synchronous>, transform_indices = @transform_11, window_bounds = array<i64: 16, 288>}, {pipeline_mode = #tpu.pipeline_mode<synchronous>, transform_indices = @transform_12, window_bounds = array<i64: 16, 1>}, {pipeline_mode = #tpu.pipeline_mode<synchronous>, transform_indices = @transform_13, window_bounds = array<i64: 16, 288>}, {pipeline_mode = #tpu.pipeline_mode<synchronous>, transform_indices = @transform_14, window_bounds = array<i64: 16, 144>}, {pipeline_mode = #tpu.pipeline_mode<synchronous>, transform_indices = @transform_15, window_bounds = array<i64: 16, 1>}, {pipeline_mode = #tpu.pipeline_mode<synchronous>, transform_indices = @transform_16, window_bounds = array<i64: 32, 64>}, {pipeline_mode = #tpu.pipeline_mode<synchronous>, transform_indices = @transform_17, window_bounds = array<i64: 32, 1>}, {pipeline_mode = #tpu.pipeline_mode<synchronous>, transform_indices = @transform_18, window_bounds = array<i64: 8, 800>}, {pipeline_mode = #tpu.pipeline_mode<synchronous>, transform_indices = @transform_19, window_bounds = array<i64: 8, 1>}, {pipeline_mode = #tpu.pipeline_mode<synchronous>, transform_indices = @transform_20, window_bounds = array<i64: 32, 144>}, {pipeline_mode = #tpu.pipeline_mode<synchronous>, transform_indices = @transform_21, window_bounds = array<i64: 32, 1>}, {transform_indices = @transform_22, window_bounds = array<i64: 1, 32, 512>}, {transform_indices = @transform_23, window_bounds = array<i64: 1, 8, 512>}]} {
    %c0 = arith.constant 0 : index
    %c0_0 = arith.constant 0 : index
    %0 = vector.load %arg2[%c0, %c0_0] : memref<1x512xf32, #tpu.memory_space<vmem>>, vector<1x512xf32>
    %c0_1 = arith.constant 0 : index
    %c0_2 = arith.constant 0 : index
    %c0_3 = arith.constant 0 : index
    %1 = vector.load %arg1[%c0_1, %c0_2, %c0_3] : memref<1x8x512xf32, #tpu.memory_space<vmem>>, vector<1x8x512xf32>
    %2 = vector.shape_cast %1 : vector<1x8x512xf32> to vector<8x512xf32>
    %c42_i32 = arith.constant 42 : i32
    %3 = tpu.dynamic_rotate %2 by %c42_i32 dim 1 : vector<8x512xf32>, i32 -> vector<8x512xf32>
    %c41_i32 = arith.constant 41 : i32
    %4 = tpu.dynamic_rotate %2 by %c41_i32 dim 1 : vector<8x512xf32>, i32 -> vector<8x512xf32>
    %c40_i32 = arith.constant 40 : i32
    %5 = tpu.dynamic_rotate %2 by %c40_i32 dim 1 : vector<8x512xf32>, i32 -> vector<8x512xf32>
    %c39_i32 = arith.constant 39 : i32
    %6 = tpu.dynamic_rotate %2 by %c39_i32 dim 1 : vector<8x512xf32>, i32 -> vector<8x512xf32>
    %c38_i32 = arith.constant 38 : i32
    %7 = tpu.dynamic_rotate %2 by %c38_i32 dim 1 : vector<8x512xf32>, i32 -> vector<8x512xf32>
    %c22_i32 = arith.constant 22 : i32
    %8 = tpu.dynamic_rotate %2 by %c22_i32 dim 1 : vector<8x512xf32>, i32 -> vector<8x512xf32>
    %c21_i32 = arith.constant 21 : i32
    %9 = tpu.dynamic_rotate %2 by %c21_i32 dim 1 : vector<8x512xf32>, i32 -> vector<8x512xf32>
    %c20_i32 = arith.constant 20 : i32
    %10 = tpu.dynamic_rotate %2 by %c20_i32 dim 1 : vector<8x512xf32>, i32 -> vector<8x512xf32>
    %c19_i32 = arith.constant 19 : i32
    %11 = tpu.dynamic_rotate %2 by %c19_i32 dim 1 : vector<8x512xf32>, i32 -> vector<8x512xf32>
    %c18_i32 = arith.constant 18 : i32
    %12 = tpu.dynamic_rotate %2 by %c18_i32 dim 1 : vector<8x512xf32>, i32 -> vector<8x512xf32>
    %c2_i32 = arith.constant 2 : i32
    %13 = tpu.dynamic_rotate %2 by %c2_i32 dim 1 : vector<8x512xf32>, i32 -> vector<8x512xf32>
    %c1_i32 = arith.constant 1 : i32
    %14 = tpu.dynamic_rotate %2 by %c1_i32 dim 1 : vector<8x512xf32>, i32 -> vector<8x512xf32>
    %c511_i32 = arith.constant 511 : i32
    %15 = tpu.dynamic_rotate %2 by %c511_i32 dim 1 : vector<8x512xf32>, i32 -> vector<8x512xf32>
    %c510_i32 = arith.constant 510 : i32
    %16 = tpu.dynamic_rotate %2 by %c510_i32 dim 1 : vector<8x512xf32>, i32 -> vector<8x512xf32>
    %c494_i32 = arith.constant 494 : i32
    %17 = tpu.dynamic_rotate %2 by %c494_i32 dim 1 : vector<8x512xf32>, i32 -> vector<8x512xf32>
    %c493_i32 = arith.constant 493 : i32
    %18 = tpu.dynamic_rotate %2 by %c493_i32 dim 1 : vector<8x512xf32>, i32 -> vector<8x512xf32>
    %c492_i32 = arith.constant 492 : i32
    %19 = tpu.dynamic_rotate %2 by %c492_i32 dim 1 : vector<8x512xf32>, i32 -> vector<8x512xf32>
    %c491_i32 = arith.constant 491 : i32
    %20 = tpu.dynamic_rotate %2 by %c491_i32 dim 1 : vector<8x512xf32>, i32 -> vector<8x512xf32>
    %c490_i32 = arith.constant 490 : i32
    %21 = tpu.dynamic_rotate %2 by %c490_i32 dim 1 : vector<8x512xf32>, i32 -> vector<8x512xf32>
    %c474_i32 = arith.constant 474 : i32
    %22 = tpu.dynamic_rotate %2 by %c474_i32 dim 1 : vector<8x512xf32>, i32 -> vector<8x512xf32>
    %c473_i32 = arith.constant 473 : i32
    %23 = tpu.dynamic_rotate %2 by %c473_i32 dim 1 : vector<8x512xf32>, i32 -> vector<8x512xf32>
    %c472_i32 = arith.constant 472 : i32
    %24 = tpu.dynamic_rotate %2 by %c472_i32 dim 1 : vector<8x512xf32>, i32 -> vector<8x512xf32>
    %c471_i32 = arith.constant 471 : i32
    %25 = tpu.dynamic_rotate %2 by %c471_i32 dim 1 : vector<8x512xf32>, i32 -> vector<8x512xf32>
    %c470_i32 = arith.constant 470 : i32
    %26 = tpu.dynamic_rotate %2 by %c470_i32 dim 1 : vector<8x512xf32>, i32 -> vector<8x512xf32>
    %27 = tpu.concatenate %3, %4, %5, %6, %7, %8, %9, %10, %11, %12, %13, %14, %2, %15, %16, %17 in 0 : vector<8x512xf32>, vector<8x512xf32>, vector<8x512xf32>, vector<8x512xf32>, vector<8x512xf32>, vector<8x512xf32>, vector<8x512xf32>, vector<8x512xf32>, vector<8x512xf32>, vector<8x512xf32>, vector<8x512xf32>, vector<8x512xf32>, vector<8x512xf32>, vector<8x512xf32>, vector<8x512xf32>, vector<8x512xf32> -> vector<128x512xf32>
    %28 = tpu.concatenate %18, %19, %20, %21, %22, %23, %24, %25, %26 in 0 : vector<8x512xf32>, vector<8x512xf32>, vector<8x512xf32>, vector<8x512xf32>, vector<8x512xf32>, vector<8x512xf32>, vector<8x512xf32>, vector<8x512xf32>, vector<8x512xf32> -> vector<72x512xf32>
    %29 = tpu.concatenate %27, %28 in 0 : vector<128x512xf32>, vector<72x512xf32> -> vector<200x512xf32>
    %30 = arith.truncf %29 : vector<200x512xf32> to vector<200x512xbf16>
    %c0_4 = arith.constant 0 : index
    %c0_5 = arith.constant 0 : index
    %31 = vector.load %arg3[%c0_4, %c0_5] : memref<32x200xbf16, #tpu.memory_space<vmem>>, vector<32x200xbf16>
    %cst = arith.constant dense<0.000000e+00> : vector<32x512xf32>
    %32 = tpu.matmul %31, %30, %cst {dimension_numbers = #tpu.dot_dimension_numbers<[1], [0], [0], [1], [0, 0, 1, 1], [], []>} : vector<32x200xbf16>, vector<200x512xbf16>, vector<32x512xf32> -> vector<32x512xf32>
    %c0_6 = arith.constant 0 : index
    %c0_7 = arith.constant 0 : index
    %33 = vector.load %arg4[%c0_6, %c0_7] : memref<32x1xf32, #tpu.memory_space<vmem>>, vector<32x1xf32>
    %34 = vector.broadcast %33 : vector<32x1xf32> to vector<32x512xf32>
    %35 = arith.addf %32, %34 : vector<32x512xf32>
    %cst_8 = arith.constant 0.000000e+00 : f32
    %36 = vector.broadcast %cst_8 : f32 to vector<32x512xf32>
    %37 = arith.maximumf %35, %36 : vector<32x512xf32>
    %38 = vector.broadcast %0 : vector<1x512xf32> to vector<32x512xf32>
    %39 = arith.mulf %37, %38 : vector<32x512xf32>
    %c21_i32_9 = arith.constant 21 : i32
    %40 = tpu.dynamic_rotate %39 by %c21_i32_9 dim 1 : vector<32x512xf32>, i32 -> vector<32x512xf32>
    %c20_i32_10 = arith.constant 20 : i32
    %41 = tpu.dynamic_rotate %39 by %c20_i32_10 dim 1 : vector<32x512xf32>, i32 -> vector<32x512xf32>
    %c19_i32_11 = arith.constant 19 : i32
    %42 = tpu.dynamic_rotate %39 by %c19_i32_11 dim 1 : vector<32x512xf32>, i32 -> vector<32x512xf32>
    %c1_i32_12 = arith.constant 1 : i32
    %43 = tpu.dynamic_rotate %39 by %c1_i32_12 dim 1 : vector<32x512xf32>, i32 -> vector<32x512xf32>
    %c511_i32_13 = arith.constant 511 : i32
    %44 = tpu.dynamic_rotate %39 by %c511_i32_13 dim 1 : vector<32x512xf32>, i32 -> vector<32x512xf32>
    %c493_i32_14 = arith.constant 493 : i32
    %45 = tpu.dynamic_rotate %39 by %c493_i32_14 dim 1 : vector<32x512xf32>, i32 -> vector<32x512xf32>
    %c492_i32_15 = arith.constant 492 : i32
    %46 = tpu.dynamic_rotate %39 by %c492_i32_15 dim 1 : vector<32x512xf32>, i32 -> vector<32x512xf32>
    %c491_i32_16 = arith.constant 491 : i32
    %47 = tpu.dynamic_rotate %39 by %c491_i32_16 dim 1 : vector<32x512xf32>, i32 -> vector<32x512xf32>
    %48 = tpu.concatenate %40, %41, %42, %43, %39, %44, %45, %46, %47 in 0 : vector<32x512xf32>, vector<32x512xf32>, vector<32x512xf32>, vector<32x512xf32>, vector<32x512xf32>, vector<32x512xf32>, vector<32x512xf32>, vector<32x512xf32>, vector<32x512xf32> -> vector<288x512xf32>
    %49 = arith.truncf %48 : vector<288x512xf32> to vector<288x512xbf16>
    %c0_17 = arith.constant 0 : index
    %c0_18 = arith.constant 0 : index
    %50 = vector.load %arg5[%c0_17, %c0_18] : memref<16x288xbf16, #tpu.memory_space<vmem>>, vector<16x288xbf16>
    %cst_19 = arith.constant dense<0.000000e+00> : vector<16x512xf32>
    %51 = tpu.matmul %50, %49, %cst_19 {dimension_numbers = #tpu.dot_dimension_numbers<[1], [0], [0], [1], [0, 0, 1, 1], [], []>} : vector<16x288xbf16>, vector<288x512xbf16>, vector<16x512xf32> -> vector<16x512xf32>
    %c0_20 = arith.constant 0 : index
    %c0_21 = arith.constant 0 : index
    %52 = vector.load %arg6[%c0_20, %c0_21] : memref<16x1xf32, #tpu.memory_space<vmem>>, vector<16x1xf32>
    %53 = vector.broadcast %52 : vector<16x1xf32> to vector<16x512xf32>
    %54 = arith.addf %51, %53 : vector<16x512xf32>
    %cst_22 = arith.constant 0.000000e+00 : f32
    %55 = vector.broadcast %cst_22 : f32 to vector<16x512xf32>
    %56 = arith.maximumf %54, %55 : vector<16x512xf32>
    %57 = vector.broadcast %0 : vector<1x512xf32> to vector<16x512xf32>
    %58 = arith.mulf %56, %57 : vector<16x512xf32>
    %c0_23 = arith.constant 0 : index
    %c0_24 = arith.constant 0 : index
    %59 = vector.load %arg7[%c0_23, %c0_24] : memref<16x288xbf16, #tpu.memory_space<vmem>>, vector<16x288xbf16>
    %cst_25 = arith.constant dense<0.000000e+00> : vector<16x512xf32>
    %60 = tpu.matmul %59, %49, %cst_25 {dimension_numbers = #tpu.dot_dimension_numbers<[1], [0], [0], [1], [0, 0, 1, 1], [], []>} : vector<16x288xbf16>, vector<288x512xbf16>, vector<16x512xf32> -> vector<16x512xf32>
    %c21_i32_26 = arith.constant 21 : i32
    %61 = tpu.dynamic_rotate %58 by %c21_i32_26 dim 1 : vector<16x512xf32>, i32 -> vector<16x512xf32>
    %c20_i32_27 = arith.constant 20 : i32
    %62 = tpu.dynamic_rotate %58 by %c20_i32_27 dim 1 : vector<16x512xf32>, i32 -> vector<16x512xf32>
    %c19_i32_28 = arith.constant 19 : i32
    %63 = tpu.dynamic_rotate %58 by %c19_i32_28 dim 1 : vector<16x512xf32>, i32 -> vector<16x512xf32>
    %c1_i32_29 = arith.constant 1 : i32
    %64 = tpu.dynamic_rotate %58 by %c1_i32_29 dim 1 : vector<16x512xf32>, i32 -> vector<16x512xf32>
    %c511_i32_30 = arith.constant 511 : i32
    %65 = tpu.dynamic_rotate %58 by %c511_i32_30 dim 1 : vector<16x512xf32>, i32 -> vector<16x512xf32>
    %c493_i32_31 = arith.constant 493 : i32
    %66 = tpu.dynamic_rotate %58 by %c493_i32_31 dim 1 : vector<16x512xf32>, i32 -> vector<16x512xf32>
    %c492_i32_32 = arith.constant 492 : i32
    %67 = tpu.dynamic_rotate %58 by %c492_i32_32 dim 1 : vector<16x512xf32>, i32 -> vector<16x512xf32>
    %c491_i32_33 = arith.constant 491 : i32
    %68 = tpu.dynamic_rotate %58 by %c491_i32_33 dim 1 : vector<16x512xf32>, i32 -> vector<16x512xf32>
    %69 = tpu.concatenate %61, %62, %63, %64, %58, %65, %66, %67, %68 in 0 : vector<16x512xf32>, vector<16x512xf32>, vector<16x512xf32>, vector<16x512xf32>, vector<16x512xf32>, vector<16x512xf32>, vector<16x512xf32>, vector<16x512xf32>, vector<16x512xf32> -> vector<144x512xf32>
    %70 = arith.truncf %69 : vector<144x512xf32> to vector<144x512xbf16>
    %c0_34 = arith.constant 0 : index
    %c0_35 = arith.constant 0 : index
    %71 = vector.load %arg8[%c0_34, %c0_35] : memref<16x144xbf16, #tpu.memory_space<vmem>>, vector<16x144xbf16>
    %cst_36 = arith.constant dense<0.000000e+00> : vector<16x512xf32>
    %72 = tpu.matmul %71, %70, %cst_36 {dimension_numbers = #tpu.dot_dimension_numbers<[1], [0], [0], [1], [0, 0, 1, 1], [], []>} : vector<16x144xbf16>, vector<144x512xbf16>, vector<16x512xf32> -> vector<16x512xf32>
    %73 = arith.addf %60, %72 : vector<16x512xf32>
    %c0_37 = arith.constant 0 : index
    %c0_38 = arith.constant 0 : index
    %74 = vector.load %arg9[%c0_37, %c0_38] : memref<16x1xf32, #tpu.memory_space<vmem>>, vector<16x1xf32>
    %75 = vector.broadcast %74 : vector<16x1xf32> to vector<16x512xf32>
    %76 = arith.addf %73, %75 : vector<16x512xf32>
    %cst_39 = arith.constant 0.000000e+00 : f32
    %77 = vector.broadcast %cst_39 : f32 to vector<16x512xf32>
    %78 = arith.maximumf %76, %77 : vector<16x512xf32>
    %79 = vector.broadcast %0 : vector<1x512xf32> to vector<16x512xf32>
    %80 = arith.mulf %78, %79 : vector<16x512xf32>
    %81 = tpu.concatenate %39, %58, %80 in 0 : vector<32x512xf32>, vector<16x512xf32>, vector<16x512xf32> -> vector<64x512xf32>
    %82 = arith.truncf %81 : vector<64x512xf32> to vector<64x512xbf16>
    %c0_40 = arith.constant 0 : index
    %c0_41 = arith.constant 0 : index
    %83 = vector.load %arg10[%c0_40, %c0_41] : memref<32x64xbf16, #tpu.memory_space<vmem>>, vector<32x64xbf16>
    %cst_42 = arith.constant dense<0.000000e+00> : vector<32x512xf32>
    %84 = tpu.matmul %83, %82, %cst_42 {dimension_numbers = #tpu.dot_dimension_numbers<[1], [0], [0], [1], [0, 0, 1, 1], [], []>} : vector<32x64xbf16>, vector<64x512xbf16>, vector<32x512xf32> -> vector<32x512xf32>
    %c0_43 = arith.constant 0 : index
    %c0_44 = arith.constant 0 : index
    %85 = vector.load %arg11[%c0_43, %c0_44] : memref<32x1xf32, #tpu.memory_space<vmem>>, vector<32x1xf32>
    %86 = vector.broadcast %85 : vector<32x1xf32> to vector<32x512xf32>
    %87 = arith.addf %84, %86 : vector<32x512xf32>
    %88 = arith.addf %87, %39 : vector<32x512xf32>
    %89 = vector.broadcast %0 : vector<1x512xf32> to vector<32x512xf32>
    %90 = arith.mulf %88, %89 : vector<32x512xf32>
    %c21_i32_45 = arith.constant 21 : i32
    %91 = tpu.dynamic_rotate %90 by %c21_i32_45 dim 1 : vector<32x512xf32>, i32 -> vector<32x512xf32>
    %c20_i32_46 = arith.constant 20 : i32
    %92 = tpu.dynamic_rotate %90 by %c20_i32_46 dim 1 : vector<32x512xf32>, i32 -> vector<32x512xf32>
    %c19_i32_47 = arith.constant 19 : i32
    %93 = tpu.dynamic_rotate %90 by %c19_i32_47 dim 1 : vector<32x512xf32>, i32 -> vector<32x512xf32>
    %c1_i32_48 = arith.constant 1 : i32
    %94 = tpu.dynamic_rotate %90 by %c1_i32_48 dim 1 : vector<32x512xf32>, i32 -> vector<32x512xf32>
    %c511_i32_49 = arith.constant 511 : i32
    %95 = tpu.dynamic_rotate %90 by %c511_i32_49 dim 1 : vector<32x512xf32>, i32 -> vector<32x512xf32>
    %c493_i32_50 = arith.constant 493 : i32
    %96 = tpu.dynamic_rotate %90 by %c493_i32_50 dim 1 : vector<32x512xf32>, i32 -> vector<32x512xf32>
    %c492_i32_51 = arith.constant 492 : i32
    %97 = tpu.dynamic_rotate %90 by %c492_i32_51 dim 1 : vector<32x512xf32>, i32 -> vector<32x512xf32>
    %c491_i32_52 = arith.constant 491 : i32
    %98 = tpu.dynamic_rotate %90 by %c491_i32_52 dim 1 : vector<32x512xf32>, i32 -> vector<32x512xf32>
    %99 = tpu.concatenate %91, %92, %93, %94, %90, %95, %96, %97, %98 in 0 : vector<32x512xf32>, vector<32x512xf32>, vector<32x512xf32>, vector<32x512xf32>, vector<32x512xf32>, vector<32x512xf32>, vector<32x512xf32>, vector<32x512xf32>, vector<32x512xf32> -> vector<288x512xf32>
    %100 = arith.truncf %99 : vector<288x512xf32> to vector<288x512xbf16>
    %c0_53 = arith.constant 0 : index
    %c0_54 = arith.constant 0 : index
    %101 = vector.load %arg12[%c0_53, %c0_54] : memref<16x288xbf16, #tpu.memory_space<vmem>>, vector<16x288xbf16>
    %cst_55 = arith.constant dense<0.000000e+00> : vector<16x512xf32>
    %102 = tpu.matmul %101, %100, %cst_55 {dimension_numbers = #tpu.dot_dimension_numbers<[1], [0], [0], [1], [0, 0, 1, 1], [], []>} : vector<16x288xbf16>, vector<288x512xbf16>, vector<16x512xf32> -> vector<16x512xf32>
    %c0_56 = arith.constant 0 : index
    %c0_57 = arith.constant 0 : index
    %103 = vector.load %arg13[%c0_56, %c0_57] : memref<16x1xf32, #tpu.memory_space<vmem>>, vector<16x1xf32>
    %104 = vector.broadcast %103 : vector<16x1xf32> to vector<16x512xf32>
    %105 = arith.addf %102, %104 : vector<16x512xf32>
    %cst_58 = arith.constant 0.000000e+00 : f32
    %106 = vector.broadcast %cst_58 : f32 to vector<16x512xf32>
    %107 = arith.maximumf %105, %106 : vector<16x512xf32>
    %108 = vector.broadcast %0 : vector<1x512xf32> to vector<16x512xf32>
    %109 = arith.mulf %107, %108 : vector<16x512xf32>
    %c0_59 = arith.constant 0 : index
    %c0_60 = arith.constant 0 : index
    %110 = vector.load %arg14[%c0_59, %c0_60] : memref<16x288xbf16, #tpu.memory_space<vmem>>, vector<16x288xbf16>
    %cst_61 = arith.constant dense<0.000000e+00> : vector<16x512xf32>
    %111 = tpu.matmul %110, %100, %cst_61 {dimension_numbers = #tpu.dot_dimension_numbers<[1], [0], [0], [1], [0, 0, 1, 1], [], []>} : vector<16x288xbf16>, vector<288x512xbf16>, vector<16x512xf32> -> vector<16x512xf32>
    %c21_i32_62 = arith.constant 21 : i32
    %112 = tpu.dynamic_rotate %109 by %c21_i32_62 dim 1 : vector<16x512xf32>, i32 -> vector<16x512xf32>
    %c20_i32_63 = arith.constant 20 : i32
    %113 = tpu.dynamic_rotate %109 by %c20_i32_63 dim 1 : vector<16x512xf32>, i32 -> vector<16x512xf32>
    %c19_i32_64 = arith.constant 19 : i32
    %114 = tpu.dynamic_rotate %109 by %c19_i32_64 dim 1 : vector<16x512xf32>, i32 -> vector<16x512xf32>
    %c1_i32_65 = arith.constant 1 : i32
    %115 = tpu.dynamic_rotate %109 by %c1_i32_65 dim 1 : vector<16x512xf32>, i32 -> vector<16x512xf32>
    %c511_i32_66 = arith.constant 511 : i32
    %116 = tpu.dynamic_rotate %109 by %c511_i32_66 dim 1 : vector<16x512xf32>, i32 -> vector<16x512xf32>
    %c493_i32_67 = arith.constant 493 : i32
    %117 = tpu.dynamic_rotate %109 by %c493_i32_67 dim 1 : vector<16x512xf32>, i32 -> vector<16x512xf32>
    %c492_i32_68 = arith.constant 492 : i32
    %118 = tpu.dynamic_rotate %109 by %c492_i32_68 dim 1 : vector<16x512xf32>, i32 -> vector<16x512xf32>
    %c491_i32_69 = arith.constant 491 : i32
    %119 = tpu.dynamic_rotate %109 by %c491_i32_69 dim 1 : vector<16x512xf32>, i32 -> vector<16x512xf32>
    %120 = tpu.concatenate %112, %113, %114, %115, %109, %116, %117, %118, %119 in 0 : vector<16x512xf32>, vector<16x512xf32>, vector<16x512xf32>, vector<16x512xf32>, vector<16x512xf32>, vector<16x512xf32>, vector<16x512xf32>, vector<16x512xf32>, vector<16x512xf32> -> vector<144x512xf32>
    %121 = arith.truncf %120 : vector<144x512xf32> to vector<144x512xbf16>
    %c0_70 = arith.constant 0 : index
    %c0_71 = arith.constant 0 : index
    %122 = vector.load %arg15[%c0_70, %c0_71] : memref<16x144xbf16, #tpu.memory_space<vmem>>, vector<16x144xbf16>
    %cst_72 = arith.constant dense<0.000000e+00> : vector<16x512xf32>
    %123 = tpu.matmul %122, %121, %cst_72 {dimension_numbers = #tpu.dot_dimension_numbers<[1], [0], [0], [1], [0, 0, 1, 1], [], []>} : vector<16x144xbf16>, vector<144x512xbf16>, vector<16x512xf32> -> vector<16x512xf32>
    %124 = arith.addf %111, %123 : vector<16x512xf32>
    %c0_73 = arith.constant 0 : index
    %c0_74 = arith.constant 0 : index
    %125 = vector.load %arg16[%c0_73, %c0_74] : memref<16x1xf32, #tpu.memory_space<vmem>>, vector<16x1xf32>
    %126 = vector.broadcast %125 : vector<16x1xf32> to vector<16x512xf32>
    %127 = arith.addf %124, %126 : vector<16x512xf32>
    %cst_75 = arith.constant 0.000000e+00 : f32
    %128 = vector.broadcast %cst_75 : f32 to vector<16x512xf32>
    %129 = arith.maximumf %127, %128 : vector<16x512xf32>
    %130 = vector.broadcast %0 : vector<1x512xf32> to vector<16x512xf32>
    %131 = arith.mulf %129, %130 : vector<16x512xf32>
    %132 = tpu.concatenate %90, %109, %131 in 0 : vector<32x512xf32>, vector<16x512xf32>, vector<16x512xf32> -> vector<64x512xf32>
    %133 = arith.truncf %132 : vector<64x512xf32> to vector<64x512xbf16>
    %c0_76 = arith.constant 0 : index
    %c0_77 = arith.constant 0 : index
    %134 = vector.load %arg17[%c0_76, %c0_77] : memref<32x64xbf16, #tpu.memory_space<vmem>>, vector<32x64xbf16>
    %cst_78 = arith.constant dense<0.000000e+00> : vector<32x512xf32>
    %135 = tpu.matmul %134, %133, %cst_78 {dimension_numbers = #tpu.dot_dimension_numbers<[1], [0], [0], [1], [0, 0, 1, 1], [], []>} : vector<32x64xbf16>, vector<64x512xbf16>, vector<32x512xf32> -> vector<32x512xf32>
    %c0_79 = arith.constant 0 : index
    %c0_80 = arith.constant 0 : index
    %136 = vector.load %arg18[%c0_79, %c0_80] : memref<32x1xf32, #tpu.memory_space<vmem>>, vector<32x1xf32>
    %137 = vector.broadcast %136 : vector<32x1xf32> to vector<32x512xf32>
    %138 = arith.addf %135, %137 : vector<32x512xf32>
    %139 = arith.addf %138, %90 : vector<32x512xf32>
    %140 = vector.broadcast %0 : vector<1x512xf32> to vector<32x512xf32>
    %141 = arith.mulf %139, %140 : vector<32x512xf32>
    %c42_i32_81 = arith.constant 42 : i32
    %142 = tpu.dynamic_rotate %141 by %c42_i32_81 dim 1 : vector<32x512xf32>, i32 -> vector<32x512xf32>
    %c41_i32_82 = arith.constant 41 : i32
    %143 = tpu.dynamic_rotate %141 by %c41_i32_82 dim 1 : vector<32x512xf32>, i32 -> vector<32x512xf32>
    %c40_i32_83 = arith.constant 40 : i32
    %144 = tpu.dynamic_rotate %141 by %c40_i32_83 dim 1 : vector<32x512xf32>, i32 -> vector<32x512xf32>
    %c39_i32_84 = arith.constant 39 : i32
    %145 = tpu.dynamic_rotate %141 by %c39_i32_84 dim 1 : vector<32x512xf32>, i32 -> vector<32x512xf32>
    %c38_i32_85 = arith.constant 38 : i32
    %146 = tpu.dynamic_rotate %141 by %c38_i32_85 dim 1 : vector<32x512xf32>, i32 -> vector<32x512xf32>
    %c22_i32_86 = arith.constant 22 : i32
    %147 = tpu.dynamic_rotate %141 by %c22_i32_86 dim 1 : vector<32x512xf32>, i32 -> vector<32x512xf32>
    %c21_i32_87 = arith.constant 21 : i32
    %148 = tpu.dynamic_rotate %141 by %c21_i32_87 dim 1 : vector<32x512xf32>, i32 -> vector<32x512xf32>
    %c20_i32_88 = arith.constant 20 : i32
    %149 = tpu.dynamic_rotate %141 by %c20_i32_88 dim 1 : vector<32x512xf32>, i32 -> vector<32x512xf32>
    %c19_i32_89 = arith.constant 19 : i32
    %150 = tpu.dynamic_rotate %141 by %c19_i32_89 dim 1 : vector<32x512xf32>, i32 -> vector<32x512xf32>
    %c18_i32_90 = arith.constant 18 : i32
    %151 = tpu.dynamic_rotate %141 by %c18_i32_90 dim 1 : vector<32x512xf32>, i32 -> vector<32x512xf32>
    %c2_i32_91 = arith.constant 2 : i32
    %152 = tpu.dynamic_rotate %141 by %c2_i32_91 dim 1 : vector<32x512xf32>, i32 -> vector<32x512xf32>
    %c1_i32_92 = arith.constant 1 : i32
    %153 = tpu.dynamic_rotate %141 by %c1_i32_92 dim 1 : vector<32x512xf32>, i32 -> vector<32x512xf32>
    %c511_i32_93 = arith.constant 511 : i32
    %154 = tpu.dynamic_rotate %141 by %c511_i32_93 dim 1 : vector<32x512xf32>, i32 -> vector<32x512xf32>
    %c510_i32_94 = arith.constant 510 : i32
    %155 = tpu.dynamic_rotate %141 by %c510_i32_94 dim 1 : vector<32x512xf32>, i32 -> vector<32x512xf32>
    %c494_i32_95 = arith.constant 494 : i32
    %156 = tpu.dynamic_rotate %141 by %c494_i32_95 dim 1 : vector<32x512xf32>, i32 -> vector<32x512xf32>
    %c493_i32_96 = arith.constant 493 : i32
    %157 = tpu.dynamic_rotate %141 by %c493_i32_96 dim 1 : vector<32x512xf32>, i32 -> vector<32x512xf32>
    %c492_i32_97 = arith.constant 492 : i32
    %158 = tpu.dynamic_rotate %141 by %c492_i32_97 dim 1 : vector<32x512xf32>, i32 -> vector<32x512xf32>
    %c491_i32_98 = arith.constant 491 : i32
    %159 = tpu.dynamic_rotate %141 by %c491_i32_98 dim 1 : vector<32x512xf32>, i32 -> vector<32x512xf32>
    %c490_i32_99 = arith.constant 490 : i32
    %160 = tpu.dynamic_rotate %141 by %c490_i32_99 dim 1 : vector<32x512xf32>, i32 -> vector<32x512xf32>
    %c474_i32_100 = arith.constant 474 : i32
    %161 = tpu.dynamic_rotate %141 by %c474_i32_100 dim 1 : vector<32x512xf32>, i32 -> vector<32x512xf32>
    %c473_i32_101 = arith.constant 473 : i32
    %162 = tpu.dynamic_rotate %141 by %c473_i32_101 dim 1 : vector<32x512xf32>, i32 -> vector<32x512xf32>
    %c472_i32_102 = arith.constant 472 : i32
    %163 = tpu.dynamic_rotate %141 by %c472_i32_102 dim 1 : vector<32x512xf32>, i32 -> vector<32x512xf32>
    %c471_i32_103 = arith.constant 471 : i32
    %164 = tpu.dynamic_rotate %141 by %c471_i32_103 dim 1 : vector<32x512xf32>, i32 -> vector<32x512xf32>
    %c470_i32_104 = arith.constant 470 : i32
    %165 = tpu.dynamic_rotate %141 by %c470_i32_104 dim 1 : vector<32x512xf32>, i32 -> vector<32x512xf32>
    %166 = tpu.concatenate %142, %143, %144, %145, %146, %147, %148, %149, %150, %151, %152, %153, %141, %154, %155, %156 in 0 : vector<32x512xf32>, vector<32x512xf32>, vector<32x512xf32>, vector<32x512xf32>, vector<32x512xf32>, vector<32x512xf32>, vector<32x512xf32>, vector<32x512xf32>, vector<32x512xf32>, vector<32x512xf32>, vector<32x512xf32>, vector<32x512xf32>, vector<32x512xf32>, vector<32x512xf32>, vector<32x512xf32>, vector<32x512xf32> -> vector<512x512xf32>
    %167 = tpu.concatenate %157, %158, %159, %160, %161, %162, %163, %164, %165 in 0 : vector<32x512xf32>, vector<32x512xf32>, vector<32x512xf32>, vector<32x512xf32>, vector<32x512xf32>, vector<32x512xf32>, vector<32x512xf32>, vector<32x512xf32>, vector<32x512xf32> -> vector<288x512xf32>
    %168 = tpu.concatenate %166, %167 in 0 : vector<512x512xf32>, vector<288x512xf32> -> vector<800x512xf32>
    %169 = arith.truncf %168 : vector<800x512xf32> to vector<800x512xbf16>
    %c0_105 = arith.constant 0 : index
    %c0_106 = arith.constant 0 : index
    %170 = vector.load %arg19[%c0_105, %c0_106] : memref<8x800xbf16, #tpu.memory_space<vmem>>, vector<8x800xbf16>
    %cst_107 = arith.constant dense<0.000000e+00> : vector<8x512xf32>
    %171 = tpu.matmul %170, %169, %cst_107 {dimension_numbers = #tpu.dot_dimension_numbers<[1], [0], [0], [1], [0, 0, 1, 1], [], []>} : vector<8x800xbf16>, vector<800x512xbf16>, vector<8x512xf32> -> vector<8x512xf32>
    %c0_108 = arith.constant 0 : index
    %c0_109 = arith.constant 0 : index
    %172 = vector.load %arg20[%c0_108, %c0_109] : memref<8x1xf32, #tpu.memory_space<vmem>>, vector<8x1xf32>
    %173 = vector.broadcast %172 : vector<8x1xf32> to vector<8x512xf32>
    %174 = arith.addf %171, %173 : vector<8x512xf32>
    %175 = arith.addf %174, %2 : vector<8x512xf32>
    %176 = vector.broadcast %0 : vector<1x512xf32> to vector<8x512xf32>
    %177 = arith.mulf %175, %176 : vector<8x512xf32>
    %178 = tpu.concatenate %177, %2 in 0 : vector<8x512xf32>, vector<8x512xf32> -> vector<16x512xf32>
    %c21_i32_110 = arith.constant 21 : i32
    %179 = tpu.dynamic_rotate %178 by %c21_i32_110 dim 1 : vector<16x512xf32>, i32 -> vector<16x512xf32>
    %c20_i32_111 = arith.constant 20 : i32
    %180 = tpu.dynamic_rotate %178 by %c20_i32_111 dim 1 : vector<16x512xf32>, i32 -> vector<16x512xf32>
    %c19_i32_112 = arith.constant 19 : i32
    %181 = tpu.dynamic_rotate %178 by %c19_i32_112 dim 1 : vector<16x512xf32>, i32 -> vector<16x512xf32>
    %c1_i32_113 = arith.constant 1 : i32
    %182 = tpu.dynamic_rotate %178 by %c1_i32_113 dim 1 : vector<16x512xf32>, i32 -> vector<16x512xf32>
    %c511_i32_114 = arith.constant 511 : i32
    %183 = tpu.dynamic_rotate %178 by %c511_i32_114 dim 1 : vector<16x512xf32>, i32 -> vector<16x512xf32>
    %c493_i32_115 = arith.constant 493 : i32
    %184 = tpu.dynamic_rotate %178 by %c493_i32_115 dim 1 : vector<16x512xf32>, i32 -> vector<16x512xf32>
    %c492_i32_116 = arith.constant 492 : i32
    %185 = tpu.dynamic_rotate %178 by %c492_i32_116 dim 1 : vector<16x512xf32>, i32 -> vector<16x512xf32>
    %c491_i32_117 = arith.constant 491 : i32
    %186 = tpu.dynamic_rotate %178 by %c491_i32_117 dim 1 : vector<16x512xf32>, i32 -> vector<16x512xf32>
    %187 = tpu.concatenate %179, %180, %181, %182, %178, %183, %184, %185, %186 in 0 : vector<16x512xf32>, vector<16x512xf32>, vector<16x512xf32>, vector<16x512xf32>, vector<16x512xf32>, vector<16x512xf32>, vector<16x512xf32>, vector<16x512xf32>, vector<16x512xf32> -> vector<144x512xf32>
    %188 = arith.truncf %187 : vector<144x512xf32> to vector<144x512xbf16>
    %c0_118 = arith.constant 0 : index
    %c0_119 = arith.constant 0 : index
    %189 = vector.load %arg21[%c0_118, %c0_119] : memref<32x144xbf16, #tpu.memory_space<vmem>>, vector<32x144xbf16>
    %cst_120 = arith.constant dense<0.000000e+00> : vector<32x512xf32>
    %190 = tpu.matmul %189, %188, %cst_120 {dimension_numbers = #tpu.dot_dimension_numbers<[1], [0], [0], [1], [0, 0, 1, 1], [], []>} : vector<32x144xbf16>, vector<144x512xbf16>, vector<32x512xf32> -> vector<32x512xf32>
    %c0_121 = arith.constant 0 : index
    %c0_122 = arith.constant 0 : index
    %191 = vector.load %arg22[%c0_121, %c0_122] : memref<32x1xf32, #tpu.memory_space<vmem>>, vector<32x1xf32>
    %192 = vector.broadcast %191 : vector<32x1xf32> to vector<32x512xf32>
    %193 = arith.addf %190, %192 : vector<32x512xf32>
    %cst_123 = arith.constant 0.000000e+00 : f32
    %194 = vector.broadcast %cst_123 : f32 to vector<32x512xf32>
    %195 = arith.maximumf %193, %194 : vector<32x512xf32>
    %196 = vector.broadcast %0 : vector<1x512xf32> to vector<32x512xf32>
    %197 = arith.mulf %195, %196 : vector<32x512xf32>
    %c0_124 = arith.constant 0 : index
    %c0_125 = arith.constant 0 : index
    %c0_126 = arith.constant 0 : index
    %198 = vector.load %arg23[%c0_124, %c0_125, %c0_126] : memref<1x32x512xf32, #tpu.memory_space<vmem>>, vector<1x32x512xf32>
    %199 = vector.shape_cast %198 : vector<1x32x512xf32> to vector<32x512xf32>
    %200 = vector.shape_cast %197 : vector<32x512xf32> to vector<1x32x512xf32>
    tpu.vector_store %arg23[%c0_124, %c0_125, %c0_126], %200 {strides = array<i32>} : memref<1x32x512xf32, #tpu.memory_space<vmem>>, vector<1x32x512xf32>,
    %c0_127 = arith.constant 0 : index
    %c0_128 = arith.constant 0 : index
    %c0_129 = arith.constant 0 : index
    %201 = vector.load %arg24[%c0_127, %c0_128, %c0_129] : memref<1x8x512xf32, #tpu.memory_space<vmem>>, vector<1x8x512xf32>
    %202 = vector.shape_cast %201 : vector<1x8x512xf32> to vector<8x512xf32>
    %203 = vector.shape_cast %177 : vector<8x512xf32> to vector<1x8x512xf32>
    tpu.vector_store %arg24[%c0_127, %c0_128, %c0_129], %203 {strides = array<i32>} : memref<1x8x512xf32, #tpu.memory_space<vmem>>, vector<1x8x512xf32>,
    return
  }
  func.func @transform_0(%arg0: i32) -> (i32, i32, i32) {
    %c0_i32 = arith.constant 0 : i32
    %c0_i32_0 = arith.constant 0 : i32
    %c0_i32_1 = arith.constant 0 : i32
    return %arg0, %c0_i32, %c0_i32_0 : i32, i32, i32
  }
  func.func @transform_1(%arg0: i32) -> (i32, i32) {
    %c0_i32 = arith.constant 0 : i32
    %c0_i32_0 = arith.constant 0 : i32
    %c0_i32_1 = arith.constant 0 : i32
    return %c0_i32, %c0_i32_0 : i32, i32
  }
  func.func @transform_2(%arg0: i32) -> (i32, i32) {
    %c0_i32 = arith.constant 0 : i32
    %c0_i32_0 = arith.constant 0 : i32
    %c0_i32_1 = arith.constant 0 : i32
    return %c0_i32, %c0_i32_0 : i32, i32
  }
  func.func @transform_3(%arg0: i32) -> (i32, i32) {
    %c0_i32 = arith.constant 0 : i32
    %c0_i32_0 = arith.constant 0 : i32
    %c0_i32_1 = arith.constant 0 : i32
    return %c0_i32, %c0_i32_0 : i32, i32
  }
  func.func @transform_4(%arg0: i32) -> (i32, i32) {
    %c0_i32 = arith.constant 0 : i32
    %c0_i32_0 = arith.constant 0 : i32
    %c0_i32_1 = arith.constant 0 : i32
    return %c0_i32, %c0_i32_0 : i32, i32
  }
  func.func @transform_5(%arg0: i32) -> (i32, i32) {
    %c0_i32 = arith.constant 0 : i32
    %c0_i32_0 = arith.constant 0 : i32
    %c0_i32_1 = arith.constant 0 : i32
    return %c0_i32, %c0_i32_0 : i32, i32
  }
  func.func @transform_6(%arg0: i32) -> (i32, i32) {
    %c0_i32 = arith.constant 0 : i32
    %c0_i32_0 = arith.constant 0 : i32
    %c0_i32_1 = arith.constant 0 : i32
    return %c0_i32, %c0_i32_0 : i32, i32
  }
  func.func @transform_7(%arg0: i32) -> (i32, i32) {
    %c0_i32 = arith.constant 0 : i32
    %c0_i32_0 = arith.constant 0 : i32
    %c0_i32_1 = arith.constant 0 : i32
    return %c0_i32, %c0_i32_0 : i32, i32
  }
  func.func @transform_8(%arg0: i32) -> (i32, i32) {
    %c0_i32 = arith.constant 0 : i32
    %c0_i32_0 = arith.constant 0 : i32
    %c0_i32_1 = arith.constant 0 : i32
    return %c0_i32, %c0_i32_0 : i32, i32
  }
  func.func @transform_9(%arg0: i32) -> (i32, i32) {
    %c0_i32 = arith.constant 0 : i32
    %c0_i32_0 = arith.constant 0 : i32
    %c0_i32_1 = arith.constant 0 : i32
    return %c0_i32, %c0_i32_0 : i32, i32
  }
  func.func @transform_10(%arg0: i32) -> (i32, i32) {
    %c0_i32 = arith.constant 0 : i32
    %c0_i32_0 = arith.constant 0 : i32
    %c0_i32_1 = arith.constant 0 : i32
    return %c0_i32, %c0_i32_0 : i32, i32
  }
  func.func @transform_11(%arg0: i32) -> (i32, i32) {
    %c0_i32 = arith.constant 0 : i32
    %c0_i32_0 = arith.constant 0 : i32
    %c0_i32_1 = arith.constant 0 : i32
    return %c0_i32, %c0_i32_0 : i32, i32
  }
  func.func @transform_12(%arg0: i32) -> (i32, i32) {
    %c0_i32 = arith.constant 0 : i32
    %c0_i32_0 = arith.constant 0 : i32
    %c0_i32_1 = arith.constant 0 : i32
    return %c0_i32, %c0_i32_0 : i32, i32
  }
  func.func @transform_13(%arg0: i32) -> (i32, i32) {
    %c0_i32 = arith.constant 0 : i32
    %c0_i32_0 = arith.constant 0 : i32
    %c0_i32_1 = arith.constant 0 : i32
    return %c0_i32, %c0_i32_0 : i32, i32
  }
  func.func @transform_14(%arg0: i32) -> (i32, i32) {
    %c0_i32 = arith.constant 0 : i32
    %c0_i32_0 = arith.constant 0 : i32
    %c0_i32_1 = arith.constant 0 : i32
    return %c0_i32, %c0_i32_0 : i32, i32
  }
  func.func @transform_15(%arg0: i32) -> (i32, i32) {
    %c0_i32 = arith.constant 0 : i32
    %c0_i32_0 = arith.constant 0 : i32
    %c0_i32_1 = arith.constant 0 : i32
    return %c0_i32, %c0_i32_0 : i32, i32
  }
  func.func @transform_16(%arg0: i32) -> (i32, i32) {
    %c0_i32 = arith.constant 0 : i32
    %c0_i32_0 = arith.constant 0 : i32
    %c0_i32_1 = arith.constant 0 : i32
    return %c0_i32, %c0_i32_0 : i32, i32
  }
  func.func @transform_17(%arg0: i32) -> (i32, i32) {
    %c0_i32 = arith.constant 0 : i32
    %c0_i32_0 = arith.constant 0 : i32
    %c0_i32_1 = arith.constant 0 : i32
    return %c0_i32, %c0_i32_0 : i32, i32
  }
  func.func @transform_18(%arg0: i32) -> (i32, i32) {
    %c0_i32 = arith.constant 0 : i32
    %c0_i32_0 = arith.constant 0 : i32
    %c0_i32_1 = arith.constant 0 : i32
    return %c0_i32, %c0_i32_0 : i32, i32
  }
  func.func @transform_19(%arg0: i32) -> (i32, i32) {
    %c0_i32 = arith.constant 0 : i32
    %c0_i32_0 = arith.constant 0 : i32
    %c0_i32_1 = arith.constant 0 : i32
    return %c0_i32, %c0_i32_0 : i32, i32
  }
  func.func @transform_20(%arg0: i32) -> (i32, i32) {
    %c0_i32 = arith.constant 0 : i32
    %c0_i32_0 = arith.constant 0 : i32
    %c0_i32_1 = arith.constant 0 : i32
    return %c0_i32, %c0_i32_0 : i32, i32
  }
  func.func @transform_21(%arg0: i32) -> (i32, i32) {
    %c0_i32 = arith.constant 0 : i32
    %c0_i32_0 = arith.constant 0 : i32
    %c0_i32_1 = arith.constant 0 : i32
    return %c0_i32, %c0_i32_0 : i32, i32
  }
  func.func @transform_22(%arg0: i32) -> (i32, i32, i32) {
    %c0_i32 = arith.constant 0 : i32
    %c0_i32_0 = arith.constant 0 : i32
    %c0_i32_1 = arith.constant 0 : i32
    return %arg0, %c0_i32, %c0_i32_0 : i32, i32, i32
  }
  func.func @transform_23(%arg0: i32) -> (i32, i32, i32) {
    %c0_i32 = arith.constant 0 : i32
    %c0_i32_0 = arith.constant 0 : i32
    %c0_i32_1 = arith.constant 0 : i32
    return %arg0, %c0_i32, %c0_i32_0 : i32, i32, i32
  }
}

</mosaic_0001>

<bundles_post_ra>
// kernel: led_forward.1
= control target key start
LH: loop header
LB: loop body
LE: loop exit
PB: predicated region body
PF: predicated region fallthrough
CT: control target
= control target key end

     0   :  { %s15306_s0 = inlined_call_operand.vmem [shape: f32[2,8,512], index: 0, kind: input, shape index: {}]   ;;  %s15307_s1 = inlined_call_operand.vmem [shape: f32[1,512], index: 1, kind: input, shape index: {}]   ;;  %s15308_s2 = inlined_call_operand.vmem [shape: bf16[32,200], index: 2, kind: input, shape index: {}]   ;;  %s15309_s3 = inlined_call_operand.vmem [shape: f32[32,1], index: 3, kind: input, shape index: {}]   ;;  %s15310_s4 = inlined_call_operand.vmem [shape: bf16[16,288], index: 4, kind: input, shape index: {}]   ;;  %s15311_s5 = inlined_call_operand.vmem [shape: f32[16,1], index: 5, kind: input, shape index: {}]   ;;  %s15312_s6 = inlined_call_operand.vmem [shape: bf16[16,288], index: 6, kind: input, shape index: {}]   ;;  %s15313_s7 = inlined_call_operand.vmem [shape: bf16[16,144], index: 7, kind: input, shape index: {}]   ;;  %s15314_s8 = inlined_call_operand.vmem [shape: f32[16,1], index: 8, kind: input, shape index: {}]   ;;  %s15315_s9 = inlined_call_operand.vmem [shape: bf16[32,64], index: 9, kind: input, shape index: {}]   ;;  %s15316_s10 = inlined_call_operand.vmem [shape: f32[32,1], index: 10, kind: input, shape index: {}]   ;;  %s15317_s11 = inlined_call_operand.vmem [shape: bf16[16,288], index: 11, kind: input, shape index: {}]   ;;  %s15318_s12 = inlined_call_operand.vmem [shape: f32[16,1], index: 12, kind: input, shape index: {}]   ;;  %s15319_s13 = inlined_call_operand.vmem [shape: bf16[16,288], index: 13, kind: input, shape index: {}]   ;;  %s15320_s14 = inlined_call_operand.vmem [shape: bf16[16,144], index: 14, kind: input, shape index: {}]   ;;  %s15321_s15 = inlined_call_operand.vmem [shape: f32[16,1], index: 15, kind: input, shape index: {}]   ;;  %s15322_s16 = inlined_call_operand.vmem [shape: bf16[32,64], index: 16, kind: input, shape index: {}]   ;;  %s15323_s17 = inlined_call_operand.vmem [shape: f32[32,1], index: 17, kind: input, shape index: {}]   ;;  %s15324_s18 = inlined_call_operand.vmem [shape: bf16[8,800], index: 18, kind: input, shape index: {}]   ;;  %s15325_s19 = inlined_call_operand.vmem [shape: f32[8,1], index: 19, kind: input, shape index: {}]   ;;  %s15326_s20 = inlined_call_operand.vmem [shape: bf16[32,144], index: 20, kind: input, shape index: {}]   ;;  %s15327_s21 = inlined_call_operand.vmem [shape: f32[32,1], index: 21, kind: input, shape index: {}]   ;;  %s15328_s22 = inlined_call_operand.vmem [shape: f32[2,32,512], index: 22, kind: output, shape index: {0}]   ;;  %s15329_s23 = inlined_call_operand.vmem [shape: f32[2,8,512], index: 23, kind: output, shape index: {1}]  }
   0x1   :  { %15855 = sst [smem:[#allocation154_spill]] %s15306_s0 }
   0x2   :  { %15856 = sst [smem:[#allocation155_spill]] %s15307_s1 }
   0x3   :  { %15857 = sst [smem:[#allocation156_spill]] %s15308_s2 }
   0x4   :  { %15858 = sst [smem:[#allocation157_spill]] %s15309_s3 }
   0x5   :  { %15859 = sst [smem:[#allocation158_spill]] %s15310_s4  ;;  %s8950_s4 = smov 0  }
   0x6   :  { %15860 = sst [smem:[#allocation159_spill]] %s15311_s5 }
   0x7   :  { %15861 = sst [smem:[#allocation160_spill]] %s15312_s6 }
   0x8   :  { %15862 = sst [smem:[#allocation161_spill]] %s15313_s7 }
   0x9   :  { %15863 = sst [smem:[#allocation162_spill]] %s15314_s8 }
   0xa   :  { %15864 = sst [smem:[#allocation163_spill]] %s15315_s9 }
   0xb   :  { %15865 = sst [smem:[#allocation164_spill]] %s15316_s10 }
   0xc   :  { %15866 = sst [smem:[#allocation165_spill]] %s15317_s11 }
   0xd   :  { %15867 = sst [smem:[#allocation166_spill]] %s15318_s12 }
   0xe   :  { %15868 = sst [smem:[#allocation167_spill]] %s15319_s13 }
   0xf   :  { %15869 = sst [smem:[#allocation168_spill]] %s15326_s20 }
  0x10   :  { %15870 = sst [smem:[#allocation169_spill]] %s15327_s21 }
  0x11   :  { %15871 = sst [smem:[#allocation170_spill]] %s15328_s22 }
  0x12   :  { %15872 = sst [smem:[#allocation171_spill]] %s15329_s23 }
  0x13 LB: > { %15873 = sst [smem:[#allocation2_spill]] %s8803_s4  ;;  %s6323_s30 = sadd.s32 4294967295, %s8803_s4   ;;  %s8803_s4 = sphi %s8950_s4, %s34_s4  }
  0x14   : > { %p6327_p0 = scmp.ge.s32.totalorder %s8803_s4, 1  ;;  %p640_p1 = scmp.lt.s32.totalorder %s8803_s4, 3 }
  0x16   : > { %p641_p2 = pnand %p6327_p0, %p640_p1 }
  0x18   : > { %644 = sbr.rel (%p641_p2) target bundleno = 4041 (0xfc9), region = 108 }
  0x1f   : > { %p709_p3 = scmp.lt.s32.totalorder %s6323_s30, 1  ;;  %s15875_s1 = sld [smem:[#allocation154_spill]]  ;;  %vm1142_vm0 = vcmask 588800   ;;  %v15391_v11 = vmov 0   ;;  %v738_v14 = vlaneseq }
  0x20   : > { %s15355_s2 = smov 42   ;;  %s15343_s6 = smov 41   ;;  %6744 = vset.pattern.permute.xlu1 %v15391_v11  ;;  %6743 = vset.pattern.permute.xlu0 %v15391_v11 }
  0x21   : > { %s17151_s30 = smov (!%p709_p3, %s6323_s30), 1  ;;  %s15341_s27 = smov 39   ;;  %v9086_v15 = vand.u32 127, %v738_v14 }
  0x22   : > { %15874 = sst [smem:[#allocation3_spill]] %s17151_s30  ;;  %s15336_s24 = sshll.u32 %s17151_s30, 5 }
  0x23   : > { %s15347_s7 = smov 40   ;;  %s15339_s28 = smov 22   ;;  %vm740_vm1 = vcmp.lt.s32.totalorder %v9086_v15, 42  ;;  %vm753_vm2 = vcmp.lt.s32.totalorder %v9086_v15, 41  ;;  %vm766_vm3 = vcmp.lt.s32.totalorder %v9086_v15, 40  ;;  %vm15385_vm4 = vcmp.lt.s32.totalorder %v9086_v15, 39 }
  0x24   : > { %s15337_s29 = smov 38   ;;  %s15371_s3 = smov 20   ;;  %vm15382_vm5 = vcmp.lt.s32.totalorder %v9086_v15, 38  ;;  %vm15381_vm6 = vcmp.lt.s32.totalorder %v9086_v15, 22  ;;  %vm818_vm7 = vcmp.lt.s32.totalorder %v9086_v15, 21  ;;  %vm831_vm8 = vcmp.lt.s32.totalorder %v9086_v15, 20 }
  0x25   : > { %s8966_s26 = scalar_lea.vmem %s15875_s1, %s15336_s24  ;;  %s15398_s0 = smov 21   ;;  %vm844_vm9 = vcmp.lt.s32.totalorder %v9086_v15, 19  ;;  %vm15388_vm10 = vcmp.lt.s32.totalorder %v9086_v15, 18  ;;  %vm883_vm11 = vcmp.lt.s32.totalorder %v9086_v15, 1  ;;  %vm15386_vm12 = vcmp.lt.s32.totalorder %v9086_v15, 2 }
  0x26   : > { %15876 = sst [smem:[#allocation4_spill]] %s8966_s26  ;;  %v8969_v0 = vld [vmem:[%s8966_s26 + $0x10] sm:$0xff]  ;;  %v8972_v1 = vld [vmem:[%s8966_s26 + $0x18] sm:$0xff]  ;;  %v8975_v2 = vld [vmem:[%s8966_s26] sm:$0xff]  ;;  %s15349_s25 = smov 18   ;;  %vm896_vm13 = vcmp.lt.s32.totalorder %v9086_v15, 127 }
  0x27   : > { %v8979_v3 = vpack.i.bf16 %v8972_v1, %v8969_v0  ;;  %v8982_v4 = vld [vmem:[%s8966_s26 + $0x8] sm:$0xff]  ;;  %s15363_s5 = smov 19   ;;  %s15359_s1 = smov 1   ;;  %v6628_v6 = vpack.i.bf16 %v8972_v1, %v8975_v2  ;;  %vm15384_vm14 = vcmp.lt.s32.totalorder %v9086_v15, 126  ;;  %vm15383_vm15 = vcmp.lt.s32.totalorder %v9086_v15, 110 }
  0x28   : > { %v8986_v5 = vpack.i.bf16 %v8982_v4, %v8975_v2  ;;  %s15345_s24 = smov 2   ;;  %v6623_v7 = vpack.i.bf16 %v8969_v0, %v8982_v4  ;;  %s16007_s8 = sld [smem:[#allocation162_spill]] }
  0x29   : > { %6514 = vrot.lane.b32.xlu1 %v8979_v3, %s15355_s2  ;;  %s16008_s10 = sld [smem:[#allocation164_spill]]  ;;  %s16017_s30 = sld [smem:[#allocation160_spill]] }
  0x2a   : > { %6504 = vrot.lane.b32.xlu0 %v8986_v5, %s15355_s2  ;;  %s15373_s2 = smov 87   ;;  %s16071_s9 = sld [smem:[#allocation163_spill]] }
  0x2b   : > { %s16104_s11 = sld [smem:[#allocation165_spill]]  ;;  %s16105_s12 = sld [smem:[#allocation166_spill]] }
  0x2c   : > { %s16192_s13 = sld [smem:[#allocation167_spill]]  ;;  %s16263_s20 = smov 42  }
  0x2d   : > { %6519 = vrot.lane.b32.xlu1 %v8979_v3, %s15343_s6  ;;  %s16274_s21 = smov 18   ;;  %s16280_s22 = smov 40  }
  0x2e   : > { %6509 = vrot.lane.b32.xlu0 %v8986_v5, %s15343_s6  ;;  %s15357_s6 = smov 108   ;;  %s16281_s23 = smov 41  }
  0x2f   : > { %s16282_s26 = smov 39   ;;  %s16286_s4 = smov 38  }
  0x31   : > { %6529 = vrot.lane.b32.xlu1 %v8986_v5, %s15341_s27 }
  0x32   : > { %6524 = vrot.lane.b32.xlu0 %v8986_v5, %s15347_s7 }
  0x35   : > { %6539 = vrot.lane.b32.xlu1 %v8979_v3, %s15341_s27  ;;  %s15353_s27 = smov 126  }
  0x36   : > { %6534 = vrot.lane.b32.xlu0 %v8979_v3, %s15347_s7  ;;  %s15361_s7 = smov 106  }
  0x39   : > { %6549 = vrot.lane.b32.xlu1 %v8986_v5, %s15339_s28 }
  0x3a   : > { %6544 = vrot.lane.b32.xlu0 %v8986_v5, %s15337_s29 }
  0x3d   : > { %6559 = vrot.lane.b32.xlu1 %v8979_v3, %s15339_s28  ;;  %s15351_s28 = smov 110  }
  0x3e   : > { %6554 = vrot.lane.b32.xlu0 %v8979_v3, %s15337_s29  ;;  %s15400_s29 = smov 127  }
  0x41   : > { %6569 = vrot.lane.b32.xlu1 %v8986_v5, %s15371_s3 }
  0x42   : > { %6564 = vrot.lane.b32.xlu0 %v8986_v5, %s15398_s0 }
  0x45   : > { %6579 = vrot.lane.b32.xlu1 %v8979_v3, %s15371_s3  ;;  %s15936_s3 = smov 108  }
  0x46   : > { %6574 = vrot.lane.b32.xlu0 %v8979_v3, %s15398_s0 }
  0x49   : > { %6589 = vrot.lane.b32.xlu1 %v8986_v5, %s15349_s25 }
  0x4a   : > { %6584 = vrot.lane.b32.xlu0 %v8986_v5, %s15363_s5 }
  0x4d   : > { %6599 = vrot.lane.b32.xlu1 %v8979_v3, %s15349_s25  ;;  %s15369_s25 = smov 107  }
  0x4e   : > { %6594 = vrot.lane.b32.xlu0 %v8979_v3, %s15363_s5  ;;  %s15877_s5 = sld [smem:[#allocation156_spill]] }
  0x51   : > { %6609 = vrot.lane.b32.xlu1 %v8986_v5, %s15359_s1 }
  0x52   : > { %6604 = vrot.lane.b32.xlu0 %v8986_v5, %s15345_s24 }
  0x54   : > { %v8747_v8 = vld [vmem:[%s15877_s5 + $0x4] ss:$8 sps:$4 sm:$0xff]  }
  0x55   : > { %6619 = vrot.lane.b32.xlu1 %v8979_v3, %s15359_s1  ;;  %6339 = vmatprep.mubr.msk.bf16.mxu0 %vm1142_vm0, %v8747_v8  ;;  %s16285_s1 = smov 22  }
  0x56   : > { %6614 = vrot.lane.b32.xlu0 %v8979_v3, %s15345_s24  ;;  %s15379_s24 = smov 109   ;;  %6342 = vmatprep.mubr.msk.bf16.mxu1 %vm1142_vm0, %v8747_v8 }
  0x59   : > { %6629 = vrot.lane.b32.xlu1 %v6628_v6, %s15400_s29 }
  0x5a   : > { %6624 = vrot.lane.b32.xlu0 %v6623_v7, %s15400_s29 }
  0x5d   : > { %6639 = vrot.lane.b32.xlu1 %v6623_v7, %s15351_s28 }
  0x5e   : > { %6634 = vrot.lane.b32.xlu0 %v6623_v7, %s15353_s27 }
  0x61   : > { %6649 = vrot.lane.b32.xlu1 %v6628_v6, %s15351_s28  ;;  %s15365_s28 = smov 89  }
  0x62   : > { %6644 = vrot.lane.b32.xlu0 %v6628_v6, %s15353_s27  ;;  %s15367_s27 = smov 90  }
  0x65   : > { %6659 = vrot.lane.b32.xlu1 %v6623_v7, %s15357_s6 }
  0x66   : > { %6654 = vrot.lane.b32.xlu0 %v6623_v7, %s15379_s24 }
  0x69   : > { %6669 = vrot.lane.b32.xlu1 %v6628_v6, %s15357_s6  ;;  %s15375_s6 = smov 88  }
  0x6a   : > { %6664 = vrot.lane.b32.xlu0 %v6628_v6, %s15379_s24  ;;  %s15911_s24 = sld [smem:[#allocation155_spill]] }
  0x6d   : > { %6679 = vrot.lane.b32.xlu1 %v6623_v7, %s15361_s7 }
  0x6e   : > { %6674 = vrot.lane.b32.xlu0 %v6623_v7, %s15369_s25 }
  0x71   : > { %6689 = vrot.lane.b32.xlu1 %v6628_v6, %s15361_s7  ;;  %s15878_s7 = sld [smem:[#allocation157_spill]] }
  0x72   : > { %6684 = vrot.lane.b32.xlu0 %v6628_v6, %s15369_s25  ;;  %s16283_s25 = smov 2  }
  0x75   : > { %6699 = vrot.lane.b32.xlu1 %v6623_v7, %s15365_s28 }
  0x76   : > { %6694 = vrot.lane.b32.xlu0 %v6623_v7, %s15367_s27 }
  0x77   : > { %v1101_v9 = vld [vmem:[%s15878_s7 + $0x8] sm:$0xff]  ;;  %v1100_v10 = vld [vmem:[%s15878_s7] sm:$0xff]  ;;  %v1102_v12 = vld [vmem:[%s15878_s7 + $0x10] sm:$0xff] }
  0x78   : > { %v1103_v13 = vld [vmem:[%s15878_s7 + $0x18] sm:$0xff]  ;;  %s16001_s7 = smov 127  }
  0x79   : > { %6709 = vrot.lane.b32.xlu1 %v6628_v6, %s15365_s28  ;;  %s15377_s28 = smov 86  }
  0x7a   : > { %6704 = vrot.lane.b32.xlu0 %v6628_v6, %s15367_s27  ;;  %s15926_s27 = smov 19  }
  0x7d   : > { %6719 = vrot.lane.b32.xlu1 %v6623_v7, %s15373_s2 }
  0x7e   : > { %6714 = vrot.lane.b32.xlu0 %v6623_v7, %s15375_s6 }
  0x81   : > { %6729 = vrot.lane.b32.xlu1 %v6628_v6, %s15373_s2  ;;  %s15922_s2 = smov 109  }
  0x82   : > { %6724 = vrot.lane.b32.xlu0 %v6628_v6, %s15375_s6  ;;  %s15925_s6 = smov 20  }
  0x85   : > { %6739 = vrot.lane.b32.xlu1 %v8979_v3, %s15377_s28 }
  0x86   : > { %6734 = vrot.lane.b32.xlu0 %v8986_v5, %s15377_s28  ;;  %s15927_s28 = smov 1  }
  0x89   : > { %1111 = vperm.xlu1 %6744, %v1101_v9  }
  0x8a   : > { %1106 = vperm.xlu0 %6743, %v1100_v10  }
  0x8d   : > { %1116 = vperm.xlu1 %6744, %v1102_v12  }
  0x8e   : > { %1121 = vperm.xlu0 %6743, %v1103_v13  }
  0x9b   : > { %v6515_v16 = vpop.permute.xlu1 %6514 }
  0x9c   : > { %v6505_v17 = vpop.permute.xlu0 %6504  ;;  %v6517_v18 = vunpack.i.h.bf16 %v6515_v16  ;;  %v6516_v19 = vunpack.i.l.bf16 %v6515_v16 }
  0x9d   : > { %v6507_v20 = vunpack.i.h.bf16 %v6505_v17  ;;  %v6506_v21 = vunpack.i.l.bf16 %v6505_v17 }
  0x9e   : > { %v741_v28 = vsel %vm740_vm1, %v6516_v19, %v6517_v18 }
  0x9f   : > { %v6520_v22 = vpop.permute.xlu1 %6519  ;;  %v743_v29 = vsel %vm740_vm1, %v6506_v21, %v6507_v20  ;;  %v744_v31 = vsel %vm740_vm1, %v6517_v18, %v6506_v21  ;;  %v742_v32 = vsel %vm740_vm1, %v6507_v20, %v6516_v19 }
  0xa0   : > { %v6522_v23 = vunpack.i.h.bf16 %v6520_v22  ;;  %v6521_v24 = vunpack.i.l.bf16 %v6520_v22  ;;  %v6510_v25 = vpop.permute.xlu0 %6509 }
  0xa1   : > { %v6512_v26 = vunpack.i.h.bf16 %v6510_v25  ;;  %v6511_v27 = vunpack.i.l.bf16 %v6510_v25 }
  0xa2   : > { %v754_v30 = vsel %vm753_vm2, %v6521_v24, %v6522_v23 }
  0xa3   : > { %v6530_v33 = vpop.permute.xlu1 %6529  ;;  %v756_v34 = vsel %vm753_vm2, %v6511_v27, %v6512_v26  ;;  %v1047_v35 = vpack.c.bf16 %v754_v30, %v741_v28  ;;  %v757_v36 = vsel %vm753_vm2, %v6522_v23, %v6511_v27  ;;  %v755_v37 = vsel %vm753_vm2, %v6512_v26, %v6521_v24 }
  0xa4   : > { %v6532_v38 = vunpack.i.h.bf16 %v6530_v33  ;;  %v6531_v39 = vunpack.i.l.bf16 %v6530_v33  ;;  %v6525_v40 = vpop.permute.xlu0 %6524  ;;  %v1045_v41 = vpack.c.bf16 %v756_v34, %v743_v29  ;;  %v1044_v42 = vpack.c.bf16 %v757_v36, %v744_v31 }
  0xa5   : > { %v6527_v43 = vunpack.i.h.bf16 %v6525_v40  ;;  %v6526_v44 = vunpack.i.l.bf16 %v6525_v40  ;;  %1215 = vmatprep.subr.bf16.mxu1 %v1047_v35  ;;  %v1046_v45 = vpack.c.bf16 %v755_v37, %v742_v32 }
  0xa6   : > { %1162 = vmatprep.subr.bf16.mxu0 %v1045_v41  ;;  %v782_v46 = vsel %vm15385_vm4, %v6531_v39, %v6532_v38 }
  0xa7   : > { %1163 = vmatpush1.bf16.msra.mxu0 %v1044_v42  ;;  %1216 = vmatpush1.bf16.msra.mxu1 %v1046_v45  ;;  %v6540_v47 = vpop.permute.xlu1 %6539  ;;  %v769_v48 = vsel %vm766_vm3, %v6526_v44, %v6527_v43 }
  0xa8   : > { %v6542_v49 = vunpack.i.h.bf16 %v6540_v47  ;;  %v6541_v50 = vunpack.i.l.bf16 %v6540_v47  ;;  %v6535_v51 = vpop.permute.xlu0 %6534  ;;  %v1049_v52 = vpack.c.bf16 %v782_v46, %v769_v48 }
  0xa9   : > { %v6537_v53 = vunpack.i.h.bf16 %v6535_v51  ;;  %v6536_v54 = vunpack.i.l.bf16 %v6535_v51 }
  0xaa   : > { %1164 = vmatprep.subr.bf16.mxu0 %v1049_v52  ;;  %v783_v55 = vsel %vm15385_vm4, %v6542_v49, %v6531_v39  ;;  %v780_v56 = vsel %vm15385_vm4, %v6541_v50, %v6542_v49  ;;  %v781_v57 = vsel %vm15385_vm4, %v6532_v38, %v6541_v50  ;;  %vm15701_vm4 = vcmp.lt.s32.totalorder %v9086_v15, 90 }
  0xab   : > { %v6550_v58 = vpop.permute.xlu1 %6549  ;;  %v770_v59 = vsel %vm766_vm3, %v6537_v53, %v6526_v44  ;;  %v767_v60 = vsel %vm766_vm3, %v6536_v54, %v6537_v53  ;;  %v768_v61 = vsel %vm766_vm3, %v6527_v43, %v6536_v54 }
  0xac   : > { %v6552_v62 = vunpack.i.h.bf16 %v6550_v58  ;;  %v6551_v63 = vunpack.i.l.bf16 %v6550_v58  ;;  %v6545_v3 = vpop.permute.xlu0 %6544  ;;  %v1048_v5 = vpack.c.bf16 %v783_v55, %v770_v59  ;;  %v1051_v6 = vpack.c.bf16 %v780_v56, %v767_v60 }
  0xad   : > { %v6547_v7 = vunpack.i.h.bf16 %v6545_v3  ;;  %v6546_v8 = vunpack.i.l.bf16 %v6545_v3  ;;  %v1050_v9 = vpack.c.bf16 %v781_v57, %v768_v61 }
  0xae   : > { %1165 = vmatpush1.bf16.msra.mxu0 %v1048_v5  ;;  %1217 = vmatprep.subr.bf16.mxu1 %v1051_v6  ;;  %v808_v10 = vsel %vm15381_vm6, %v6551_v63, %v6552_v62 }
  0xaf   : > { %1218 = vmatpush1.bf16.msra.mxu1 %v1050_v9  ;;  %v6560_v12 = vpop.permute.xlu1 %6559  ;;  %v795_v13 = vsel %vm15382_vm5, %v6546_v8, %v6547_v7 }
  0xb0   : > { %v6562_v16 = vunpack.i.h.bf16 %v6560_v12  ;;  %v6561_v17 = vunpack.i.l.bf16 %v6560_v12  ;;  %v6555_v18 = vpop.permute.xlu0 %6554  ;;  %v1053_v19 = vpack.c.bf16 %v808_v10, %v795_v13 }
  0xb1   : > { %v6557_v20 = vunpack.i.h.bf16 %v6555_v18  ;;  %v6556_v21 = vunpack.i.l.bf16 %v6555_v18 }
  0xb2   : > { %1166 = vmatprep.subr.bf16.mxu0 %v1053_v19  ;;  %v809_v22 = vsel %vm15381_vm6, %v6562_v16, %v6551_v63  ;;  %v806_v23 = vsel %vm15381_vm6, %v6561_v17, %v6562_v16  ;;  %v807_v24 = vsel %vm15381_vm6, %v6552_v62, %v6561_v17  ;;  %vm935_vm6 = vcmp.lt.s32.totalorder %v9086_v15, 109 }
  0xb3   : > { %v6570_v25 = vpop.permute.xlu1 %6569  ;;  %v796_v26 = vsel %vm15382_vm5, %v6557_v20, %v6546_v8  ;;  %v793_v27 = vsel %vm15382_vm5, %v6556_v21, %v6557_v20  ;;  %v794_v28 = vsel %vm15382_vm5, %v6547_v7, %v6556_v21  ;;  %vm948_vm5 = vcmp.lt.s32.totalorder %v9086_v15, 108 }
  0xb4   : > { %v6572_v29 = vunpack.i.h.bf16 %v6570_v25  ;;  %v6571_v30 = vunpack.i.l.bf16 %v6570_v25  ;;  %v6565_v31 = vpop.permute.xlu0 %6564  ;;  %v1052_v32 = vpack.c.bf16 %v809_v22, %v796_v26  ;;  %v1055_v33 = vpack.c.bf16 %v806_v23, %v793_v27 }
  0xb5   : > { %v6567_v34 = vunpack.i.h.bf16 %v6565_v31  ;;  %v6566_v35 = vunpack.i.l.bf16 %v6565_v31  ;;  %v1054_v36 = vpack.c.bf16 %v807_v24, %v794_v28 }
  0xb6   : > { %1167 = vmatpush1.bf16.msra.mxu0 %v1052_v32  ;;  %1219 = vmatprep.subr.bf16.mxu1 %v1055_v33  ;;  %v9146_v37 = vsel %vm831_vm8, %v6571_v30, %v6572_v29 }
  0xb7   : > { %15879 = vst [vmem:[#allocation5_spill] sm:$0xff] %v9146_v37  ;;  %1220 = vmatpush1.bf16.msra.mxu1 %v1054_v36  ;;  %v6580_v38 = vpop.permute.xlu1 %6579  ;;  %v9150_v39 = vsel %vm818_vm7, %v6566_v35, %v6567_v34 }
  0xb8   : > { %15880 = vst [vmem:[#allocation6_spill] sm:$0xff] %v9150_v39  ;;  %v6582_v40 = vunpack.i.h.bf16 %v6580_v38  ;;  %v6581_v41 = vunpack.i.l.bf16 %v6580_v38  ;;  %v6575_v42 = vpop.permute.xlu0 %6574  ;;  %v1057_v43 = vpack.c.bf16 %v9146_v37, %v9150_v39 }
  0xb9   : > { %v6577_v44 = vunpack.i.h.bf16 %v6575_v42  ;;  %v6576_v45 = vunpack.i.l.bf16 %v6575_v42 }
  0xba   : > { %1168 = vmatprep.subr.bf16.mxu0 %v1057_v43  ;;  %v9157_v46 = vsel %vm831_vm8, %v6582_v40, %v6571_v30  ;;  %v9161_v47 = vsel %vm831_vm8, %v6581_v41, %v6582_v40  ;;  %v9165_v48 = vsel %vm831_vm8, %v6572_v29, %v6581_v41 }
  0xbb   : > { %15881 = vst [vmem:[#allocation7_spill] sm:$0xff] %v9157_v46  ;;  %15882 = vst [vmem:[#allocation8_spill] sm:$0xff] %v9161_v47  ;;  %v6590_v49 = vpop.permute.xlu1 %6589  ;;  %v9169_v50 = vsel %vm818_vm7, %v6577_v44, %v6566_v35  ;;  %v9173_v51 = vsel %vm818_vm7, %v6576_v45, %v6577_v44  ;;  %v9177_v52 = vsel %vm818_vm7, %v6567_v34, %v6576_v45 }
  0xbc   : > { %15883 = vst [vmem:[#allocation9_spill] sm:$0xff] %v9165_v48  ;;  %15884 = vst [vmem:[#allocation10_spill] sm:$0xff] %v9169_v50  ;;  %v6592_v53 = vunpack.i.h.bf16 %v6590_v49  ;;  %v6591_v54 = vunpack.i.l.bf16 %v6590_v49  ;;  %v6585_v55 = vpop.permute.xlu0 %6584  ;;  %v1056_v56 = vpack.c.bf16 %v9157_v46, %v9169_v50  ;;  %v1059_v57 = vpack.c.bf16 %v9161_v47, %v9173_v51 }
  0xbd   : > { %15885 = vst [vmem:[#allocation11_spill] sm:$0xff] %v9173_v51  ;;  %15886 = vst [vmem:[#allocation12_spill] sm:$0xff] %v9177_v52  ;;  %v6587_v58 = vunpack.i.h.bf16 %v6585_v55  ;;  %v6586_v59 = vunpack.i.l.bf16 %v6585_v55  ;;  %v1058_v60 = vpack.c.bf16 %v9165_v48, %v9177_v52 }
  0xbe   : > { %1169 = vmatpush1.bf16.msra.mxu0 %v1056_v56  ;;  %1221 = vmatprep.subr.bf16.mxu1 %v1059_v57  ;;  %v860_v61 = vsel %vm15388_vm10, %v6591_v54, %v6592_v53 }
  0xbf   : > { %1222 = vmatpush1.bf16.msra.mxu1 %v1058_v60  ;;  %v6600_v62 = vpop.permute.xlu1 %6599  ;;  %v9190_v63 = vsel %vm844_vm9, %v6586_v59, %v6587_v58 }
  0xc0   : > { %15887 = vst [vmem:[#allocation13_spill] sm:$0xff] %v9190_v63  ;;  %v6602_v3 = vunpack.i.h.bf16 %v6600_v62  ;;  %v6601_v5 = vunpack.i.l.bf16 %v6600_v62  ;;  %v6595_v6 = vpop.permute.xlu0 %6594  ;;  %v1061_v7 = vpack.c.bf16 %v860_v61, %v9190_v63 }
  0xc1   : > { %v6597_v8 = vunpack.i.h.bf16 %v6595_v6  ;;  %v6596_v9 = vunpack.i.l.bf16 %v6595_v6 }
  0xc2   : > { %1170 = vmatprep.subr.bf16.mxu0 %v1061_v7  ;;  %v861_v10 = vsel %vm15388_vm10, %v6602_v3, %v6591_v54  ;;  %v858_v12 = vsel %vm15388_vm10, %v6601_v5, %v6602_v3  ;;  %v859_v13 = vsel %vm15388_vm10, %v6592_v53, %v6601_v5  ;;  %vm15390_vm10 = vcmp.lt.s32.totalorder %v9086_v15, 87 }
  0xc3   : > { %v6610_v16 = vpop.permute.xlu1 %6609  ;;  %v9202_v17 = vsel %vm844_vm9, %v6597_v8, %v6586_v59  ;;  %v9206_v18 = vsel %vm844_vm9, %v6596_v9, %v6597_v8  ;;  %v9210_v19 = vsel %vm844_vm9, %v6587_v58, %v6596_v9 }
  0xc4   : > { %15888 = vst [vmem:[#allocation14_spill] sm:$0xff] %v9202_v17  ;;  %15889 = vst [vmem:[#allocation15_spill] sm:$0xff] %v9206_v18  ;;  %v6612_v20 = vunpack.i.h.bf16 %v6610_v16  ;;  %v6611_v21 = vunpack.i.l.bf16 %v6610_v16  ;;  %v6605_v22 = vpop.permute.xlu0 %6604  ;;  %v1060_v23 = vpack.c.bf16 %v861_v10, %v9202_v17  ;;  %v1063_v24 = vpack.c.bf16 %v858_v12, %v9206_v18 }
  0xc5   : > { %15890 = vst [vmem:[#allocation16_spill] sm:$0xff] %v9210_v19  ;;  %v6607_v25 = vunpack.i.h.bf16 %v6605_v22  ;;  %v6606_v26 = vunpack.i.l.bf16 %v6605_v22  ;;  %v1062_v27 = vpack.c.bf16 %v859_v13, %v9210_v19 }
  0xc6   : > { %1171 = vmatpush1.bf16.msra.mxu0 %v1060_v23  ;;  %1223 = vmatprep.subr.bf16.mxu1 %v1063_v24  ;;  %v9218_v28 = vsel %vm883_vm11, %v6611_v21, %v6612_v20 }
  0xc7   : > { %15891 = vst [vmem:[#allocation17_spill] sm:$0xff] %v9218_v28  ;;  %1224 = vmatpush1.bf16.msra.mxu1 %v1062_v27  ;;  %v6620_v29 = vpop.permute.xlu1 %6619  ;;  %v873_v30 = vsel %vm15386_vm12, %v6606_v26, %v6607_v25 }
  0xc8   : > { %v6622_v31 = vunpack.i.h.bf16 %v6620_v29  ;;  %v6621_v32 = vunpack.i.l.bf16 %v6620_v29  ;;  %v6615_v33 = vpop.permute.xlu0 %6614  ;;  %v1065_v34 = vpack.c.bf16 %v9218_v28, %v873_v30 }
  0xc9   : > { %v6617_v35 = vunpack.i.h.bf16 %v6615_v33  ;;  %v6616_v36 = vunpack.i.l.bf16 %v6615_v33 }
  0xca   : > { %1172 = vmatprep.subr.bf16.mxu0 %v1065_v34  ;;  %v9225_v38 = vsel %vm883_vm11, %v6622_v31, %v6611_v21  ;;  %v9229_v40 = vsel %vm883_vm11, %v6621_v32, %v6622_v31  ;;  %v9233_v41 = vsel %vm883_vm11, %v6612_v20, %v6621_v32 }
  0xcb   : > { %15892 = vst [vmem:[#allocation18_spill] sm:$0xff] %v9225_v38  ;;  %15893 = vst [vmem:[#allocation19_spill] sm:$0xff] %v9229_v40  ;;  %v6630_v42 = vpop.permute.xlu1 %6629  ;;  %v874_v43 = vsel %vm15386_vm12, %v6617_v35, %v6606_v26  ;;  %v871_v44 = vsel %vm15386_vm12, %v6616_v36, %v6617_v35  ;;  %v872_v45 = vsel %vm15386_vm12, %v6607_v25, %v6616_v36  ;;  %vm15389_vm12 = vcmp.lt.s32.totalorder %v9086_v15, 89 }
  0xcc   : > { %15894 = vst [vmem:[#allocation20_spill] sm:$0xff] %v9233_v41  ;;  %v6632_v49 = vunpack.i.h.bf16 %v6630_v42  ;;  %v6631_v53 = vunpack.i.l.bf16 %v6630_v42  ;;  %v6625_v54 = vpop.permute.xlu0 %6624  ;;  %v1064_v55 = vpack.c.bf16 %v9225_v38, %v874_v43  ;;  %v1067_v56 = vpack.c.bf16 %v9229_v40, %v871_v44 }
  0xcd   : > { %v6627_v57 = vunpack.i.h.bf16 %v6625_v54  ;;  %v6626_v58 = vunpack.i.l.bf16 %v6625_v54  ;;  %v1066_v59 = vpack.c.bf16 %v9233_v41, %v872_v45 }
  0xce   : > { %1173 = vmatpush1.bf16.msra.mxu0 %v1064_v55  ;;  %1225 = vmatprep.subr.bf16.mxu1 %v1067_v56  ;;  %v9247_v60 = vsel %vm896_vm13, %v6632_v49, %v6631_v53 }
  0xcf   : > { %15895 = vst [vmem:[#allocation21_spill] sm:$0xff] %v9247_v60  ;;  %1226 = vmatpush1.bf16.msra.mxu1 %v1066_v59  ;;  %v6640_v61 = vpop.permute.xlu1 %6639  ;;  %v9253_v62 = vsel %vm896_vm13, %v6626_v58, %v6627_v57  ;;  %v1071_v3 = vpack.c.bf16 %v9247_v60, %v8972_v1  ;;  %v9259_v5 = vsel %vm896_vm13, %v6631_v53, %v6626_v58 }
  0xd0   : > { %15896 = vst [vmem:[#allocation22_spill] sm:$0xff] %v9253_v62  ;;  %15897 = vst [vmem:[#allocation23_spill] sm:$0xff] %v9259_v5  ;;  %v9263_v6 = vsel %vm896_vm13, %v6627_v57, %v6632_v49  ;;  %v6642_v7 = vunpack.i.h.bf16 %v6640_v61  ;;  %v6641_v8 = vunpack.i.l.bf16 %v6640_v61  ;;  %v6635_v9 = vpop.permute.xlu0 %6634  ;;  %v1069_v10 = vpack.c.bf16 %v9253_v62, %v8982_v4 }
  0xd1   : > { %15898 = vst [vmem:[#allocation24_spill] sm:$0xff] %v9263_v6  ;;  %v1068_v12 = vpack.c.bf16 %v9259_v5, %v8975_v2  ;;  %v6637_v13 = vunpack.i.h.bf16 %v6635_v9  ;;  %v6636_v16 = vunpack.i.l.bf16 %v6635_v9  ;;  %1227 = vmatprep.subr.bf16.mxu1 %v1071_v3  ;;  %v1070_v1 = vpack.c.bf16 %v9263_v6, %v8969_v0 }
  0xd2   : > { %1174 = vmatprep.subr.bf16.mxu0 %v1069_v10  ;;  %v924_v20 = vsel %vm15383_vm15, %v6641_v8, %v6642_v7 }
  0xd3   : > { %1175 = vmatpush1.bf16.msra.mxu0 %v1068_v12  ;;  %1228 = vmatpush1.bf16.msra.mxu1 %v1070_v1  ;;  %v6650_v21 = vpop.permute.xlu1 %6649  ;;  %v911_v22 = vsel %vm15384_vm14, %v6636_v16, %v6637_v13 }
  0xd4   : > { %v6652_v4 = vunpack.i.h.bf16 %v6650_v21  ;;  %v6651_v23 = vunpack.i.l.bf16 %v6650_v21  ;;  %v6645_v24 = vpop.permute.xlu0 %6644  ;;  %v1073_v2 = vpack.c.bf16 %v924_v20, %v911_v22 }
  0xd5   : > { %v6647_v25 = vunpack.i.h.bf16 %v6645_v24  ;;  %v6646_v26 = vunpack.i.l.bf16 %v6645_v24 }
  0xd6   : > { %1176 = vmatprep.subr.bf16.mxu0 %v1073_v2  ;;  %v925_v0 = vsel %vm15383_vm15, %v6651_v23, %v6641_v8  ;;  %v926_v27 = vsel %vm15383_vm15, %v6652_v4, %v6651_v23  ;;  %v923_v29 = vsel %vm15383_vm15, %v6642_v7, %v6652_v4  ;;  %vm961_vm15 = vcmp.lt.s32.totalorder %v9086_v15, 107 }
  0xd7   : > { %v6660_v30 = vpop.permute.xlu1 %6659  ;;  %v912_v31 = vsel %vm15384_vm14, %v6646_v26, %v6636_v16  ;;  %v913_v32 = vsel %vm15384_vm14, %v6647_v25, %v6646_v26  ;;  %v910_v33 = vsel %vm15384_vm14, %v6637_v13, %v6647_v25  ;;  %vm15387_vm14 = vcmp.lt.s32.totalorder %v9086_v15, 106 }
  0xd8   : > { %v6662_v34 = vunpack.i.h.bf16 %v6660_v30  ;;  %v6661_v35 = vunpack.i.l.bf16 %v6660_v30  ;;  %v6655_v36 = vpop.permute.xlu0 %6654  ;;  %v1072_v42 = vpack.c.bf16 %v925_v0, %v912_v31  ;;  %v1075_v43 = vpack.c.bf16 %v926_v27, %v913_v32 }
  0xd9   : > { %v6657_v44 = vunpack.i.h.bf16 %v6655_v36  ;;  %v6656_v45 = vunpack.i.l.bf16 %v6655_v36  ;;  %v1074_v49 = vpack.c.bf16 %v923_v29, %v910_v33 }
  0xda   : > { %1177 = vmatpush1.bf16.msra.mxu0 %v1072_v42  ;;  %1229 = vmatprep.subr.bf16.mxu1 %v1075_v43  ;;  %v9291_v53 = vsel %vm948_vm5, %v6661_v35, %v6662_v34 }
  0xdb   : > { %15899 = vst [vmem:[#allocation25_spill] sm:$0xff] %v9291_v53  ;;  %1230 = vmatpush1.bf16.msra.mxu1 %v1074_v49  ;;  %v6670_v54 = vpop.permute.xlu1 %6669  ;;  %v9295_v55 = vsel %vm935_vm6, %v6656_v45, %v6657_v44 }
  0xdc   : > { %15900 = vst [vmem:[#allocation26_spill] sm:$0xff] %v9295_v55  ;;  %v6672_v56 = vunpack.i.h.bf16 %v6670_v54  ;;  %v6671_v57 = vunpack.i.l.bf16 %v6670_v54  ;;  %v6665_v58 = vpop.permute.xlu0 %6664  ;;  %v1077_v59 = vpack.c.bf16 %v9291_v53, %v9295_v55 }
  0xdd   : > { %v6667_v61 = vunpack.i.h.bf16 %v6665_v58  ;;  %v6666_v3 = vunpack.i.l.bf16 %v6665_v58 }
  0xde   : > { %1178 = vmatprep.subr.bf16.mxu0 %v1077_v59  ;;  %v9302_v7 = vsel %vm948_vm5, %v6671_v57, %v6661_v35  ;;  %v9306_v8 = vsel %vm948_vm5, %v6672_v56, %v6671_v57  ;;  %v9310_v9 = vsel %vm948_vm5, %v6662_v34, %v6672_v56 }
  0xdf   : > { %15901 = vst [vmem:[#allocation27_spill] sm:$0xff] %v9302_v7  ;;  %15902 = vst [vmem:[#allocation28_spill] sm:$0xff] %v9306_v8  ;;  %v6680_v10 = vpop.permute.xlu1 %6679  ;;  %v9314_v12 = vsel %vm935_vm6, %v6666_v3, %v6656_v45  ;;  %v9318_v13 = vsel %vm935_vm6, %v6667_v61, %v6666_v3  ;;  %v9322_v16 = vsel %vm935_vm6, %v6657_v44, %v6667_v61 }
  0xe0   : > { %15903 = vst [vmem:[#allocation29_spill] sm:$0xff] %v9310_v9  ;;  %15904 = vst [vmem:[#allocation30_spill] sm:$0xff] %v9314_v12  ;;  %v6682_v1 = vunpack.i.h.bf16 %v6680_v10  ;;  %v6681_v20 = vunpack.i.l.bf16 %v6680_v10  ;;  %v6675_v21 = vpop.permute.xlu0 %6674  ;;  %v1076_v22 = vpack.c.bf16 %v9302_v7, %v9314_v12  ;;  %v1079_v4 = vpack.c.bf16 %v9306_v8, %v9318_v13 }
  0xe1   : > { %15905 = vst [vmem:[#allocation31_spill] sm:$0xff] %v9318_v13  ;;  %15906 = vst [vmem:[#allocation32_spill] sm:$0xff] %v9322_v16  ;;  %v6677_v23 = vunpack.i.h.bf16 %v6675_v21  ;;  %v6676_v24 = vunpack.i.l.bf16 %v6675_v21  ;;  %v1078_v2 = vpack.c.bf16 %v9310_v9, %v9322_v16 }
  0xe2   : > { %1179 = vmatpush1.bf16.msra.mxu0 %v1076_v22  ;;  %1231 = vmatprep.subr.bf16.mxu1 %v1079_v4  ;;  %v976_v25 = vsel %vm15387_vm14, %v6681_v20, %v6682_v1 }
  0xe3   : > { %1232 = vmatpush1.bf16.msra.mxu1 %v1078_v2  ;;  %v6690_v26 = vpop.permute.xlu1 %6689  ;;  %v9335_v0 = vsel %vm961_vm15, %v6676_v24, %v6677_v23 }
  0xe4   : > { %15907 = vst [vmem:[#allocation33_spill] sm:$0xff] %v9335_v0  ;;  %v6692_v27 = vunpack.i.h.bf16 %v6690_v26  ;;  %v6691_v29 = vunpack.i.l.bf16 %v6690_v26  ;;  %v6685_v30 = vpop.permute.xlu0 %6684  ;;  %v1081_v31 = vpack.c.bf16 %v976_v25, %v9335_v0 }
  0xe5   : > { %v6687_v32 = vunpack.i.h.bf16 %v6685_v30  ;;  %v6686_v33 = vunpack.i.l.bf16 %v6685_v30 }
  0xe6   : > { %1180 = vmatprep.subr.bf16.mxu0 %v1081_v31  ;;  %v977_v34 = vsel %vm15387_vm14, %v6691_v29, %v6681_v20  ;;  %v978_v35 = vsel %vm15387_vm14, %v6692_v27, %v6691_v29  ;;  %v975_v36 = vsel %vm15387_vm14, %v6682_v1, %v6692_v27  ;;  %vm15519_vm14 = vcmp.lt.s32.totalorder %v9086_v15, 88 }
  0xe7   : > { %v6700_v42 = vpop.permute.xlu1 %6699  ;;  %v9347_v43 = vsel %vm961_vm15, %v6686_v33, %v6676_v24  ;;  %v9351_v44 = vsel %vm961_vm15, %v6687_v32, %v6686_v33  ;;  %v9355_v45 = vsel %vm961_vm15, %v6677_v23, %v6687_v32 }
  0xe8   : > { %15908 = vst [vmem:[#allocation34_spill] sm:$0xff] %v9347_v43  ;;  %15909 = vst [vmem:[#allocation35_spill] sm:$0xff] %v9351_v44  ;;  %v6702_v49 = vunpack.i.h.bf16 %v6700_v42  ;;  %v6701_v54 = vunpack.i.l.bf16 %v6700_v42  ;;  %v6695_v56 = vpop.permute.xlu0 %6694  ;;  %v1080_v57 = vpack.c.bf16 %v977_v34, %v9347_v43  ;;  %v1083_v58 = vpack.c.bf16 %v978_v35, %v9351_v44 }
  0xe9   : > { %15910 = vst [vmem:[#allocation36_spill] sm:$0xff] %v9355_v45  ;;  %v6697_v59 = vunpack.i.h.bf16 %v6695_v56  ;;  %v6696_v61 = vunpack.i.l.bf16 %v6695_v56  ;;  %v1082_v3 = vpack.c.bf16 %v975_v36, %v9355_v45 }
  0xea   : > { %1181 = vmatpush1.bf16.msra.mxu0 %v1080_v57  ;;  %1233 = vmatprep.subr.bf16.mxu1 %v1083_v58  ;;  %v1002_v10 = vsel %vm15389_vm12, %v6701_v54, %v6702_v49 }
  0xeb   : > { %1234 = vmatpush1.bf16.msra.mxu1 %v1082_v3  ;;  %v6710_v1 = vpop.permute.xlu1 %6709  ;;  %v989_v20 = vsel %vm15701_vm4, %v6696_v61, %v6697_v59 }
  0xec   : > { %v6712_v21 = vunpack.i.h.bf16 %v6710_v1  ;;  %v6711_v22 = vunpack.i.l.bf16 %v6710_v1  ;;  %v6705_v4 = vpop.permute.xlu0 %6704  ;;  %v1085_v23 = vpack.c.bf16 %v1002_v10, %v989_v20 }
  0xed   : > { %v6707_v24 = vunpack.i.h.bf16 %v6705_v4  ;;  %v6706_v2 = vunpack.i.l.bf16 %v6705_v4 }
  0xee   : > { %1182 = vmatprep.subr.bf16.mxu0 %v1085_v23  ;;  %v1003_v25 = vsel %vm15389_vm12, %v6711_v22, %v6701_v54  ;;  %v1004_v26 = vsel %vm15389_vm12, %v6712_v21, %v6711_v22  ;;  %v1001_v27 = vsel %vm15389_vm12, %v6702_v49, %v6712_v21  ;;  %vm1039_vm12 = vcmp.lt.s32.totalorder %v9086_v15, 86 }
  0xef   : > { %v6720_v29 = vpop.permute.xlu1 %6719  ;;  %v990_v30 = vsel %vm15701_vm4, %v6706_v2, %v6696_v61  ;;  %v991_v31 = vsel %vm15701_vm4, %v6707_v24, %v6706_v2  ;;  %v988_v32 = vsel %vm15701_vm4, %v6697_v59, %v6707_v24  ;;  %vm16430_vm4 = vcmp.lt.s32.totalorder %v9086_v15, 22 }
  0xf0   : > { %v6722_v33 = vunpack.i.h.bf16 %v6720_v29  ;;  %v6721_v34 = vunpack.i.l.bf16 %v6720_v29  ;;  %v6715_v35 = vpop.permute.xlu0 %6714  ;;  %v1084_v36 = vpack.c.bf16 %v1003_v25, %v990_v30  ;;  %v1087_v42 = vpack.c.bf16 %v1004_v26, %v991_v31 }
  0xf1   : > { %v6717_v49 = vunpack.i.h.bf16 %v6715_v35  ;;  %v6716_v54 = vunpack.i.l.bf16 %v6715_v35  ;;  %v1086_v56 = vpack.c.bf16 %v1001_v27, %v988_v32 }
  0xf2   : > { %1183 = vmatpush1.bf16.msra.mxu0 %v1084_v36  ;;  %1235 = vmatprep.subr.bf16.mxu1 %v1087_v42  ;;  %v1028_v57 = vsel %vm15390_vm10, %v6721_v34, %v6722_v33 }
  0xf3   : > { %1236 = vmatpush1.bf16.msra.mxu1 %v1086_v56  ;;  %v6730_v58 = vpop.permute.xlu1 %6729  ;;  %v1015_v59 = vsel %vm15519_vm14, %v6716_v54, %v6717_v49 }
  0xf4   : > { %v6732_v61 = vunpack.i.h.bf16 %v6730_v58  ;;  %v6731_v3 = vunpack.i.l.bf16 %v6730_v58  ;;  %v6725_v10 = vpop.permute.xlu0 %6724  ;;  %v1089_v1 = vpack.c.bf16 %v1028_v57, %v1015_v59 }
  0xf5   : > { %v6727_v20 = vunpack.i.h.bf16 %v6725_v10  ;;  %v6726_v21 = vunpack.i.l.bf16 %v6725_v10  ;;  %v8745_v10 = vld [vmem:[%s15877_s5] ss:$8 sps:$4 sm:$0xff]  }
  0xf6   : > { %1184 = vmatprep.subr.bf16.mxu0 %v1089_v1  ;;  %v1029_v22 = vsel %vm15390_vm10, %v6731_v3, %v6721_v34  ;;  %v1030_v4 = vsel %vm15390_vm10, %v6732_v61, %v6731_v3  ;;  %v1027_v23 = vsel %vm15390_vm10, %v6722_v33, %v6732_v61  ;;  %vm1149_vm10 = vcmask 1043456   ;;  %v8748_v1 = vld [vmem:[%s15877_s5 + $0x14] ss:$8 sps:$4 sm:$0xff]  }
  0xf7   : > { %v6740_v24 = vpop.permute.xlu1 %6739  ;;  %v1016_v2 = vsel %vm15519_vm14, %v6726_v21, %v6716_v54  ;;  %v1017_v25 = vsel %vm15519_vm14, %v6727_v20, %v6726_v21  ;;  %v1014_v26 = vsel %vm15519_vm14, %v6717_v49, %v6727_v20  ;;  %v8750_v20 = vld [vmem:[%s15877_s5 + $0x10] ss:$8 sps:$4 sm:$0xff]   ;;  %v1286_v21 = vshrl.u32 %v738_v14, 7  ;;  %s16000_s5 = smov 21  }
  0xf8   : > { %v6742_v27 = vunpack.i.h.bf16 %v6740_v24  ;;  %v6741_v29 = vunpack.i.l.bf16 %v6740_v24  ;;  %v6735_v30 = vpop.permute.xlu0 %6734  ;;  %v1088_v31 = vpack.c.bf16 %v1029_v22, %v1016_v2  ;;  %v1091_v32 = vpack.c.bf16 %v1030_v4, %v1017_v25  ;;  %v725_v2 = vld [vmem:[%s15911_s24] sm:$0xf]  ;;  %s15937_s24 = sld [smem:[#allocation158_spill]] }
  0xf9   : > { %v6737_v34 = vunpack.i.h.bf16 %v6735_v30  ;;  %v6736_v35 = vunpack.i.l.bf16 %v6735_v30  ;;  %v1090_v33 = vpack.c.bf16 %v1027_v23, %v1014_v26  ;;  %v1287_v22 = vsub.s32 0, %v1286_v21 }
  0xfa   : > { %1185 = vmatpush1.bf16.msra.mxu0 %v1088_v31  ;;  %1237 = vmatprep.subr.bf16.mxu1 %v1091_v32  ;;  %v1040_v36 = vsel %vm1039_vm12, %v6741_v29, %v6742_v27  ;;  %v1295_v4 = vsub.s32 2, %v1286_v21  ;;  %vm2601_vm14 = vcmask 523264  }
  0xfb   : > { %1238 = vmatpush1.bf16.msra.mxu1 %v1090_v33  ;;  %v1041_v42 = vsel %vm1039_vm12, %v6737_v34, %v6741_v29  ;;  %v1043_v49 = vsel %vm1039_vm12, %v6742_v27, %v6736_v35  ;;  %v1042_v54 = vsel %vm1039_vm12, %v6736_v35, %v6737_v34  ;;  %v1094_v56 = vpack.c.bf16 %v1040_v36, %v1040_v36 }
  0xfc   : > { %v1093_v57 = vpack.c.bf16 %v1041_v42, %v1041_v42  ;;  %v1095_v58 = vpack.c.bf16 %v1043_v49, %v1043_v49  ;;  %v1092_v59 = vpack.c.bf16 %v1042_v54, %v1042_v54  ;;  %v9419_v32 = vrot.slane %v725_v2, %v1287_v22 }
  0xfd   : > { %v1157_v61 = vsel %vm1149_vm10, %v1094_v56, 0  ;;  %v9421_v34 = vrot.slane %v725_v2, %v1295_v4 }
  0xfe   : > { %6338 = vmatprep.subr.msk.bf16.mxu0 %vm1149_vm10, %v1093_v57  ;;  %6341 = vmatprep.subr.msk.bf16.mxu1 %vm1149_vm10, %v1095_v58  ;;  %v1151_v3 = vsel %vm1149_vm10, %v1092_v59, 0  ;;  %15912 = vst [vmem:[#allocation37_spill] sm:$0xff] %v9419_v32  ;;  %vm15672_vm10 = vcmask 130048  }
  0xff   : > { %1187 = vmatpush1.bf16.msra.mxu0 %v1151_v3  ;;  %1240 = vmatpush1.bf16.msra.mxu1 %v1157_v61  ;;  %15913 = vst [vmem:[#allocation38_spill] sm:$0xff] %v9421_v34  ;;  %v1291_v3 = vsub.s32 1, %v1286_v21 }
 0x102   : > { %1195 = vmatmul.mubr.bf16.vlgmr.msra.gmra.mrb[0].mxu0 %v8745_v10  ;;  %1248 = vmatmul.mubr.bf16.vlgmr.msra.gmra.mrb[0].mxu1 %v8745_v10 }
 0x103   : > { %6340 = vmatprep.mubr.msk.bf16.mxu0 %vm1142_vm0, %v8748_v1  ;;  %6343 = vmatprep.mubr.msk.bf16.mxu1 %vm1142_vm0, %v8748_v1  ;;  %vm1808_vm0 = vcmask 261120  }
 0x108   : > { %v1112_v23 = vpop.permute.xlu1 %1111 }
 0x109   : > { %v1107_v24 = vpop.permute.xlu0 %1106 }
 0x10a   : > { %1205 = vmatmul.mubr.bf16.gmra.mrb[4].mxu0 %v8750_v20  ;;  %1258 = vmatmul.mubr.bf16.gmra.mrb[4].mxu1 %v8750_v20 }
 0x1d5   : > { %v1196_v25 = vpop.f32.mrb[0].mxu0  ;;  %v1249_v26 = vpop.f32.mrb[0].mxu1 }
 0x1d6   : > { %v1197_v27 = vadd.f32 %v1196_v25, %v1107_v24  ;;  %v1250_v29 = vadd.f32 %v1249_v26, %v1107_v24  ;;  %v1198_v30 = vpop.f32.mrb[1].mxu0  ;;  %v1251_v31 = vpop.f32.mrb[1].mxu1 }
 0x1d7   : > { %v1200_v35 = vpop.f32.mrb[2].mxu0  ;;  %v1253_v14 = vpop.f32.mrb[2].mxu1  ;;  %v1199_v61 = vadd.f32 %v1198_v30, %v1107_v24 }
 0x1d8   : > { %v1268_v33 = vmax.f32 %v1197_v27, 0.0  ;;  %v1270_v36 = vmax.f32 %v1250_v29, 0.0  ;;  %v1201_v42 = vadd.f32 %v1200_v35, %v1112_v23  ;;  %v1254_v49 = vadd.f32 %v1253_v14, %v1112_v23  ;;  %v1202_v54 = vpop.f32.mrb[3].mxu0  ;;  %v1255_v56 = vpop.f32.mrb[3].mxu1 }
 0x1d9   : > { %v1203_v59 = vadd.f32 %v1202_v54, %v1112_v23  ;;  %v1256_v27 = vadd.f32 %v1255_v56, %v1112_v23  ;;  %v1252_v54 = vadd.f32 %v1251_v31, %v1107_v24 }
 0x1da   : > { %v1272_v57 = vmax.f32 %v1201_v42, 0.0  ;;  %v1274_v58 = vmax.f32 %v1254_v49, 0.0  ;;  %v9424_v10 = vmul.f32 %v9419_v32, %v1268_v33  ;;  %v9427_v1 = vmul.f32 %v9421_v34, %v1270_v36 }
 0x1db   : > { %v1273_v26 = vmax.f32 %v1203_v59, 0.0  ;;  %v1269_v42 = vmax.f32 %v1199_v61, 0.0  ;;  %v9443_v49 = vrot.slane %v725_v2, %v1291_v3  ;;  %v1275_v59 = vmax.f32 %v1256_v27, 0.0 }
 0x1dc   : > { %15914 = vst [vmem:[#allocation39_spill] sm:$0xff] %v9424_v10  ;;  %15915 = vst [vmem:[#allocation40_spill] sm:$0xff] %v9427_v1  ;;  %v9430_v20 = vmul.f32 %v9419_v32, %v1272_v57  ;;  %v9433_v22 = vmul.f32 %v9421_v34, %v1274_v58  ;;  %v1299_v57 = vsub.s32 3, %v1286_v21  ;;  %v1271_v61 = vmax.f32 %v1252_v54, 0.0  ;;  %v1117_v54 = vpop.permute.xlu1 %1116 }
 0x1dd   : > { %v1206_v4 = vpop.f32.mrb[4].mxu0  ;;  %v1259_v25 = vpop.f32.mrb[4].mxu1  ;;  %15918 = vst [vmem:[#allocation43_spill] sm:$0xff] %v9443_v49  ;;  %v9450_v56 = vmul.f32 %v9443_v49, %v1273_v26  ;;  %v9453_v11 = vmul.f32 %v9443_v49, %v1269_v42 }
 0x1de   : > { %15916 = vst [vmem:[#allocation41_spill] sm:$0xff] %v9430_v20  ;;  %15917 = vst [vmem:[#allocation42_spill] sm:$0xff] %v9433_v22  ;;  %v1208_v29 = vpop.f32.mrb[5].mxu0  ;;  %v1261_v35 = vpop.f32.mrb[5].mxu1  ;;  %v9437_v30 = vpack.i.bf16 %v9433_v22, %v9427_v1  ;;  %v9441_v14 = vpack.i.bf16 %v9430_v20, %v9424_v10  ;;  %v9455_v3 = vrot.slane %v725_v2, %v1299_v57 }
 0x1df   : > { %v1210_v33 = vpop.f32.mrb[6].mxu0  ;;  %v1263_v36 = vpop.f32.mrb[6].mxu1  ;;  %15919 = vst [vmem:[#allocation44_spill] sm:$0xff] %v9450_v56  ;;  %15920 = vst [vmem:[#allocation45_spill] sm:$0xff] %v9453_v11  ;;  %v9466_v24 = vpack.i.bf16 %v9450_v56, %v9453_v11  ;;  %v1207_v57 = vadd.f32 %v1206_v4, %v1117_v54  ;;  %v1209_v0 = vadd.f32 %v1208_v29, %v1117_v54 }
 0x1e0   : > { %v1265_v58 = vpop.f32.mrb[7].mxu1  ;;  %6786 = vrot.lane.b32.xlu0 %v9437_v30, %s15400_s29  ;;  %v1212_v23 = vpop.f32.mrb[7].mxu0  ;;  %6746 = vrot.lane.b32.xlu1 %v9441_v14, %s15398_s0  ;;  %15921 = vst [vmem:[#allocation46_spill] sm:$0xff] %v9455_v3  ;;  %v9462_v21 = vmul.f32 %v9455_v3, %v1275_v59  ;;  %v9469_v31 = vmul.f32 %v9455_v3, %v1271_v61 }
 0x1e1   : > { %v1122_v26 = vpop.permute.xlu0 %1121  ;;  %v1260_v59 = vadd.f32 %v1259_v25, %v1117_v54  ;;  %v1276_v44 = vmax.f32 %v1207_v57, 0.0  ;;  %v1277_v29 = vmax.f32 %v1209_v0, 0.0  ;;  %v9694_v37 = vpack.c.bf16 %v9430_v20, %v9424_v10 }
 0x1e2   : > { %15923 = vst [vmem:[#allocation47_spill] sm:$0xff] %v9462_v21  ;;  %15924 = vst [vmem:[#allocation48_spill] sm:$0xff] %v9469_v31  ;;  %v9477_v2 = vpack.i.bf16 %v9462_v21, %v9469_v31  ;;  %v1211_v27 = vadd.f32 %v1210_v33, %v1122_v26  ;;  %v1264_v42 = vadd.f32 %v1263_v36, %v1122_v26 }
 0x1e3   : > { %v1213_v61 = vadd.f32 %v1212_v23, %v1122_v26  ;;  %v1278_v9 = vmax.f32 %v1260_v59, 0.0  ;;  %v1266_v4 = vadd.f32 %v1265_v58, %v1122_v26  ;;  %v9518_v23 = vmul.f32 %v9419_v32, %v1276_v44  ;;  %v8753_v59 = vld [vmem:[%s15937_s24 + $0x4] ss:$12 sps:$4 sm:$0xff]  }
 0x1e4   : > { %6796 = vrot.lane.b32.xlu0 %v9437_v30, %s15922_s2  ;;  %6751 = vrot.lane.b32.xlu1 %v9437_v30, %s15398_s0  ;;  %v1280_v45 = vmax.f32 %v1211_v27, 0.0  ;;  %v1282_v43 = vmax.f32 %v1264_v42, 0.0  ;;  %v1262_v42 = vadd.f32 %v1261_v35, %v1117_v54 }
 0x1e5   : > { %v1281_v25 = vmax.f32 %v1213_v61, 0.0  ;;  %15930 = vst [vmem:[#allocation51_spill] sm:$0xff] %v9518_v23  ;;  %v9521_v27 = vmul.f32 %v9421_v34, %v1278_v9  ;;  %v1283_v58 = vmax.f32 %v1266_v4, 0.0  ;;  %v9535_v9 = vmul.f32 %v9443_v49, %v1277_v29  ;;  %1844 = vmatprep.mubr.bf16.mxu0 %v8753_v59  ;;  %1930 = vmatprep.mubr.bf16.mxu1 %v8753_v59 }
 0x1e6   : > { %v9512_v33 = vmul.f32 %v9419_v32, %v1280_v45  ;;  %v9515_v36 = vmul.f32 %v9421_v34, %v1282_v43  ;;  %v1279_v0 = vmax.f32 %v1262_v42, 0.0 }
 0x1e7   : > { %15931 = vst [vmem:[#allocation52_spill] sm:$0xff] %v9521_v27  ;;  %v9528_v45 = vmul.f32 %v9443_v49, %v1281_v25  ;;  %15933 = vst [vmem:[#allocation54_spill] sm:$0xff] %v9535_v9  ;;  %v9540_v35 = vmul.f32 %v9455_v3, %v1283_v58 }
 0x1e8   : > { %6806 = vrot.lane.b32.xlu0 %v9466_v24, %s15398_s0  ;;  %6756 = vrot.lane.b32.xlu1 %v9441_v14, %s15925_s6  ;;  %15928 = vst [vmem:[#allocation49_spill] sm:$0xff] %v9512_v33  ;;  %15929 = vst [vmem:[#allocation50_spill] sm:$0xff] %v9515_v36  ;;  %v6905_v43 = vpack.i.bf16 %v9515_v36, %v9521_v27  ;;  %v6865_v44 = vpack.i.bf16 %v9512_v33, %v9518_v23 }
 0x1e9   : > { %15932 = vst [vmem:[#allocation53_spill] sm:$0xff] %v9528_v45  ;;  %15934 = vst [vmem:[#allocation55_spill] sm:$0xff] %v9540_v35  ;;  %v6915_v26 = vpack.i.bf16 %v9528_v45, %v9535_v9  ;;  %v9545_v54 = vmul.f32 %v9455_v3, %v1279_v0 }
 0x1eb   : > { %15935 = vst [vmem:[#allocation56_spill] sm:$0xff] %v9545_v54  ;;  %v6920_v57 = vpack.i.bf16 %v9540_v35, %v9545_v54 }
 0x1ec   : > { %6811 = vrot.lane.b32.xlu0 %v9477_v2, %s15398_s0  ;;  %6761 = vrot.lane.b32.xlu1 %v9437_v30, %s15925_s6 }
 0x1f0   : > { %6816 = vrot.lane.b32.xlu0 %v9466_v24, %s15925_s6  ;;  %6766 = vrot.lane.b32.xlu1 %v9441_v14, %s15926_s27 }
 0x1f4   : > { %6821 = vrot.lane.b32.xlu0 %v9477_v2, %s15925_s6  ;;  %6771 = vrot.lane.b32.xlu1 %v9437_v30, %s15926_s27 }
 0x1f8   : > { %6826 = vrot.lane.b32.xlu0 %v9466_v24, %s15926_s27  ;;  %6776 = vrot.lane.b32.xlu1 %v9441_v14, %s15927_s28 }
 0x1fc   : > { %6831 = vrot.lane.b32.xlu0 %v9477_v2, %s15926_s27  ;;  %6781 = vrot.lane.b32.xlu1 %v9437_v30, %s15927_s28 }
 0x200   : > { %6836 = vrot.lane.b32.xlu0 %v9466_v24, %s15927_s28  ;;  %6791 = vrot.lane.b32.xlu1 %v9441_v14, %s15400_s29 }
 0x204   : > { %6841 = vrot.lane.b32.xlu0 %v9477_v2, %s15927_s28  ;;  %6801 = vrot.lane.b32.xlu1 %v9441_v14, %s15922_s2 }
 0x208   : > { %6851 = vrot.lane.b32.xlu0 %v9477_v2, %s15400_s29  ;;  %6846 = vrot.lane.b32.xlu1 %v9466_v24, %s15400_s29 }
 0x20c   : > { %6861 = vrot.lane.b32.xlu0 %v9477_v2, %s15922_s2  ;;  %6856 = vrot.lane.b32.xlu1 %v9466_v24, %s15922_s2 }
 0x210   : > { %6906 = vrot.lane.b32.xlu0 %v6905_v43, %s15400_s29  ;;  %6866 = vrot.lane.b32.xlu1 %v6865_v44, %s15398_s0 }
 0x214   : > { %6916 = vrot.lane.b32.xlu0 %v6915_v26, %s15398_s0  ;;  %6871 = vrot.lane.b32.xlu1 %v6905_v43, %s15398_s0 }
 0x218   : > { %6921 = vrot.lane.b32.xlu0 %v6920_v57, %s15398_s0  ;;  %6876 = vrot.lane.b32.xlu1 %v6865_v44, %s15925_s6  ;;  %s15938_s0 = smov 107  }
 0x21c   : > { %6926 = vrot.lane.b32.xlu0 %v6915_v26, %s15925_s6  ;;  %6881 = vrot.lane.b32.xlu1 %v6905_v43, %s15925_s6 }
 0x220   : > { %6931 = vrot.lane.b32.xlu0 %v6920_v57, %s15925_s6  ;;  %6886 = vrot.lane.b32.xlu1 %v6865_v44, %s15926_s27 }
 0x224   : > { %6936 = vrot.lane.b32.xlu0 %v6915_v26, %s15926_s27  ;;  %6891 = vrot.lane.b32.xlu1 %v6905_v43, %s15926_s27 }
 0x228   : > { %6941 = vrot.lane.b32.xlu0 %v6920_v57, %s15926_s27  ;;  %6896 = vrot.lane.b32.xlu1 %v6865_v44, %s15927_s28 }
 0x22c   : > { %6946 = vrot.lane.b32.xlu0 %v6915_v26, %s15927_s28  ;;  %6901 = vrot.lane.b32.xlu1 %v6905_v43, %s15927_s28 }
 0x230   : > { %6951 = vrot.lane.b32.xlu0 %v6920_v57, %s15927_s28  ;;  %6911 = vrot.lane.b32.xlu1 %v6865_v44, %s15400_s29 }
 0x234   : > { %6956 = vrot.lane.b32.xlu0 %v6905_v43, %s15922_s2  ;;  %6961 = vrot.lane.b32.xlu1 %v6865_v44, %s15922_s2 }
 0x238   : > { %6971 = vrot.lane.b32.xlu0 %v9437_v30, %s15936_s3  ;;  %6966 = vrot.lane.b32.xlu1 %v9466_v24, %s15936_s3 }
 0x23c   : > { %6986 = vrot.lane.b32.xlu0 %v9477_v2, %s15936_s3  ;;  %6976 = vrot.lane.b32.xlu1 %v6915_v26, %s15400_s29 }
 0x240   : > { %6991 = vrot.lane.b32.xlu0 %v6920_v57, %s15400_s29  ;;  %6981 = vrot.lane.b32.xlu1 %v9441_v14, %s15936_s3  ;;  %s15939_s29 = sld [smem:[#allocation159_spill]] }
 0x244   : > { %6996 = vrot.lane.b32.xlu0 %v6905_v43, %s15936_s3  ;;  %7001 = vrot.lane.b32.xlu1 %v6915_v26, %s15922_s2 }
 0x248   : > { %7011 = vrot.lane.b32.xlu0 %v6920_v57, %s15922_s2  ;;  %7006 = vrot.lane.b32.xlu1 %v6865_v44, %s15936_s3 }
 0x24c   : > { %7026 = vrot.lane.b32.xlu0 %v9437_v30, %s15938_s0  ;;  %7016 = vrot.lane.b32.xlu1 %v6915_v26, %s15936_s3 }
 0x250   : > { %7036 = vrot.lane.b32.xlu0 %v6920_v57, %s15936_s3  ;;  %7021 = vrot.lane.b32.xlu1 %v9466_v24, %s15938_s0 }
 0x252   : > { %v9590_v61 = vpop.permute.xlu0 %6786  ;;  %v6747_v4 = vpop.permute.xlu1 %6746 }
 0x253   : > { %v6749_v24 = vunpack.i.h.bf16 %v6747_v4  ;;  %v6748_v58 = vunpack.i.l.bf16 %v6747_v4 }
 0x254   : > { %7041 = vrot.lane.b32.xlu0 %v9477_v2, %s15938_s0  ;;  %7031 = vrot.lane.b32.xlu1 %v9441_v14, %s15938_s0  ;;  %v1782_v14 = vld [vmem:[%s15939_s29 + $0x8] sm:$0xff]  ;;  %v1781_v2 = vld [vmem:[%s15939_s29] sm:$0xff]  ;;  %s16289_s29 = smov 110  }
 0x256   : > { %v9596_v25 = vpop.permute.xlu0 %6796  ;;  %v6752_v30 = vpop.permute.xlu1 %6751 }
 0x257   : > { %v6754_v4 = vunpack.i.h.bf16 %v6752_v30 }
 0x258   : > { %7046 = vrot.lane.b32.xlu0 %v6905_v43, %s15938_s0  ;;  %7051 = vrot.lane.b32.xlu1 %v6915_v26, %s15938_s0 }
 0x25a   : > { %v6807_v29 = vpop.permute.xlu0 %6806  ;;  %v9600_v42 = vpop.permute.xlu1 %6756 }
 0x25b   : > { %v6809_v0 = vunpack.i.h.bf16 %v6807_v29  ;;  %v6808_v59 = vunpack.i.l.bf16 %v6807_v29  ;;  %v6753_v29 = vunpack.i.l.bf16 %v6752_v30  ;;  %v6759_v40 = vunpack.i.h.bf16 %v9600_v42 }
 0x25c   : > { %7061 = vrot.lane.b32.xlu0 %v6920_v57, %s15938_s0  ;;  %7056 = vrot.lane.b32.xlu1 %v6865_v44, %s15938_s0  ;;  %v6758_v41 = vunpack.i.l.bf16 %v9600_v42  ;;  %v9684_v42 = vpack.c.bf16 %v9450_v56, %v9453_v11 }
 0x25d   : > { %v1361_v43 = vsel %vm818_vm7, %v6748_v58, %v6808_v59  ;;  %v1362_v26 = vsel %vm818_vm7, %v6749_v24, %v6809_v0  ;;  %v1357_v53 = vsel %vm818_vm7, %v6808_v59, %v6753_v29  ;;  %v1358_v12 = vsel %vm818_vm7, %v6809_v0, %v6754_v4 }
 0x25e   : > { %v6812_v7 = vpop.permute.xlu0 %6811  ;;  %v9614_v57 = vpop.permute.xlu1 %6761  ;;  %v9616_v44 = vpack.c.bf16 %v1362_v26, %v1361_v43 }
 0x25f   : > { %v6814_v8 = vunpack.i.h.bf16 %v6812_v7  ;;  %v6813_v16 = vunpack.i.l.bf16 %v6812_v7  ;;  %v6763_v62 = vunpack.i.l.bf16 %v9614_v57  ;;  %v6764_v38 = vunpack.i.h.bf16 %v9614_v57 }
 0x260   : > { %15940 = vst [vmem:[#allocation57_spill] sm:$0xff] %v9616_v44  ;;  %1790 = vperm.xlu0 %6743, %v1782_v14   ;;  %1785 = vperm.xlu1 %6744, %v1781_v2   ;;  %v9637_v2 = vpack.c.bf16 %v1358_v12, %v1357_v53 }
 0x261   : > { %v1365_v13 = vsel %vm818_vm7, %v6813_v16, %v6748_v58  ;;  %v1366_v30 = vsel %vm818_vm7, %v6814_v8, %v6749_v24  ;;  %1812 = vmatprep.subr.bf16.mxu0 %v9616_v44  ;;  %v1353_v43 = vsel %vm818_vm7, %v6753_v29, %v6813_v16  ;;  %v1354_v7 = vsel %vm818_vm7, %v6754_v4, %v6814_v8 }
 0x262   : > { %v6817_v59 = vpop.permute.xlu0 %6816  ;;  %v9631_v26 = vpop.permute.xlu1 %6766  ;;  %v9633_v0 = vpack.c.bf16 %v1366_v30, %v1365_v13  ;;  %v9635_v14 = vpack.c.bf16 %v1354_v7, %v1353_v43  ;;  %15943 = vst [vmem:[#allocation60_spill] sm:$0xff] %v9637_v2 }
 0x263   : > { %v6818_v6 = vunpack.i.l.bf16 %v6817_v59  ;;  %v6819_v55 = vunpack.i.h.bf16 %v6817_v59 }
 0x264   : > { %15941 = vst [vmem:[#allocation58_spill] sm:$0xff] %v9633_v0  ;;  %15942 = vst [vmem:[#allocation59_spill] sm:$0xff] %v9635_v14  ;;  %1813 = vmatpush1.bf16.msra.mxu0 %v9633_v0  ;;  %1898 = vmatprep.subr.bf16.mxu1 %v9635_v14 }
 0x265   : > { %1899 = vmatpush1.bf16.msra.mxu1 %v9637_v2  ;;  %v1405_v28 = vsel %vm831_vm8, %v6818_v6, %v6763_v62  ;;  %v1406_v19 = vsel %vm831_vm8, %v6819_v55, %v6764_v38  ;;  %v1409_v47 = vsel %vm831_vm8, %v6758_v41, %v6818_v6  ;;  %v1410_v48 = vsel %vm831_vm8, %v6759_v40, %v6819_v55 }
 0x266   : > { %v6822_v24 = vpop.permute.xlu0 %6821  ;;  %v9642_v16 = vpop.permute.xlu1 %6771  ;;  %v9699_v51 = vpack.c.bf16 %v1410_v48, %v1409_v47  ;;  %v9701_v52 = vpack.c.bf16 %v1406_v19, %v1405_v28 }
 0x267   : > { %v6823_v18 = vunpack.i.l.bf16 %v6822_v24  ;;  %v6824_v59 = vunpack.i.h.bf16 %v6822_v24  ;;  %v9690_v24 = vpack.c.bf16 %v9462_v21, %v9469_v31  ;;  %v6774_v55 = vunpack.i.h.bf16 %v9642_v16 }
 0x268   : > { %15944 = vst [vmem:[#allocation61_spill] sm:$0xff] %v9701_v52  ;;  %v6773_v48 = vunpack.i.l.bf16 %v9642_v16 }
 0x269   : > { %v1413_v6 = vsel %vm831_vm8, %v6823_v18, %v6758_v41  ;;  %v1414_v57 = vsel %vm831_vm8, %v6824_v59, %v6759_v40  ;;  %v1401_v31 = vsel %vm831_vm8, %v6763_v62, %v6823_v18  ;;  %v1402_v21 = vsel %vm831_vm8, %v6764_v38, %v6824_v59 }
 0x26a   : > { %v9644_v58 = vpop.permute.xlu0 %6826  ;;  %v9646_v8 = vpop.permute.xlu1 %6776  ;;  %v9716_v18 = vpack.c.bf16 %v1402_v21, %v1401_v31  ;;  %v9718_v62 = vpack.c.bf16 %v1414_v57, %v1413_v6 }
 0x26b   : > { %v6828_v46 = vunpack.i.l.bf16 %v9644_v58  ;;  %v6829_v19 = vunpack.i.h.bf16 %v9644_v58 }
 0x26c   : > { %15945 = vst [vmem:[#allocation62_spill] sm:$0xff] %v9716_v18  ;;  %15946 = vst [vmem:[#allocation63_spill] sm:$0xff] %v9718_v62 }
 0x26e   : > { %v9648_v4 = vpop.permute.xlu0 %6831  ;;  %v9650_v13 = vpop.permute.xlu1 %6781 }
 0x26f   : > { %v6833_v38 = vunpack.i.l.bf16 %v9648_v4 }
 0x272   : > { %v9652_v29 = vpop.permute.xlu0 %6836  ;;  %v9654_v53 = vpop.permute.xlu1 %6791 }
 0x276   : > { %v9656_v12 = vpop.permute.xlu0 %6841  ;;  %v9658_v30 = vpop.permute.xlu1 %6801 }
 0x27a   : > { %v9660_v43 = vpop.permute.xlu0 %6851  ;;  %v9662_v7 = vpop.permute.xlu1 %6846 }
 0x27e   : > { %v9664_v5 = vpop.permute.xlu0 %6861  ;;  %v9666_v60 = vpop.permute.xlu1 %6856 }
 0x282   : > { %v9676_v17 = vpop.permute.xlu0 %6906  ;;  %v6867_v63 = vpop.permute.xlu1 %6866 }
 0x283   : > { %v6869_v41 = vunpack.i.h.bf16 %v6867_v63  ;;  %v6868_v11 = vunpack.i.l.bf16 %v6867_v63 }
 0x286   : > { %v6917_v50 = vpop.permute.xlu0 %6916  ;;  %v6872_v39 = vpop.permute.xlu1 %6871 }
 0x287   : > { %v6919_v56 = vunpack.i.h.bf16 %v6917_v50  ;;  %v6918_v47 = vunpack.i.l.bf16 %v6917_v50  ;;  %v6874_v28 = vunpack.i.h.bf16 %v6872_v39  ;;  %v6873_v40 = vunpack.i.l.bf16 %v6872_v39 }
 0x288   : > { %v6834_v50 = vunpack.i.h.bf16 %v9648_v4  ;;  %v9727_v39 = vsel %vm844_vm9, %v6828_v46, %v6773_v48  ;;  %v15948_v4 = vunpack.i.l.bf16 %v9631_v26 }
 0x289   : > { %v1363_v20 = vsel %vm818_vm7, %v6868_v11, %v6918_v47  ;;  %v1364_v10 = vsel %vm818_vm7, %v6869_v41, %v6919_v56  ;;  %v1360_v57 = vsel %vm818_vm7, %v6919_v56, %v6874_v28  ;;  %v1359_v6 = vsel %vm818_vm7, %v6918_v47, %v6873_v40 }
 0x28a   : > { %v6922_v16 = vpop.permute.xlu0 %6921  ;;  %v6877_v58 = vpop.permute.xlu1 %6876  ;;  %v9723_v59 = vpack.c.bf16 %v1364_v10, %v1363_v20  ;;  %v1457_v10 = vsel %vm844_vm9, %v15948_v4, %v6828_v46  ;;  %v15949_v20 = vunpack.i.h.bf16 %v9631_v26  ;;  %v9759_v3 = vpack.c.bf16 %v1360_v57, %v1359_v6 }
 0x28b   : > { %v6924_v21 = vunpack.i.h.bf16 %v6922_v16  ;;  %v6923_v31 = vunpack.i.l.bf16 %v6922_v16  ;;  %v6878_v14 = vunpack.i.l.bf16 %v6877_v58  ;;  %v6783_v6 = vunpack.i.l.bf16 %v9650_v13 }
 0x28c   : > { %15947 = vst [vmem:[#allocation64_spill] sm:$0xff] %v9723_v59  ;;  %1814 = vmatprep.subr.bf16.mxu0 %v9723_v59  ;;  %v1458_v63 = vsel %vm844_vm9, %v15949_v20, %v6829_v19  ;;  %v1449_v20 = vsel %vm844_vm9, %v6773_v48, %v6833_v38  ;;  %15950 = vst [vmem:[#allocation65_spill] sm:$0xff] %v9759_v3 }
 0x28d   : > { %v1367_v16 = vsel %vm818_vm7, %v6923_v31, %v6868_v11  ;;  %v1368_v56 = vsel %vm818_vm7, %v6924_v21, %v6869_v41  ;;  %v1355_v47 = vsel %vm818_vm7, %v6873_v40, %v6923_v31  ;;  %v1356_v2 = vsel %vm818_vm7, %v6874_v28, %v6924_v21 }
 0x28e   : > { %v6927_v59 = vpop.permute.xlu0 %6926  ;;  %v6882_v0 = vpop.permute.xlu1 %6881  ;;  %v9751_v46 = vpack.c.bf16 %v1368_v56, %v1367_v16  ;;  %v9753_v4 = vpack.c.bf16 %v1356_v2, %v1355_v47  ;;  %v1450_v11 = vsel %vm844_vm9, %v6774_v55, %v6834_v50  ;;  %v6838_v40 = vunpack.i.l.bf16 %v9652_v29 }
 0x28f   : > { %v6929_v41 = vunpack.i.h.bf16 %v6927_v59  ;;  %v6928_v44 = vunpack.i.l.bf16 %v6927_v59  ;;  %v6879_v28 = vunpack.i.h.bf16 %v6877_v58  ;;  %v6884_v21 = vunpack.i.h.bf16 %v6882_v0 }
 0x290   : > { %v6883_v31 = vunpack.i.l.bf16 %v6882_v0  ;;  %1815 = vmatpush1.bf16.msra.mxu0 %v9751_v46  ;;  %1900 = vmatprep.subr.bf16.mxu1 %v9753_v4  ;;  %v1454_v2 = vsel %vm844_vm9, %v6829_v19, %v6774_v55  ;;  %v9771_v57 = vpack.c.bf16 %v1458_v63, %v1457_v10  ;;  %v15951_v0 = vunpack.i.l.bf16 %v9631_v26 }
 0x291   : > { %1816 = vmatprep.subr.bf16.mxu0 %v9699_v51  ;;  %1901 = vmatpush1.bf16.msra.mxu1 %v9759_v3  ;;  %v1411_v59 = vsel %vm831_vm8, %v6878_v14, %v6928_v44  ;;  %v6839_v55 = vunpack.i.h.bf16 %v9652_v29  ;;  %v1412_v56 = vsel %vm831_vm8, %v6879_v28, %v6929_v41  ;;  %v15952_v47 = vunpack.i.h.bf16 %v9631_v26 }
 0x292   : > { %v1461_v58 = vsel %vm844_vm9, %v6833_v38, %v15951_v0  ;;  %v6932_v19 = vpop.permute.xlu0 %6931  ;;  %v6887_v16 = vpop.permute.xlu1 %6886  ;;  %1902 = vmatprep.subr.bf16.mxu1 %v9716_v18  ;;  %v9786_v3 = vpack.c.bf16 %v1450_v11, %v1449_v20  ;;  %v1408_v38 = vsel %vm831_vm8, %v6929_v41, %v6884_v21  ;;  %v1407_v29 = vsel %vm831_vm8, %v6928_v44, %v6883_v31 }
 0x293   : > { %v1462_v63 = vsel %vm844_vm9, %v6834_v50, %v15952_v47  ;;  %v6934_v10 = vunpack.i.h.bf16 %v6932_v19  ;;  %v6933_v48 = vunpack.i.l.bf16 %v6932_v19  ;;  %v9793_v0 = vpack.c.bf16 %v1412_v56, %v1411_v59 }
 0x294   : > { %1817 = vmatpush1.bf16.msra.mxu0 %v9718_v62  ;;  %v15954_v18 = vunpack.i.l.bf16 %v9646_v8  ;;  %v6843_v41 = vunpack.i.l.bf16 %v9656_v12  ;;  %v6888_v47 = vunpack.i.l.bf16 %v6887_v16 }
 0x295   : > { %15953 = vst [vmem:[#allocation66_spill] sm:$0xff] %v9793_v0  ;;  %v1415_v50 = vsel %vm831_vm8, %v6933_v48, %v6878_v14  ;;  %v1416_v20 = vsel %vm831_vm8, %v6934_v10, %v6879_v28  ;;  %1903 = vmatpush1.bf16.msra.mxu1 %v9701_v52  ;;  %v1403_v44 = vsel %vm831_vm8, %v6883_v31, %v6933_v48  ;;  %v15955_v28 = vunpack.i.h.bf16 %v9646_v8 }
 0x296   : > { %v1505_v26 = vsel %vm883_vm11, %v15954_v18, %v6838_v40  ;;  %v1404_v11 = vsel %vm831_vm8, %v6884_v21, %v6934_v10  ;;  %1818 = vmatprep.subr.bf16.mxu0 %v9793_v0  ;;  %v6937_v59 = vpop.permute.xlu0 %6936  ;;  %v6892_v18 = vpop.permute.xlu1 %6891  ;;  %v9810_v19 = vpack.c.bf16 %v1416_v20, %v1415_v50  ;;  %v9818_v52 = vpack.c.bf16 %v1408_v38, %v1407_v29 }
 0x297   : > { %v9812_v14 = vpack.c.bf16 %v1404_v11, %v1403_v44  ;;  %v1506_v56 = vsel %vm883_vm11, %v15955_v28, %v6839_v55  ;;  %v6939_v31 = vunpack.i.h.bf16 %v6937_v59  ;;  %v6938_v48 = vunpack.i.l.bf16 %v6937_v59 }
 0x298   : > { %v6844_v21 = vunpack.i.h.bf16 %v9656_v12  ;;  %v6889_v10 = vunpack.i.h.bf16 %v6887_v16  ;;  %v6894_v0 = vunpack.i.h.bf16 %v6892_v18  ;;  %v6893_v62 = vunpack.i.l.bf16 %v6892_v18  ;;  %1819 = vmatpush1.bf16.msra.mxu0 %v9810_v19 }
 0x299   : > { %1904 = vmatprep.subr.bf16.mxu1 %v9812_v14  ;;  %1820 = vmatprep.subr.bf16.mxu0 %v9771_v57  ;;  %v1459_v50 = vsel %vm844_vm9, %v6888_v47, %v6938_v48  ;;  %v9828_v20 = vpack.c.bf16 %v1454_v2, %v9727_v39  ;;  %v9832_v12 = vpack.c.bf16 %v9528_v45, %v9535_v9  ;;  %v15957_v38 = vunpack.i.h.bf16 %v9650_v13 }
 0x29a   : > { %1905 = vmatpush1.bf16.msra.mxu1 %v9818_v52  ;;  %v1501_v16 = vsel %vm883_vm11, %v6838_v40, %v6783_v6  ;;  %v6942_v44 = vpop.permute.xlu0 %6941  ;;  %v6897_v11 = vpop.permute.xlu1 %6896  ;;  %v9841_v59 = vpack.c.bf16 %v1462_v63, %v1461_v58  ;;  %v1460_v39 = vsel %vm844_vm9, %v6889_v10, %v6939_v31  ;;  %v9845_v28 = vpack.c.bf16 %v1506_v56, %v1505_v26 }
 0x29b   : > { %15956 = vst [vmem:[#allocation67_spill] sm:$0xff] %v9832_v12  ;;  %v1502_v29 = vsel %vm883_vm11, %v6839_v55, %v15957_v38  ;;  %1906 = vmatprep.subr.bf16.mxu1 %v9786_v3  ;;  %v6944_v2 = vunpack.i.h.bf16 %v6942_v44  ;;  %v6943_v18 = vunpack.i.l.bf16 %v6942_v44  ;;  %v1497_v40 = vsel %vm883_vm11, %v6783_v6, %v6843_v41 }
 0x29c   : > { %v1456_v9 = vsel %vm844_vm9, %v6939_v31, %v6894_v0  ;;  %v1455_v55 = vsel %vm844_vm9, %v6938_v48, %v6893_v62  ;;  %1821 = vmatpush1.bf16.msra.mxu0 %v9841_v59  ;;  %v9854_v58 = vpack.c.bf16 %v1460_v39, %v1459_v50  ;;  %v15958_v63 = vmov %v15957_v38 }
 0x29d   : > { %v1498_v38 = vsel %vm883_vm11, %v15958_v63, %v6844_v21  ;;  %v1463_v26 = vsel %vm844_vm9, %v6943_v18, %v6888_v47  ;;  %v1464_v6 = vsel %vm844_vm9, %v6944_v2, %v6889_v10  ;;  %v1451_v56 = vsel %vm844_vm9, %v6893_v62, %v6943_v18 }
 0x29e   : > { %1907 = vmatpush1.bf16.msra.mxu1 %v9828_v20  ;;  %v1452_v31 = vsel %vm844_vm9, %v6894_v0, %v6944_v2  ;;  %v15959_v48 = vunpack.i.l.bf16 %v9646_v8  ;;  %v15960_v50 = vunpack.i.h.bf16 %v9646_v8  ;;  %1822 = vmatprep.subr.bf16.mxu0 %v9854_v58  ;;  %v6947_v10 = vpop.permute.xlu0 %6946  ;;  %v6902_v44 = vpop.permute.xlu1 %6901  ;;  %v9878_v39 = vpack.c.bf16 %v1464_v6, %v1463_v26 }
 0x29f   : > { %v9880_v62 = vpack.c.bf16 %v1452_v31, %v1451_v56  ;;  %v6898_v18 = vunpack.i.l.bf16 %v6897_v11  ;;  %v6949_v0 = vunpack.i.h.bf16 %v6947_v10  ;;  %v6948_v2 = vunpack.i.l.bf16 %v6947_v10 }
 0x2a0   : > { %v1509_v13 = vsel %vm883_vm11, %v6843_v41, %v15959_v48  ;;  %v1510_v47 = vsel %vm883_vm11, %v6844_v21, %v15960_v50  ;;  %v9882_v63 = vpack.c.bf16 %v1456_v9, %v1455_v55  ;;  %v6899_v45 = vunpack.i.h.bf16 %v6897_v11  ;;  %1823 = vmatpush1.bf16.msra.mxu0 %v9878_v39 }
 0x2a1   : > { %v6904_v41 = vunpack.i.h.bf16 %v6902_v44  ;;  %v6903_v48 = vunpack.i.l.bf16 %v6902_v44  ;;  %1908 = vmatprep.subr.bf16.mxu1 %v9880_v62  ;;  %v9886_v8 = vpack.c.bf16 %v1498_v38, %v1497_v40  ;;  %1824 = vmatprep.subr.bf16.mxu0 %v9845_v28  ;;  %v1507_v21 = vsel %vm883_vm11, %v6898_v18, %v6948_v2 }
 0x2a2   : > { %1909 = vmatpush1.bf16.msra.mxu1 %v9882_v63  ;;  %v9894_v9 = vpack.c.bf16 %v9433_v22, %v9427_v1  ;;  %v9898_v11 = vpack.c.bf16 %v9540_v35, %v9545_v54  ;;  %v6854_v55 = vunpack.i.h.bf16 %v9660_v43  ;;  %v6952_v26 = vpop.permute.xlu0 %6951  ;;  %v9901_v40 = vpop.permute.xlu1 %6911  ;;  %v9904_v38 = vpack.c.bf16 %v1510_v47, %v1509_v13 }
 0x2a3   : > { %1910 = vmatprep.subr.bf16.mxu1 %v9886_v8  ;;  %v1508_v6 = vsel %vm883_vm11, %v6899_v45, %v6949_v0  ;;  %v9908_v56 = vpack.c.bf16 %v1502_v29, %v1501_v16  ;;  %v6853_v31 = vunpack.i.l.bf16 %v9660_v43  ;;  %v6849_v50 = vunpack.i.h.bf16 %v9662_v7 }
 0x2a4   : > { %15961 = vst [vmem:[#allocation68_spill] sm:$0xff] %v9894_v9  ;;  %15962 = vst [vmem:[#allocation69_spill] sm:$0xff] %v9898_v11  ;;  %v6954_v10 = vunpack.i.h.bf16 %v6952_v26  ;;  %v6953_v44 = vunpack.i.l.bf16 %v6952_v26  ;;  %v6848_v54 = vunpack.i.l.bf16 %v9662_v7  ;;  %v1504_v35 = vsel %vm883_vm11, %v6949_v0, %v6904_v41  ;;  %1825 = vmatpush1.bf16.msra.mxu0 %v9904_v38 }
 0x2a5   : > { %v1503_v13 = vsel %vm883_vm11, %v6948_v2, %v6903_v48  ;;  %v9918_v47 = vpack.c.bf16 %v1508_v6, %v1507_v21  ;;  %v6789_v0 = vunpack.i.h.bf16 %v9590_v61  ;;  %v6788_v2 = vunpack.i.l.bf16 %v9590_v61 }
 0x2a6   : > { %v1511_v16 = vsel %vm883_vm11, %v6953_v44, %v6898_v18  ;;  %v1512_v43 = vsel %vm883_vm11, %v6954_v10, %v6899_v45  ;;  %1911 = vmatpush1.bf16.msra.mxu1 %v9908_v56  ;;  %v1499_v7 = vsel %vm883_vm11, %v6903_v48, %v6953_v44  ;;  %v1500_v29 = vsel %vm883_vm11, %v6904_v41, %v6954_v10  ;;  %v9932_v21 = vpop.permute.xlu0 %6956  ;;  %v9934_v18 = vpop.permute.xlu1 %6961 }
 0x2a7   : > { %1826 = vmatprep.subr.bf16.mxu0 %v9918_v47  ;;  %v9936_v26 = vpack.c.bf16 %v1512_v43, %v1511_v16  ;;  %v9938_v45 = vpack.c.bf16 %v1500_v29, %v1499_v7  ;;  %v6794_v6 = vunpack.i.h.bf16 %v9654_v53  ;;  %v6793_v48 = vunpack.i.l.bf16 %v9654_v53 }
 0x2a8   : > { %v9942_v44 = vpack.c.bf16 %v1504_v35, %v1503_v13  ;;  %v9946_v41 = vpack.c.bf16 %v9512_v33, %v9518_v23  ;;  %v1546_v61 = vsel %vm896_vm13, %v6789_v0, %v6854_v55  ;;  %v1545_v10 = vsel %vm896_vm13, %v6788_v2, %v6853_v31 }
 0x2a9   : > { %1827 = vmatpush1.bf16.msra.mxu0 %v9936_v26  ;;  %1912 = vmatprep.subr.bf16.mxu1 %v9938_v45  ;;  %v1549_v16 = vsel %vm896_vm13, %v6848_v54, %v6788_v2  ;;  %v6864_v35 = vunpack.i.h.bf16 %v9664_v5  ;;  %v1550_v53 = vsel %vm896_vm13, %v6849_v50, %v6789_v0  ;;  %v1557_v13 = vsel %vm896_vm13, %v6853_v31, %v6793_v48 }
 0x2aa   : > { %15963 = vst [vmem:[#allocation70_spill] sm:$0xff] %v9946_v41  ;;  %1828 = vmatprep.subr.bf16.mxu0 %v9684_v42  ;;  %1913 = vmatpush1.bf16.msra.mxu1 %v9942_v44  ;;  %v1558_v43 = vsel %vm896_vm13, %v6854_v55, %v6794_v6  ;;  %v1553_v7 = vsel %vm896_vm13, %v6793_v48, %v6848_v54  ;;  %v6859_v2 = vunpack.i.h.bf16 %v9666_v60  ;;  %v6858_v23 = vunpack.i.l.bf16 %v9666_v60  ;;  %v9971_v33 = vpop.permute.xlu0 %6971  ;;  %v9973_v22 = vpop.permute.xlu1 %6966 }
 0x2ab   : > { %v1554_v29 = vsel %vm896_vm13, %v6794_v6, %v6849_v50  ;;  %1914 = vmatprep.subr.bf16.mxu1 %v9690_v24  ;;  %v6799_v31 = vunpack.i.h.bf16 %v9596_v25  ;;  %v6798_v55 = vunpack.i.l.bf16 %v9596_v25  ;;  %v6863_v0 = vunpack.i.l.bf16 %v9664_v5 }
 0x2ac   : > { %v9981_v54 = vpack.c.bf16 %v9515_v36, %v9521_v27  ;;  %v6804_v50 = vunpack.i.h.bf16 %v9658_v30  ;;  %v6803_v60 = vunpack.i.l.bf16 %v9658_v30  ;;  %v9986_v6 = vpack.c.bf16 %v1550_v53, %v1549_v16 }
 0x2ad   : > { %1829 = vmatpush1.bf16.msra.mxu0 %v9694_v37  ;;  %v9988_v48 = vpack.c.bf16 %v1558_v43, %v1557_v13  ;;  %v9992_v1 = vsel %vm935_vm6, %v6799_v31, %v6864_v35  ;;  %v9996_v5 = vpack.c.bf16 %v1554_v29, %v1553_v7  ;;  %v9998_v25 = vpack.c.bf16 %v1546_v61, %v1545_v10 }
 0x2ae   : > { %15964 = vst [vmem:[#allocation71_spill] sm:$0xff] %v9981_v54  ;;  %15965 = vst [vmem:[#allocation72_spill] sm:$0xff] %v9986_v6  ;;  %1830 = vmatprep.subr.bf16.mxu0 %v9832_v12  ;;  %1915 = vmatpush1.bf16.msra.mxu1 %v9894_v9  ;;  %v1601_v30 = vsel %vm935_vm6, %v6803_v60, %v6858_v23  ;;  %v1602_v16 = vsel %vm935_vm6, %v6804_v50, %v6859_v2  ;;  %v10004_v53 = vpop.permute.xlu0 %6986  ;;  %v6977_v13 = vpop.permute.xlu1 %6976  ;;  %v6909_v36 = vunpack.i.h.bf16 %v9676_v17 }
 0x2af   : > { %15966 = vst [vmem:[#allocation73_spill] sm:$0xff] %v9988_v48  ;;  %15967 = vst [vmem:[#allocation74_spill] sm:$0xff] %v9996_v5  ;;  %1916 = vmatprep.subr.bf16.mxu1 %v9898_v11  ;;  %v1597_v43 = vsel %vm935_vm6, %v6858_v23, %v6798_v55  ;;  %v1598_v7 = vsel %vm935_vm6, %v6859_v2, %v6799_v31  ;;  %v6979_v29 = vunpack.i.h.bf16 %v6977_v13  ;;  %v6978_v61 = vunpack.i.l.bf16 %v6977_v13 }
 0x2b0   : > { %15968 = vst [vmem:[#allocation75_spill] sm:$0xff] %v9998_v25  ;;  %v1605_v10 = vsel %vm935_vm6, %v6863_v0, %v6803_v60  ;;  %v1606_v27 = vsel %vm935_vm6, %v6864_v35, %v6804_v50  ;;  %v6908_v9 = vunpack.i.l.bf16 %v9676_v17  ;;  %v6914_v11 = vunpack.i.h.bf16 %v9901_v40 }
 0x2b1   : > { %v6913_v12 = vunpack.i.l.bf16 %v9901_v40  ;;  %1831 = vmatpush1.bf16.msra.mxu0 %v9946_v41  ;;  %v6969_v31 = vunpack.i.h.bf16 %v9973_v22  ;;  %v6968_v60 = vunpack.i.l.bf16 %v9973_v22  ;;  %v1593_v35 = vsel %vm935_vm6, %v6798_v55, %v6863_v0 }
 0x2b2   : > { %1832 = vmatprep.subr.bf16.mxu0 %v9986_v6  ;;  %1917 = vmatpush1.bf16.msra.mxu1 %v9981_v54  ;;  %v6992_v17 = vpop.permute.xlu0 %6991  ;;  %v10028_v50 = vpop.permute.xlu1 %6981  ;;  %v1551_v40 = vsel %vm896_vm13, %v6978_v61, %v6908_v9  ;;  %v1552_v13 = vsel %vm896_vm13, %v6979_v29, %v6909_v36  ;;  %v10034_v23 = vpack.c.bf16 %v1598_v7, %v1597_v43  ;;  %v6959_v54 = vunpack.i.h.bf16 %v9932_v21 }
 0x2b3   : > { %v1555_v22 = vsel %vm896_vm13, %v6913_v12, %v6978_v61  ;;  %v1556_v2 = vsel %vm896_vm13, %v6914_v11, %v6979_v29  ;;  %v6994_v55 = vunpack.i.h.bf16 %v6992_v17  ;;  %v6993_v0 = vunpack.i.l.bf16 %v6992_v17  ;;  %1918 = vmatprep.subr.bf16.mxu1 %v9988_v48 }
 0x2b4   : > { %v10043_v6 = vpack.c.bf16 %v1552_v13, %v1551_v40  ;;  %v10045_v41 = vpack.c.bf16 %v1606_v27, %v1605_v10  ;;  %v10047_v43 = vpack.c.bf16 %v1602_v16, %v1601_v30  ;;  %v15972_v61 = vunpack.i.l.bf16 %v9971_v33 }
 0x2b5   : > { %1833 = vmatpush1.bf16.msra.mxu0 %v9996_v5  ;;  %v1547_v7 = vsel %vm896_vm13, %v6908_v9, %v6993_v0  ;;  %v1548_v29 = vsel %vm896_vm13, %v6909_v36, %v6994_v55  ;;  %v15973_v48 = vunpack.i.h.bf16 %v9971_v33  ;;  %v6983_v27 = vunpack.i.l.bf16 %v10028_v50 }
 0x2b6   : > { %15969 = vst [vmem:[#allocation76_spill] sm:$0xff] %v10043_v6  ;;  %15970 = vst [vmem:[#allocation77_spill] sm:$0xff] %v10045_v41  ;;  %v1645_v17 = vsel %vm948_vm5, %v6968_v60, %v15972_v61  ;;  %1834 = vmatprep.subr.bf16.mxu0 %v10043_v6  ;;  %1919 = vmatpush1.bf16.msra.mxu1 %v9998_v25  ;;  %v10064_v9 = vpop.permute.xlu0 %6996  ;;  %v7002_v30 = vpop.permute.xlu1 %7001  ;;  %v10066_v36 = vpack.c.bf16 %v1556_v2, %v1555_v22  ;;  %v6958_v13 = vunpack.i.l.bf16 %v9932_v21 }
 0x2b7   : > { %15971 = vst [vmem:[#allocation78_spill] sm:$0xff] %v10047_v43  ;;  %v1646_v40 = vsel %vm948_vm5, %v6969_v31, %v15973_v48  ;;  %v1559_v16 = vsel %vm896_vm13, %v6993_v0, %v6913_v12  ;;  %v1560_v10 = vsel %vm896_vm13, %v6994_v55, %v6914_v11  ;;  %v7004_v48 = vunpack.i.h.bf16 %v7002_v30 }
 0x2b8   : > { %v7003_v61 = vunpack.i.l.bf16 %v7002_v30  ;;  %v10073_v5 = vpack.c.bf16 %v1548_v29, %v1547_v7  ;;  %v6964_v6 = vunpack.i.h.bf16 %v9934_v18  ;;  %v6984_v25 = vunpack.i.h.bf16 %v10028_v50 }
 0x2b9   : > { %1835 = vmatpush1.bf16.msra.mxu0 %v10066_v36  ;;  %v10078_v2 = vpack.c.bf16 %v1560_v10, %v1559_v16  ;;  %v10081_v22 = vpack.c.bf16 %v9992_v1, %v1593_v35  ;;  %v6963_v12 = vunpack.i.l.bf16 %v9934_v18  ;;  %v1600_v21 = vsel %vm935_vm6, %v7004_v48, %v6959_v54 }
 0x2ba   : > { %15974 = vst [vmem:[#allocation79_spill] sm:$0xff] %v10073_v5  ;;  %1836 = vmatprep.subr.bf16.mxu0 %v10034_v23  ;;  %v1599_v11 = vsel %vm935_vm6, %v7003_v61, %v6958_v13  ;;  %v10089_v55 = vpack.c.bf16 %v1646_v40, %v1645_v17  ;;  %v6989_v50 = vunpack.i.h.bf16 %v10004_v53  ;;  %v6988_v0 = vunpack.i.l.bf16 %v10004_v53  ;;  %v7012_v18 = vpop.permute.xlu0 %7011  ;;  %v7007_v35 = vpop.permute.xlu1 %7006 }
 0x2bb   : > { %15975 = vst [vmem:[#allocation80_spill] sm:$0xff] %v10081_v22  ;;  %v1649_v1 = vsel %vm948_vm5, %v6983_v27, %v6968_v60  ;;  %1920 = vmatprep.subr.bf16.mxu1 %v10078_v2  ;;  %v10096_v7 = vpack.c.bf16 %v1600_v21, %v1599_v11  ;;  %v1603_v29 = vsel %vm935_vm6, %v6963_v12, %v7003_v61  ;;  %v7014_v40 = vunpack.i.h.bf16 %v7012_v18 }
 0x2bc   : > { %15976 = vst [vmem:[#allocation81_spill] sm:$0xff] %v10089_v55  ;;  %v1604_v17 = vsel %vm935_vm6, %v6964_v6, %v7004_v48  ;;  %1921 = vmatpush1.bf16.msra.mxu1 %v10073_v5  ;;  %v7013_v30 = vunpack.i.l.bf16 %v7012_v18  ;;  %v1650_v53 = vsel %vm948_vm5, %v6984_v25, %v6969_v31  ;;  %v6999_v60 = vunpack.i.h.bf16 %v10064_v9 }
 0x2bd   : > { %15977 = vst [vmem:[#allocation82_spill] sm:$0xff] %v10096_v7  ;;  %v6998_v16 = vunpack.i.l.bf16 %v10064_v9  ;;  %1922 = vmatprep.subr.bf16.mxu1 %v10045_v41  ;;  %1837 = vmatpush1.bf16.msra.mxu0 %v10047_v43  ;;  %v1653_v10 = vsel %vm948_vm5, %v6988_v0, %v6983_v27  ;;  %v1596_v61 = vsel %vm935_vm6, %v6959_v54, %v7014_v40  ;;  %v7009_v11 = vunpack.i.h.bf16 %v7007_v35 }
 0x2be   : > { %v1595_v48 = vsel %vm935_vm6, %v6958_v13, %v7013_v30  ;;  %1838 = vmatprep.subr.bf16.mxu0 %v10096_v7  ;;  %v1607_v31 = vsel %vm935_vm6, %v7013_v30, %v6963_v12  ;;  %v1608_v9 = vsel %vm935_vm6, %v7014_v40, %v6964_v6  ;;  %v7027_v21 = vpop.permute.xlu0 %7026  ;;  %v7017_v18 = vpop.permute.xlu1 %7016  ;;  %v10120_v43 = vpack.c.bf16 %v1604_v17, %v1603_v29 }
 0x2bf   : > { %v10122_v27 = vpack.c.bf16 %v1608_v9, %v1607_v31  ;;  %v1654_v13 = vsel %vm948_vm5, %v6989_v50, %v6984_v25  ;;  %v7008_v41 = vunpack.i.l.bf16 %v7007_v35  ;;  %v7019_v54 = vunpack.i.h.bf16 %v7017_v18 }
 0x2c0   : > { %15978 = vst [vmem:[#allocation83_spill] sm:$0xff] %v10120_v43  ;;  %1923 = vmatpush1.bf16.msra.mxu1 %v10081_v22  ;;  %v7018_v7 = vunpack.i.l.bf16 %v7017_v18  ;;  %v10127_v5 = vpack.c.bf16 %v1596_v61, %v1595_v48  ;;  %v15981_v12 = vunpack.i.l.bf16 %v9971_v33  ;;  %v15982_v29 = vunpack.i.h.bf16 %v9971_v33 }
 0x2c1   : > { %15979 = vst [vmem:[#allocation84_spill] sm:$0xff] %v10122_v27  ;;  %1839 = vmatpush1.bf16.msra.mxu0 %v10120_v43  ;;  %1924 = vmatprep.subr.bf16.mxu1 %v10122_v27  ;;  %v1652_v35 = vsel %vm948_vm5, %v7009_v11, %v7019_v54  ;;  %v1648_v33 = vsel %vm948_vm5, %v7019_v54, %v6999_v60 }
 0x2c2   : > { %15980 = vst [vmem:[#allocation85_spill] sm:$0xff] %v10127_v5  ;;  %v1641_v6 = vsel %vm948_vm5, %v15981_v12, %v6988_v0  ;;  %v1642_v17 = vsel %vm948_vm5, %v15982_v29, %v6989_v50  ;;  %v1651_v25 = vsel %vm948_vm5, %v7008_v41, %v7018_v7  ;;  %1840 = vmatprep.subr.bf16.mxu0 %v10089_v55  ;;  %v7037_v40 = vpop.permute.xlu0 %7036  ;;  %v7022_v50 = vpop.permute.xlu1 %7021  ;;  %v7029_v29 = vunpack.i.h.bf16 %v7027_v21 }
 0x2c3   : > { %v1647_v0 = vsel %vm948_vm5, %v7018_v7, %v6998_v16  ;;  %v10148_v30 = vpack.c.bf16 %v1654_v13, %v1653_v10  ;;  %v10150_v48 = vpack.c.bf16 %v1650_v53, %v1649_v1  ;;  %v7039_v31 = vunpack.i.h.bf16 %v7037_v40 }
 0x2c4   : > { %v10152_v61 = vpack.c.bf16 %v1648_v33, %v1647_v0  ;;  %1925 = vmatpush1.bf16.msra.mxu1 %v10127_v5  ;;  %v7038_v9 = vunpack.i.l.bf16 %v7037_v40  ;;  %v7024_v18 = vunpack.i.h.bf16 %v7022_v50  ;;  %v7023_v12 = vunpack.i.l.bf16 %v7022_v50 }
 0x2c5   : > { %15983 = vst [vmem:[#allocation86_spill] sm:$0xff] %v10148_v30  ;;  %15984 = vst [vmem:[#allocation87_spill] sm:$0xff] %v10150_v48  ;;  %v7028_v55 = vunpack.i.l.bf16 %v7027_v21  ;;  %1926 = vmatprep.subr.bf16.mxu1 %v10148_v30  ;;  %1841 = vmatpush1.bf16.msra.mxu0 %v10150_v48  ;;  %v10157_v7 = vpack.c.bf16 %v1642_v17, %v1641_v6  ;;  %v10159_v10 = vpack.c.bf16 %v1652_v35, %v1651_v25 }
 0x2c6   : > { %15985 = vst [vmem:[#allocation88_spill] sm:$0xff] %v10152_v61  ;;  %v1643_v1 = vsel %vm948_vm5, %v6998_v16, %v7038_v9  ;;  %v1644_v53 = vsel %vm948_vm5, %v6999_v60, %v7039_v31  ;;  %1842 = vmatprep.subr.bf16.mxu0 %v10152_v61  ;;  %v1655_v13 = vsel %vm948_vm5, %v7038_v9, %v7008_v41  ;;  %v7042_v54 = vpop.permute.xlu0 %7041  ;;  %v7032_v0 = vpop.permute.xlu1 %7031 }
 0x2c7   : > { %15986 = vst [vmem:[#allocation89_spill] sm:$0xff] %v10157_v7  ;;  %15987 = vst [vmem:[#allocation90_spill] sm:$0xff] %v10159_v10  ;;  %v1656_v21 = vsel %vm948_vm5, %v7039_v31, %v7009_v11  ;;  %v1693_v17 = vsel %vm961_vm15, %v7023_v12, %v7028_v55  ;;  %v1694_v16 = vsel %vm961_vm15, %v7024_v18, %v7029_v29  ;;  %v7044_v60 = vunpack.i.h.bf16 %v7042_v54  ;;  %v8751_v11 = vld [vmem:[%s15937_s24] ss:$12 sps:$4 sm:$0xff]  }
 0x2c8   : > { %v10170_v6 = vpack.c.bf16 %v1656_v21, %v1655_v13  ;;  %v10176_v25 = vpack.c.bf16 %v1644_v53, %v1643_v1  ;;  %1927 = vmatpush1.bf16.msra.mxu1 %v10157_v7  ;;  %v7043_v35 = vunpack.i.l.bf16 %v7042_v54  ;;  %v7034_v41 = vunpack.i.h.bf16 %v7032_v0 }
 0x2c9   : > { %v7033_v33 = vunpack.i.l.bf16 %v7032_v0  ;;  %1843 = vmatpush1.bf16.msra.mxu0 %v10159_v10  ;;  %v10184_v40 = vpack.c.bf16 %v1694_v16, %v1693_v17  ;;  %v1690_v31 = vsel %vm961_vm15, %v7029_v29, %v7044_v60 }
 0x2ca   : > { %15988 = vst [vmem:[#allocation91_spill] sm:$0xff] %v10170_v6  ;;  %15989 = vst [vmem:[#allocation92_spill] sm:$0xff] %v10176_v25  ;;  %1928 = vmatprep.subr.bf16.mxu1 %v10170_v6  ;;  %v1689_v50 = vsel %vm961_vm15, %v7028_v55, %v7043_v35  ;;  %v1698_v1 = vsel %vm961_vm15, %v7034_v41, %v7024_v18  ;;  %v7047_v53 = vpop.permute.xlu0 %7046  ;;  %v7052_v13 = vpop.permute.xlu1 %7051  ;;  %v1702_v55 = vsel %vm961_vm15, %v7044_v60, %v7034_v41 }
 0x2cb   : > { %15990 = vst [vmem:[#allocation93_spill] sm:$0xff] %v10184_v40  ;;  %v1697_v9 = vsel %vm961_vm15, %v7033_v33, %v7023_v12  ;;  %1855 = vmatprep.subr.bf16.mxu0 %v10184_v40  ;;  %v1701_v54 = vsel %vm961_vm15, %v7043_v35, %v7033_v33  ;;  %v10201_v0 = vpack.c.bf16 %v1690_v31, %v1689_v50  ;;  %v7049_v12 = vunpack.i.h.bf16 %v7047_v53 }
 0x2cc   : > { %v10195_v21 = vpack.c.bf16 %v1698_v1, %v1697_v9  ;;  %1929 = vmatpush1.bf16.msra.mxu1 %v10176_v25  ;;  %v7048_v29 = vunpack.i.l.bf16 %v7047_v53  ;;  %v7054_v17 = vunpack.i.h.bf16 %v7052_v13  ;;  %v7053_v18 = vunpack.i.l.bf16 %v7052_v13  ;;  %1845 = vmatmul.mubr.bf16.vlgmr.msra.gmra.mrb[8].mxu0 %v8751_v11 }
 0x2cd   : > { %15992 = vst [vmem:[#allocation95_spill] sm:$0xff] %v10201_v0  ;;  %v10205_v16 = vpack.c.bf16 %v1702_v55, %v1701_v54  ;;  %v15994_v9 = vmov 0  }
 0x2ce   : > { %15991 = vst [vmem:[#allocation94_spill] sm:$0xff] %v10195_v21  ;;  %1856 = vmatpush1.bf16.msra.mxu0 %v10195_v21  ;;  %1887 = vmatprep.mubr.bf16.mxu0 %v15994_v9  ;;  %v1695_v35 = vsel %vm961_vm15, %v7053_v18, %v7048_v29  ;;  %v1696_v60 = vsel %vm961_vm15, %v7054_v17, %v7049_v12  ;;  %v7062_v41 = vpop.permute.xlu0 %7061  ;;  %v7057_v33 = vpop.permute.xlu1 %7056 }
 0x2cf   : > { %15993 = vst [vmem:[#allocation96_spill] sm:$0xff] %v10205_v16  ;;  %1931 = vmatmul.mubr.bf16.vlgmr.msra.gmra.mrb[8].mxu1 %v8751_v11  ;;  %1941 = vmatprep.subr.bf16.mxu1 %v10205_v16  ;;  %v10213_v50 = vpack.c.bf16 %v1696_v60, %v1695_v35  ;;  %v7064_v31 = vunpack.i.h.bf16 %v7062_v41  ;;  %v7063_v1 = vunpack.i.l.bf16 %v7062_v41  ;;  %v7059_v53 = vunpack.i.h.bf16 %v7057_v33 }
 0x2d0   : > { %1942 = vmatpush1.bf16.msra.mxu1 %v10201_v0  ;;  %v7058_v13 = vunpack.i.l.bf16 %v7057_v33  ;;  %1973 = vmatprep.mubr.bf16.mxu1 %v15994_v9 }
 0x2d1   : > { %15995 = vst [vmem:[#allocation97_spill] sm:$0xff] %v10213_v50  ;;  %1857 = vmatprep.subr.bf16.mxu0 %v10213_v50  ;;  %v1691_v54 = vsel %vm961_vm15, %v7048_v29, %v7063_v1  ;;  %v1692_v11 = vsel %vm961_vm15, %v7049_v12, %v7064_v31  ;;  %v1700_v35 = vsel %vm961_vm15, %v7059_v53, %v7054_v17  ;;  %v8754_v12 = vld [vmem:[%s15937_s24 + $0x8] ss:$12 sps:$4 sm:$0xff]   ;;  %s16006_s24 = sld [smem:[#allocation161_spill]] }
 0x2d2   : > { %v1699_v55 = vsel %vm961_vm15, %v7058_v13, %v7053_v18  ;;  %v1703_v41 = vsel %vm961_vm15, %v7063_v1, %v7058_v13  ;;  %v1704_v33 = vsel %vm961_vm15, %v7064_v31, %v7059_v53  ;;  %v10232_v0 = vpack.c.bf16 %v1692_v11, %v1691_v54 }
 0x2d3   : > { %v10226_v60 = vpack.c.bf16 %v1700_v35, %v1699_v55  ;;  %v10234_v29 = vpack.c.bf16 %v1704_v33, %v1703_v41 }
 0x2d4   : > { %15997 = vst [vmem:[#allocation99_spill] sm:$0xff] %v10232_v0 }
 0x2d5   : > { %15996 = vst [vmem:[#allocation98_spill] sm:$0xff] %v10226_v60  ;;  %15998 = vst [vmem:[#allocation100_spill] sm:$0xff] %v10234_v29  ;;  %1858 = vmatpush1.bf16.msra.mxu0 %v10226_v60  ;;  %1943 = vmatprep.subr.bf16.mxu1 %v10234_v29 }
 0x2d6   : > { %1944 = vmatpush1.bf16.msra.mxu1 %v10232_v0 }
 0x2d8   : > { %6347 = vmatmul.mubr.msk.bf16.vlgmr.msra.gmra.mrb[8].mxu0 %vm1808_vm0, %v8754_v12 }
 0x2db   : > { %6348 = vmatmul.mubr.msk.bf16.vlgmr.msra.gmra.mrb[8].mxu1 %vm1808_vm0, %v8754_v12 }
 0x2df   : > { %v1786_v17 = vpop.permute.xlu1 %1785  ;;  %v1791_v53 = vpop.permute.xlu0 %1790 }
 0x3ab   : > { %v1889_v18 = vpop.f32.mrb[8].mxu0 }
 0x3ac   : > { %v6406_v31 = vadd.f32 %v1889_v18, %v1786_v17  ;;  %v1891_v1 = vpop.f32.mrb[9].mxu0 }
 0x3ad   : > { %v6407_v13 = vadd.f32 %v1891_v1, %v1786_v17  ;;  %v1893_v54 = vpop.f32.mrb[10].mxu0 }
 0x3ae   : > { %v1984_v11 = vmax.f32 %v6406_v31, 0.0  ;;  %v1975_v55 = vpop.f32.mrb[8].mxu1  ;;  %v6408_v35 = vadd.f32 %v1893_v54, %v1791_v53  ;;  %v1895_v41 = vpop.f32.mrb[11].mxu0 }
 0x3af   : > { %v1985_v33 = vmax.f32 %v6407_v13, 0.0  ;;  %v6410_v60 = vadd.f32 %v1975_v55, %v1786_v17  ;;  %v1977_v29 = vpop.f32.mrb[9].mxu1  ;;  %v6409_v50 = vadd.f32 %v1895_v41, %v1791_v53 }
 0x3b0   : > { %v1988_v0 = vmax.f32 %v6408_v35, 0.0  ;;  %v6411_v9 = vadd.f32 %v1977_v29, %v1786_v17  ;;  %v1979_v21 = vpop.f32.mrb[10].mxu1  ;;  %v1992_v18 = vmul.f32 %v1984_v11, %v9419_v32  ;;  %v15999_v35 = vld [vmem:[#allocation46_spill] sm:$0xff] }
 0x3b1   : > { %v1986_v16 = vmax.f32 %v6410_v60, 0.0  ;;  %v1989_v12 = vmax.f32 %v6409_v50, 0.0  ;;  %v6412_v25 = vadd.f32 %v1979_v21, %v1791_v53  ;;  %v1981_v40 = vpop.f32.mrb[11].mxu1  ;;  %v1993_v54 = vmul.f32 %v1985_v33, %v9443_v49  ;;  %v2523_v33 = vld [vmem:[%s16007_s8] sm:$0xff] }
 0x3b2   : > { %v1996_v1 = vmul.f32 %v1988_v0, %v9419_v32  ;;  %v1987_v10 = vmax.f32 %v6411_v9, 0.0  ;;  %v6413_v31 = vadd.f32 %v1981_v40, %v1791_v53  ;;  %v8755_v53 = vld [vmem:[%s16006_s24 + $0x4] ss:$8 sps:$4 sm:$0xff]  }
 0x3b3   : > { %v1994_v13 = vmul.f32 %v1986_v16, %v9421_v34  ;;  %v1997_v55 = vmul.f32 %v1989_v12, %v9443_v49  ;;  %v1990_v41 = vmax.f32 %v6412_v25, 0.0  ;;  %6351 = vmatprep.mubr.msk.bf16.mxu0 %vm15672_vm10, %v8755_v53  ;;  %6352 = vmatprep.mubr.msk.bf16.mxu1 %vm15672_vm10, %v8755_v53  ;;  %v2524_v12 = vld [vmem:[%s16007_s8 + $0x8] sm:$0xff]  ;;  %s16287_s8 = smov 126  }
 0x3b4   : > { %v1995_v29 = vmul.f32 %v1987_v10, %v15999_v35  ;;  %v1991_v17 = vmax.f32 %v6413_v31, 0.0  ;;  %v7065_v60 = vpack.i.bf16 %v1996_v1, %v1992_v18  ;;  %v10260_v16 = vpack.c.bf16 %v1996_v1, %v1992_v18  ;;  %v2567_v18 = vld [vmem:[%s16008_s10] sm:$0xff]  ;;  %v2568_v1 = vld [vmem:[%s16008_s10 + $0x8] sm:$0xff]  ;;  %v2569_v31 = vld [vmem:[%s16008_s10 + $0x10] sm:$0xff] }
 0x3b5   : > { %v1998_v21 = vmul.f32 %v1990_v41, %v9421_v34  ;;  %v7135_v50 = vpack.i.bf16 %v1997_v55, %v1993_v54  ;;  %v10256_v25 = vpack.c.bf16 %v1997_v55, %v1993_v54  ;;  %v2570_v54 = vld [vmem:[%s16008_s10 + $0x18] sm:$0xff]  ;;  %s16291_s10 = smov 106  }
 0x3b6   : > { %v1999_v11 = vmul.f32 %v1991_v17, %v15999_v35  ;;  %7066 = vrot.lane.b32.xlu1 %v7065_v60, %s16000_s5  ;;  %16004 = vst [vmem:[#allocation103_spill] sm:$0xff] %v10260_v16 }
 0x3b7   : > { %v7105_v0 = vpack.i.bf16 %v1998_v21, %v1994_v13  ;;  %16002 = vst [vmem:[#allocation101_spill] sm:$0xff] %v10256_v25  ;;  %v10262_v9 = vpack.c.bf16 %v1998_v21, %v1994_v13 }
 0x3b8   : > { %v7140_v40 = vpack.i.bf16 %v1999_v11, %v1995_v29  ;;  %v10258_v10 = vpack.c.bf16 %v1999_v11, %v1995_v29 }
 0x3b9   : > { %7106 = vrot.lane.b32.xlu0 %v7105_v0, %s16001_s7  ;;  %16005 = vst [vmem:[#allocation104_spill] sm:$0xff] %v10262_v9 }
 0x3ba   : > { %7071 = vrot.lane.b32.xlu1 %v7105_v0, %s16000_s5  ;;  %16003 = vst [vmem:[#allocation102_spill] sm:$0xff] %v10258_v10 }
 0x3bd   : > { %7116 = vrot.lane.b32.xlu0 %v7105_v0, %s15922_s2 }
 0x3be   : > { %7076 = vrot.lane.b32.xlu1 %v7065_v60, %s15925_s6 }
 0x3c1   : > { %7126 = vrot.lane.b32.xlu0 %v7105_v0, %s15936_s3 }
 0x3c2   : > { %7081 = vrot.lane.b32.xlu1 %v7105_v0, %s15925_s6 }
 0x3c5   : > { %7136 = vrot.lane.b32.xlu0 %v7135_v50, %s16000_s5 }
 0x3c6   : > { %7086 = vrot.lane.b32.xlu1 %v7065_v60, %s15926_s27 }
 0x3c9   : > { %7141 = vrot.lane.b32.xlu0 %v7140_v40, %s16000_s5 }
 0x3ca   : > { %7091 = vrot.lane.b32.xlu1 %v7105_v0, %s15926_s27 }
 0x3cd   : > { %7146 = vrot.lane.b32.xlu0 %v7135_v50, %s15925_s6 }
 0x3ce   : > { %7096 = vrot.lane.b32.xlu1 %v7065_v60, %s15927_s28 }
 0x3d1   : > { %7151 = vrot.lane.b32.xlu0 %v7140_v40, %s15925_s6 }
 0x3d2   : > { %7101 = vrot.lane.b32.xlu1 %v7105_v0, %s15927_s28 }
 0x3d5   : > { %7156 = vrot.lane.b32.xlu0 %v7135_v50, %s15926_s27 }
 0x3d6   : > { %7111 = vrot.lane.b32.xlu1 %v7065_v60, %s16001_s7 }
 0x3d9   : > { %7161 = vrot.lane.b32.xlu0 %v7140_v40, %s15926_s27 }
 0x3da   : > { %7121 = vrot.lane.b32.xlu1 %v7065_v60, %s15922_s2 }
 0x3dd   : > { %7166 = vrot.lane.b32.xlu0 %v7135_v50, %s15927_s28 }
 0x3de   : > { %7131 = vrot.lane.b32.xlu1 %v7065_v60, %s15936_s3 }
 0x3e1   : > { %7171 = vrot.lane.b32.xlu0 %v7140_v40, %s15927_s28 }
 0x3e2   : > { %7181 = vrot.lane.b32.xlu1 %v7135_v50, %s16001_s7 }
 0x3e5   : > { %7176 = vrot.lane.b32.xlu0 %v7105_v0, %s15938_s0 }
 0x3e6   : > { %7191 = vrot.lane.b32.xlu1 %v7135_v50, %s15922_s2 }
 0x3e9   : > { %7186 = vrot.lane.b32.xlu0 %v7140_v40, %s16001_s7 }
 0x3ea   : > { %7201 = vrot.lane.b32.xlu1 %v7135_v50, %s15936_s3 }
 0x3ed   : > { %7196 = vrot.lane.b32.xlu0 %v7140_v40, %s15922_s2 }
 0x3ee   : > { %7211 = vrot.lane.b32.xlu1 %v7135_v50, %s15938_s0 }
 0x3f1   : > { %7206 = vrot.lane.b32.xlu0 %v7140_v40, %s15936_s3 }
 0x3f2   : > { %7216 = vrot.lane.b32.xlu1 %v7065_v60, %s15938_s0 }
 0x3f5   : > { %7221 = vrot.lane.b32.xlu0 %v7140_v40, %s15938_s0 }
 0x3f6   : > { %2527 = vperm.xlu1 %6744, %v2523_v33  }
 0x3f9   : > { %2532 = vperm.xlu0 %6743, %v2524_v12  }
 0x3fa   : > { %2573 = vperm.xlu1 %6744, %v2567_v18  }
 0x3fd   : > { %2578 = vperm.xlu0 %6743, %v2568_v1  }
 0x3fe   : > { %2583 = vperm.xlu1 %6744, %v2569_v31  }
 0x401   : > { %2588 = vperm.xlu0 %6743, %v2570_v54  }
 0x428   : > { %v7067_v13 = vpop.permute.xlu1 %7066 }
 0x429   : > { %v7069_v11 = vunpack.i.h.bf16 %v7067_v13  ;;  %v7068_v0 = vunpack.i.l.bf16 %v7067_v13 }
 0x42b   : > { %v10315_v55 = vpop.permute.xlu0 %7106 }
 0x42c   : > { %v7072_v41 = vpop.permute.xlu1 %7071 }
 0x42d   : > { %v7074_v1 = vunpack.i.h.bf16 %v7072_v41  ;;  %v7073_v31 = vunpack.i.l.bf16 %v7072_v41 }
 0x42f   : > { %v10317_v29 = vpop.permute.xlu0 %7116 }
 0x430   : > { %v7077_v17 = vpop.permute.xlu1 %7076 }
 0x431   : > { %v7078_v48 = vunpack.i.l.bf16 %v7077_v17 }
 0x433   : > { %v10319_v60 = vpop.permute.xlu0 %7126 }
 0x434   : > { %v7082_v21 = vpop.permute.xlu1 %7081 }
 0x437   : > { %v7137_v50 = vpop.permute.xlu0 %7136 }
 0x438   : > { %v7139_v40 = vunpack.i.h.bf16 %v7137_v50  ;;  %v7138_v53 = vunpack.i.l.bf16 %v7137_v50  ;;  %v10321_v33 = vpop.permute.xlu1 %7086 }
 0x43a   : > { %v2024_v12 = vsel %vm818_vm7, %v7068_v0, %v7138_v53  ;;  %v2025_v18 = vsel %vm818_vm7, %v7069_v11, %v7139_v40  ;;  %v2022_v13 = vsel %vm818_vm7, %v7138_v53, %v7073_v31  ;;  %v2023_v50 = vsel %vm818_vm7, %v7139_v40, %v7074_v1 }
 0x43b   : > { %v7142_v54 = vpop.permute.xlu0 %7141  ;;  %v2197_v35 = vpack.c.bf16 %v2025_v18, %v2024_v12  ;;  %v7079_v18 = vunpack.i.h.bf16 %v7077_v17  ;;  %v2198_v5 = vpack.c.bf16 %v2023_v50, %v2022_v13 }
 0x43c   : > { %v7144_v34 = vunpack.i.h.bf16 %v7142_v54  ;;  %v7143_v49 = vunpack.i.l.bf16 %v7142_v54  ;;  %v10327_v32 = vpop.permute.xlu1 %7091 }
 0x43d   : > { %2247 = vmatprep.subr.bf16.mxu0 %v2197_v35 }
 0x43e   : > { %v2026_v6 = vsel %vm818_vm7, %v7143_v49, %v7068_v0  ;;  %v2027_v7 = vsel %vm818_vm7, %v7144_v34, %v7069_v11  ;;  %v2020_v41 = vsel %vm818_vm7, %v7073_v31, %v7143_v49  ;;  %v2021_v12 = vsel %vm818_vm7, %v7074_v1, %v7144_v34 }
 0x43f   : > { %v7147_v54 = vpop.permute.xlu0 %7146  ;;  %v2196_v61 = vpack.c.bf16 %v2027_v7, %v2026_v6  ;;  %v2199_v53 = vpack.c.bf16 %v2021_v12, %v2020_v41  ;;  %v7084_v34 = vunpack.i.h.bf16 %v7082_v21  ;;  %v7083_v0 = vunpack.i.l.bf16 %v7082_v21 }
 0x440   : > { %v7149_v30 = vunpack.i.h.bf16 %v7147_v54  ;;  %v7148_v40 = vunpack.i.l.bf16 %v7147_v54  ;;  %v10341_v35 = vpop.permute.xlu1 %7096  ;;  %v7089_v12 = vunpack.i.h.bf16 %v10321_v33 }
 0x441   : > { %2248 = vmatpush1.bf16.msra.mxu0 %v2196_v61  ;;  %2290 = vmatprep.subr.bf16.mxu1 %v2199_v53 }
 0x442   : > { %2291 = vmatpush1.bf16.msra.mxu1 %v2198_v5  ;;  %v2048_v11 = vsel %vm831_vm8, %v7078_v48, %v7148_v40  ;;  %v2049_v49 = vsel %vm831_vm8, %v7079_v18, %v7149_v30  ;;  %v2046_v13 = vsel %vm831_vm8, %v7148_v40, %v7083_v0  ;;  %v2047_v5 = vsel %vm831_vm8, %v7149_v30, %v7084_v34 }
 0x443   : > { %v7152_v1 = vpop.permute.xlu0 %7151  ;;  %v2201_v7 = vpack.c.bf16 %v2049_v49, %v2048_v11  ;;  %v7088_v30 = vunpack.i.l.bf16 %v10321_v33 }
 0x444   : > { %v7154_v6 = vunpack.i.h.bf16 %v7152_v1  ;;  %v7153_v17 = vunpack.i.l.bf16 %v7152_v1  ;;  %v10347_v31 = vpop.permute.xlu1 %7101 }
 0x445   : > { %2249 = vmatprep.subr.bf16.mxu0 %v2201_v7  ;;  %v7093_v7 = vunpack.i.l.bf16 %v10327_v32 }
 0x446   : > { %v2050_v61 = vsel %vm831_vm8, %v7153_v17, %v7078_v48  ;;  %v2051_v50 = vsel %vm831_vm8, %v7154_v6, %v7079_v18  ;;  %v2044_v21 = vsel %vm831_vm8, %v7083_v0, %v7153_v17  ;;  %v2045_v41 = vsel %vm831_vm8, %v7084_v34, %v7154_v6 }
 0x447   : > { %v7157_v54 = vpop.permute.xlu0 %7156  ;;  %v2200_v53 = vpack.c.bf16 %v2051_v50, %v2050_v61  ;;  %v2203_v40 = vpack.c.bf16 %v2045_v41, %v2044_v21  ;;  %v2202_v48 = vpack.c.bf16 %v2047_v5, %v2046_v13  ;;  %v7094_v0 = vunpack.i.h.bf16 %v10327_v32 }
 0x448   : > { %v7159_v11 = vunpack.i.h.bf16 %v7157_v54  ;;  %v7158_v49 = vunpack.i.l.bf16 %v7157_v54  ;;  %v10363_v1 = vpop.permute.xlu1 %7111 }
 0x449   : > { %2250 = vmatpush1.bf16.msra.mxu0 %v2200_v53  ;;  %2292 = vmatprep.subr.bf16.mxu1 %v2203_v40  ;;  %v7099_v53 = vunpack.i.h.bf16 %v10341_v35 }
 0x44a   : > { %2293 = vmatpush1.bf16.msra.mxu1 %v2202_v48  ;;  %v2072_v18 = vsel %vm844_vm9, %v7088_v30, %v7158_v49  ;;  %v2073_v34 = vsel %vm844_vm9, %v7089_v12, %v7159_v11  ;;  %v2070_v13 = vsel %vm844_vm9, %v7158_v49, %v7093_v7  ;;  %v2071_v5 = vsel %vm844_vm9, %v7159_v11, %v7094_v0 }
 0x44b   : > { %v7162_v6 = vpop.permute.xlu0 %7161  ;;  %v2205_v33 = vpack.c.bf16 %v2073_v34, %v2072_v18  ;;  %v7098_v11 = vunpack.i.l.bf16 %v10341_v35  ;;  %v7109_v35 = vunpack.i.h.bf16 %v10315_v55 }
 0x44c   : > { %v7164_v17 = vunpack.i.h.bf16 %v7162_v6  ;;  %v7163_v61 = vunpack.i.l.bf16 %v7162_v6  ;;  %v10371_v50 = vpop.permute.xlu1 %7121 }
 0x44d   : > { %2251 = vmatprep.subr.bf16.mxu0 %v2205_v33 }
 0x44e   : > { %v2074_v21 = vsel %vm844_vm9, %v7163_v61, %v7088_v30  ;;  %v2075_v41 = vsel %vm844_vm9, %v7164_v17, %v7089_v12  ;;  %v2068_v32 = vsel %vm844_vm9, %v7093_v7, %v7163_v61  ;;  %v2069_v54 = vsel %vm844_vm9, %v7094_v0, %v7164_v17 }
 0x44f   : > { %v7167_v40 = vpop.permute.xlu0 %7166  ;;  %v2204_v49 = vpack.c.bf16 %v2075_v41, %v2074_v21  ;;  %v2207_v48 = vpack.c.bf16 %v2069_v54, %v2068_v32  ;;  %v2206_v30 = vpack.c.bf16 %v2071_v5, %v2070_v13  ;;  %v7104_v12 = vunpack.i.h.bf16 %v10347_v31 }
 0x450   : > { %v7169_v18 = vunpack.i.h.bf16 %v7167_v40  ;;  %v7168_v34 = vunpack.i.l.bf16 %v7167_v40  ;;  %v10387_v6 = vpop.permute.xlu1 %7131  ;;  %v7103_v7 = vunpack.i.l.bf16 %v10347_v31  ;;  %v7108_v17 = vunpack.i.l.bf16 %v10315_v55 }
 0x451   : > { %2252 = vmatpush1.bf16.msra.mxu0 %v2204_v49  ;;  %2294 = vmatprep.subr.bf16.mxu1 %v2207_v48  ;;  %v7114_v54 = vunpack.i.h.bf16 %v10363_v1  ;;  %v7113_v40 = vunpack.i.l.bf16 %v10363_v1 }
 0x452   : > { %2295 = vmatpush1.bf16.msra.mxu1 %v2206_v30  ;;  %v2096_v0 = vsel %vm883_vm11, %v7098_v11, %v7168_v34  ;;  %v2097_v33 = vsel %vm883_vm11, %v7099_v53, %v7169_v18  ;;  %v2094_v13 = vsel %vm883_vm11, %v7168_v34, %v7103_v7  ;;  %v2095_v5 = vsel %vm883_vm11, %v7169_v18, %v7104_v12 }
 0x453   : > { %v7172_v61 = vpop.permute.xlu0 %7171  ;;  %v2209_v21 = vpack.c.bf16 %v2097_v33, %v2096_v0  ;;  %v2210_v1 = vpack.c.bf16 %v2095_v5, %v2094_v13 }
 0x454   : > { %v7174_v31 = vunpack.i.h.bf16 %v7172_v61  ;;  %v7173_v41 = vunpack.i.l.bf16 %v7172_v61  ;;  %v7182_v32 = vpop.permute.xlu1 %7181 }
 0x455   : > { %2253 = vmatprep.subr.bf16.mxu0 %v2209_v21  ;;  %v7184_v49 = vunpack.i.h.bf16 %v7182_v32  ;;  %v7183_v48 = vunpack.i.l.bf16 %v7182_v32 }
 0x456   : > { %v2098_v55 = vsel %vm883_vm11, %v7173_v41, %v7098_v11  ;;  %v2099_v30 = vsel %vm883_vm11, %v7174_v31, %v7099_v53  ;;  %v2092_v34 = vsel %vm883_vm11, %v7103_v7, %v7173_v41  ;;  %v2093_v18 = vsel %vm883_vm11, %v7104_v12, %v7174_v31 }
 0x457   : > { %v10411_v0 = vpop.permute.xlu0 %7176  ;;  %v2208_v33 = vpack.c.bf16 %v2099_v30, %v2098_v55  ;;  %v2211_v61 = vpack.c.bf16 %v2093_v18, %v2092_v34  ;;  %v2120_v21 = vsel %vm896_vm13, %v7113_v40, %v7183_v48  ;;  %v2121_v11 = vsel %vm896_vm13, %v7114_v54, %v7184_v49 }
 0x458   : > { %v7192_v32 = vpop.permute.xlu1 %7191  ;;  %v2118_v53 = vsel %vm896_vm13, %v7183_v48, %v7108_v17  ;;  %v2119_v7 = vsel %vm896_vm13, %v7184_v49, %v7109_v35  ;;  %v7119_v12 = vunpack.i.h.bf16 %v10317_v29  ;;  %v7118_v31 = vunpack.i.l.bf16 %v10317_v29 }
 0x459   : > { %2254 = vmatpush1.bf16.msra.mxu0 %v2208_v33  ;;  %2296 = vmatprep.subr.bf16.mxu1 %v2211_v61  ;;  %v7194_v13 = vunpack.i.h.bf16 %v7192_v32  ;;  %v7193_v5 = vunpack.i.l.bf16 %v7192_v32  ;;  %v7124_v30 = vunpack.i.h.bf16 %v10371_v50  ;;  %v7123_v34 = vunpack.i.l.bf16 %v10371_v50 }
 0x45a   : > { %2255 = vmatprep.subr.bf16.mxu0 %v10256_v25  ;;  %2297 = vmatpush1.bf16.msra.mxu1 %v2210_v1  ;;  %v2217_v18 = vpack.c.bf16 %v2119_v7, %v2118_v53  ;;  %v2216_v33 = vpack.c.bf16 %v2121_v11, %v2120_v21  ;;  %v7179_v21 = vunpack.i.h.bf16 %v10411_v0  ;;  %v16010_v25 = vunpack.i.h.bf16 %v10387_v6 }
 0x45b   : > { %v7187_v29 = vpop.permute.xlu0 %7186  ;;  %2298 = vmatprep.subr.bf16.mxu1 %v10258_v10  ;;  %v2142_v55 = vsel %vm935_vm6, %v7193_v5, %v7118_v31  ;;  %v2143_v50 = vsel %vm935_vm6, %v7194_v13, %v7119_v12  ;;  %v2144_v1 = vsel %vm935_vm6, %v7123_v34, %v7193_v5  ;;  %v2145_v49 = vsel %vm935_vm6, %v7124_v30, %v7194_v13 }
 0x45c   : > { %v7189_v61 = vunpack.i.h.bf16 %v7187_v29  ;;  %v7188_v32 = vunpack.i.l.bf16 %v7187_v29  ;;  %v7202_v41 = vpop.permute.xlu1 %7201  ;;  %v16009_v13 = vunpack.i.l.bf16 %v10387_v6  ;;  %v2221_v10 = vpack.c.bf16 %v2143_v50, %v2142_v55 }
 0x45d   : > { %2256 = vmatpush1.bf16.msra.mxu0 %v10260_v16  ;;  %v7204_v48 = vunpack.i.h.bf16 %v7202_v41  ;;  %v7203_v53 = vunpack.i.l.bf16 %v7202_v41 }
 0x45e   : > { %v2117_v11 = vsel %vm896_vm13, %v7109_v35, %v7189_v61  ;;  %v2116_v7 = vsel %vm896_vm13, %v7108_v17, %v7188_v32  ;;  %2257 = vmatprep.subr.bf16.mxu0 %v2217_v18  ;;  %2299 = vmatpush1.bf16.msra.mxu1 %v10262_v9  ;;  %v2122_v5 = vsel %vm896_vm13, %v7188_v32, %v7113_v40 }
 0x45f   : > { %v2168_v29 = vsel %vm948_vm5, %v16009_v13, %v7203_v53  ;;  %v7197_v41 = vpop.permute.xlu0 %7196  ;;  %v2123_v16 = vsel %vm896_vm13, %v7189_v61, %v7114_v54  ;;  %v2218_v35 = vpack.c.bf16 %v2117_v11, %v2116_v7  ;;  %v2169_v17 = vsel %vm948_vm5, %v16010_v25, %v7204_v48 }
 0x460   : > { %v7199_v18 = vunpack.i.h.bf16 %v7197_v41  ;;  %v7198_v9 = vunpack.i.l.bf16 %v7197_v41  ;;  %v2219_v43 = vpack.c.bf16 %v2123_v16, %v2122_v5  ;;  %v7212_v40 = vpop.permute.xlu1 %7211  ;;  %v16011_v13 = vunpack.i.l.bf16 %v10319_v60 }
 0x461   : > { %2258 = vmatpush1.bf16.msra.mxu0 %v2216_v33  ;;  %v7214_v32 = vunpack.i.h.bf16 %v7212_v40  ;;  %v7213_v27 = vunpack.i.l.bf16 %v7212_v40  ;;  %v16012_v54 = vunpack.i.h.bf16 %v10319_v60  ;;  %v7178_v61 = vunpack.i.l.bf16 %v10411_v0 }
 0x462   : > { %v2166_v22 = vsel %vm948_vm5, %v7203_v53, %v16011_v13  ;;  %v2141_v25 = vsel %vm935_vm6, %v7119_v12, %v7199_v18  ;;  %v2140_v16 = vsel %vm935_vm6, %v7118_v31, %v7198_v9  ;;  %2300 = vmatprep.subr.bf16.mxu1 %v2219_v43  ;;  %2259 = vmatprep.subr.bf16.mxu0 %v2221_v10  ;;  %v16016_v60 = vunpack.i.h.bf16 %v10387_v6 }
 0x463   : > { %v2167_v55 = vsel %vm948_vm5, %v7204_v48, %v16012_v54  ;;  %v2146_v33 = vsel %vm935_vm6, %v7198_v9, %v7123_v34  ;;  %2301 = vmatpush1.bf16.msra.mxu1 %v2218_v35  ;;  %v7207_v50 = vpop.permute.xlu0 %7206  ;;  %v2220_v53 = vpack.c.bf16 %v2145_v49, %v2144_v1  ;;  %v2147_v11 = vsel %vm935_vm6, %v7199_v18, %v7124_v30 }
 0x464   : > { %v2222_v48 = vpack.c.bf16 %v2141_v25, %v2140_v16  ;;  %v2224_v7 = vpack.c.bf16 %v2169_v17, %v2168_v29  ;;  %v7209_v0 = vunpack.i.h.bf16 %v7207_v50  ;;  %v7208_v5 = vunpack.i.l.bf16 %v7207_v50  ;;  %v7217_v12 = vpop.permute.xlu1 %7216 }
 0x465   : > { %v2223_v41 = vpack.c.bf16 %v2147_v11, %v2146_v33  ;;  %v2225_v40 = vpack.c.bf16 %v2167_v55, %v2166_v22  ;;  %2260 = vmatpush1.bf16.msra.mxu0 %v2220_v53  ;;  %v7219_v31 = vunpack.i.h.bf16 %v7217_v12  ;;  %v7218_v43 = vunpack.i.l.bf16 %v7217_v12  ;;  %v16022_v12 = vld [vmem:[#allocation60_spill] sm:$0xff] }
 0x466   : > { %v2190_v10 = vsel %vm961_vm15, %v7213_v27, %v7178_v61  ;;  %v2191_v9 = vsel %vm961_vm15, %v7214_v32, %v7179_v21  ;;  %v16013_v34 = vmov %v16012_v54  ;;  %v16014_v49 = vmov %v16011_v13 }
 0x467   : > { %v2165_v30 = vsel %vm948_vm5, %v16013_v34, %v7209_v0  ;;  %v2164_v1 = vsel %vm948_vm5, %v16014_v49, %v7208_v5  ;;  %2302 = vmatprep.subr.bf16.mxu1 %v2223_v41  ;;  %2261 = vmatprep.subr.bf16.mxu0 %v2225_v40  ;;  %v16015_v22 = vunpack.i.l.bf16 %v10387_v6  ;;  %v2192_v35 = vsel %vm961_vm15, %v7218_v43, %v7213_v27  ;;  %v7222_v18 = vpop.permute.xlu0 %7221  ;;  %v16021_v41 = vld [vmem:[#allocation64_spill] sm:$0xff]  ;;  %v16023_v40 = vld [vmem:[#allocation65_spill] sm:$0xff]  ;;  %v16052_v34 = vld [vmem:[#allocation90_spill] sm:$0xff] }
 0x468   : > { %v2193_v17 = vsel %vm961_vm15, %v7219_v31, %v7214_v32  ;;  %2303 = vmatpush1.bf16.msra.mxu1 %v2222_v48  ;;  %v2171_v13 = vsel %vm948_vm5, %v7209_v0, %v16016_v60  ;;  %v2226_v54 = vpack.c.bf16 %v2165_v30, %v2164_v1  ;;  %v7224_v55 = vunpack.i.h.bf16 %v7222_v18  ;;  %v16019_v0 = vld [vmem:[#allocation59_spill] sm:$0xff]  ;;  %v16053_v30 = vld [vmem:[#allocation93_spill] sm:$0xff]  ;;  %v16054_v49 = vld [vmem:[#allocation92_spill] sm:$0xff] }
 0x469   : > { %v2170_v29 = vsel %vm948_vm5, %v7208_v5, %v16015_v22  ;;  %v7223_v25 = vunpack.i.l.bf16 %v7222_v18  ;;  %v2229_v33 = vpack.c.bf16 %v2191_v9, %v2190_v10  ;;  %2262 = vmatpush1.bf16.msra.mxu0 %v2224_v7  ;;  %v2228_v50 = vpack.c.bf16 %v2193_v17, %v2192_v35  ;;  %v8757_v7 = vld [vmem:[%s16006_s24] ss:$8 sps:$4 sm:$0xff]   ;;  %v16055_v1 = vld [vmem:[#allocation96_spill] sm:$0xff]  ;;  %v16059_v17 = vld [vmem:[#allocation95_spill] sm:$0xff] }
 0x46a   : > { %v2227_v16 = vpack.c.bf16 %v2171_v13, %v2170_v29  ;;  %v2189_v32 = vsel %vm961_vm15, %v7179_v21, %v7224_v55  ;;  %v2195_v53 = vsel %vm961_vm15, %v7224_v55, %v7219_v31  ;;  %v8760_v21 = vld [vmem:[%s16017_s30 + $0x4] ss:$12 sps:$4 sm:$0xff]   ;;  %v16020_v5 = vld [vmem:[#allocation58_spill] sm:$0xff]  ;;  %v16057_v29 = vmov 0   ;;  %v16060_v18 = vld [vmem:[#allocation100_spill] sm:$0xff] }
 0x46b   : > { %v2188_v27 = vsel %vm961_vm15, %v7178_v61, %v7223_v25  ;;  %2263 = vmatprep.subr.bf16.mxu0 %v2229_v33  ;;  %v2194_v6 = vsel %vm961_vm15, %v7223_v25, %v7218_v43  ;;  %v16018_v61 = vld [vmem:[#allocation57_spill] sm:$0xff]  ;;  %v16024_v31 = vld [vmem:[#allocation62_spill] sm:$0xff]  ;;  %v16025_v43 = vld [vmem:[#allocation63_spill] sm:$0xff] }
 0x46c   : > { %2304 = vmatprep.subr.bf16.mxu1 %v2227_v16  ;;  %v2230_v11 = vpack.c.bf16 %v2189_v32, %v2188_v27  ;;  %v2231_v48 = vpack.c.bf16 %v2195_v53, %v2194_v6  ;;  %v16026_v10 = vld [vmem:[#allocation66_spill] sm:$0xff]  ;;  %v16027_v9 = vld [vmem:[#allocation61_spill] sm:$0xff]  ;;  %v16062_v13 = vld [vmem:[#allocation99_spill] sm:$0xff] }
 0x46d   : > { %2305 = vmatpush1.bf16.msra.mxu1 %v2226_v54  ;;  %2264 = vmatpush1.bf16.msra.mxu0 %v2228_v50  ;;  %v16056_v22 = vld [vmem:[#allocation94_spill] sm:$0xff]  ;;  %v16058_v35 = vld [vmem:[#allocation97_spill] sm:$0xff]  ;;  %v16066_v55 = vld [vmem:[#allocation104_spill] sm:$0xff] }
 0x46e   : > { %2306 = vmatprep.subr.bf16.mxu1 %v2231_v48  ;;  %2351 = vmatprep.subr.bf16.mxu0 %v16018_v61  ;;  %v16061_v60 = vld [vmem:[#allocation98_spill] sm:$0xff] }
 0x46f   : > { %v8761_v54 = vld [vmem:[%s16017_s30 + $0x8] ss:$12 sps:$4 sm:$0xff]  }
 0x470   : > { %2280 = vmatmul.mubr.bf16.vlgmr.msra.gmra.mrb[12].mxu0 %v8757_v7 }
 0x471   : > { %2307 = vmatpush1.bf16.msra.mxu1 %v2230_v11  ;;  %2352 = vmatpush1.bf16.msra.mxu0 %v16020_v5 }
 0x472   : > { %2437 = vmatprep.subr.bf16.mxu1 %v16019_v0  ;;  %2383 = vmatprep.mubr.bf16.mxu0 %v8760_v21 }
 0x473   : > { %2353 = vmatprep.subr.bf16.mxu0 %v16021_v41 }
 0x474   : > { %2323 = vmatmul.mubr.bf16.vlgmr.msra.gmra.mrb[12].mxu1 %v8757_v7 }
 0x475   : > { %2438 = vmatpush1.bf16.msra.mxu1 %v16022_v12  ;;  %2469 = vmatprep.mubr.bf16.mxu1 %v8760_v21  ;;  %v2528_v25 = vpop.permute.xlu1 %2527 }
 0x476   : > { %2439 = vmatprep.subr.bf16.mxu1 %v9753_v4  ;;  %2354 = vmatpush1.bf16.msra.mxu0 %v9751_v46  ;;  %v16031_v46 = vld [vmem:[#allocation70_spill] sm:$0xff]  ;;  %v16032_v4 = vld [vmem:[#allocation72_spill] sm:$0xff] }
 0x477   : > { %2355 = vmatprep.subr.bf16.mxu0 %v9699_v51  ;;  %v16028_v51 = vld [vmem:[#allocation67_spill] sm:$0xff] }
 0x478   : > { %v2533_v33 = vpop.permute.xlu0 %2532 }
 0x479   : > { %2440 = vmatpush1.bf16.msra.mxu1 %v16023_v40 }
 0x47a   : > { %2441 = vmatprep.subr.bf16.mxu1 %v16024_v31  ;;  %2356 = vmatpush1.bf16.msra.mxu0 %v16025_v43 }
 0x47b   : > { %2357 = vmatprep.subr.bf16.mxu0 %v16026_v10 }
 0x47d   : > { %2442 = vmatpush1.bf16.msra.mxu1 %v16027_v9 }
 0x47e   : > { %2443 = vmatprep.subr.bf16.mxu1 %v9812_v14  ;;  %2358 = vmatpush1.bf16.msra.mxu0 %v9810_v19  ;;  %v16034_v19 = vld [vmem:[#allocation73_spill] sm:$0xff]  ;;  %v16035_v14 = vld [vmem:[#allocation74_spill] sm:$0xff] }
 0x47f   : > { %2359 = vmatprep.subr.bf16.mxu0 %v9771_v57  ;;  %v16033_v57 = vld [vmem:[#allocation71_spill] sm:$0xff] }
 0x481   : > { %2444 = vmatpush1.bf16.msra.mxu1 %v9818_v52  ;;  %v16029_v52 = vld [vmem:[#allocation68_spill] sm:$0xff] }
 0x482   : > { %2445 = vmatprep.subr.bf16.mxu1 %v9786_v3  ;;  %2360 = vmatpush1.bf16.msra.mxu0 %v9841_v59  ;;  %v16030_v3 = vld [vmem:[#allocation69_spill] sm:$0xff]  ;;  %v16037_v59 = vld [vmem:[#allocation75_spill] sm:$0xff] }
 0x483   : > { %2361 = vmatprep.subr.bf16.mxu0 %v9854_v58  ;;  %v16039_v58 = vld [vmem:[#allocation77_spill] sm:$0xff] }
 0x485   : > { %2446 = vmatpush1.bf16.msra.mxu1 %v9828_v20  ;;  %v16036_v20 = vld [vmem:[#allocation76_spill] sm:$0xff] }
 0x486   : > { %2447 = vmatprep.subr.bf16.mxu1 %v9880_v62  ;;  %2362 = vmatpush1.bf16.msra.mxu0 %v9878_v39  ;;  %v16040_v39 = vld [vmem:[#allocation78_spill] sm:$0xff] }
 0x487   : > { %2363 = vmatprep.subr.bf16.mxu0 %v9845_v28  ;;  %v16038_v28 = vld [vmem:[#allocation79_spill] sm:$0xff]  ;;  %v16041_v62 = vld [vmem:[#allocation82_spill] sm:$0xff] }
 0x489   : > { %2448 = vmatpush1.bf16.msra.mxu1 %v9882_v63  ;;  %v16042_v63 = vld [vmem:[#allocation80_spill] sm:$0xff] }
 0x48a   : > { %2449 = vmatprep.subr.bf16.mxu1 %v9886_v8  ;;  %2364 = vmatpush1.bf16.msra.mxu0 %v9904_v38  ;;  %v16043_v8 = vld [vmem:[#allocation84_spill] sm:$0xff]  ;;  %v16044_v38 = vld [vmem:[#allocation83_spill] sm:$0xff] }
 0x48b   : > { %2365 = vmatprep.subr.bf16.mxu0 %v9918_v47  ;;  %v16046_v47 = vld [vmem:[#allocation85_spill] sm:$0xff] }
 0x48d   : > { %2450 = vmatpush1.bf16.msra.mxu1 %v9908_v56  ;;  %v16045_v56 = vld [vmem:[#allocation81_spill] sm:$0xff] }
 0x48e   : > { %2451 = vmatprep.subr.bf16.mxu1 %v9938_v45  ;;  %2366 = vmatpush1.bf16.msra.mxu0 %v9936_v26  ;;  %v16047_v26 = vld [vmem:[#allocation86_spill] sm:$0xff]  ;;  %v16048_v45 = vld [vmem:[#allocation87_spill] sm:$0xff] }
 0x48f   : > { %2367 = vmatprep.subr.bf16.mxu0 %v9684_v42 }
 0x491   : > { %2452 = vmatpush1.bf16.msra.mxu1 %v9942_v44  ;;  %v16049_v44 = vld [vmem:[#allocation88_spill] sm:$0xff] }
 0x492   : > { %2453 = vmatprep.subr.bf16.mxu1 %v9690_v24  ;;  %2368 = vmatpush1.bf16.msra.mxu0 %v9694_v37 }
 0x493   : > { %2369 = vmatprep.subr.bf16.mxu0 %v16028_v51 }
 0x495   : > { %2454 = vmatpush1.bf16.msra.mxu1 %v16029_v52 }
 0x496   : > { %2455 = vmatprep.subr.bf16.mxu1 %v16030_v3  ;;  %2370 = vmatpush1.bf16.msra.mxu0 %v16031_v46 }
 0x497   : > { %2371 = vmatprep.subr.bf16.mxu0 %v16032_v4 }
 0x499   : > { %2456 = vmatpush1.bf16.msra.mxu1 %v16033_v57 }
 0x49a   : > { %2457 = vmatprep.subr.bf16.mxu1 %v16034_v19  ;;  %2372 = vmatpush1.bf16.msra.mxu0 %v16035_v14  ;;  %v16068_v19 = vld [vmem:[#allocation43_spill] sm:$0xff] }
 0x49b   : > { %2373 = vmatprep.subr.bf16.mxu0 %v16036_v20 }
 0x49d   : > { %2458 = vmatpush1.bf16.msra.mxu1 %v16037_v59 }
 0x49e   : > { %2459 = vmatprep.subr.bf16.mxu1 %v10078_v2  ;;  %2374 = vmatpush1.bf16.msra.mxu0 %v10066_v36  ;;  %v16051_v36 = vld [vmem:[#allocation91_spill] sm:$0xff]  ;;  %v8758_v2 = vld [vmem:[%s16017_s30] ss:$12 sps:$4 sm:$0xff]  }
 0x49f   : > { %2375 = vmatprep.subr.bf16.mxu0 %v10034_v23  ;;  %v16050_v23 = vld [vmem:[#allocation89_spill] sm:$0xff] }
 0x4a1   : > { %2460 = vmatpush1.bf16.msra.mxu1 %v16038_v28  ;;  %v16069_v28 = vld [vmem:[#allocation38_spill] sm:$0xff] }
 0x4a2   : > { %2461 = vmatprep.subr.bf16.mxu1 %v16039_v58  ;;  %2376 = vmatpush1.bf16.msra.mxu0 %v16040_v39 }
 0x4a3   : > { %2377 = vmatprep.subr.bf16.mxu0 %v16041_v62 }
 0x4a5   : > { %2462 = vmatpush1.bf16.msra.mxu1 %v16042_v63  ;;  %v16070_v63 = vld [vmem:[#allocation46_spill] sm:$0xff] }
 0x4a6   : > { %2463 = vmatprep.subr.bf16.mxu1 %v16043_v8  ;;  %2378 = vmatpush1.bf16.msra.mxu0 %v16044_v38 }
 0x4a7   : > { %2379 = vmatprep.subr.bf16.mxu0 %v16045_v56 }
 0x4a9   : > { %2464 = vmatpush1.bf16.msra.mxu1 %v16046_v47 }
 0x4aa   : > { %2465 = vmatprep.subr.bf16.mxu1 %v16047_v26  ;;  %2380 = vmatpush1.bf16.msra.mxu0 %v16048_v45  ;;  %v8762_v45 = vld [vmem:[%s16071_s9] sm:$0xff]  }
 0x4ab   : > { %2381 = vmatprep.subr.bf16.mxu0 %v16049_v44  ;;  %v8763_v44 = vld [vmem:[%s16071_s9 + $0x8] sm:$0xff]   ;;  %s16290_s9 = smov 86  }
 0x4ad   : > { %2466 = vmatpush1.bf16.msra.mxu1 %v16050_v23  ;;  %v2574_v23 = vpop.permute.xlu1 %2573 }
 0x4ae   : > { %2467 = vmatprep.subr.bf16.mxu1 %v16051_v36  ;;  %2382 = vmatpush1.bf16.msra.mxu0 %v16052_v34 }
 0x4af   : > { %2394 = vmatprep.subr.bf16.mxu0 %v16053_v30 }
 0x4b1   : > { %2468 = vmatpush1.bf16.msra.mxu1 %v16054_v49  ;;  %2384 = vmatmul.mubr.bf16.vlgmr.msra.gmra.mrb[12].mxu0 %v8758_v2 }
 0x4b2   : > { %2480 = vmatprep.subr.bf16.mxu1 %v16055_v1  ;;  %2395 = vmatpush1.bf16.msra.mxu0 %v16056_v22  ;;  %v16072_v22 = vld [vmem:[#allocation39_spill] sm:$0xff] }
 0x4b3   : > { %2426 = vmatprep.mubr.bf16.mxu0 %v16057_v29  ;;  %2396 = vmatprep.subr.bf16.mxu0 %v16058_v35 }
 0x4b4   : > { %2470 = vmatmul.mubr.bf16.vlgmr.msra.gmra.mrb[12].mxu1 %v8758_v2  ;;  %v2579_v2 = vpop.permute.xlu0 %2578 }
 0x4b5   : > { %2481 = vmatpush1.bf16.msra.mxu1 %v16059_v17  ;;  %2512 = vmatprep.mubr.bf16.mxu1 %v16057_v29 }
 0x4b6   : > { %2482 = vmatprep.subr.bf16.mxu1 %v16060_v18  ;;  %2397 = vmatpush1.bf16.msra.mxu0 %v16061_v60 }
 0x4b7   : > { %2608 = vmatprep.subr.bf16.mxu0 %v9684_v42  ;;  %v16063_v42 = vld [vmem:[#allocation101_spill] sm:$0xff] }
 0x4b9   : > { %2483 = vmatpush1.bf16.msra.mxu1 %v16062_v13 }
 0x4ba   : > { %2661 = vmatprep.subr.bf16.mxu1 %v9690_v24  ;;  %v16064_v24 = vld [vmem:[#allocation102_spill] sm:$0xff] }
 0x4bd   : > { %6356 = vmatmul.mubr.msk.bf16.vlgmr.msra.gmra.mrb[12].mxu0 %vm1808_vm0, %v8761_v54 }
 0x4be   : > { %2609 = vmatpush1.bf16.msra.mxu0 %v9694_v37  ;;  %2640 = vmatprep.mubr.bf16.mxu0 %v16057_v29  ;;  %v16065_v37 = vld [vmem:[#allocation103_spill] sm:$0xff] }
 0x4bf   : > { %2610 = vmatprep.subr.bf16.mxu0 %v16028_v51 }
 0x4c0   : > { %6357 = vmatmul.mubr.msk.bf16.vlgmr.msra.gmra.mrb[12].mxu1 %vm1808_vm0, %v8761_v54 }
 0x4c1   : > { %2662 = vmatpush1.bf16.msra.mxu1 %v16029_v52  ;;  %2693 = vmatprep.mubr.bf16.mxu1 %v16057_v29 }
 0x4c2   : > { %2663 = vmatprep.subr.bf16.mxu1 %v16030_v3  ;;  %2611 = vmatpush1.bf16.msra.mxu0 %v16031_v46  ;;  %v16067_v3 = vld [vmem:[#allocation37_spill] sm:$0xff] }
 0x4c3   : > { %2612 = vmatprep.subr.bf16.mxu0 %v16063_v42  ;;  %v16073_v42 = vld [vmem:[#allocation40_spill] sm:$0xff] }
 0x4c5   : > { %2664 = vmatpush1.bf16.msra.mxu1 %v16033_v57 }
 0x4c6   : > { %2665 = vmatprep.subr.bf16.mxu1 %v16064_v24  ;;  %2613 = vmatpush1.bf16.msra.mxu0 %v16065_v37  ;;  %v16074_v37 = vld [vmem:[#allocation41_spill] sm:$0xff] }
 0x4c9   : > { %2666 = vmatpush1.bf16.msra.mxu1 %v16066_v55 }
 0x590   : > { %v2428_v16 = vpop.f32.mrb[12].mxu0 }
 0x591   : > { %v2535_v50 = vadd.f32 %v2528_v25, %v2428_v16  ;;  %v2430_v27 = vpop.f32.mrb[13].mxu0 }
 0x592   : > { %v2536_v32 = vadd.f32 %v2528_v25, %v2430_v27  ;;  %v2432_v53 = vpop.f32.mrb[14].mxu0 }
 0x593   : > { %v2514_v6 = vpop.f32.mrb[12].mxu1  ;;  %v2543_v11 = vmax.f32 %v2535_v50, 0.0  ;;  %v2539_v7 = vadd.f32 %v2533_v33, %v2432_v53  ;;  %v2434_v61 = vpop.f32.mrb[15].mxu0 }
 0x594   : > { %v2537_v48 = vadd.f32 %v2528_v25, %v2514_v6  ;;  %v2516_v21 = vpop.f32.mrb[13].mxu1  ;;  %v2544_v0 = vmax.f32 %v2536_v32, 0.0  ;;  %v2540_v41 = vadd.f32 %v2533_v33, %v2434_v61  ;;  %v16077_v32 = vld [vmem:[#allocation42_spill] sm:$0xff] }
 0x595   : > { %v2538_v5 = vadd.f32 %v2528_v25, %v2516_v21  ;;  %v2518_v12 = vpop.f32.mrb[14].mxu1  ;;  %v2547_v31 = vmax.f32 %v2539_v7, 0.0  ;;  %v2551_v46 = vmul.f32 %v2543_v11, %v16067_v3 }
 0x596   : > { %v2545_v40 = vmax.f32 %v2537_v48, 0.0  ;;  %v2541_v43 = vadd.f32 %v2533_v33, %v2518_v12  ;;  %v2520_v10 = vpop.f32.mrb[15].mxu1  ;;  %v2548_v51 = vmax.f32 %v2540_v41, 0.0  ;;  %v2552_v14 = vmul.f32 %v2544_v0, %v16068_v19  ;;  %v16080_v41 = vld [vmem:[#allocation44_spill] sm:$0xff] }
 0x597   : > { %v2546_v9 = vmax.f32 %v2538_v5, 0.0  ;;  %v2542_v52 = vadd.f32 %v2533_v33, %v2520_v10  ;;  %v2555_v4 = vmul.f32 %v2547_v31, %v16067_v3 }
 0x598   : > { %v2549_v57 = vmax.f32 %v2541_v43, 0.0  ;;  %v2556_v20 = vmul.f32 %v2548_v51, %v16068_v19  ;;  %v2553_v58 = vmul.f32 %v2545_v40, %v16069_v28  ;;  %v16081_v51 = vld [vmem:[#allocation45_spill] sm:$0xff] }
 0x599   : > { %v2550_v59 = vmax.f32 %v2542_v52, 0.0  ;;  %v2559_v39 = vpack.c.bf16 %v2555_v4, %v2551_v46  ;;  %v2554_v8 = vmul.f32 %v2546_v9, %v16070_v63 }
 0x59a   : > { %v2557_v62 = vmul.f32 %v2549_v57, %v16069_v28  ;;  %v2560_v56 = vpack.c.bf16 %v2556_v20, %v2552_v14  ;;  %v16083_v14 = vld [vmem:[#allocation47_spill] sm:$0xff] }
 0x59b   : > { %v2558_v38 = vmul.f32 %v2550_v59, %v16070_v63 }
 0x59c   : > { %v2561_v47 = vpack.c.bf16 %v2557_v62, %v2553_v58  ;;  %2614 = vmatprep.subr.bf16.mxu0 %v2560_v56  ;;  %v16085_v58 = vld [vmem:[#allocation48_spill] sm:$0xff] }
 0x59d   : > { %v2562_v26 = vpack.c.bf16 %v2558_v38, %v2554_v8  ;;  %2615 = vmatpush1.bf16.msra.mxu0 %v2559_v39 }
 0x59f   : > { %2667 = vmatprep.subr.bf16.mxu1 %v2562_v26  ;;  %v2584_v26 = vpop.permute.xlu1 %2583 }
 0x5a0   : > { %2668 = vmatpush1.bf16.msra.mxu1 %v2561_v47  ;;  %6360 = vmatmul.mubr.msk.bf16.vlgmr.msra.gmra.mrb[16].mxu0 %vm2601_vm14, %v8762_v45  ;;  %v2589_v47 = vpop.permute.xlu0 %2588 }
 0x5a1   : > { %2650 = vmatprep.mubr.bf16.mxu0 %v16057_v29 }
 0x5a3   : > { %6362 = vmatmul.mubr.msk.bf16.vlgmr.msra.gmra.mrb[16].mxu1 %vm2601_vm14, %v8762_v45 }
 0x5a4   : > { %2703 = vmatprep.mubr.bf16.mxu1 %v16057_v29 }
 0x5a8   : > { %6361 = vmatmul.mubr.msk.bf16.gmra.mrb[20].mxu0 %vm2601_vm14, %v8763_v44 }
 0x5ab   : > { %6363 = vmatmul.mubr.msk.bf16.gmra.mrb[20].mxu1 %vm2601_vm14, %v8763_v44 }
 0x673   : > { %v2642_v36 = vpop.f32.mrb[16].mxu0 }
 0x674   : > { %v2643_v34 = vadd.f32 %v2642_v36, %v2574_v23  ;;  %v2644_v30 = vpop.f32.mrb[17].mxu0 }
 0x675   : > { %v2646_v1 = vpop.f32.mrb[18].mxu0  ;;  %v2645_v11 = vadd.f32 %v2644_v30, %v2574_v23  ;;  %v16089_v30 = vld [vmem:[#allocation51_spill] sm:$0xff] }
 0x676   : > { %v2695_v49 = vpop.f32.mrb[16].mxu1  ;;  %v2714_v35 = vadd.f32 %v2643_v34, %v16072_v22  ;;  %v2647_v18 = vadd.f32 %v2646_v1, %v2579_v2  ;;  %v2648_v13 = vpop.f32.mrb[19].mxu0  ;;  %v16090_v22 = vld [vmem:[#allocation50_spill] sm:$0xff] }
 0x677   : > { %v2696_v17 = vadd.f32 %v2695_v49, %v2574_v23  ;;  %v2697_v60 = vpop.f32.mrb[17].mxu1  ;;  %v2649_v27 = vadd.f32 %v2648_v13, %v2579_v2  ;;  %v2715_v52 = vadd.f32 %v2645_v11, %v16081_v51  ;;  %v16099_v11 = vld [vmem:[#allocation55_spill] sm:$0xff] }
 0x678   : > { %v2699_v54 = vpop.f32.mrb[18].mxu1  ;;  %v2718_v55 = vadd.f32 %v2647_v18, %v16074_v37  ;;  %v10633_v33 = vmul.f32 %v2714_v35, %v16067_v3  ;;  %v2698_v46 = vadd.f32 %v2697_v60, %v2574_v23  ;;  %v16091_v18 = vld [vmem:[#allocation52_spill] sm:$0xff]  ;;  %v8766_v51 = vld [vmem:[%s16104_s11 + $0x4] ss:$12 sps:$4 sm:$0xff]  }
 0x679   : > { %v2716_v24 = vadd.f32 %v2696_v17, %v16073_v42  ;;  %v2700_v25 = vadd.f32 %v2699_v54, %v2579_v2  ;;  %v2701_v16 = vpop.f32.mrb[19].mxu1  ;;  %v2719_v12 = vadd.f32 %v2649_v27, %v16080_v41  ;;  %v10666_v59 = vmul.f32 %v2715_v52, %v16068_v19  ;;  %v16094_v42 = vld [vmem:[#allocation53_spill] sm:$0xff]  ;;  %v16101_v41 = vld [vmem:[#allocation56_spill] sm:$0xff]  ;;  %3268 = vmatprep.mubr.bf16.mxu0 %v8766_v51 }
 0x67a   : > { %16075 = vst [vmem:[#allocation57_spill] sm:$0xff] %v10633_v33  ;;  %v10636_v50 = vmul.f32 %v2718_v55, %v16067_v3  ;;  %v2702_v40 = vadd.f32 %v2701_v16, %v2579_v2  ;;  %v2717_v39 = vadd.f32 %v2698_v46, %v16085_v58  ;;  %v16088_v2 = vld [vmem:[#allocation49_spill] sm:$0xff]  ;;  %3354 = vmatprep.mubr.bf16.mxu1 %v8766_v51 }
 0x67b   : > { %v2720_v6 = vadd.f32 %v2700_v25, %v16077_v32  ;;  %v2652_v53 = vpop.f32.mrb[20].mxu0  ;;  %v10640_v48 = vmul.f32 %v2716_v24, %v16069_v28  ;;  %v10660_v57 = vmul.f32 %v2719_v12, %v16068_v19  ;;  %16084 = vst [vmem:[#allocation65_spill] sm:$0xff] %v10666_v59  ;;  %v16096_v25 = vld [vmem:[#allocation54_spill] sm:$0xff] }
 0x67c   : > { %16076 = vst [vmem:[#allocation59_spill] sm:$0xff] %v10636_v50  ;;  %v2654_v21 = vpop.f32.mrb[21].mxu0  ;;  %v10647_v61 = vpack.i.bf16 %v10636_v50, %v10633_v33  ;;  %v2721_v20 = vadd.f32 %v2702_v40, %v16083_v14  ;;  %v10681_v38 = vmul.f32 %v2717_v39, %v16070_v63  ;;  %v2653_v44 = vadd.f32 %v2652_v53, %v2584_v26 }
 0x67d   : > { %16078 = vst [vmem:[#allocation58_spill] sm:$0xff] %v10640_v48  ;;  %v10643_v7 = vmul.f32 %v2720_v6, %v16069_v28  ;;  %v2656_v5 = vpop.f32.mrb[22].mxu0  ;;  %16082 = vst [vmem:[#allocation60_spill] sm:$0xff] %v10660_v57  ;;  %v10678_v8 = vpack.i.bf16 %v10660_v57, %v10666_v59  ;;  %v2655_v17 = vadd.f32 %v2654_v21, %v2584_v26 }
 0x67e   : > { %v2705_v0 = vpop.f32.mrb[20].mxu1  ;;  %v2658_v43 = vpop.f32.mrb[23].mxu0  ;;  %7226 = vrot.lane.b32.xlu1 %v10647_v61, %s16000_s5  ;;  %v10672_v62 = vmul.f32 %v2721_v20, %v16070_v63  ;;  %16087 = vst [vmem:[#allocation63_spill] sm:$0xff] %v10681_v38  ;;  %v2657_v45 = vadd.f32 %v2656_v5, %v2589_v47  ;;  %v2722_v49 = vadd.f32 %v2653_v44, %v16089_v30 }
 0x67f   : > { %16079 = vst [vmem:[#allocation64_spill] sm:$0xff] %v10643_v7  ;;  %v2707_v31 = vpop.f32.mrb[21].mxu1  ;;  %v10654_v10 = vpack.i.bf16 %v10643_v7, %v10640_v48  ;;  %v2706_v36 = vadd.f32 %v2705_v0, %v2584_v26  ;;  %v2659_v1 = vadd.f32 %v2658_v43, %v2589_v47  ;;  %v2723_v16 = vadd.f32 %v2655_v17, %v16096_v25 }
 0x680   : > { %v2709_v9 = vpop.f32.mrb[22].mxu1  ;;  %16086 = vst [vmem:[#allocation62_spill] sm:$0xff] %v10672_v62  ;;  %v10689_v56 = vpack.i.bf16 %v10672_v62, %v10681_v38  ;;  %v2726_v34 = vadd.f32 %v2657_v45, %v16088_v2  ;;  %v10729_v54 = vmul.f32 %v2722_v49, %v16067_v3  ;;  %v2708_v32 = vadd.f32 %v2707_v31, %v2584_v26  ;;  %v3207_v26 = vld [vmem:[%s16105_s12 + $0x8] sm:$0xff] }
 0x681   : > { %v2711_v4 = vpop.f32.mrb[23].mxu1  ;;  %7266 = vrot.lane.b32.xlu0 %v10654_v10, %s16001_s7  ;;  %v2710_v23 = vadd.f32 %v2709_v9, %v2589_v47  ;;  %v2724_v60 = vadd.f32 %v2706_v36, %v16091_v18  ;;  %v2727_v24 = vadd.f32 %v2659_v1, %v16094_v42  ;;  %v10753_v5 = vmul.f32 %v2723_v16, %v16068_v19 }
 0x682   : > { %7231 = vrot.lane.b32.xlu1 %v10654_v10, %s16000_s5  ;;  %v10724_v13 = vmul.f32 %v2726_v34, %v16067_v3  ;;  %16093 = vst [vmem:[#allocation61_spill] sm:$0xff] %v10729_v54  ;;  %v2712_v55 = vadd.f32 %v2711_v4, %v2589_v47  ;;  %v2725_v12 = vadd.f32 %v2708_v32, %v16101_v41 }
 0x683   : > { %v2728_v35 = vadd.f32 %v2710_v23, %v16090_v22  ;;  %v10739_v27 = vmul.f32 %v2724_v60, %v16069_v28  ;;  %v10746_v53 = vmul.f32 %v2727_v24, %v16068_v19  ;;  %16100 = vst [vmem:[#allocation70_spill] sm:$0xff] %v10753_v5 }
 0x684   : > { %16092 = vst [vmem:[#allocation66_spill] sm:$0xff] %v10724_v13  ;;  %v7345_v6 = vpack.i.bf16 %v10724_v13, %v10729_v54  ;;  %v2729_v21 = vadd.f32 %v2712_v55, %v16099_v11  ;;  %v10764_v43 = vmul.f32 %v2725_v12, %v16070_v63 }
 0x685   : > { %7276 = vrot.lane.b32.xlu0 %v10654_v10, %s15922_s2  ;;  %v10733_v37 = vmul.f32 %v2728_v35, %v16069_v28  ;;  %16097 = vst [vmem:[#allocation68_spill] sm:$0xff] %v10739_v27  ;;  %16098 = vst [vmem:[#allocation69_spill] sm:$0xff] %v10746_v53  ;;  %v7395_v31 = vpack.i.bf16 %v10746_v53, %v10753_v5 }
 0x686   : > { %7236 = vrot.lane.b32.xlu1 %v10647_v61, %s15925_s6  ;;  %v10758_v40 = vmul.f32 %v2729_v21, %v16070_v63  ;;  %16103 = vst [vmem:[#allocation71_spill] sm:$0xff] %v10764_v43 }
 0x687   : > { %16095 = vst [vmem:[#allocation67_spill] sm:$0xff] %v10733_v37  ;;  %v7385_v0 = vpack.i.bf16 %v10733_v37, %v10739_v27 }
 0x688   : > { %16102 = vst [vmem:[#allocation72_spill] sm:$0xff] %v10758_v40  ;;  %v7400_v9 = vpack.i.bf16 %v10758_v40, %v10764_v43 }
 0x689   : > { %7286 = vrot.lane.b32.xlu0 %v10678_v8, %s16000_s5 }
 0x68a   : > { %7241 = vrot.lane.b32.xlu1 %v10654_v10, %s15925_s6 }
 0x68d   : > { %7291 = vrot.lane.b32.xlu0 %v10689_v56, %s16000_s5 }
 0x68e   : > { %7246 = vrot.lane.b32.xlu1 %v10647_v61, %s15926_s27 }
 0x691   : > { %7296 = vrot.lane.b32.xlu0 %v10678_v8, %s15925_s6 }
 0x692   : > { %7251 = vrot.lane.b32.xlu1 %v10654_v10, %s15926_s27 }
 0x695   : > { %7301 = vrot.lane.b32.xlu0 %v10689_v56, %s15925_s6 }
 0x696   : > { %7256 = vrot.lane.b32.xlu1 %v10647_v61, %s15927_s28 }
 0x699   : > { %7306 = vrot.lane.b32.xlu0 %v10678_v8, %s15926_s27 }
 0x69a   : > { %7261 = vrot.lane.b32.xlu1 %v10654_v10, %s15927_s28 }
 0x69d   : > { %7311 = vrot.lane.b32.xlu0 %v10689_v56, %s15926_s27 }
 0x69e   : > { %7271 = vrot.lane.b32.xlu1 %v10647_v61, %s16001_s7 }
 0x6a1   : > { %7316 = vrot.lane.b32.xlu0 %v10678_v8, %s15927_s28 }
 0x6a2   : > { %7281 = vrot.lane.b32.xlu1 %v10647_v61, %s15922_s2 }
 0x6a5   : > { %7321 = vrot.lane.b32.xlu0 %v10689_v56, %s15927_s28 }
 0x6a6   : > { %7326 = vrot.lane.b32.xlu1 %v10678_v8, %s16001_s7 }
 0x6a9   : > { %7331 = vrot.lane.b32.xlu0 %v10689_v56, %s16001_s7 }
 0x6aa   : > { %7336 = vrot.lane.b32.xlu1 %v10678_v8, %s15922_s2 }
 0x6ad   : > { %7341 = vrot.lane.b32.xlu0 %v10689_v56, %s15922_s2 }
 0x6ae   : > { %7346 = vrot.lane.b32.xlu1 %v7345_v6, %s16000_s5 }
 0x6b1   : > { %7386 = vrot.lane.b32.xlu0 %v7385_v0, %s16001_s7 }
 0x6b2   : > { %7351 = vrot.lane.b32.xlu1 %v7385_v0, %s16000_s5 }
 0x6b5   : > { %7396 = vrot.lane.b32.xlu0 %v7395_v31, %s16000_s5 }
 0x6b6   : > { %7356 = vrot.lane.b32.xlu1 %v7345_v6, %s15925_s6 }
 0x6b9   : > { %7401 = vrot.lane.b32.xlu0 %v7400_v9, %s16000_s5 }
 0x6ba   : > { %7361 = vrot.lane.b32.xlu1 %v7385_v0, %s15925_s6 }
 0x6bd   : > { %7406 = vrot.lane.b32.xlu0 %v7395_v31, %s15925_s6 }
 0x6be   : > { %7366 = vrot.lane.b32.xlu1 %v7345_v6, %s15926_s27 }
 0x6c1   : > { %7411 = vrot.lane.b32.xlu0 %v7400_v9, %s15925_s6 }
 0x6c2   : > { %7371 = vrot.lane.b32.xlu1 %v7385_v0, %s15926_s27 }
 0x6c5   : > { %7416 = vrot.lane.b32.xlu0 %v7395_v31, %s15926_s27 }
 0x6c6   : > { %7376 = vrot.lane.b32.xlu1 %v7345_v6, %s15927_s28 }
 0x6c9   : > { %7421 = vrot.lane.b32.xlu0 %v7400_v9, %s15926_s27 }
 0x6ca   : > { %7381 = vrot.lane.b32.xlu1 %v7385_v0, %s15927_s28 }
 0x6cd   : > { %7426 = vrot.lane.b32.xlu0 %v7395_v31, %s15927_s28 }
 0x6ce   : > { %7391 = vrot.lane.b32.xlu1 %v7345_v6, %s16001_s7 }
 0x6d1   : > { %7431 = vrot.lane.b32.xlu0 %v7400_v9, %s15927_s28 }
 0x6d2   : > { %7441 = vrot.lane.b32.xlu1 %v7345_v6, %s15922_s2 }
 0x6d5   : > { %7436 = vrot.lane.b32.xlu0 %v7385_v0, %s15922_s2 }
 0x6d6   : > { %7446 = vrot.lane.b32.xlu1 %v10678_v8, %s15936_s3 }
 0x6d9   : > { %7451 = vrot.lane.b32.xlu0 %v10654_v10, %s15936_s3 }
 0x6da   : > { %7456 = vrot.lane.b32.xlu1 %v7395_v31, %s16001_s7 }
 0x6dd   : > { %7466 = vrot.lane.b32.xlu0 %v10689_v56, %s15936_s3 }
 0x6de   : > { %7461 = vrot.lane.b32.xlu1 %v10647_v61, %s15936_s3 }
 0x6e1   : > { %7471 = vrot.lane.b32.xlu0 %v7400_v9, %s16001_s7 }
 0x6e2   : > { %7481 = vrot.lane.b32.xlu1 %v7395_v31, %s15922_s2 }
 0x6e5   : > { %7476 = vrot.lane.b32.xlu0 %v7385_v0, %s15936_s3 }
 0x6e6   : > { %7486 = vrot.lane.b32.xlu1 %v7345_v6, %s15936_s3 }
 0x6e9   : > { %7491 = vrot.lane.b32.xlu0 %v7400_v9, %s15922_s2 }
 0x6ea   : > { %7496 = vrot.lane.b32.xlu1 %v7395_v31, %s15936_s3 }
 0x6ed   : > { %7506 = vrot.lane.b32.xlu0 %v10654_v10, %s15938_s0 }
 0x6ee   : > { %7501 = vrot.lane.b32.xlu1 %v10678_v8, %s15938_s0 }
 0x6f0   : > { %v7227_v52 = vpop.permute.xlu1 %7226 }
 0x6f1   : > { %7516 = vrot.lane.b32.xlu0 %v7400_v9, %s15936_s3  ;;  %v7229_v8 = vunpack.i.h.bf16 %v7227_v52 }
 0x6f2   : > { %7511 = vrot.lane.b32.xlu1 %v10647_v61, %s15938_s0  ;;  %v3206_v61 = vld [vmem:[%s16105_s12] sm:$0xff]  ;;  %s16443_s12 = smov 87  }
 0x6f3   : > { %v10808_v46 = vpop.permute.xlu0 %7266 }
 0x6f4   : > { %v7232_v4 = vpop.permute.xlu1 %7231 }
 0x6f5   : > { %7521 = vrot.lane.b32.xlu0 %v10689_v56, %s15938_s0  ;;  %v7228_v56 = vunpack.i.l.bf16 %v7227_v52  ;;  %v7234_v45 = vunpack.i.h.bf16 %v7232_v4  ;;  %v7233_v2 = vunpack.i.l.bf16 %v7232_v4 }
 0x6f6   : > { %7531 = vrot.lane.b32.xlu1 %v7395_v31, %s15938_s0 }
 0x6f7   : > { %v10814_v14 = vpop.permute.xlu0 %7276 }
 0x6f8   : > { %v10818_v10 = vpop.permute.xlu1 %7236 }
 0x6f9   : > { %7526 = vrot.lane.b32.xlu0 %v7385_v0, %s15938_s0 }
 0x6fa   : > { %7536 = vrot.lane.b32.xlu1 %v7345_v6, %s15938_s0 }
 0x6fb   : > { %v7287_v20 = vpop.permute.xlu0 %7286 }
 0x6fc   : > { %v7289_v58 = vunpack.i.h.bf16 %v7287_v20  ;;  %v7288_v39 = vunpack.i.l.bf16 %v7287_v20  ;;  %v10825_v47 = vpop.permute.xlu1 %7241 }
 0x6fd   : > { %7541 = vrot.lane.b32.xlu0 %v7400_v9, %s15938_s0 }
 0x6fe   : > { %3210 = vperm.xlu1 %6744, %v3206_v61   ;;  %v2786_v23 = vsel %vm818_vm7, %v7228_v56, %v7288_v39  ;;  %v2787_v36 = vsel %vm818_vm7, %v7229_v8, %v7289_v58  ;;  %v2782_v22 = vsel %vm818_vm7, %v7288_v39, %v7233_v2  ;;  %v2783_v35 = vsel %vm818_vm7, %v7289_v58, %v7234_v45 }
 0x6ff   : > { %v7292_v44 = vpop.permute.xlu0 %7291  ;;  %v10834_v49 = vpack.c.bf16 %v2787_v36, %v2786_v23  ;;  %v10858_v32 = vpack.c.bf16 %v2783_v35, %v2782_v22  ;;  %v10894_v36 = vpack.c.bf16 %v10660_v57, %v10666_v59 }
 0x700   : > { %v7294_v34 = vunpack.i.h.bf16 %v7292_v44  ;;  %v7293_v30 = vunpack.i.l.bf16 %v7292_v44  ;;  %v10836_v1 = vpop.permute.xlu1 %7246  ;;  %v7238_v44 = vunpack.i.l.bf16 %v10818_v10 }
 0x701   : > { %3215 = vperm.xlu0 %6743, %v3207_v26   ;;  %3236 = vmatprep.subr.bf16.mxu0 %v10834_v49  ;;  %v7243_v26 = vunpack.i.l.bf16 %v10825_v47  ;;  %16106 = vst [vmem:[#allocation73_spill] sm:$0xff] %v10894_v36 }
 0x702   : > { %v2790_v17 = vsel %vm818_vm7, %v7293_v30, %v7228_v56  ;;  %v2791_v18 = vsel %vm818_vm7, %v7294_v34, %v7229_v8  ;;  %v2778_v24 = vsel %vm818_vm7, %v7233_v2, %v7293_v30  ;;  %v2779_v55 = vsel %vm818_vm7, %v7234_v45, %v7294_v34 }
 0x703   : > { %v7297_v60 = vpop.permute.xlu0 %7296  ;;  %v10847_v42 = vpack.c.bf16 %v2791_v18, %v2790_v17  ;;  %v10853_v25 = vpack.c.bf16 %v2779_v55, %v2778_v24  ;;  %v7244_v56 = vunpack.i.h.bf16 %v10825_v47  ;;  %v7239_v45 = vunpack.i.h.bf16 %v10818_v10 }
 0x704   : > { %v10856_v16 = vpop.permute.xlu1 %7251  ;;  %v7299_v39 = vunpack.i.h.bf16 %v7297_v60  ;;  %v7298_v61 = vunpack.i.l.bf16 %v7297_v60  ;;  %v10898_v2 = vpack.c.bf16 %v10672_v62, %v10681_v38  ;;  %v10906_v10 = vpack.c.bf16 %v10636_v50, %v10633_v33 }
 0x705   : > { %3237 = vmatpush1.bf16.msra.mxu0 %v10847_v42  ;;  %3322 = vmatprep.subr.bf16.mxu1 %v10853_v25  ;;  %v10914_v60 = vpack.c.bf16 %v10746_v53, %v10753_v5  ;;  %v10919_v55 = vpack.c.bf16 %v10643_v7, %v10640_v48 }
 0x706   : > { %3323 = vmatpush1.bf16.msra.mxu1 %v10858_v32  ;;  %16107 = vst [vmem:[#allocation74_spill] sm:$0xff] %v10898_v2  ;;  %v2830_v34 = vsel %vm831_vm8, %v7298_v61, %v7243_v26  ;;  %v2831_v47 = vsel %vm831_vm8, %v7299_v39, %v7244_v56  ;;  %16108 = vst [vmem:[#allocation76_spill] sm:$0xff] %v10906_v10  ;;  %v2834_v17 = vsel %vm831_vm8, %v7238_v44, %v7298_v61 }
 0x707   : > { %v7302_v6 = vpop.permute.xlu0 %7301  ;;  %v2835_v18 = vsel %vm831_vm8, %v7239_v45, %v7299_v39  ;;  %16109 = vst [vmem:[#allocation75_spill] sm:$0xff] %v10914_v60  ;;  %16110 = vst [vmem:[#allocation79_spill] sm:$0xff] %v10919_v55  ;;  %v10927_v61 = vpack.c.bf16 %v10724_v13, %v10729_v54  ;;  %v10932_v24 = vpack.c.bf16 %v2831_v47, %v2830_v34 }
 0x708   : > { %v10862_v11 = vpop.permute.xlu1 %7256  ;;  %v7303_v30 = vunpack.i.l.bf16 %v7302_v6  ;;  %v7304_v22 = vunpack.i.h.bf16 %v7302_v6  ;;  %v10923_v6 = vpack.c.bf16 %v10758_v40, %v10764_v43  ;;  %v10936_v40 = vpack.c.bf16 %v2835_v18, %v2834_v17 }
 0x709   : > { %16112 = vst [vmem:[#allocation78_spill] sm:$0xff] %v10927_v61 }
 0x70a   : > { %16111 = vst [vmem:[#allocation77_spill] sm:$0xff] %v10923_v6  ;;  %v2838_v7 = vsel %vm831_vm8, %v7303_v30, %v7238_v44  ;;  %16113 = vst [vmem:[#allocation82_spill] sm:$0xff] %v10936_v40  ;;  %v2839_v43 = vsel %vm831_vm8, %v7304_v22, %v7239_v45  ;;  %v2826_v34 = vsel %vm831_vm8, %v7243_v26, %v7303_v30  ;;  %v16114_v26 = vunpack.i.l.bf16 %v10856_v16 }
 0x70b   : > { %v10864_v21 = vpop.permute.xlu0 %7306  ;;  %v2827_v44 = vsel %vm831_vm8, %v7244_v56, %v7304_v22  ;;  %v10964_v22 = vpack.c.bf16 %v2839_v43, %v2838_v7 }
 0x70c   : > { %v10866_v0 = vpop.permute.xlu1 %7261  ;;  %v7308_v13 = vunpack.i.l.bf16 %v10864_v21  ;;  %v7309_v47 = vunpack.i.h.bf16 %v10864_v21  ;;  %v10962_v30 = vpack.c.bf16 %v2827_v44, %v2826_v34  ;;  %v16118_v44 = vunpack.i.h.bf16 %v10836_v1 }
 0x70d   : > { %16115 = vst [vmem:[#allocation80_spill] sm:$0xff] %v10964_v22 }
 0x70e   : > { %v10960_v56 = vsel %vm844_vm9, %v7308_v13, %v16114_v26 }
 0x70f   : > { %v10868_v41 = vpop.permute.xlu0 %7311 }
 0x710   : > { %v10870_v12 = vpop.permute.xlu1 %7271 }
 0x713   : > { %v10872_v31 = vpop.permute.xlu0 %7316 }
 0x714   : > { %v10874_v9 = vpop.permute.xlu1 %7281 }
 0x717   : > { %v10876_v51 = vpop.permute.xlu0 %7321 }
 0x718   : > { %v10878_v52 = vpop.permute.xlu1 %7326 }
 0x71b   : > { %v10880_v4 = vpop.permute.xlu0 %7331 }
 0x71c   : > { %v10882_v20 = vpop.permute.xlu1 %7336 }
 0x71f   : > { %v10884_v58 = vpop.permute.xlu0 %7341 }
 0x720   : > { %v7347_v8 = vpop.permute.xlu1 %7346 }
 0x721   : > { %v7349_v39 = vunpack.i.h.bf16 %v7347_v8  ;;  %v7348_v54 = vunpack.i.l.bf16 %v7347_v8 }
 0x723   : > { %v10890_v23 = vpop.permute.xlu0 %7386 }
 0x724   : > { %v7352_v35 = vpop.permute.xlu1 %7351 }
 0x725   : > { %v7354_v53 = vunpack.i.h.bf16 %v7352_v35  ;;  %v7353_v50 = vunpack.i.l.bf16 %v7352_v35 }
 0x727   : > { %v7397_v5 = vpop.permute.xlu0 %7396 }
 0x728   : > { %v7399_v57 = vunpack.i.h.bf16 %v7397_v5  ;;  %v7398_v38 = vunpack.i.l.bf16 %v7397_v5  ;;  %v10941_v62 = vpop.permute.xlu1 %7356  ;;  %v16116_v5 = vunpack.i.l.bf16 %v10836_v1 }
 0x72a   : > { %v2788_v45 = vsel %vm818_vm7, %v7348_v54, %v7398_v38  ;;  %v2789_v8 = vsel %vm818_vm7, %v7349_v39, %v7399_v57  ;;  %v2882_v18 = vsel %vm844_vm9, %v16116_v5, %v7308_v13 }
 0x72b   : > { %v7402_v17 = vpop.permute.xlu0 %7401  ;;  %v10954_v59 = vpack.c.bf16 %v2789_v8, %v2788_v45  ;;  %v2785_v45 = vsel %vm818_vm7, %v7399_v57, %v7354_v53  ;;  %v2883_v57 = vsel %vm844_vm9, %v16118_v44, %v7309_v47 }
 0x72c   : > { %v7404_v35 = vunpack.i.h.bf16 %v7402_v17  ;;  %v7403_v48 = vunpack.i.l.bf16 %v7402_v17  ;;  %v7362_v21 = vpop.permute.xlu1 %7361  ;;  %v2784_v17 = vsel %vm818_vm7, %v7398_v38, %v7353_v50 }
 0x72d   : > { %3238 = vmatprep.subr.bf16.mxu0 %v10954_v59 }
 0x72e   : > { %v2792_v8 = vsel %vm818_vm7, %v7403_v48, %v7348_v54  ;;  %v2793_v34 = vsel %vm818_vm7, %v7404_v35, %v7349_v39  ;;  %v2780_v13 = vsel %vm818_vm7, %v7353_v50, %v7403_v48  ;;  %v2781_v38 = vsel %vm818_vm7, %v7354_v53, %v7404_v35 }
 0x72f   : > { %v7407_v7 = vpop.permute.xlu0 %7406  ;;  %v10979_v43 = vpack.c.bf16 %v2793_v34, %v2792_v8  ;;  %v7313_v54 = vunpack.i.l.bf16 %v10868_v41  ;;  %v10990_v26 = vpack.c.bf16 %v2781_v38, %v2780_v13  ;;  %v7314_v8 = vunpack.i.h.bf16 %v10868_v41 }
 0x730   : > { %v7409_v5 = vunpack.i.h.bf16 %v7407_v7  ;;  %v7408_v39 = vunpack.i.l.bf16 %v7407_v7  ;;  %v7359_v34 = vunpack.i.h.bf16 %v10941_v62  ;;  %v7358_v50 = vunpack.i.l.bf16 %v10941_v62  ;;  %v10996_v48 = vpop.permute.xlu1 %7366 }
 0x731   : > { %16117 = vst [vmem:[#allocation84_spill] sm:$0xff] %v10979_v43  ;;  %3239 = vmatpush1.bf16.msra.mxu0 %v10979_v43  ;;  %v10998_v53 = vpack.c.bf16 %v2785_v45, %v2784_v17  ;;  %v16120_v35 = vunpack.i.h.bf16 %v10856_v16  ;;  %v7364_v13 = vunpack.i.h.bf16 %v7362_v21  ;;  %v7363_v38 = vunpack.i.l.bf16 %v7362_v21  ;;  %3324 = vmatprep.subr.bf16.mxu1 %v10990_v26 }
 0x732   : > { %3240 = vmatprep.subr.bf16.mxu0 %v10936_v40  ;;  %v2836_v17 = vsel %vm831_vm8, %v7358_v50, %v7408_v39  ;;  %v2837_v45 = vsel %vm831_vm8, %v7359_v34, %v7409_v5 }
 0x733   : > { %16119 = vst [vmem:[#allocation83_spill] sm:$0xff] %v10998_v53  ;;  %v2879_v44 = vsel %vm844_vm9, %v7309_v47, %v16120_v35  ;;  %3325 = vmatpush1.bf16.msra.mxu1 %v10998_v53  ;;  %v7412_v41 = vpop.permute.xlu0 %7411  ;;  %v11013_v47 = vpack.c.bf16 %v2883_v57, %v2882_v18  ;;  %v16122_v35 = vunpack.i.l.bf16 %v10836_v1  ;;  %v11020_v62 = vpack.c.bf16 %v2837_v45, %v2836_v17 }
 0x734   : > { %v7414_v7 = vunpack.i.h.bf16 %v7412_v41  ;;  %v7413_v33 = vunpack.i.l.bf16 %v7412_v41  ;;  %3326 = vmatprep.subr.bf16.mxu1 %v10962_v30  ;;  %v7372_v43 = vpop.permute.xlu1 %7371  ;;  %v16124_v18 = vunpack.i.l.bf16 %v10856_v16  ;;  %v2832_v17 = vsel %vm831_vm8, %v7408_v39, %v7363_v38 }
 0x735   : > { %16121 = vst [vmem:[#allocation81_spill] sm:$0xff] %v11013_v47  ;;  %v2886_v21 = vsel %vm844_vm9, %v7313_v54, %v16122_v35  ;;  %16123 = vst [vmem:[#allocation85_spill] sm:$0xff] %v11020_v62  ;;  %3241 = vmatpush1.bf16.msra.mxu0 %v10964_v22  ;;  %v16125_v35 = vunpack.i.h.bf16 %v10856_v16  ;;  %v2833_v45 = vsel %vm831_vm8, %v7409_v5, %v7364_v13 }
 0x736   : > { %v2874_v57 = vsel %vm844_vm9, %v16124_v18, %v7313_v54  ;;  %v2840_v53 = vsel %vm831_vm8, %v7413_v33, %v7358_v50  ;;  %v2841_v40 = vsel %vm831_vm8, %v7414_v7, %v7359_v34  ;;  %3242 = vmatprep.subr.bf16.mxu0 %v11020_v62  ;;  %v16126_v54 = vunpack.i.h.bf16 %v10836_v1 }
 0x737   : > { %v2875_v41 = vsel %vm844_vm9, %v16125_v35, %v7314_v8  ;;  %3327 = vmatpush1.bf16.msra.mxu1 %v10932_v24  ;;  %v7417_v18 = vpop.permute.xlu0 %7416  ;;  %v11047_v39 = vpack.c.bf16 %v2841_v40, %v2840_v53  ;;  %v2828_v5 = vsel %vm831_vm8, %v7363_v38, %v7413_v33  ;;  %v2829_v50 = vsel %vm831_vm8, %v7364_v13, %v7414_v7 }
 0x738   : > { %v2887_v16 = vsel %vm844_vm9, %v7314_v8, %v16126_v54  ;;  %v7419_v35 = vunpack.i.h.bf16 %v7417_v18  ;;  %v7418_v34 = vunpack.i.l.bf16 %v7417_v18  ;;  %v11053_v22 = vpack.c.bf16 %v2829_v50, %v2828_v5  ;;  %v11061_v40 = vpop.permute.xlu1 %7376 }
 0x739   : > { %v11055_v62 = vpack.c.bf16 %v2875_v41, %v2874_v57  ;;  %v7323_v1 = vunpack.i.l.bf16 %v10876_v51  ;;  %v7369_v8 = vunpack.i.h.bf16 %v10996_v48  ;;  %v7368_v54 = vunpack.i.l.bf16 %v10996_v48  ;;  %3243 = vmatpush1.bf16.msra.mxu0 %v11047_v39 }
 0x73a   : > { %v11063_v33 = vpack.c.bf16 %v2833_v45, %v2832_v17  ;;  %v7374_v53 = vunpack.i.h.bf16 %v7372_v43  ;;  %v7373_v7 = vunpack.i.l.bf16 %v7372_v43  ;;  %3328 = vmatprep.subr.bf16.mxu1 %v11053_v22  ;;  %3244 = vmatprep.subr.bf16.mxu0 %v11013_v47  ;;  %v16128_v13 = vunpack.i.l.bf16 %v10872_v31 }
 0x73b   : > { %v16129_v38 = vunpack.i.l.bf16 %v10862_v11  ;;  %v16130_v48 = vunpack.i.h.bf16 %v10872_v31  ;;  %v16131_v41 = vunpack.i.h.bf16 %v10862_v11  ;;  %v7324_v43 = vunpack.i.h.bf16 %v10876_v51  ;;  %v7422_v45 = vpop.permute.xlu0 %7421 }
 0x73c   : > { %16127 = vst [vmem:[#allocation86_spill] sm:$0xff] %v11063_v33  ;;  %3329 = vmatpush1.bf16.msra.mxu1 %v11063_v33  ;;  %v11081_v18 = vpack.c.bf16 %v2887_v16, %v2886_v21  ;;  %v2884_v5 = vsel %vm844_vm9, %v7368_v54, %v7418_v34  ;;  %v2885_v50 = vsel %vm844_vm9, %v7369_v8, %v7419_v35  ;;  %v16133_v21 = vunpack.i.l.bf16 %v10862_v11 }
 0x73d   : > { %v2930_v57 = vsel %vm883_vm11, %v16129_v38, %v16128_v13  ;;  %v2931_v17 = vsel %vm883_vm11, %v16131_v41, %v16130_v48  ;;  %v7424_v13 = vunpack.i.h.bf16 %v7422_v45  ;;  %v7423_v38 = vunpack.i.l.bf16 %v7422_v45  ;;  %3330 = vmatprep.subr.bf16.mxu1 %v11055_v62  ;;  %v7382_v41 = vpop.permute.xlu1 %7381 }
 0x73e   : > { %v11088_v47 = vpack.c.bf16 %v2885_v50, %v2884_v5  ;;  %v11091_v48 = vpack.c.bf16 %v2879_v44, %v10960_v56  ;;  %v2934_v16 = vsel %vm883_vm11, %v7323_v1, %v16133_v21  ;;  %3245 = vmatpush1.bf16.msra.mxu0 %v11081_v18  ;;  %v11099_v33 = vpack.c.bf16 %v2931_v17, %v2930_v57 }
 0x73f   : > { %v16134_v45 = vunpack.i.l.bf16 %v10866_v0  ;;  %v2880_v56 = vsel %vm844_vm9, %v7418_v34, %v7373_v7  ;;  %v2881_v44 = vsel %vm844_vm9, %v7419_v35, %v7374_v53  ;;  %v2888_v50 = vsel %vm844_vm9, %v7423_v38, %v7368_v54  ;;  %v7427_v57 = vpop.permute.xlu0 %7426 }
 0x740   : > { %16132 = vst [vmem:[#allocation87_spill] sm:$0xff] %v11091_v48  ;;  %v2889_v21 = vsel %vm844_vm9, %v7424_v13, %v7369_v8  ;;  %3246 = vmatprep.subr.bf16.mxu0 %v11088_v47  ;;  %3331 = vmatpush1.bf16.msra.mxu1 %v11091_v48  ;;  %v2877_v34 = vsel %vm844_vm9, %v7374_v53, %v7424_v13  ;;  %v16135_v35 = vunpack.i.h.bf16 %v10866_v0  ;;  %v16136_v8 = vunpack.i.h.bf16 %v10862_v11 }
 0x741   : > { %v2922_v5 = vsel %vm883_vm11, %v16134_v45, %v7323_v1  ;;  %v11115_v17 = vpack.c.bf16 %v2889_v21, %v2888_v50  ;;  %v2876_v1 = vsel %vm844_vm9, %v7373_v7, %v7423_v38  ;;  %v7429_v51 = vunpack.i.h.bf16 %v7427_v57  ;;  %v11140_v11 = vpop.permute.xlu1 %7391 }
 0x742   : > { %v2923_v54 = vsel %vm883_vm11, %v16135_v35, %v7324_v43  ;;  %v2935_v45 = vsel %vm883_vm11, %v7324_v43, %v16136_v8  ;;  %v7428_v48 = vunpack.i.l.bf16 %v7427_v57  ;;  %v11129_v50 = vpack.c.bf16 %v2877_v34, %v2876_v1 }
 0x743   : > { %v16137_v21 = vunpack.i.l.bf16 %v10866_v0  ;;  %v16138_v7 = vunpack.i.l.bf16 %v10872_v31  ;;  %v7379_v13 = vunpack.i.h.bf16 %v11061_v40  ;;  %v7378_v38 = vunpack.i.l.bf16 %v11061_v40  ;;  %3247 = vmatpush1.bf16.msra.mxu0 %v11115_v17 }
 0x744   : > { %v11142_v43 = vpack.c.bf16 %v2881_v44, %v2880_v56  ;;  %v16140_v57 = vmov %v16135_v35  ;;  %v16141_v1 = vunpack.i.h.bf16 %v10872_v31  ;;  %v7384_v35 = vunpack.i.h.bf16 %v7382_v41  ;;  %3332 = vmatprep.subr.bf16.mxu1 %v11129_v50  ;;  %3248 = vmatprep.subr.bf16.mxu0 %v11099_v33  ;;  %v7432_v56 = vpop.permute.xlu0 %7431 }
 0x745   : > { %v2926_v53 = vsel %vm883_vm11, %v16138_v7, %v16137_v21  ;;  %v7383_v8 = vunpack.i.l.bf16 %v7382_v41  ;;  %v11152_v40 = vpack.c.bf16 %v2923_v54, %v2922_v5  ;;  %v7329_v21 = vunpack.i.h.bf16 %v10878_v52 }
 0x746   : > { %16139 = vst [vmem:[#allocation88_spill] sm:$0xff] %v11142_v43  ;;  %v2927_v34 = vsel %vm883_vm11, %v16141_v1, %v16140_v57  ;;  %3333 = vmatpush1.bf16.msra.mxu1 %v11142_v43  ;;  %v11156_v44 = vpack.c.bf16 %v2935_v45, %v2934_v16  ;;  %v2932_v0 = vsel %vm883_vm11, %v7378_v38, %v7428_v48  ;;  %v7328_v41 = vunpack.i.l.bf16 %v10878_v52  ;;  %v11170_v45 = vpop.permute.xlu1 %7441 }
 0x747   : > { %v2933_v31 = vsel %vm883_vm11, %v7379_v13, %v7429_v51  ;;  %v7434_v7 = vunpack.i.h.bf16 %v7432_v56  ;;  %v7433_v57 = vunpack.i.l.bf16 %v7432_v56  ;;  %3334 = vmatprep.subr.bf16.mxu1 %v11152_v40  ;;  %v7273_v54 = vunpack.i.l.bf16 %v10870_v12 }
 0x748   : > { %16142 = vst [vmem:[#allocation89_spill] sm:$0xff] %v11156_v44  ;;  %v11164_v5 = vpack.c.bf16 %v2933_v31, %v2932_v0  ;;  %v7334_v1 = vunpack.i.h.bf16 %v10880_v4  ;;  %v7333_v16 = vunpack.i.l.bf16 %v10880_v4  ;;  %3249 = vmatpush1.bf16.msra.mxu0 %v11156_v44  ;;  %v11172_v43 = vpack.c.bf16 %v2927_v34, %v2926_v53  ;;  %v11185_v53 = vpop.permute.xlu0 %7436 }
 0x749   : > { %v2928_v52 = vsel %vm883_vm11, %v7428_v48, %v7383_v8  ;;  %v2929_v56 = vsel %vm883_vm11, %v7429_v51, %v7384_v35  ;;  %v2936_v0 = vsel %vm883_vm11, %v7433_v57, %v7378_v38  ;;  %v2937_v31 = vsel %vm883_vm11, %v7434_v7, %v7379_v13 }
 0x74a   : > { %16143 = vst [vmem:[#allocation91_spill] sm:$0xff] %v11164_v5  ;;  %16144 = vst [vmem:[#allocation90_spill] sm:$0xff] %v11172_v43  ;;  %3250 = vmatprep.subr.bf16.mxu0 %v11164_v5  ;;  %v7268_v4 = vunpack.i.l.bf16 %v10808_v46  ;;  %3335 = vmatpush1.bf16.msra.mxu1 %v11172_v43  ;;  %v11187_v34 = vpack.c.bf16 %v2937_v31, %v2936_v0  ;;  %v2924_v48 = vsel %vm883_vm11, %v7383_v8, %v7433_v57  ;;  %v11205_v8 = vpop.permute.xlu1 %7446 }
 0x74b   : > { %v2925_v51 = vsel %vm883_vm11, %v7384_v35, %v7434_v7  ;;  %v7269_v38 = vunpack.i.h.bf16 %v10808_v46  ;;  %v2978_v13 = vsel %vm896_vm13, %v7273_v54, %v7328_v41  ;;  %v16145_v5 = vunpack.i.h.bf16 %v10870_v12 }
 0x74c   : > { %v11200_v44 = vpack.c.bf16 %v2925_v51, %v2924_v48  ;;  %v7339_v0 = vunpack.i.h.bf16 %v10882_v20  ;;  %v7338_v31 = vunpack.i.l.bf16 %v10882_v20  ;;  %3251 = vmatpush1.bf16.msra.mxu0 %v11187_v34  ;;  %v11207_v35 = vpack.c.bf16 %v2929_v56, %v2928_v52 }
 0x74d   : > { %v2979_v43 = vsel %vm896_vm13, %v16145_v5, %v7329_v21  ;;  %v2974_v46 = vsel %vm896_vm13, %v7328_v41, %v7268_v4  ;;  %v2971_v7 = vsel %vm896_vm13, %v7269_v38, %v7334_v1  ;;  %v2970_v57 = vsel %vm896_vm13, %v7268_v4, %v7333_v16  ;;  %3252 = vmatprep.subr.bf16.mxu0 %v10894_v36  ;;  %v11223_v41 = vpop.permute.xlu0 %7451 }
 0x74e   : > { %16146 = vst [vmem:[#allocation93_spill] sm:$0xff] %v11207_v35  ;;  %3336 = vmatprep.subr.bf16.mxu1 %v11200_v44  ;;  %v2975_v20 = vsel %vm896_vm13, %v7329_v21, %v7269_v38  ;;  %v7279_v5 = vunpack.i.h.bf16 %v10814_v14  ;;  %v7284_v52 = vunpack.i.h.bf16 %v10874_v9  ;;  %v7283_v56 = vunpack.i.l.bf16 %v10874_v9 }
 0x74f   : > { %3337 = vmatpush1.bf16.msra.mxu1 %v11207_v35  ;;  %v11227_v4 = vpack.c.bf16 %v10733_v37, %v10739_v27  ;;  %v7278_v48 = vunpack.i.l.bf16 %v10814_v14  ;;  %v2982_v21 = vsel %vm896_vm13, %v7333_v16, %v7273_v54  ;;  %v16148_v51 = vunpack.i.h.bf16 %v10870_v12  ;;  %v7457_v14 = vpop.permute.xlu1 %7456 }
 0x750   : > { %3338 = vmatprep.subr.bf16.mxu1 %v10898_v2  ;;  %v11237_v38 = vpack.c.bf16 %v2979_v43, %v2978_v13  ;;  %v11241_v35 = vsel %vm935_vm6, %v7283_v56, %v7338_v31  ;;  %v11245_v37 = vsel %vm935_vm6, %v7284_v52, %v7339_v0  ;;  %3253 = vmatpush1.bf16.msra.mxu0 %v10906_v10  ;;  %v7344_v12 = vunpack.i.h.bf16 %v10884_v58 }
 0x751   : > { %16147 = vst [vmem:[#allocation92_spill] sm:$0xff] %v11227_v4  ;;  %v2983_v9 = vsel %vm896_vm13, %v7334_v1, %v16148_v51  ;;  %v11248_v27 = vpack.c.bf16 %v2975_v20, %v2974_v46  ;;  %v11250_v54 = vpack.c.bf16 %v2971_v7, %v2970_v57  ;;  %v7343_v43 = vunpack.i.l.bf16 %v10884_v58  ;;  %3254 = vmatprep.subr.bf16.mxu0 %v10914_v60  ;;  %v11258_v10 = vpop.permute.xlu0 %7466 }
 0x752   : > { %16149 = vst [vmem:[#allocation96_spill] sm:$0xff] %v11237_v38  ;;  %v7459_v1 = vunpack.i.h.bf16 %v7457_v14  ;;  %v7458_v16 = vunpack.i.l.bf16 %v7457_v14  ;;  %v7389_v13 = vunpack.i.h.bf16 %v10890_v23  ;;  %v7388_v51 = vunpack.i.l.bf16 %v10890_v23 }
 0x753   : > { %16150 = vst [vmem:[#allocation94_spill] sm:$0xff] %v11248_v27  ;;  %16151 = vst [vmem:[#allocation97_spill] sm:$0xff] %v11250_v54  ;;  %3339 = vmatpush1.bf16.msra.mxu1 %v10919_v55  ;;  %v11260_v46 = vpack.c.bf16 %v2983_v9, %v2982_v21  ;;  %v3022_v7 = vsel %vm935_vm6, %v7338_v31, %v7278_v48  ;;  %v7393_v57 = vunpack.i.l.bf16 %v11140_v11  ;;  %v7448_v20 = vunpack.i.l.bf16 %v11205_v8  ;;  %v11273_v21 = vpop.permute.xlu1 %7461 }
 0x754   : > { %3340 = vmatprep.subr.bf16.mxu1 %v10923_v6  ;;  %v3023_v23 = vsel %vm935_vm6, %v7339_v0, %v7279_v5  ;;  %v7454_v14 = vunpack.i.h.bf16 %v11223_v41  ;;  %v7453_v55 = vunpack.i.l.bf16 %v11223_v41  ;;  %3255 = vmatpush1.bf16.msra.mxu0 %v10927_v61  ;;  %v2976_v31 = vsel %vm896_vm13, %v7458_v16, %v7388_v51 }
 0x755   : > { %16152 = vst [vmem:[#allocation95_spill] sm:$0xff] %v11260_v46  ;;  %v2977_v9 = vsel %vm896_vm13, %v7459_v1, %v7389_v13  ;;  %v3019_v58 = vsel %vm935_vm6, %v7279_v5, %v7344_v12  ;;  %v3018_v0 = vsel %vm935_vm6, %v7278_v48, %v7343_v43  ;;  %v7394_v6 = vunpack.i.h.bf16 %v11140_v11  ;;  %3256 = vmatprep.subr.bf16.mxu0 %v11248_v27  ;;  %v7472_v5 = vpop.permute.xlu0 %7471 }
 0x756   : > { %v3030_v41 = vsel %vm935_vm6, %v7343_v43, %v7283_v56  ;;  %v7438_v60 = vunpack.i.l.bf16 %v11185_v53  ;;  %v2980_v2 = vsel %vm896_vm13, %v7393_v57, %v7458_v16  ;;  %v3031_v48 = vsel %vm935_vm6, %v7344_v12, %v7284_v52 }
 0x757   : > { %3341 = vmatpush1.bf16.msra.mxu1 %v11227_v4  ;;  %v2981_v11 = vsel %vm896_vm13, %v7394_v6, %v7459_v1  ;;  %v7474_v27 = vunpack.i.h.bf16 %v7472_v5  ;;  %v7473_v36 = vunpack.i.l.bf16 %v7472_v5  ;;  %v11297_v56 = vpack.c.bf16 %v2977_v9, %v2976_v31  ;;  %v7482_v16 = vpop.permute.xlu1 %7481 }
 0x758   : > { %3342 = vmatprep.subr.bf16.mxu1 %v11260_v46  ;;  %3257 = vmatpush1.bf16.msra.mxu0 %v11237_v38  ;;  %v3070_v4 = vsel %vm948_vm5, %v7448_v20, %v7453_v55  ;;  %v16154_v52 = vunpack.i.h.bf16 %v11205_v8  ;;  %v7484_v9 = vunpack.i.h.bf16 %v7482_v16  ;;  %v7483_v5 = vunpack.i.l.bf16 %v7482_v16 }
 0x759   : > { %16153 = vst [vmem:[#allocation100_spill] sm:$0xff] %v11297_v56  ;;  %v2972_v1 = vsel %vm896_vm13, %v7388_v51, %v7473_v36  ;;  %v2973_v31 = vsel %vm896_vm13, %v7389_v13, %v7474_v27  ;;  %3258 = vmatprep.subr.bf16.mxu0 %v11297_v56  ;;  %v7463_v43 = vunpack.i.l.bf16 %v11273_v21  ;;  %v11315_v61 = vpop.permute.xlu0 %7476  ;;  %v11317_v38 = vpack.c.bf16 %v2981_v11, %v2980_v2 }
 0x75a   : > { %v3071_v12 = vsel %vm948_vm5, %v16154_v52, %v7454_v14  ;;  %v2984_v52 = vsel %vm896_vm13, %v7473_v36, %v7393_v57  ;;  %v2985_v51 = vsel %vm896_vm13, %v7474_v27, %v7394_v6  ;;  %v7443_v13 = vunpack.i.l.bf16 %v11170_v45 }
 0x75b   : > { %3343 = vmatpush1.bf16.msra.mxu1 %v11250_v54  ;;  %v11324_v46 = vpack.c.bf16 %v3023_v23, %v3022_v7  ;;  %v11326_v16 = vpack.c.bf16 %v2973_v31, %v2972_v1  ;;  %v11330_v56 = vpack.c.bf16 %v11245_v37, %v11241_v35  ;;  %v7464_v54 = vunpack.i.h.bf16 %v11273_v21  ;;  %v11336_v36 = vpop.permute.xlu1 %7486 }
 0x75c   : > { %3259 = vmatpush1.bf16.msra.mxu0 %v11317_v38  ;;  %v11334_v2 = vpack.c.bf16 %v2985_v51, %v2984_v52  ;;  %v3024_v27 = vsel %vm935_vm6, %v7483_v5, %v7438_v60  ;;  %v16155_v6 = vunpack.i.h.bf16 %v11185_v53  ;;  %v7444_v57 = vunpack.i.h.bf16 %v11170_v45 }
 0x75d   : > { %3260 = vmatprep.subr.bf16.mxu0 %v11324_v46  ;;  %v11346_v37 = vpack.c.bf16 %v3031_v48, %v3030_v41  ;;  %v11348_v35 = vpack.c.bf16 %v3019_v58, %v3018_v0  ;;  %v11350_v23 = vpack.c.bf16 %v3071_v12, %v3070_v4  ;;  %v16157_v21 = vunpack.i.l.bf16 %v11258_v10  ;;  %v7492_v4 = vpop.permute.xlu0 %7491 }
 0x75e   : > { %v3025_v7 = vsel %vm935_vm6, %v7484_v9, %v16155_v6  ;;  %v16158_v1 = vunpack.i.h.bf16 %v11258_v10  ;;  %v3074_v45 = vsel %vm948_vm5, %v7463_v43, %v7448_v20  ;;  %v3028_v41 = vsel %vm935_vm6, %v7443_v13, %v7483_v5  ;;  %3344 = vmatprep.subr.bf16.mxu1 %v11334_v2 }
 0x75f   : > { %16156 = vst [vmem:[#allocation98_spill] sm:$0xff] %v11350_v23  ;;  %v3066_v11 = vsel %vm948_vm5, %v7453_v55, %v16157_v21  ;;  %v3029_v58 = vsel %vm935_vm6, %v7444_v57, %v7484_v9  ;;  %3345 = vmatpush1.bf16.msra.mxu1 %v11326_v16  ;;  %v7494_v55 = vunpack.i.h.bf16 %v7492_v4  ;;  %v7493_v0 = vunpack.i.l.bf16 %v7492_v4  ;;  %v7497_v9 = vpop.permute.xlu1 %7496 }
 0x760   : > { %v3067_v31 = vsel %vm948_vm5, %v7454_v14, %v16158_v1  ;;  %v11368_v48 = vpack.c.bf16 %v3025_v7, %v3024_v27  ;;  %v16159_v14 = vunpack.i.h.bf16 %v11205_v8  ;;  %v7479_v12 = vunpack.i.h.bf16 %v11315_v61  ;;  %3346 = vmatprep.subr.bf16.mxu1 %v11346_v37  ;;  %3261 = vmatpush1.bf16.msra.mxu0 %v11330_v56 }
 0x761   : > { %v7478_v5 = vunpack.i.l.bf16 %v11315_v61  ;;  %v7488_v52 = vunpack.i.l.bf16 %v11336_v36  ;;  %v3020_v51 = vsel %vm935_vm6, %v7438_v60, %v7493_v0  ;;  %v16160_v27 = vmov %v16155_v6  ;;  %v7507_v21 = vpop.permute.xlu0 %7506 }
 0x762   : > { %v3075_v20 = vsel %vm948_vm5, %v7464_v54, %v16159_v14  ;;  %v3021_v8 = vsel %vm935_vm6, %v16160_v27, %v7494_v55  ;;  %v7499_v6 = vunpack.i.h.bf16 %v7497_v9  ;;  %v7498_v7 = vunpack.i.l.bf16 %v7497_v9  ;;  %3262 = vmatprep.subr.bf16.mxu0 %v11368_v48 }
 0x763   : > { %v7489_v61 = vunpack.i.h.bf16 %v11336_v36  ;;  %v11387_v1 = vpack.c.bf16 %v3029_v58, %v3028_v41  ;;  %v3032_v4 = vsel %vm935_vm6, %v7493_v0, %v7443_v13  ;;  %v3033_v60 = vsel %vm935_vm6, %v7494_v55, %v7444_v57  ;;  %3347 = vmatpush1.bf16.msra.mxu1 %v11348_v35  ;;  %v7502_v55 = vpop.permute.xlu1 %7501 }
 0x764   : > { %v3076_v53 = vsel %vm948_vm5, %v7488_v52, %v7498_v7  ;;  %v11396_v14 = vpack.c.bf16 %v3021_v8, %v3020_v51  ;;  %v16163_v9 = vunpack.i.l.bf16 %v11258_v10  ;;  %v16164_v41 = vunpack.i.h.bf16 %v11258_v10 }
 0x765   : > { %16161 = vst [vmem:[#allocation99_spill] sm:$0xff] %v11387_v1  ;;  %v3077_v57 = vsel %vm948_vm5, %v7489_v61, %v7499_v6  ;;  %3263 = vmatpush1.bf16.msra.mxu0 %v11387_v1  ;;  %v11409_v58 = vpack.c.bf16 %v3033_v60, %v3032_v4  ;;  %v3072_v0 = vsel %vm948_vm5, %v7498_v7, %v7478_v5  ;;  %v7508_v27 = vunpack.i.l.bf16 %v7507_v21 }
 0x766   : > { %16162 = vst [vmem:[#allocation101_spill] sm:$0xff] %v11396_v14  ;;  %v3078_v36 = vsel %vm948_vm5, %v16163_v9, %v7463_v43  ;;  %v3079_v13 = vsel %vm948_vm5, %v16164_v41, %v7464_v54  ;;  %v3073_v51 = vsel %vm948_vm5, %v7499_v6, %v7479_v12  ;;  %v7509_v43 = vunpack.i.h.bf16 %v7507_v21  ;;  %3264 = vmatprep.subr.bf16.mxu0 %v11350_v23  ;;  %v7517_v54 = vpop.permute.xlu0 %7516 }
 0x767   : > { %v7504_v10 = vunpack.i.h.bf16 %v7502_v55  ;;  %v7503_v8 = vunpack.i.l.bf16 %v7502_v55  ;;  %3348 = vmatprep.subr.bf16.mxu1 %v11409_v58  ;;  %v11417_v9 = vpack.c.bf16 %v3079_v13, %v3078_v36  ;;  %v11419_v4 = vpack.c.bf16 %v3075_v20, %v3074_v45  ;;  %v7512_v36 = vpop.permute.xlu1 %7511 }
 0x768   : > { %v11421_v60 = vpack.c.bf16 %v3073_v51, %v3072_v0  ;;  %3349 = vmatpush1.bf16.msra.mxu1 %v11396_v14  ;;  %v7519_v7 = vunpack.i.h.bf16 %v7517_v54  ;;  %v7518_v41 = vunpack.i.l.bf16 %v7517_v54  ;;  %v11430_v13 = vpack.c.bf16 %v3067_v31, %v3066_v11 }
 0x769   : > { %16165 = vst [vmem:[#allocation102_spill] sm:$0xff] %v11417_v9  ;;  %16166 = vst [vmem:[#allocation103_spill] sm:$0xff] %v11419_v4  ;;  %v3118_v6 = vsel %vm961_vm15, %v7503_v8, %v7508_v27  ;;  %v3119_v21 = vsel %vm961_vm15, %v7504_v10, %v7509_v43  ;;  %3350 = vmatprep.subr.bf16.mxu1 %v11417_v9  ;;  %3265 = vmatpush1.bf16.msra.mxu0 %v11419_v4  ;;  %v7514_v0 = vunpack.i.h.bf16 %v7512_v36 }
 0x76a   : > { %16167 = vst [vmem:[#allocation104_spill] sm:$0xff] %v11421_v60  ;;  %16168 = vst [vmem:[#allocation39_spill] sm:$0xff] %v11430_v13  ;;  %v11432_v45 = vpack.c.bf16 %v3077_v57, %v3076_v53  ;;  %v3068_v20 = vsel %vm948_vm5, %v7478_v5, %v7518_v41  ;;  %v3069_v55 = vsel %vm948_vm5, %v7479_v12, %v7519_v7  ;;  %v7513_v51 = vunpack.i.l.bf16 %v7512_v36  ;;  %v7522_v54 = vpop.permute.xlu0 %7521 }
 0x76b   : > { %3266 = vmatprep.subr.bf16.mxu0 %v11421_v60  ;;  %v3080_v9 = vsel %vm948_vm5, %v7518_v41, %v7488_v52  ;;  %v3081_v11 = vsel %vm948_vm5, %v7519_v7, %v7489_v61  ;;  %v11443_v31 = vpack.c.bf16 %v3119_v21, %v3118_v6  ;;  %v11445_v53 = vpack.c.bf16 %v3069_v55, %v3068_v20  ;;  %v8764_v52 = vld [vmem:[%s16104_s11] ss:$12 sps:$4 sm:$0xff]   ;;  %v7532_v7 = vpop.permute.xlu1 %7531 }
 0x76c   : > { %16169 = vst [vmem:[#allocation40_spill] sm:$0xff] %v11432_v45  ;;  %v3122_v5 = vsel %vm961_vm15, %v7513_v51, %v7503_v8  ;;  %v3123_v12 = vsel %vm961_vm15, %v7514_v0, %v7504_v10  ;;  %3351 = vmatpush1.bf16.msra.mxu1 %v11430_v13  ;;  %v7524_v57 = vunpack.i.h.bf16 %v7522_v54  ;;  %v7523_v36 = vunpack.i.l.bf16 %v7522_v54 }
 0x76d   : > { %16170 = vst [vmem:[#allocation41_spill] sm:$0xff] %v11443_v31  ;;  %16171 = vst [vmem:[#allocation42_spill] sm:$0xff] %v11445_v53  ;;  %3267 = vmatpush1.bf16.msra.mxu0 %v11432_v45  ;;  %v11456_v61 = vpack.c.bf16 %v3081_v11, %v3080_v9  ;;  %v11458_v41 = vpack.c.bf16 %v3123_v12, %v3122_v5  ;;  %v7534_v6 = vunpack.i.h.bf16 %v7532_v7  ;;  %v7533_v21 = vunpack.i.l.bf16 %v7532_v7 }
 0x76e   : > { %v3114_v8 = vsel %vm961_vm15, %v7508_v27, %v7523_v36  ;;  %v3115_v10 = vsel %vm961_vm15, %v7509_v43, %v7524_v57  ;;  %3279 = vmatprep.subr.bf16.mxu0 %v11443_v31  ;;  %v7527_v20 = vpop.permute.xlu0 %7526  ;;  %v3126_v9 = vsel %vm961_vm15, %v7523_v36, %v7513_v51  ;;  %v3127_v55 = vsel %vm961_vm15, %v7524_v57, %v7514_v0 }
 0x76f   : > { %16172 = vst [vmem:[#allocation44_spill] sm:$0xff] %v11456_v61  ;;  %16173 = vst [vmem:[#allocation45_spill] sm:$0xff] %v11458_v41  ;;  %3352 = vmatprep.subr.bf16.mxu1 %v11456_v61  ;;  %v7529_v54 = vunpack.i.h.bf16 %v7527_v20  ;;  %v7528_v27 = vunpack.i.l.bf16 %v7527_v20  ;;  %v11471_v11 = vpack.c.bf16 %v3127_v55, %v3126_v9  ;;  %v11473_v43 = vpack.c.bf16 %v3115_v10, %v3114_v8  ;;  %v7537_v5 = vpop.permute.xlu1 %7536 }
 0x770   : > { %3353 = vmatpush1.bf16.msra.mxu1 %v11445_v53  ;;  %3269 = vmatmul.mubr.bf16.vlgmr.msra.gmra.mrb[24].mxu0 %v8764_v52  ;;  %v7539_v51 = vunpack.i.h.bf16 %v7537_v5  ;;  %v7538_v12 = vunpack.i.l.bf16 %v7537_v5 }
 0x771   : > { %16174 = vst [vmem:[#allocation47_spill] sm:$0xff] %v11471_v11  ;;  %16175 = vst [vmem:[#allocation48_spill] sm:$0xff] %v11473_v43  ;;  %3280 = vmatpush1.bf16.msra.mxu0 %v11458_v41  ;;  %3311 = vmatprep.mubr.bf16.mxu0 %v16057_v29  ;;  %v3120_v0 = vsel %vm961_vm15, %v7533_v21, %v7528_v27  ;;  %v3121_v57 = vsel %vm961_vm15, %v7534_v6, %v7529_v54 }
 0x772   : > { %3365 = vmatprep.subr.bf16.mxu1 %v11471_v11  ;;  %v7542_v36 = vpop.permute.xlu0 %7541  ;;  %v11482_v7 = vpack.c.bf16 %v3121_v57, %v3120_v0  ;;  %v3124_v8 = vsel %vm961_vm15, %v7538_v12, %v7533_v21  ;;  %v3125_v10 = vsel %vm961_vm15, %v7539_v51, %v7534_v6 }
 0x773   : > { %3355 = vmatmul.mubr.bf16.vlgmr.msra.gmra.mrb[24].mxu1 %v8764_v52  ;;  %v7544_v20 = vunpack.i.h.bf16 %v7542_v36  ;;  %v7543_v9 = vunpack.i.l.bf16 %v7542_v36  ;;  %v11491_v55 = vpack.c.bf16 %v3125_v10, %v3124_v8  ;;  %v8767_v36 = vld [vmem:[%s16104_s11 + $0x8] ss:$12 sps:$4 sm:$0xff]   ;;  %s16368_s11 = smov 88  }
 0x774   : > { %16176 = vst [vmem:[#allocation49_spill] sm:$0xff] %v11482_v7  ;;  %3366 = vmatpush1.bf16.msra.mxu1 %v11473_v43  ;;  %3397 = vmatprep.mubr.bf16.mxu1 %v16057_v29 }
 0x775   : > { %3281 = vmatprep.subr.bf16.mxu0 %v11482_v7  ;;  %16177 = vst [vmem:[#allocation51_spill] sm:$0xff] %v11491_v55  ;;  %v3116_v52 = vsel %vm961_vm15, %v7528_v27, %v7543_v9  ;;  %v3117_v5 = vsel %vm961_vm15, %v7529_v54, %v7544_v20  ;;  %v3128_v21 = vsel %vm961_vm15, %v7543_v9, %v7538_v12 }
 0x776   : > { %v3129_v6 = vsel %vm961_vm15, %v7544_v20, %v7539_v51  ;;  %3282 = vmatpush1.bf16.msra.mxu0 %v11491_v55  ;;  %v11504_v57 = vpack.c.bf16 %v3117_v5, %v3116_v52 }
 0x777   : > { %v11502_v0 = vpack.c.bf16 %v3129_v6, %v3128_v21 }
 0x778   : > { %16179 = vst [vmem:[#allocation52_spill] sm:$0xff] %v11504_v57 }
 0x779   : > { %16178 = vst [vmem:[#allocation50_spill] sm:$0xff] %v11502_v0  ;;  %3367 = vmatprep.subr.bf16.mxu1 %v11502_v0 }
 0x77a   : > { %3368 = vmatpush1.bf16.msra.mxu1 %v11504_v57 }
 0x77c   : > { %6367 = vmatmul.mubr.msk.bf16.vlgmr.msra.gmra.mrb[24].mxu0 %vm1808_vm0, %v8767_v36 }
 0x77d   : > { %v3211_v54 = vpop.permute.xlu1 %3210 }
 0x77f   : > { %6368 = vmatmul.mubr.msk.bf16.vlgmr.msra.gmra.mrb[24].mxu1 %vm1808_vm0, %v8767_v36 }
 0x780   : > { %v3216_v8 = vpop.permute.xlu0 %3215 }
 0x84f   : > { %v3313_v27 = vpop.f32.mrb[24].mxu0 }
 0x850   : > { %v6414_v51 = vadd.f32 %v3313_v27, %v3211_v54  ;;  %v3315_v12 = vpop.f32.mrb[25].mxu0 }
 0x851   : > { %v6415_v10 = vadd.f32 %v3315_v12, %v3211_v54  ;;  %v3317_v20 = vpop.f32.mrb[26].mxu0 }
 0x852   : > { %v3408_v9 = vmax.f32 %v6414_v51, 0.0  ;;  %v3399_v52 = vpop.f32.mrb[24].mxu1  ;;  %v6416_v5 = vadd.f32 %v3317_v20, %v3216_v8  ;;  %v3319_v21 = vpop.f32.mrb[27].mxu0 }
 0x853   : > { %v3409_v6 = vmax.f32 %v6415_v10, 0.0  ;;  %v6418_v55 = vadd.f32 %v3399_v52, %v3211_v54  ;;  %v3401_v0 = vpop.f32.mrb[25].mxu1  ;;  %v6417_v43 = vadd.f32 %v3319_v21, %v3216_v8 }
 0x854   : > { %v3412_v57 = vmax.f32 %v6416_v5, 0.0  ;;  %v6419_v7 = vadd.f32 %v3401_v0, %v3211_v54  ;;  %v3403_v29 = vpop.f32.mrb[26].mxu1  ;;  %v3416_v27 = vmul.f32 %v3408_v9, %v16067_v3  ;;  %v3946_v5 = vld [vmem:[%s15321_s15] sm:$0xff] }
 0x855   : > { %v3410_v41 = vmax.f32 %v6418_v55, 0.0  ;;  %v3413_v36 = vmax.f32 %v6417_v43, 0.0  ;;  %v6420_v11 = vadd.f32 %v3403_v29, %v3216_v8  ;;  %v3405_v53 = vpop.f32.mrb[27].mxu1  ;;  %v3417_v20 = vmul.f32 %v3409_v6, %v16068_v19  ;;  %v3947_v6 = vld [vmem:[%s15321_s15 + $0x8] sm:$0xff] }
 0x856   : > { %v3420_v12 = vmul.f32 %v3412_v57, %v16067_v3  ;;  %v3411_v31 = vmax.f32 %v6419_v7, 0.0  ;;  %v6421_v51 = vadd.f32 %v3405_v53, %v3216_v8  ;;  %v8768_v8 = vld [vmem:[%s15320_s14 + $0x4] ss:$8 sps:$4 sm:$0xff]  }
 0x857   : > { %v3418_v10 = vmul.f32 %v3410_v41, %v16069_v28  ;;  %v3421_v52 = vmul.f32 %v3413_v36, %v16068_v19  ;;  %v3414_v21 = vmax.f32 %v6420_v11, 0.0  ;;  %6371 = vmatprep.mubr.msk.bf16.mxu0 %vm15672_vm10, %v8768_v8  ;;  %6372 = vmatprep.mubr.msk.bf16.mxu1 %vm15672_vm10, %v8768_v8  ;;  %v3990_v36 = vld [vmem:[%s15323_s17] sm:$0xff] }
 0x858   : > { %v3419_v0 = vmul.f32 %v3411_v31, %v16070_v63  ;;  %v3415_v54 = vmax.f32 %v6421_v51, 0.0  ;;  %v7545_v55 = vpack.i.bf16 %v3420_v12, %v3416_v27  ;;  %v11529_v11 = vpack.c.bf16 %v3420_v12, %v3416_v27  ;;  %v3991_v27 = vld [vmem:[%s15323_s17 + $0x8] sm:$0xff]  ;;  %v3992_v12 = vld [vmem:[%s15323_s17 + $0x10] sm:$0xff]  ;;  %v3993_v51 = vld [vmem:[%s15323_s17 + $0x18] sm:$0xff] }
 0x859   : > { %v3422_v29 = vmul.f32 %v3414_v21, %v16069_v28  ;;  %v7615_v43 = vpack.i.bf16 %v3421_v52, %v3417_v20  ;;  %v11525_v41 = vpack.c.bf16 %v3421_v52, %v3417_v20 }
 0x85a   : > { %v3423_v9 = vmul.f32 %v3415_v54, %v16070_v63  ;;  %7546 = vrot.lane.b32.xlu1 %v7545_v55, %s16000_s5  ;;  %16182 = vst [vmem:[#allocation55_spill] sm:$0xff] %v11529_v11 }
 0x85b   : > { %v7585_v7 = vpack.i.bf16 %v3422_v29, %v3418_v10  ;;  %16180 = vst [vmem:[#allocation53_spill] sm:$0xff] %v11525_v41  ;;  %v11531_v57 = vpack.c.bf16 %v3422_v29, %v3418_v10 }
 0x85c   : > { %v7620_v53 = vpack.i.bf16 %v3423_v9, %v3419_v0  ;;  %v11527_v31 = vpack.c.bf16 %v3423_v9, %v3419_v0 }
 0x85d   : > { %7586 = vrot.lane.b32.xlu0 %v7585_v7, %s16001_s7  ;;  %16183 = vst [vmem:[#allocation56_spill] sm:$0xff] %v11531_v57 }
 0x85e   : > { %7551 = vrot.lane.b32.xlu1 %v7585_v7, %s16000_s5  ;;  %16181 = vst [vmem:[#allocation54_spill] sm:$0xff] %v11527_v31 }
 0x861   : > { %7596 = vrot.lane.b32.xlu0 %v7585_v7, %s15922_s2 }
 0x862   : > { %7556 = vrot.lane.b32.xlu1 %v7545_v55, %s15925_s6 }
 0x865   : > { %7606 = vrot.lane.b32.xlu0 %v7585_v7, %s15936_s3 }
 0x866   : > { %7561 = vrot.lane.b32.xlu1 %v7585_v7, %s15925_s6 }
 0x869   : > { %7616 = vrot.lane.b32.xlu0 %v7615_v43, %s16000_s5 }
 0x86a   : > { %7566 = vrot.lane.b32.xlu1 %v7545_v55, %s15926_s27 }
 0x86d   : > { %7621 = vrot.lane.b32.xlu0 %v7620_v53, %s16000_s5 }
 0x86e   : > { %7571 = vrot.lane.b32.xlu1 %v7585_v7, %s15926_s27 }
 0x871   : > { %7626 = vrot.lane.b32.xlu0 %v7615_v43, %s15925_s6 }
 0x872   : > { %7576 = vrot.lane.b32.xlu1 %v7545_v55, %s15927_s28 }
 0x875   : > { %7631 = vrot.lane.b32.xlu0 %v7620_v53, %s15925_s6 }
 0x876   : > { %7581 = vrot.lane.b32.xlu1 %v7585_v7, %s15927_s28 }
 0x879   : > { %7636 = vrot.lane.b32.xlu0 %v7615_v43, %s15926_s27 }
 0x87a   : > { %7591 = vrot.lane.b32.xlu1 %v7545_v55, %s16001_s7 }
 0x87d   : > { %7641 = vrot.lane.b32.xlu0 %v7620_v53, %s15926_s27 }
 0x87e   : > { %7601 = vrot.lane.b32.xlu1 %v7545_v55, %s15922_s2 }
 0x881   : > { %7646 = vrot.lane.b32.xlu0 %v7615_v43, %s15927_s28 }
 0x882   : > { %7611 = vrot.lane.b32.xlu1 %v7545_v55, %s15936_s3 }
 0x885   : > { %7651 = vrot.lane.b32.xlu0 %v7620_v53, %s15927_s28 }
 0x886   : > { %7661 = vrot.lane.b32.xlu1 %v7615_v43, %s16001_s7 }
 0x889   : > { %7656 = vrot.lane.b32.xlu0 %v7585_v7, %s15938_s0 }
 0x88a   : > { %7671 = vrot.lane.b32.xlu1 %v7615_v43, %s15922_s2 }
 0x88d   : > { %7666 = vrot.lane.b32.xlu0 %v7620_v53, %s16001_s7 }
 0x88e   : > { %7681 = vrot.lane.b32.xlu1 %v7615_v43, %s15936_s3 }
 0x891   : > { %7676 = vrot.lane.b32.xlu0 %v7620_v53, %s15922_s2 }
 0x892   : > { %7691 = vrot.lane.b32.xlu1 %v7615_v43, %s15938_s0 }
 0x895   : > { %7686 = vrot.lane.b32.xlu0 %v7620_v53, %s15936_s3 }
 0x896   : > { %7696 = vrot.lane.b32.xlu1 %v7545_v55, %s15938_s0 }
 0x899   : > { %7701 = vrot.lane.b32.xlu0 %v7620_v53, %s15938_s0 }
 0x89a   : > { %3950 = vperm.xlu1 %6744, %v3946_v5  }
 0x89d   : > { %3955 = vperm.xlu0 %6743, %v3947_v6  }
 0x89e   : > { %3996 = vperm.xlu1 %6744, %v3990_v36  }
 0x8a1   : > { %4001 = vperm.xlu0 %6743, %v3991_v27  }
 0x8a2   : > { %4006 = vperm.xlu1 %6744, %v3992_v12  }
 0x8a5   : > { %4011 = vperm.xlu0 %6743, %v3993_v51  }
 0x8cc   : > { %v7547_v20 = vpop.permute.xlu1 %7546 }
 0x8cd   : > { %v7549_v43 = vunpack.i.h.bf16 %v7547_v20  ;;  %v7548_v9 = vunpack.i.l.bf16 %v7547_v20 }
 0x8cf   : > { %v11584_v10 = vpop.permute.xlu0 %7586 }
 0x8d0   : > { %v7552_v52 = vpop.permute.xlu1 %7551 }
 0x8d1   : > { %v7554_v36 = vunpack.i.h.bf16 %v7552_v52  ;;  %v7553_v27 = vunpack.i.l.bf16 %v7552_v52 }
 0x8d3   : > { %v11586_v21 = vpop.permute.xlu0 %7596 }
 0x8d4   : > { %v7557_v0 = vpop.permute.xlu1 %7556 }
 0x8d5   : > { %v7558_v13 = vunpack.i.l.bf16 %v7557_v0 }
 0x8d7   : > { %v11588_v54 = vpop.permute.xlu0 %7606 }
 0x8d8   : > { %v7562_v55 = vpop.permute.xlu1 %7561 }
 0x8db   : > { %v7617_v29 = vpop.permute.xlu0 %7616 }
 0x8dc   : > { %v7619_v7 = vunpack.i.h.bf16 %v7617_v29  ;;  %v7618_v53 = vunpack.i.l.bf16 %v7617_v29  ;;  %v11590_v8 = vpop.permute.xlu1 %7566 }
 0x8de   : > { %v3448_v5 = vsel %vm818_vm7, %v7548_v9, %v7618_v53  ;;  %v3449_v6 = vsel %vm818_vm7, %v7549_v43, %v7619_v7  ;;  %v3446_v20 = vsel %vm818_vm7, %v7618_v53, %v7553_v27  ;;  %v3447_v29 = vsel %vm818_vm7, %v7619_v7, %v7554_v36 }
 0x8df   : > { %v7622_v12 = vpop.permute.xlu0 %7621  ;;  %v3621_v51 = vpack.c.bf16 %v3449_v6, %v3448_v5  ;;  %v7559_v6 = vunpack.i.h.bf16 %v7557_v0  ;;  %v3622_v4 = vpack.c.bf16 %v3447_v29, %v3446_v20 }
 0x8e0   : > { %v7624_v63 = vunpack.i.h.bf16 %v7622_v12  ;;  %v7623_v28 = vunpack.i.l.bf16 %v7622_v12  ;;  %v11596_v19 = vpop.permute.xlu1 %7571 }
 0x8e1   : > { %3670 = vmatprep.subr.bf16.mxu0 %v3621_v51 }
 0x8e2   : > { %v3450_v3 = vsel %vm818_vm7, %v7623_v28, %v7548_v9  ;;  %v3451_v45 = vsel %vm818_vm7, %v7624_v63, %v7549_v43  ;;  %v3444_v52 = vsel %vm818_vm7, %v7553_v27, %v7623_v28  ;;  %v3445_v5 = vsel %vm818_vm7, %v7554_v36, %v7624_v63 }
 0x8e3   : > { %v7627_v12 = vpop.permute.xlu0 %7626  ;;  %v3620_v61 = vpack.c.bf16 %v3451_v45, %v3450_v3  ;;  %v3623_v53 = vpack.c.bf16 %v3445_v5, %v3444_v52  ;;  %v7564_v63 = vunpack.i.h.bf16 %v7562_v55  ;;  %v7563_v9 = vunpack.i.l.bf16 %v7562_v55 }
 0x8e4   : > { %v7629_v60 = vunpack.i.h.bf16 %v7627_v12  ;;  %v7628_v7 = vunpack.i.l.bf16 %v7627_v12  ;;  %v11610_v51 = vpop.permute.xlu1 %7576  ;;  %v7569_v5 = vunpack.i.h.bf16 %v11590_v8 }
 0x8e5   : > { %3671 = vmatpush1.bf16.msra.mxu0 %v3620_v61  ;;  %3713 = vmatprep.subr.bf16.mxu1 %v3623_v53 }
 0x8e6   : > { %3714 = vmatpush1.bf16.msra.mxu1 %v3622_v4  ;;  %v3472_v43 = vsel %vm831_vm8, %v7558_v13, %v7628_v7  ;;  %v3473_v28 = vsel %vm831_vm8, %v7559_v6, %v7629_v60  ;;  %v3470_v20 = vsel %vm831_vm8, %v7628_v7, %v7563_v9  ;;  %v3471_v4 = vsel %vm831_vm8, %v7629_v60, %v7564_v63 }
 0x8e7   : > { %v7632_v36 = vpop.permute.xlu0 %7631  ;;  %v3625_v3 = vpack.c.bf16 %v3473_v28, %v3472_v43  ;;  %v7568_v60 = vunpack.i.l.bf16 %v11590_v8 }
 0x8e8   : > { %v7634_v45 = vunpack.i.h.bf16 %v7632_v36  ;;  %v7633_v0 = vunpack.i.l.bf16 %v7632_v36  ;;  %v11616_v27 = vpop.permute.xlu1 %7581 }
 0x8e9   : > { %3672 = vmatprep.subr.bf16.mxu0 %v3625_v3  ;;  %v7573_v3 = vunpack.i.l.bf16 %v11596_v19 }
 0x8ea   : > { %v3474_v61 = vsel %vm831_vm8, %v7633_v0, %v7558_v13  ;;  %v3475_v29 = vsel %vm831_vm8, %v7634_v45, %v7559_v6  ;;  %v3468_v55 = vsel %vm831_vm8, %v7563_v9, %v7633_v0  ;;  %v3469_v52 = vsel %vm831_vm8, %v7564_v63, %v7634_v45 }
 0x8eb   : > { %v7637_v12 = vpop.permute.xlu0 %7636  ;;  %v3624_v53 = vpack.c.bf16 %v3475_v29, %v3474_v61  ;;  %v3627_v7 = vpack.c.bf16 %v3469_v52, %v3468_v55  ;;  %v3626_v13 = vpack.c.bf16 %v3471_v4, %v3470_v20  ;;  %v7574_v9 = vunpack.i.h.bf16 %v11596_v19 }
 0x8ec   : > { %v7639_v43 = vunpack.i.h.bf16 %v7637_v12  ;;  %v7638_v28 = vunpack.i.l.bf16 %v7637_v12  ;;  %v11632_v36 = vpop.permute.xlu1 %7591 }
 0x8ed   : > { %3673 = vmatpush1.bf16.msra.mxu0 %v3624_v53  ;;  %3715 = vmatprep.subr.bf16.mxu1 %v3627_v7  ;;  %v7579_v53 = vunpack.i.h.bf16 %v11610_v51 }
 0x8ee   : > { %3716 = vmatpush1.bf16.msra.mxu1 %v3626_v13  ;;  %v3496_v6 = vsel %vm844_vm9, %v7568_v60, %v7638_v28  ;;  %v3497_v63 = vsel %vm844_vm9, %v7569_v5, %v7639_v43  ;;  %v3494_v20 = vsel %vm844_vm9, %v7638_v28, %v7573_v3  ;;  %v3495_v4 = vsel %vm844_vm9, %v7639_v43, %v7574_v9 }
 0x8ef   : > { %v7642_v45 = vpop.permute.xlu0 %7641  ;;  %v3629_v8 = vpack.c.bf16 %v3497_v63, %v3496_v6  ;;  %v7578_v43 = vunpack.i.l.bf16 %v11610_v51  ;;  %v7589_v51 = vunpack.i.h.bf16 %v11584_v10 }
 0x8f0   : > { %v7644_v0 = vunpack.i.h.bf16 %v7642_v45  ;;  %v7643_v61 = vunpack.i.l.bf16 %v7642_v45  ;;  %v11640_v29 = vpop.permute.xlu1 %7601 }
 0x8f1   : > { %3674 = vmatprep.subr.bf16.mxu0 %v3629_v8 }
 0x8f2   : > { %v3498_v55 = vsel %vm844_vm9, %v7643_v61, %v7568_v60  ;;  %v3499_v52 = vsel %vm844_vm9, %v7644_v0, %v7569_v5  ;;  %v3492_v19 = vsel %vm844_vm9, %v7573_v3, %v7643_v61  ;;  %v3493_v12 = vsel %vm844_vm9, %v7574_v9, %v7644_v0 }
 0x8f3   : > { %v7647_v7 = vpop.permute.xlu0 %7646  ;;  %v3628_v28 = vpack.c.bf16 %v3499_v52, %v3498_v55  ;;  %v3631_v13 = vpack.c.bf16 %v3493_v12, %v3492_v19  ;;  %v3630_v60 = vpack.c.bf16 %v3495_v4, %v3494_v20  ;;  %v7584_v5 = vunpack.i.h.bf16 %v11616_v27 }
 0x8f4   : > { %v7649_v6 = vunpack.i.h.bf16 %v7647_v7  ;;  %v7648_v63 = vunpack.i.l.bf16 %v7647_v7  ;;  %v11656_v45 = vpop.permute.xlu1 %7611  ;;  %v7583_v3 = vunpack.i.l.bf16 %v11616_v27  ;;  %v7588_v0 = vunpack.i.l.bf16 %v11584_v10 }
 0x8f5   : > { %3675 = vmatpush1.bf16.msra.mxu0 %v3628_v28  ;;  %3717 = vmatprep.subr.bf16.mxu1 %v3631_v13  ;;  %v7594_v12 = vunpack.i.h.bf16 %v11632_v36  ;;  %v7593_v7 = vunpack.i.l.bf16 %v11632_v36 }
 0x8f6   : > { %3718 = vmatpush1.bf16.msra.mxu1 %v3630_v60  ;;  %v3520_v9 = vsel %vm883_vm11, %v7578_v43, %v7648_v63  ;;  %v3521_v8 = vsel %vm883_vm11, %v7579_v53, %v7649_v6  ;;  %v3518_v20 = vsel %vm883_vm11, %v7648_v63, %v7583_v3  ;;  %v3519_v4 = vsel %vm883_vm11, %v7649_v6, %v7584_v5 }
 0x8f7   : > { %v7652_v61 = vpop.permute.xlu0 %7651  ;;  %v3633_v55 = vpack.c.bf16 %v3521_v8, %v3520_v9  ;;  %v3634_v36 = vpack.c.bf16 %v3519_v4, %v3518_v20 }
 0x8f8   : > { %v7654_v27 = vunpack.i.h.bf16 %v7652_v61  ;;  %v7653_v52 = vunpack.i.l.bf16 %v7652_v61  ;;  %v7662_v19 = vpop.permute.xlu1 %7661 }
 0x8f9   : > { %3676 = vmatprep.subr.bf16.mxu0 %v3633_v55  ;;  %v7664_v28 = vunpack.i.h.bf16 %v7662_v19  ;;  %v7663_v13 = vunpack.i.l.bf16 %v7662_v19 }
 0x8fa   : > { %v3522_v10 = vsel %vm883_vm11, %v7653_v52, %v7578_v43  ;;  %v3523_v60 = vsel %vm883_vm11, %v7654_v27, %v7579_v53  ;;  %v3516_v63 = vsel %vm883_vm11, %v7583_v3, %v7653_v52  ;;  %v3517_v6 = vsel %vm883_vm11, %v7584_v5, %v7654_v27 }
 0x8fb   : > { %v11680_v9 = vpop.permute.xlu0 %7656  ;;  %v3632_v8 = vpack.c.bf16 %v3523_v60, %v3522_v10  ;;  %v3635_v61 = vpack.c.bf16 %v3517_v6, %v3516_v63  ;;  %v3544_v55 = vsel %vm896_vm13, %v7593_v7, %v7663_v13  ;;  %v3545_v43 = vsel %vm896_vm13, %v7594_v12, %v7664_v28 }
 0x8fc   : > { %v7672_v19 = vpop.permute.xlu1 %7671  ;;  %v3542_v53 = vsel %vm896_vm13, %v7663_v13, %v7588_v0  ;;  %v3543_v3 = vsel %vm896_vm13, %v7664_v28, %v7589_v51  ;;  %v7599_v5 = vunpack.i.h.bf16 %v11586_v21  ;;  %v7598_v27 = vunpack.i.l.bf16 %v11586_v21 }
 0x8fd   : > { %3677 = vmatpush1.bf16.msra.mxu0 %v3632_v8  ;;  %3719 = vmatprep.subr.bf16.mxu1 %v3635_v61  ;;  %v7674_v20 = vunpack.i.h.bf16 %v7672_v19  ;;  %v7673_v4 = vunpack.i.l.bf16 %v7672_v19  ;;  %v7604_v60 = vunpack.i.h.bf16 %v11640_v29  ;;  %v7603_v63 = vunpack.i.l.bf16 %v11640_v29 }
 0x8fe   : > { %3678 = vmatprep.subr.bf16.mxu0 %v11525_v41  ;;  %3720 = vmatpush1.bf16.msra.mxu1 %v3634_v36  ;;  %v3641_v6 = vpack.c.bf16 %v3543_v3, %v3542_v53  ;;  %v3640_v8 = vpack.c.bf16 %v3545_v43, %v3544_v55  ;;  %v7659_v55 = vunpack.i.h.bf16 %v11680_v9  ;;  %v16185_v41 = vunpack.i.h.bf16 %v11656_v45 }
 0x8ff   : > { %v7667_v21 = vpop.permute.xlu0 %7666  ;;  %3721 = vmatprep.subr.bf16.mxu1 %v11527_v31  ;;  %v3566_v10 = vsel %vm935_vm6, %v7673_v4, %v7598_v27  ;;  %v3567_v29 = vsel %vm935_vm6, %v7674_v20, %v7599_v5  ;;  %v3568_v36 = vsel %vm935_vm6, %v7603_v63, %v7673_v4  ;;  %v3569_v28 = vsel %vm935_vm6, %v7604_v60, %v7674_v20 }
 0x900   : > { %v7669_v61 = vunpack.i.h.bf16 %v7667_v21  ;;  %v7668_v19 = vunpack.i.l.bf16 %v7667_v21  ;;  %v7682_v52 = vpop.permute.xlu1 %7681  ;;  %v16184_v20 = vunpack.i.l.bf16 %v11656_v45  ;;  %v3645_v31 = vpack.c.bf16 %v3567_v29, %v3566_v10 }
 0x901   : > { %3679 = vmatpush1.bf16.msra.mxu0 %v11529_v11  ;;  %v7684_v13 = vunpack.i.h.bf16 %v7682_v52  ;;  %v7683_v53 = vunpack.i.l.bf16 %v7682_v52 }
 0x902   : > { %v3541_v43 = vsel %vm896_vm13, %v7589_v51, %v7669_v61  ;;  %v3540_v3 = vsel %vm896_vm13, %v7588_v0, %v7668_v19  ;;  %3680 = vmatprep.subr.bf16.mxu0 %v3641_v6  ;;  %3722 = vmatpush1.bf16.msra.mxu1 %v11531_v57  ;;  %v3546_v4 = vsel %vm896_vm13, %v7668_v19, %v7593_v7 }
 0x903   : > { %v3592_v21 = vsel %vm948_vm5, %v16184_v20, %v7683_v53  ;;  %v7677_v52 = vpop.permute.xlu0 %7676  ;;  %v3547_v11 = vsel %vm896_vm13, %v7669_v61, %v7594_v12  ;;  %v3642_v51 = vpack.c.bf16 %v3541_v43, %v3540_v3  ;;  %v3593_v0 = vsel %vm948_vm5, %v16185_v41, %v7684_v13 }
 0x904   : > { %v7679_v6 = vunpack.i.h.bf16 %v7677_v52  ;;  %v7678_v57 = vunpack.i.l.bf16 %v7677_v52  ;;  %v3643_v14 = vpack.c.bf16 %v3547_v11, %v3546_v4  ;;  %v7692_v7 = vpop.permute.xlu1 %7691  ;;  %v16186_v20 = vunpack.i.l.bf16 %v11588_v54 }
 0x905   : > { %3681 = vmatpush1.bf16.msra.mxu0 %v3640_v8  ;;  %v7694_v19 = vunpack.i.h.bf16 %v7692_v7  ;;  %v7693_v23 = vunpack.i.l.bf16 %v7692_v7  ;;  %v16187_v12 = vunpack.i.h.bf16 %v11588_v54  ;;  %v7658_v61 = vunpack.i.l.bf16 %v11680_v9 }
 0x906   : > { %v3590_v1 = vsel %vm948_vm5, %v7683_v53, %v16186_v20  ;;  %v3565_v41 = vsel %vm935_vm6, %v7599_v5, %v7679_v6  ;;  %v3564_v11 = vsel %vm935_vm6, %v7598_v27, %v7678_v57  ;;  %3723 = vmatprep.subr.bf16.mxu1 %v3643_v14  ;;  %3682 = vmatprep.subr.bf16.mxu0 %v3645_v31  ;;  %v16191_v54 = vunpack.i.h.bf16 %v11656_v45 }
 0x907   : > { %v3591_v10 = vsel %vm948_vm5, %v7684_v13, %v16187_v12  ;;  %v3570_v8 = vsel %vm935_vm6, %v7678_v57, %v7603_v63  ;;  %3724 = vmatpush1.bf16.msra.mxu1 %v3642_v51  ;;  %v7687_v29 = vpop.permute.xlu0 %7686  ;;  %v3644_v53 = vpack.c.bf16 %v3569_v28, %v3568_v36  ;;  %v3571_v43 = vsel %vm935_vm6, %v7679_v6, %v7604_v60 }
 0x908   : > { %v3646_v13 = vpack.c.bf16 %v3565_v41, %v3564_v11  ;;  %v3648_v3 = vpack.c.bf16 %v3593_v0, %v3592_v21  ;;  %v7689_v9 = vunpack.i.h.bf16 %v7687_v29  ;;  %v7688_v4 = vunpack.i.l.bf16 %v7687_v29  ;;  %v7697_v5 = vpop.permute.xlu1 %7696 }
 0x909   : > { %v3647_v52 = vpack.c.bf16 %v3571_v43, %v3570_v8  ;;  %v3649_v7 = vpack.c.bf16 %v3591_v10, %v3590_v1  ;;  %3683 = vmatpush1.bf16.msra.mxu0 %v3644_v53  ;;  %v7699_v27 = vunpack.i.h.bf16 %v7697_v5  ;;  %v7698_v14 = vunpack.i.l.bf16 %v7697_v5  ;;  %v16216_v5 = vld [vmem:[#allocation96_spill] sm:$0xff] }
 0x90a   : > { %v3614_v31 = vsel %vm961_vm15, %v7693_v23, %v7658_v61  ;;  %v3615_v57 = vsel %vm961_vm15, %v7694_v19, %v7659_v55  ;;  %v16188_v63 = vmov %v16187_v12  ;;  %v16189_v28 = vmov %v16186_v20 }
 0x90b   : > { %v3589_v60 = vsel %vm948_vm5, %v16188_v63, %v7689_v9  ;;  %v3588_v36 = vsel %vm948_vm5, %v16189_v28, %v7688_v4  ;;  %3725 = vmatprep.subr.bf16.mxu1 %v3647_v52  ;;  %3684 = vmatprep.subr.bf16.mxu0 %v3649_v7  ;;  %v16190_v1 = vunpack.i.l.bf16 %v11656_v45  ;;  %v3616_v51 = vsel %vm961_vm15, %v7698_v14, %v7693_v23  ;;  %v7702_v6 = vpop.permute.xlu0 %7701  ;;  %v16213_v52 = vld [vmem:[#allocation94_spill] sm:$0xff]  ;;  %v16217_v7 = vld [vmem:[#allocation100_spill] sm:$0xff]  ;;  %v16230_v63 = vld [vmem:[#allocation47_spill] sm:$0xff] }
 0x90c   : > { %v3617_v0 = vsel %vm961_vm15, %v7699_v27, %v7694_v19  ;;  %3726 = vmatpush1.bf16.msra.mxu1 %v3646_v13  ;;  %v3595_v20 = vsel %vm948_vm5, %v7689_v9, %v16191_v54  ;;  %v3650_v12 = vpack.c.bf16 %v3589_v60, %v3588_v36  ;;  %v7704_v10 = vunpack.i.h.bf16 %v7702_v6  ;;  %v16194_v9 = vld [vmem:[#allocation82_spill] sm:$0xff]  ;;  %v16231_v60 = vld [vmem:[#allocation45_spill] sm:$0xff] }
 0x90d   : > { %v3594_v21 = vsel %vm948_vm5, %v7688_v4, %v16190_v1  ;;  %v7703_v41 = vunpack.i.l.bf16 %v7702_v6  ;;  %v3653_v8 = vpack.c.bf16 %v3615_v57, %v3614_v31  ;;  %3685 = vmatpush1.bf16.msra.mxu0 %v3648_v3  ;;  %v3652_v29 = vpack.c.bf16 %v3617_v0, %v3616_v51  ;;  %v8770_v3 = vld [vmem:[%s15320_s14] ss:$8 sps:$4 sm:$0xff]   ;;  %v16234_v1 = vld [vmem:[#allocation48_spill] sm:$0xff]  ;;  %v16236_v51 = vld [vmem:[#allocation51_spill] sm:$0xff] }
 0x90e   : > { %v3651_v11 = vpack.c.bf16 %v3595_v20, %v3594_v21  ;;  %v3613_v19 = vsel %vm961_vm15, %v7659_v55, %v7704_v10  ;;  %v3619_v53 = vsel %vm961_vm15, %v7704_v10, %v7699_v27  ;;  %v8773_v55 = vld [vmem:[%s16192_s13 + $0x4] ss:$12 sps:$4 sm:$0xff]   ;;  %v16212_v4 = vld [vmem:[#allocation78_spill] sm:$0xff]  ;;  %v16232_v28 = vmov 0   ;;  %v16237_v0 = vld [vmem:[#allocation52_spill] sm:$0xff] }
 0x90f   : > { %v3612_v23 = vsel %vm961_vm15, %v7658_v61, %v7703_v41  ;;  %3686 = vmatprep.subr.bf16.mxu0 %v3653_v8  ;;  %v3618_v45 = vsel %vm961_vm15, %v7703_v41, %v7698_v14  ;;  %v16193_v61 = vld [vmem:[#allocation84_spill] sm:$0xff]  ;;  %v16218_v27 = vld [vmem:[#allocation97_spill] sm:$0xff]  ;;  %v16219_v14 = vld [vmem:[#allocation99_spill] sm:$0xff] }
 0x910   : > { %3727 = vmatprep.subr.bf16.mxu1 %v3651_v11  ;;  %v3654_v43 = vpack.c.bf16 %v3613_v19, %v3612_v23  ;;  %v3655_v13 = vpack.c.bf16 %v3619_v53, %v3618_v45  ;;  %v16220_v31 = vld [vmem:[#allocation98_spill] sm:$0xff]  ;;  %v16233_v36 = vld [vmem:[#allocation49_spill] sm:$0xff]  ;;  %v16241_v10 = vld [vmem:[#allocation56_spill] sm:$0xff] }
 0x911   : > { %3728 = vmatpush1.bf16.msra.mxu1 %v3650_v12  ;;  %3687 = vmatpush1.bf16.msra.mxu0 %v3652_v29  ;;  %v16229_v57 = vld [vmem:[#allocation42_spill] sm:$0xff]  ;;  %v16238_v54 = vld [vmem:[#allocation53_spill] sm:$0xff]  ;;  %v16240_v12 = vld [vmem:[#allocation55_spill] sm:$0xff] }
 0x912   : > { %3729 = vmatprep.subr.bf16.mxu1 %v3655_v13  ;;  %3774 = vmatprep.subr.bf16.mxu0 %v10834_v49  ;;  %v16195_v49 = vld [vmem:[#allocation83_spill] sm:$0xff]  ;;  %v16235_v21 = vld [vmem:[#allocation50_spill] sm:$0xff] }
 0x913   : > { %v8774_v6 = vld [vmem:[%s16192_s13 + $0x8] ss:$12 sps:$4 sm:$0xff]  }
 0x914   : > { %3703 = vmatmul.mubr.bf16.vlgmr.msra.gmra.mrb[28].mxu0 %v8770_v3  ;;  %v16239_v20 = vld [vmem:[#allocation54_spill] sm:$0xff] }
 0x915   : > { %3730 = vmatpush1.bf16.msra.mxu1 %v3654_v43  ;;  %3775 = vmatpush1.bf16.msra.mxu0 %v10847_v42  ;;  %v16197_v42 = vld [vmem:[#allocation85_spill] sm:$0xff] }
 0x916   : > { %3860 = vmatprep.subr.bf16.mxu1 %v10853_v25  ;;  %3806 = vmatprep.mubr.bf16.mxu0 %v8773_v55  ;;  %v16196_v25 = vld [vmem:[#allocation80_spill] sm:$0xff] }
 0x917   : > { %3776 = vmatprep.subr.bf16.mxu0 %v10954_v59  ;;  %v16198_v59 = vld [vmem:[#allocation81_spill] sm:$0xff] }
 0x918   : > { %3746 = vmatmul.mubr.bf16.vlgmr.msra.gmra.mrb[28].mxu1 %v8770_v3 }
 0x919   : > { %3861 = vmatpush1.bf16.msra.mxu1 %v10858_v32  ;;  %3892 = vmatprep.mubr.bf16.mxu1 %v8773_v55  ;;  %v16199_v32 = vld [vmem:[#allocation86_spill] sm:$0xff]  ;;  %v3951_v41 = vpop.permute.xlu1 %3950 }
 0x91a   : > { %3862 = vmatprep.subr.bf16.mxu1 %v10990_v26  ;;  %3777 = vmatpush1.bf16.msra.mxu0 %v16193_v61  ;;  %v16203_v26 = vld [vmem:[#allocation91_spill] sm:$0xff] }
 0x91b   : > { %3778 = vmatprep.subr.bf16.mxu0 %v16194_v9 }
 0x91c   : > { %v3956_v8 = vpop.permute.xlu0 %3955 }
 0x91d   : > { %3863 = vmatpush1.bf16.msra.mxu1 %v16195_v49 }
 0x91e   : > { %3864 = vmatprep.subr.bf16.mxu1 %v10962_v30  ;;  %3779 = vmatpush1.bf16.msra.mxu0 %v16196_v25  ;;  %v16200_v30 = vld [vmem:[#allocation87_spill] sm:$0xff] }
 0x91f   : > { %3780 = vmatprep.subr.bf16.mxu0 %v16197_v42 }
 0x921   : > { %3865 = vmatpush1.bf16.msra.mxu1 %v10932_v24  ;;  %v16201_v24 = vld [vmem:[#allocation88_spill] sm:$0xff] }
 0x922   : > { %3866 = vmatprep.subr.bf16.mxu1 %v11053_v22  ;;  %3781 = vmatpush1.bf16.msra.mxu0 %v11047_v39  ;;  %v16202_v22 = vld [vmem:[#allocation89_spill] sm:$0xff] }
 0x923   : > { %3782 = vmatprep.subr.bf16.mxu0 %v16198_v59  ;;  %v16206_v39 = vld [vmem:[#allocation93_spill] sm:$0xff] }
 0x925   : > { %3867 = vmatpush1.bf16.msra.mxu1 %v16199_v32 }
 0x926   : > { %3868 = vmatprep.subr.bf16.mxu1 %v11055_v62  ;;  %3783 = vmatpush1.bf16.msra.mxu0 %v11081_v18  ;;  %v16204_v62 = vld [vmem:[#allocation90_spill] sm:$0xff] }
 0x927   : > { %3784 = vmatprep.subr.bf16.mxu0 %v11088_v47  ;;  %v16205_v47 = vld [vmem:[#allocation73_spill] sm:$0xff]  ;;  %v16207_v18 = vld [vmem:[#allocation74_spill] sm:$0xff] }
 0x929   : > { %3869 = vmatpush1.bf16.msra.mxu1 %v16200_v30 }
 0x92a   : > { %3870 = vmatprep.subr.bf16.mxu1 %v11129_v50  ;;  %3785 = vmatpush1.bf16.msra.mxu0 %v11115_v17  ;;  %v16209_v17 = vld [vmem:[#allocation75_spill] sm:$0xff] }
 0x92b   : > { %3786 = vmatprep.subr.bf16.mxu0 %v11099_v33  ;;  %v16208_v33 = vld [vmem:[#allocation76_spill] sm:$0xff]  ;;  %v16210_v50 = vld [vmem:[#allocation79_spill] sm:$0xff] }
 0x92d   : > { %3871 = vmatpush1.bf16.msra.mxu1 %v16201_v24 }
 0x92e   : > { %3872 = vmatprep.subr.bf16.mxu1 %v11152_v40  ;;  %3787 = vmatpush1.bf16.msra.mxu0 %v16202_v22  ;;  %v16211_v40 = vld [vmem:[#allocation77_spill] sm:$0xff] }
 0x92f   : > { %3788 = vmatprep.subr.bf16.mxu0 %v16203_v26 }
 0x931   : > { %3873 = vmatpush1.bf16.msra.mxu1 %v16204_v62 }
 0x932   : > { %3874 = vmatprep.subr.bf16.mxu1 %v11200_v44  ;;  %3789 = vmatpush1.bf16.msra.mxu0 %v11187_v34  ;;  %v16214_v44 = vld [vmem:[#allocation92_spill] sm:$0xff]  ;;  %v16215_v34 = vld [vmem:[#allocation95_spill] sm:$0xff] }
 0x933   : > { %3790 = vmatprep.subr.bf16.mxu0 %v16205_v47 }
 0x935   : > { %3875 = vmatpush1.bf16.msra.mxu1 %v16206_v39 }
 0x936   : > { %3876 = vmatprep.subr.bf16.mxu1 %v16207_v18  ;;  %3791 = vmatpush1.bf16.msra.mxu0 %v16208_v33 }
 0x937   : > { %3792 = vmatprep.subr.bf16.mxu0 %v16209_v17 }
 0x939   : > { %3877 = vmatpush1.bf16.msra.mxu1 %v16210_v50 }
 0x93a   : > { %3878 = vmatprep.subr.bf16.mxu1 %v16211_v40  ;;  %3793 = vmatpush1.bf16.msra.mxu0 %v16212_v4 }
 0x93b   : > { %3794 = vmatprep.subr.bf16.mxu0 %v16213_v52  ;;  %v16244_v52 = vld [vmem:[#allocation38_spill] sm:$0xff] }
 0x93d   : > { %3879 = vmatpush1.bf16.msra.mxu1 %v16214_v44 }
 0x93e   : > { %3880 = vmatprep.subr.bf16.mxu1 %v16215_v34  ;;  %3795 = vmatpush1.bf16.msra.mxu0 %v16216_v5 }
 0x93f   : > { %3796 = vmatprep.subr.bf16.mxu0 %v16217_v7  ;;  %v16245_v7 = vld [vmem:[#allocation46_spill] sm:$0xff] }
 0x941   : > { %3881 = vmatpush1.bf16.msra.mxu1 %v16218_v27 }
 0x942   : > { %3882 = vmatprep.subr.bf16.mxu1 %v11334_v2  ;;  %3797 = vmatpush1.bf16.msra.mxu0 %v11317_v38  ;;  %v16221_v2 = vld [vmem:[#allocation101_spill] sm:$0xff]  ;;  %v16222_v38 = vld [vmem:[#allocation102_spill] sm:$0xff] }
 0x943   : > { %3798 = vmatprep.subr.bf16.mxu0 %v11324_v46  ;;  %v16223_v46 = vld [vmem:[#allocation103_spill] sm:$0xff] }
 0x945   : > { %3883 = vmatpush1.bf16.msra.mxu1 %v11326_v16  ;;  %v16224_v16 = vld [vmem:[#allocation104_spill] sm:$0xff] }
 0x946   : > { %3884 = vmatprep.subr.bf16.mxu1 %v11346_v37  ;;  %3799 = vmatpush1.bf16.msra.mxu0 %v11330_v56  ;;  %v16225_v37 = vld [vmem:[#allocation39_spill] sm:$0xff]  ;;  %v16226_v56 = vld [vmem:[#allocation44_spill] sm:$0xff] }
 0x947   : > { %3800 = vmatprep.subr.bf16.mxu0 %v11368_v48  ;;  %v16227_v48 = vld [vmem:[#allocation40_spill] sm:$0xff] }
 0x949   : > { %3885 = vmatpush1.bf16.msra.mxu1 %v11348_v35  ;;  %v8771_v35 = vld [vmem:[%s16192_s13] ss:$12 sps:$4 sm:$0xff]   ;;  %s16356_s13 = smov 89  }
 0x94a   : > { %3886 = vmatprep.subr.bf16.mxu1 %v11409_v58  ;;  %3801 = vmatpush1.bf16.msra.mxu0 %v16219_v14  ;;  %v16228_v58 = vld [vmem:[#allocation41_spill] sm:$0xff] }
 0x94b   : > { %3802 = vmatprep.subr.bf16.mxu0 %v16220_v31 }
 0x94d   : > { %3887 = vmatpush1.bf16.msra.mxu1 %v16221_v2 }
 0x94e   : > { %3888 = vmatprep.subr.bf16.mxu1 %v16222_v38  ;;  %3803 = vmatpush1.bf16.msra.mxu0 %v16223_v46  ;;  %v8775_v46 = vld [vmem:[%s15322_s16] sm:$0xff]  }
 0x94f   : > { %3804 = vmatprep.subr.bf16.mxu0 %v16224_v16  ;;  %v8776_v16 = vld [vmem:[%s15322_s16 + $0x8] sm:$0xff]  }
 0x951   : > { %3889 = vmatpush1.bf16.msra.mxu1 %v16225_v37  ;;  %v3997_v37 = vpop.permute.xlu1 %3996 }
 0x952   : > { %3890 = vmatprep.subr.bf16.mxu1 %v16226_v56  ;;  %3805 = vmatpush1.bf16.msra.mxu0 %v16227_v48 }
 0x953   : > { %3817 = vmatprep.subr.bf16.mxu0 %v16228_v58 }
 0x955   : > { %3891 = vmatpush1.bf16.msra.mxu1 %v16229_v57  ;;  %3807 = vmatmul.mubr.bf16.vlgmr.msra.gmra.mrb[28].mxu0 %v8771_v35 }
 0x956   : > { %3903 = vmatprep.subr.bf16.mxu1 %v16230_v63  ;;  %3818 = vmatpush1.bf16.msra.mxu0 %v16231_v60 }
 0x957   : > { %3849 = vmatprep.mubr.bf16.mxu0 %v16232_v28  ;;  %3819 = vmatprep.subr.bf16.mxu0 %v16233_v36  ;;  %v16246_v36 = vld [vmem:[#allocation57_spill] sm:$0xff] }
 0x958   : > { %3893 = vmatmul.mubr.bf16.vlgmr.msra.gmra.mrb[28].mxu1 %v8771_v35  ;;  %v4002_v35 = vpop.permute.xlu0 %4001 }
 0x959   : > { %3904 = vmatpush1.bf16.msra.mxu1 %v16234_v1  ;;  %3935 = vmatprep.mubr.bf16.mxu1 %v16232_v28 }
 0x95a   : > { %3905 = vmatprep.subr.bf16.mxu1 %v16235_v21  ;;  %3820 = vmatpush1.bf16.msra.mxu0 %v16236_v51 }
 0x95b   : > { %4030 = vmatprep.subr.bf16.mxu0 %v16205_v47  ;;  %v16242_v47 = vld [vmem:[#allocation37_spill] sm:$0xff] }
 0x95d   : > { %3906 = vmatpush1.bf16.msra.mxu1 %v16237_v0 }
 0x95e   : > { %4083 = vmatprep.subr.bf16.mxu1 %v16207_v18 }
 0x961   : > { %6376 = vmatmul.mubr.msk.bf16.vlgmr.msra.gmra.mrb[28].mxu0 %vm1808_vm0, %v8774_v6 }
 0x962   : > { %4031 = vmatpush1.bf16.msra.mxu0 %v16208_v33  ;;  %4062 = vmatprep.mubr.bf16.mxu0 %v16232_v28 }
 0x963   : > { %4032 = vmatprep.subr.bf16.mxu0 %v16209_v17  ;;  %v16243_v17 = vld [vmem:[#allocation43_spill] sm:$0xff] }
 0x964   : > { %6377 = vmatmul.mubr.msk.bf16.vlgmr.msra.gmra.mrb[28].mxu1 %vm1808_vm0, %v8774_v6 }
 0x965   : > { %4084 = vmatpush1.bf16.msra.mxu1 %v16210_v50  ;;  %4115 = vmatprep.mubr.bf16.mxu1 %v16232_v28 }
 0x966   : > { %4085 = vmatprep.subr.bf16.mxu1 %v16211_v40  ;;  %4033 = vmatpush1.bf16.msra.mxu0 %v16212_v4 }
 0x967   : > { %4034 = vmatprep.subr.bf16.mxu0 %v16238_v54  ;;  %v16247_v54 = vld [vmem:[#allocation65_spill] sm:$0xff] }
 0x969   : > { %4086 = vmatpush1.bf16.msra.mxu1 %v16214_v44 }
 0x96a   : > { %4087 = vmatprep.subr.bf16.mxu1 %v16239_v20  ;;  %4035 = vmatpush1.bf16.msra.mxu0 %v16240_v12 }
 0x96d   : > { %4088 = vmatpush1.bf16.msra.mxu1 %v16241_v10 }
 0xa34   : > { %v3851_v11 = vpop.f32.mrb[28].mxu0 }
 0xa35   : > { %v3958_v29 = vadd.f32 %v3951_v41, %v3851_v11  ;;  %v3853_v23 = vpop.f32.mrb[29].mxu0  ;;  %v16248_v11 = vld [vmem:[#allocation58_spill] sm:$0xff] }
 0xa36   : > { %v3959_v19 = vadd.f32 %v3951_v41, %v3853_v23  ;;  %v3855_v53 = vpop.f32.mrb[30].mxu0 }
 0xa37   : > { %v3937_v45 = vpop.f32.mrb[28].mxu1  ;;  %v3966_v43 = vmax.f32 %v3958_v29, 0.0  ;;  %v3962_v3 = vadd.f32 %v3956_v8, %v3855_v53  ;;  %v3857_v61 = vpop.f32.mrb[31].mxu0  ;;  %v16249_v29 = vld [vmem:[#allocation59_spill] sm:$0xff] }
 0xa38   : > { %v3960_v13 = vadd.f32 %v3951_v41, %v3937_v45  ;;  %v3939_v55 = vpop.f32.mrb[29].mxu1  ;;  %v3967_v9 = vmax.f32 %v3959_v19, 0.0  ;;  %v3963_v25 = vadd.f32 %v3956_v8, %v3857_v61  ;;  %v16250_v53 = vld [vmem:[#allocation63_spill] sm:$0xff] }
 0xa39   : > { %v3961_v49 = vadd.f32 %v3951_v41, %v3939_v55  ;;  %v3941_v42 = vpop.f32.mrb[30].mxu1  ;;  %v3970_v32 = vmax.f32 %v3962_v3, 0.0  ;;  %v3974_v39 = vmul.f32 %v3966_v43, %v16242_v47 }
 0xa3a   : > { %v3968_v59 = vmax.f32 %v3960_v13, 0.0  ;;  %v3964_v30 = vadd.f32 %v3956_v8, %v3941_v42  ;;  %v3943_v24 = vpop.f32.mrb[31].mxu1  ;;  %v3971_v26 = vmax.f32 %v3963_v25, 0.0  ;;  %v3975_v50 = vmul.f32 %v3967_v9, %v16243_v17  ;;  %v16251_v13 = vld [vmem:[#allocation60_spill] sm:$0xff] }
 0xa3b   : > { %v3969_v22 = vmax.f32 %v3961_v49, 0.0  ;;  %v3965_v62 = vadd.f32 %v3956_v8, %v3943_v24  ;;  %v3978_v18 = vmul.f32 %v3970_v32, %v16242_v47  ;;  %v16255_v25 = vld [vmem:[#allocation64_spill] sm:$0xff] }
 0xa3c   : > { %v3972_v33 = vmax.f32 %v3964_v30, 0.0  ;;  %v3979_v40 = vmul.f32 %v3971_v26, %v16243_v17  ;;  %v3976_v44 = vmul.f32 %v3968_v59, %v16244_v52  ;;  %v4007_v59 = vpop.permute.xlu1 %4006 }
 0xa3d   : > { %v3973_v4 = vmax.f32 %v3965_v62, 0.0  ;;  %v3982_v34 = vpack.c.bf16 %v3978_v18, %v3974_v39  ;;  %v3977_v27 = vmul.f32 %v3969_v22, %v16245_v7  ;;  %v16259_v22 = vld [vmem:[#allocation62_spill] sm:$0xff]  ;;  %v4012_v39 = vpop.permute.xlu0 %4011 }
 0xa3e   : > { %v3980_v5 = vmul.f32 %v3972_v33, %v16244_v52  ;;  %v3983_v31 = vpack.c.bf16 %v3979_v40, %v3975_v50 }
 0xa3f   : > { %v3981_v14 = vmul.f32 %v3973_v4, %v16245_v7 }
 0xa40   : > { %v3984_v2 = vpack.c.bf16 %v3980_v5, %v3976_v44  ;;  %4036 = vmatprep.subr.bf16.mxu0 %v3983_v31 }
 0xa41   : > { %v3985_v38 = vpack.c.bf16 %v3981_v14, %v3977_v27  ;;  %4037 = vmatpush1.bf16.msra.mxu0 %v3982_v34  ;;  %v16262_v27 = vld [vmem:[#allocation61_spill] sm:$0xff] }
 0xa43   : > { %4089 = vmatprep.subr.bf16.mxu1 %v3985_v38 }
 0xa44   : > { %4090 = vmatpush1.bf16.msra.mxu1 %v3984_v2  ;;  %6380 = vmatmul.mubr.msk.bf16.vlgmr.msra.gmra.mrb[32].mxu0 %vm2601_vm14, %v8775_v46 }
 0xa45   : > { %4072 = vmatprep.mubr.bf16.mxu0 %v16232_v28 }
 0xa47   : > { %6382 = vmatmul.mubr.msk.bf16.vlgmr.msra.gmra.mrb[32].mxu1 %vm2601_vm14, %v8775_v46 }
 0xa48   : > { %4125 = vmatprep.mubr.bf16.mxu1 %v16232_v28 }
 0xa4c   : > { %6381 = vmatmul.mubr.msk.bf16.gmra.mrb[36].mxu0 %vm2601_vm14, %v8776_v16 }
 0xa4f   : > { %6383 = vmatmul.mubr.msk.bf16.gmra.mrb[36].mxu1 %vm2601_vm14, %v8776_v16  ;;  %v16264_v16 = vld [vmem:[#allocation70_spill] sm:$0xff]  ;;  %vm16377_vm14 = vcmp.lt.s32.totalorder %v9086_v15, 18 }
 0xa50   : > { %vm16380_vm10 = vmmov %vm16377_vm14 }
 0xb17   : > { %v4064_v56 = vpop.f32.mrb[32].mxu0 }
 0xb18   : > { %v4065_v48 = vadd.f32 %v4064_v56, %v3997_v37  ;;  %v4066_v58 = vpop.f32.mrb[33].mxu0 }
 0xb19   : > { %v4067_v57 = vadd.f32 %v4066_v58, %v3997_v37  ;;  %v4068_v60 = vpop.f32.mrb[34].mxu0 }
 0xb1a   : > { %v4117_v63 = vpop.f32.mrb[32].mxu1  ;;  %v4136_v1 = vadd.f32 %v4065_v48, %v16246_v36  ;;  %v4069_v51 = vadd.f32 %v4068_v60, %v4002_v35  ;;  %v4070_v6 = vpop.f32.mrb[35].mxu0  ;;  %v16267_v36 = vld [vmem:[#allocation66_spill] sm:$0xff] }
 0xb1b   : > { %v4118_v21 = vadd.f32 %v4117_v63, %v3997_v37  ;;  %v4119_v0 = vpop.f32.mrb[33].mxu1  ;;  %v4137_v20 = vadd.f32 %v4067_v57, %v16247_v54  ;;  %v4071_v10 = vadd.f32 %v4070_v6, %v4002_v35  ;;  %v16266_v63 = vld [vmem:[#allocation68_spill] sm:$0xff]  ;;  %v16269_v6 = vld [vmem:[#allocation71_spill] sm:$0xff] }
 0xb1c   : > { %v4120_v12 = vadd.f32 %v4119_v0, %v3997_v37  ;;  %v4121_v41 = vpop.f32.mrb[34].mxu1  ;;  %v4140_v23 = vadd.f32 %v4069_v51, %v16249_v29  ;;  %v11905_v61 = vmul.f32 %v4136_v1, %v16242_v47 }
 0xb1d   : > { %v4138_v8 = vadd.f32 %v4118_v21, %v16248_v11  ;;  %v4122_v19 = vadd.f32 %v4121_v41, %v4002_v35  ;;  %v4123_v45 = vpop.f32.mrb[35].mxu1  ;;  %v4141_v3 = vadd.f32 %v4071_v10, %v16251_v13  ;;  %v11908_v9 = vmul.f32 %v4137_v20, %v16243_v17  ;;  %v16270_v20 = vld [vmem:[#allocation69_spill] sm:$0xff] }
 0xb1e   : > { %v4139_v43 = vadd.f32 %v4120_v12, %v16250_v53  ;;  %v4124_v55 = vadd.f32 %v4123_v45, %v4002_v35  ;;  %16252 = vst [vmem:[#allocation84_spill] sm:$0xff] %v11905_v61  ;;  %v11911_v49 = vmul.f32 %v4140_v23, %v16242_v47  ;;  %v16277_v45 = vld [vmem:[#allocation72_spill] sm:$0xff] }
 0xb1f   : > { %16253 = vst [vmem:[#allocation82_spill] sm:$0xff] %v11908_v9  ;;  %v4142_v42 = vadd.f32 %v4122_v19, %v16255_v25  ;;  %v11915_v32 = vmul.f32 %v4138_v8, %v16244_v52  ;;  %v11921_v24 = vmul.f32 %v4141_v3, %v16243_v17  ;;  %v4074_v62 = vpop.f32.mrb[36].mxu0  ;;  %v16273_v8 = vld [vmem:[#allocation67_spill] sm:$0xff] }
 0xb20   : > { %16254 = vst [vmem:[#allocation83_spill] sm:$0xff] %v11911_v49  ;;  %v11918_v30 = vmul.f32 %v4139_v43, %v16245_v7  ;;  %v4143_v26 = vadd.f32 %v4124_v55, %v16259_v22  ;;  %v4075_v33 = vadd.f32 %v4074_v62, %v4007_v59  ;;  %v4076_v50 = vpop.f32.mrb[37].mxu0  ;;  %v11929_v40 = vpack.i.bf16 %v11911_v49, %v11905_v61 }
 0xb21   : > { %16256 = vst [vmem:[#allocation80_spill] sm:$0xff] %v11915_v32  ;;  %16258 = vst [vmem:[#allocation81_spill] sm:$0xff] %v11921_v24  ;;  %v11925_v18 = vmul.f32 %v4142_v42, %v16244_v52  ;;  %v4077_v44 = vadd.f32 %v4076_v50, %v4007_v59  ;;  %v4078_v5 = vpop.f32.mrb[38].mxu0  ;;  %v11992_v55 = vpack.i.bf16 %v11921_v24, %v11908_v9 }
 0xb22   : > { %16257 = vst [vmem:[#allocation85_spill] sm:$0xff] %v11918_v30  ;;  %v11932_v4 = vmul.f32 %v4143_v26, %v16245_v7  ;;  %v4127_v34 = vpop.f32.mrb[36].mxu1  ;;  %v4144_v14 = vadd.f32 %v4075_v33, %v16262_v27  ;;  %v4079_v2 = vadd.f32 %v4078_v5, %v4012_v39  ;;  %v4080_v46 = vpop.f32.mrb[39].mxu0  ;;  %7721 = vrot.lane.b32.xlu0 %v11929_v40, %s15926_s27 }
 0xb23   : > { %16260 = vst [vmem:[#allocation86_spill] sm:$0xff] %v11925_v18  ;;  %v4128_v31 = vadd.f32 %v4127_v34, %v4007_v59  ;;  %v4129_v38 = vpop.f32.mrb[37].mxu1  ;;  %7706 = vrot.lane.b32.xlu1 %v11929_v40, %s16263_s20  ;;  %v4145_v37 = vadd.f32 %v4077_v44, %v16264_v16  ;;  %v4081_v35 = vadd.f32 %v4080_v46, %v4012_v39 }
 0xb24   : > { %16261 = vst [vmem:[#allocation87_spill] sm:$0xff] %v11932_v4  ;;  %v4130_v56 = vadd.f32 %v4129_v38, %v4007_v59  ;;  %v4131_v48 = vpop.f32.mrb[38].mxu1  ;;  %v11942_v58 = vpack.i.bf16 %v11925_v18, %v11915_v32  ;;  %v11945_v57 = vmul.f32 %v4144_v14, %v16242_v47  ;;  %v4148_v1 = vadd.f32 %v4079_v2, %v16267_v36 }
 0xb25   : > { %v4146_v60 = vadd.f32 %v4128_v31, %v16266_v63  ;;  %v4132_v21 = vadd.f32 %v4131_v48, %v4012_v39  ;;  %v4133_v51 = vpop.f32.mrb[39].mxu1  ;;  %v11950_v0 = vmul.f32 %v4145_v37, %v16243_v17  ;;  %v4149_v12 = vadd.f32 %v4081_v35, %v16270_v20 }
 0xb26   : > { %16265 = vst [vmem:[#allocation88_spill] sm:$0xff] %v11945_v57  ;;  %v4147_v54 = vadd.f32 %v4130_v56, %v16269_v6  ;;  %v4134_v10 = vadd.f32 %v4133_v51, %v4012_v39  ;;  %v11958_v11 = vmul.f32 %v4148_v1, %v16242_v47  ;;  %7726 = vrot.lane.b32.xlu0 %v11929_v40, %s16274_s21 }
 0xb27   : > { %16268 = vst [vmem:[#allocation89_spill] sm:$0xff] %v11950_v0  ;;  %v11955_v41 = vmul.f32 %v4146_v60, %v16244_v52  ;;  %v4150_v29 = vadd.f32 %v4132_v21, %v16273_v8  ;;  %7711 = vrot.lane.b32.xlu1 %v11942_v58, %s16263_s20  ;;  %v11969_v19 = vmul.f32 %v4149_v12, %v16243_v17 }
 0xb28   : > { %16272 = vst [vmem:[#allocation90_spill] sm:$0xff] %v11958_v11  ;;  %v11966_v23 = vmul.f32 %v4147_v54, %v16245_v7  ;;  %v4151_v53 = vadd.f32 %v4134_v10, %v16277_v45  ;;  %v11988_v3 = vpack.i.bf16 %v11932_v4, %v11918_v30  ;;  %v12000_v25 = vpack.i.bf16 %v11958_v11, %v11945_v57 }
 0xb29   : > { %16271 = vst [vmem:[#allocation91_spill] sm:$0xff] %v11955_v41  ;;  %16276 = vst [vmem:[#allocation93_spill] sm:$0xff] %v11969_v19  ;;  %v11973_v43 = vmul.f32 %v4150_v29, %v16244_v52  ;;  %v12020_v59 = vpack.i.bf16 %v11969_v19, %v11950_v0 }
 0xb2a   : > { %16275 = vst [vmem:[#allocation73_spill] sm:$0xff] %v11966_v23  ;;  %v11976_v13 = vmul.f32 %v4151_v53, %v16245_v7  ;;  %7736 = vrot.lane.b32.xlu0 %v11929_v40, %s16280_s22  ;;  %16284 = vst [vmem:[#allocation75_spill] sm:$0xff] %v11988_v3 }
 0xb2b   : > { %16278 = vst [vmem:[#allocation74_spill] sm:$0xff] %v11973_v43  ;;  %7716 = vrot.lane.b32.xlu1 %v11929_v40, %s16281_s23  ;;  %v12008_v42 = vpack.i.bf16 %v11973_v43, %v11955_v41 }
 0xb2c   : > { %16279 = vst [vmem:[#allocation76_spill] sm:$0xff] %v11976_v13  ;;  %v12024_v22 = vpack.i.bf16 %v11976_v13, %v11966_v23 }
 0xb2e   : > { %7746 = vrot.lane.b32.xlu0 %v11929_v40, %s16282_s26  ;;  %16288 = vst [vmem:[#allocation79_spill] sm:$0xff] %v12024_v22 }
 0xb2f   : > { %7731 = vrot.lane.b32.xlu1 %v11929_v40, %s16283_s25 }
 0xb32   : > { %7756 = vrot.lane.b32.xlu0 %v11942_v58, %s16001_s7 }
 0xb33   : > { %7741 = vrot.lane.b32.xlu1 %v11929_v40, %s15927_s28 }
 0xb36   : > { %7766 = vrot.lane.b32.xlu0 %v11929_v40, %s16285_s1 }
 0xb37   : > { %7751 = vrot.lane.b32.xlu1 %v11929_v40, %s16286_s4 }
 0xb3a   : > { %7771 = vrot.lane.b32.xlu0 %v11942_v58, %s16287_s8 }
 0xb3b   : > { %7761 = vrot.lane.b32.xlu1 %v11929_v40, %s16001_s7 }
 0xb3e   : > { %7781 = vrot.lane.b32.xlu0 %v11929_v40, %s16000_s5 }
 0xb3f   : > { %7776 = vrot.lane.b32.xlu1 %v11929_v40, %s16287_s8 }
 0xb42   : > { %7786 = vrot.lane.b32.xlu0 %v11942_v58, %s16289_s29 }
 0xb43   : > { %7791 = vrot.lane.b32.xlu1 %v11929_v40, %s16289_s29 }
 0xb46   : > { %7796 = vrot.lane.b32.xlu0 %v11929_v40, %s15925_s6 }
 0xb47   : > { %7806 = vrot.lane.b32.xlu1 %v11929_v40, %s16290_s9 }
 0xb4a   : > { %7801 = vrot.lane.b32.xlu0 %v11942_v58, %s16290_s9 }
 0xb4b   : > { %7811 = vrot.lane.b32.xlu1 %v11942_v58, %s15922_s2 }
 0xb4e   : > { %7816 = vrot.lane.b32.xlu0 %v11929_v40, %s15922_s2 }
 0xb4f   : > { %7826 = vrot.lane.b32.xlu1 %v11929_v40, %s15936_s3 }
 0xb52   : > { %7821 = vrot.lane.b32.xlu0 %v11942_v58, %s15936_s3 }
 0xb53   : > { %7831 = vrot.lane.b32.xlu1 %v11942_v58, %s16281_s23 }
 0xb56   : > { %7841 = vrot.lane.b32.xlu0 %v11929_v40, %s15938_s0 }
 0xb57   : > { %7836 = vrot.lane.b32.xlu1 %v11942_v58, %s15938_s0 }
 0xb5a   : > { %7856 = vrot.lane.b32.xlu0 %v11929_v40, %s16291_s10 }
 0xb5b   : > { %7846 = vrot.lane.b32.xlu1 %v11942_v58, %s16280_s22 }
 0xb5e   : > { %7881 = vrot.lane.b32.xlu0 %v11988_v3, %s15926_s27 }
 0xb5f   : > { %7851 = vrot.lane.b32.xlu1 %v11942_v58, %s16291_s10 }
 0xb62   : > { %7891 = vrot.lane.b32.xlu0 %v11988_v3, %s16274_s21 }
 0xb63   : > { %7861 = vrot.lane.b32.xlu1 %v11992_v55, %s16263_s20 }
 0xb66   : > { %7901 = vrot.lane.b32.xlu0 %v11992_v55, %s16283_s25 }
 0xb67   : > { %7866 = vrot.lane.b32.xlu1 %v11988_v3, %s16263_s20 }
 0xb6a   : > { %7916 = vrot.lane.b32.xlu0 %v11988_v3, %s16280_s22 }
 0xb6b   : > { %7871 = vrot.lane.b32.xlu1 %v11992_v55, %s16281_s23 }
 0xb6e   : > { %7921 = vrot.lane.b32.xlu0 %v11992_v55, %s15927_s28 }
 0xb6f   : > { %7876 = vrot.lane.b32.xlu1 %v11992_v55, %s15926_s27 }
 0xb72   : > { %7936 = vrot.lane.b32.xlu0 %v11988_v3, %s16282_s26 }
 0xb73   : > { %7886 = vrot.lane.b32.xlu1 %v11992_v55, %s16274_s21 }
 0xb76   : > { %7941 = vrot.lane.b32.xlu0 %v11992_v55, %s16286_s4 }
 0xb77   : > { %7896 = vrot.lane.b32.xlu1 %v11988_v3, %s16281_s23 }
 0xb7a   : > { %7961 = vrot.lane.b32.xlu0 %v11988_v3, %s16285_s1 }
 0xb7b   : > { %7906 = vrot.lane.b32.xlu1 %v11988_v3, %s16283_s25 }
 0xb7e   : > { %7976 = vrot.lane.b32.xlu0 %v11988_v3, %s16000_s5 }
 0xb7f   : > { %7911 = vrot.lane.b32.xlu1 %v11992_v55, %s16280_s22 }
 0xb82   : > { %7991 = vrot.lane.b32.xlu0 %v11988_v3, %s15925_s6 }
 0xb83   : > { %7926 = vrot.lane.b32.xlu1 %v11988_v3, %s15927_s28 }
 0xb86   : > { %8001 = vrot.lane.b32.xlu0 %v11992_v55, %s15922_s2 }
 0xb87   : > { %7931 = vrot.lane.b32.xlu1 %v11992_v55, %s16282_s26 }
 0xb8a   : > { %8011 = vrot.lane.b32.xlu0 %v11992_v55, %s15938_s0 }
 0xb8b   : > { %7946 = vrot.lane.b32.xlu1 %v11988_v3, %s16286_s4 }
 0xb8e   : > { %8016 = vrot.lane.b32.xlu0 %v11992_v55, %s16291_s10 }
 0xb8f   : > { %7951 = vrot.lane.b32.xlu1 %v11992_v55, %s16001_s7 }
 0xb92   : > { %8021 = vrot.lane.b32.xlu0 %v12000_v25, %s16263_s20 }
 0xb93   : > { %7956 = vrot.lane.b32.xlu1 %v11992_v55, %s16285_s1 }
 0xb94   : > { %v12126_v27 = vpop.permute.xlu0 %7721 }
 0xb95   : > { %v12128_v14 = vpop.permute.xlu1 %7706 }
 0xb96   : > { %8026 = vrot.lane.b32.xlu0 %v12008_v42, %s16263_s20  ;;  %v7709_v41 = vunpack.i.h.bf16 %v12128_v14  ;;  %v7708_v43 = vunpack.i.l.bf16 %v12128_v14 }
 0xb97   : > { %7966 = vrot.lane.b32.xlu1 %v11992_v55, %s16287_s8 }
 0xb98   : > { %v12134_v31 = vpop.permute.xlu0 %7726 }
 0xb99   : > { %v12136_v2 = vpop.permute.xlu1 %7711 }
 0xb9a   : > { %8031 = vrot.lane.b32.xlu0 %v12000_v25, %s16281_s23  ;;  %v7714_v7 = vunpack.i.h.bf16 %v12136_v2  ;;  %v7713_v52 = vunpack.i.l.bf16 %v12136_v2 }
 0xb9b   : > { %7971 = vrot.lane.b32.xlu1 %v11992_v55, %s16000_s5 }
 0xb9c   : > { %v12142_v38 = vpop.permute.xlu0 %7736 }
 0xb9d   : > { %v12144_v46 = vpop.permute.xlu1 %7716 }
 0xb9e   : > { %8041 = vrot.lane.b32.xlu0 %v12000_v25, %s16274_s21 }
 0xb9f   : > { %7981 = vrot.lane.b32.xlu1 %v11992_v55, %s16289_s29 }
 0xba0   : > { %v12150_v16 = vpop.permute.xlu0 %7746 }
 0xba1   : > { %v12152_v37 = vpop.permute.xlu1 %7731 }
 0xba2   : > { %8051 = vrot.lane.b32.xlu0 %v12000_v25, %s16280_s22 }
 0xba3   : > { %7986 = vrot.lane.b32.xlu1 %v11992_v55, %s15925_s6 }
 0xba4   : > { %v12158_v56 = vpop.permute.xlu0 %7756 }
 0xba5   : > { %16292 = vst [vmem:[#allocation77_spill] sm:$0xff] %v12158_v56  ;;  %v12160_v35 = vpop.permute.xlu1 %7741 }
 0xba6   : > { %8061 = vrot.lane.b32.xlu0 %v12000_v25, %s16282_s26 }
 0xba7   : > { %7996 = vrot.lane.b32.xlu1 %v11992_v55, %s16290_s9 }
 0xba8   : > { %v12166_v48 = vpop.permute.xlu0 %7766 }
 0xba9   : > { %16293 = vst [vmem:[#allocation78_spill] sm:$0xff] %v12166_v48  ;;  %v12168_v63 = vpop.permute.xlu1 %7751 }
 0xbaa   : > { %8066 = vrot.lane.b32.xlu0 %v12000_v25, %s16286_s4 }
 0xbab   : > { %8006 = vrot.lane.b32.xlu1 %v11992_v55, %s15936_s3 }
 0xbac   : > { %v12174_v60 = vpop.permute.xlu0 %7771 }
 0xbad   : > { %16294 = vst [vmem:[#allocation94_spill] sm:$0xff] %v12174_v60  ;;  %v12176_v36 = vpop.permute.xlu1 %7761  ;;  %v16432_v60 = vunpack.i.h.bf16 %v12166_v48 }
 0xbae   : > { %16295 = vst [vmem:[#allocation92_spill] sm:$0xff] %v12176_v36  ;;  %8071 = vrot.lane.b32.xlu0 %v12008_v42, %s16001_s7 }
 0xbaf   : > { %8036 = vrot.lane.b32.xlu1 %v12000_v25, %s15926_s27 }
 0xbb0   : > { %v12182_v1 = vpop.permute.xlu0 %7781 }
 0xbb1   : > { %16296 = vst [vmem:[#allocation95_spill] sm:$0xff] %v12182_v1  ;;  %v12184_v21 = vpop.permute.xlu1 %7776 }
 0xbb2   : > { %16297 = vst [vmem:[#allocation96_spill] sm:$0xff] %v12184_v21  ;;  %8081 = vrot.lane.b32.xlu0 %v12000_v25, %s16285_s1 }
 0xbb3   : > { %8046 = vrot.lane.b32.xlu1 %v12000_v25, %s16283_s25 }
 0xbb4   : > { %v12190_v51 = vpop.permute.xlu0 %7786 }
 0xbb5   : > { %16298 = vst [vmem:[#allocation100_spill] sm:$0xff] %v12190_v51  ;;  %v12192_v6 = vpop.permute.xlu1 %7791 }
 0xbb6   : > { %16299 = vst [vmem:[#allocation97_spill] sm:$0xff] %v12192_v6  ;;  %8086 = vrot.lane.b32.xlu0 %v12008_v42, %s16287_s8 }
 0xbb7   : > { %8056 = vrot.lane.b32.xlu1 %v12000_v25, %s15927_s28 }
 0xbb8   : > { %v12198_v54 = vpop.permute.xlu0 %7796 }
 0xbb9   : > { %v12200_v20 = vpop.permute.xlu1 %7806 }
 0xbba   : > { %16300 = vst [vmem:[#allocation99_spill] sm:$0xff] %v12200_v20  ;;  %8096 = vrot.lane.b32.xlu0 %v12000_v25, %s16000_s5 }
 0xbbb   : > { %8076 = vrot.lane.b32.xlu1 %v12000_v25, %s16001_s7 }
 0xbbc   : > { %v12206_v12 = vpop.permute.xlu0 %7801 }
 0xbbd   : > { %16301 = vst [vmem:[#allocation98_spill] sm:$0xff] %v12206_v12  ;;  %v12208_v10 = vpop.permute.xlu1 %7811  ;;  %v16384_v12 = vunpack.i.l.bf16 %v12152_v37 }
 0xbbe   : > { %16302 = vst [vmem:[#allocation101_spill] sm:$0xff] %v12208_v10  ;;  %8101 = vrot.lane.b32.xlu0 %v12008_v42, %s16289_s29 }
 0xbbf   : > { %8091 = vrot.lane.b32.xlu1 %v12000_v25, %s16287_s8 }
 0xbc0   : > { %v12214_v8 = vpop.permute.xlu0 %7816 }
 0xbc1   : > { %16303 = vst [vmem:[#allocation102_spill] sm:$0xff] %v12214_v8  ;;  %v12216_v29 = vpop.permute.xlu1 %7826 }
 0xbc2   : > { %16304 = vst [vmem:[#allocation103_spill] sm:$0xff] %v12216_v29  ;;  %8111 = vrot.lane.b32.xlu0 %v12000_v25, %s15925_s6 }
 0xbc3   : > { %8106 = vrot.lane.b32.xlu1 %v12000_v25, %s16289_s29 }
 0xbc4   : > { %v12222_v45 = vpop.permute.xlu0 %7821 }
 0xbc5   : > { %16305 = vst [vmem:[#allocation104_spill] sm:$0xff] %v12222_v45  ;;  %v12224_v53 = vpop.permute.xlu1 %7831  ;;  %v16389_v45 = vunpack.i.l.bf16 %v12142_v38 }
 0xbc6   : > { %8116 = vrot.lane.b32.xlu0 %v12008_v42, %s16290_s9 }
 0xbc7   : > { %8121 = vrot.lane.b32.xlu1 %v12000_v25, %s16290_s9 }
 0xbc8   : > { %v12230_v5 = vpop.permute.xlu0 %7841 }
 0xbc9   : > { %16306 = vst [vmem:[#allocation39_spill] sm:$0xff] %v12230_v5  ;;  %v12232_v34 = vpop.permute.xlu1 %7836 }
 0xbca   : > { %16307 = vst [vmem:[#allocation44_spill] sm:$0xff] %v12232_v34  ;;  %8131 = vrot.lane.b32.xlu0 %v12000_v25, %s15922_s2  ;;  %v16470_v34 = vunpack.i.l.bf16 %v12150_v16 }
 0xbcb   : > { %8126 = vrot.lane.b32.xlu1 %v12008_v42, %s15922_s2 }
 0xbcc   : > { %v12238_v44 = vpop.permute.xlu0 %7856 }
 0xbcd   : > { %16308 = vst [vmem:[#allocation40_spill] sm:$0xff] %v12238_v44  ;;  %v12240_v50 = vpop.permute.xlu1 %7846 }
 0xbce   : > { %8141 = vrot.lane.b32.xlu0 %v12000_v25, %s15936_s3 }
 0xbcf   : > { %8136 = vrot.lane.b32.xlu1 %v12008_v42, %s15936_s3 }
 0xbd0   : > { %v12246_v33 = vpop.permute.xlu0 %7881 }
 0xbd1   : > { %16309 = vst [vmem:[#allocation41_spill] sm:$0xff] %v12246_v33  ;;  %v12248_v39 = vpop.permute.xlu1 %7851 }
 0xbd2   : > { %16310 = vst [vmem:[#allocation42_spill] sm:$0xff] %v12248_v39  ;;  %8156 = vrot.lane.b32.xlu0 %v12000_v25, %s15938_s0 }
 0xbd3   : > { %8146 = vrot.lane.b32.xlu1 %v12008_v42, %s16281_s23 }
 0xbd4   : > { %v12254_v62 = vpop.permute.xlu0 %7891 }
 0xbd5   : > { %16311 = vst [vmem:[#allocation47_spill] sm:$0xff] %v12254_v62  ;;  %v7862_v26 = vpop.permute.xlu1 %7861 }
 0xbd6   : > { %v7864_v17 = vunpack.i.h.bf16 %v7862_v26  ;;  %v7863_v47 = vunpack.i.l.bf16 %v7862_v26  ;;  %8171 = vrot.lane.b32.xlu0 %v12020_v59, %s16263_s20 }
 0xbd7   : > { %8151 = vrot.lane.b32.xlu1 %v12008_v42, %s15938_s0 }
 0xbd8   : > { %v12266_v23 = vsel %vm740_vm1, %v7863_v47, %v7713_v52  ;;  %v12270_v13 = vsel %vm740_vm1, %v7864_v17, %v7714_v7  ;;  %v12272_v2 = vpop.permute.xlu0 %7901  ;;  %v4208_v14 = vsel %vm740_vm1, %v7708_v43, %v7863_v47  ;;  %v4209_v32 = vsel %vm740_vm1, %v7709_v41, %v7864_v17 }
 0xbd9   : > { %16312 = vst [vmem:[#allocation45_spill] sm:$0xff] %v12266_v23  ;;  %16313 = vst [vmem:[#allocation49_spill] sm:$0xff] %v12270_v13  ;;  %v7867_v26 = vpop.permute.xlu1 %7866  ;;  %v5321_v28 = vpack.c.bf16 %v4209_v32, %v4208_v14  ;;  %v7834_v32 = vunpack.i.h.bf16 %v12224_v53  ;;  %v16325_v13 = vunpack.i.l.bf16 %v12246_v33 }
 0xbda   : > { %16314 = vst [vmem:[#allocation48_spill] sm:$0xff] %v12272_v2  ;;  %v7869_v30 = vunpack.i.h.bf16 %v7867_v26  ;;  %v7868_v4 = vunpack.i.l.bf16 %v7867_v26  ;;  %8176 = vrot.lane.b32.xlu0 %v12024_v22, %s16263_s20  ;;  %s16343_s20 = smov 90  }
 0xbdb   : > { %8161 = vrot.lane.b32.xlu1 %v12008_v42, %s16280_s22  ;;  %5557 = vmatprep.subr.bf16.mxu0 %v5321_v28 }
 0xbdc   : > { %v4212_v39 = vsel %vm740_vm1, %v7868_v4, %v7708_v43  ;;  %v4213_v47 = vsel %vm740_vm1, %v7869_v30, %v7709_v41  ;;  %v12288_v17 = vpop.permute.xlu0 %7916  ;;  %v12294_v26 = vsel %vm740_vm1, %v7713_v52, %v7868_v4  ;;  %v12298_v23 = vsel %vm740_vm1, %v7714_v7, %v7869_v30 }
 0xbdd   : > { %v12290_v57 = vpop.permute.xlu1 %7871  ;;  %v5320_v18 = vpack.c.bf16 %v4213_v47, %v4212_v39  ;;  %16315 = vst [vmem:[#allocation50_spill] sm:$0xff] %v12294_v26  ;;  %16316 = vst [vmem:[#allocation51_spill] sm:$0xff] %v12298_v23  ;;  %v7833_v43 = vunpack.i.l.bf16 %v12224_v53  ;;  %v7849_v47 = vunpack.i.h.bf16 %v12240_v50  ;;  %v7848_v52 = vunpack.i.l.bf16 %v12240_v50 }
 0xbde   : > { %v15615_v41 = vunpack.i.h.bf16 %v12290_v57  ;;  %v15613_v28 = vunpack.i.l.bf16 %v12290_v57  ;;  %8181 = vrot.lane.b32.xlu0 %v12020_v59, %s15926_s27  ;;  %v7723_v39 = vunpack.i.l.bf16 %v12126_v27  ;;  %v16323_v14 = vunpack.i.h.bf16 %v12288_v17 }
 0xbdf   : > { %8166 = vrot.lane.b32.xlu1 %v12008_v42, %s16291_s10  ;;  %5558 = vmatpush1.bf16.msra.mxu0 %v5320_v18  ;;  %v16321_v18 = vunpack.i.l.bf16 %v12288_v17 }
 0xbe0   : > { %v12318_v4 = vsel %vm753_vm2, %v15613_v28, %v7833_v43  ;;  %v12324_v53 = vsel %vm753_vm2, %v15615_v41, %v7834_v32  ;;  %v12328_v7 = vpop.permute.xlu0 %7921  ;;  %v7724_v28 = vunpack.i.h.bf16 %v12126_v27  ;;  %v12352_v27 = vsel %vm766_vm3, %v7849_v47, %v16323_v14 }
 0xbe1   : > { %16317 = vst [vmem:[#allocation52_spill] sm:$0xff] %v12318_v4  ;;  %16318 = vst [vmem:[#allocation53_spill] sm:$0xff] %v12324_v53  ;;  %v12330_v30 = vpop.permute.xlu1 %7876  ;;  %v12346_v50 = vsel %vm766_vm3, %v7848_v52, %v16321_v18  ;;  %v4596_v41 = vsel %vm844_vm9, %v16325_v13, %v7723_v39  ;;  %v16326_v4 = vunpack.i.h.bf16 %v12246_v33  ;;  %v16406_v29 = vunpack.i.l.bf16 %v12328_v7 }
 0xbe2   : > { %16319 = vst [vmem:[#allocation54_spill] sm:$0xff] %v12328_v7  ;;  %16320 = vst [vmem:[#allocation55_spill] sm:$0xff] %v12330_v30  ;;  %8186 = vrot.lane.b32.xlu0 %v12000_v25, %s16291_s10  ;;  %v16327_v26 = vunpack.i.l.bf16 %v12330_v30  ;;  %v16328_v23 = vunpack.i.h.bf16 %v12330_v30 }
 0xbe3   : > { %8191 = vrot.lane.b32.xlu1 %v12024_v22, %s15926_s27  ;;  %16322 = vst [vmem:[#allocation56_spill] sm:$0xff] %v12346_v50  ;;  %16324 = vst [vmem:[#allocation57_spill] sm:$0xff] %v12352_v27  ;;  %v4597_v53 = vsel %vm844_vm9, %v16326_v4, %v7724_v28 }
 0xbe4   : > { %v4592_v18 = vsel %vm844_vm9, %v7723_v39, %v16327_v26  ;;  %v4593_v14 = vsel %vm844_vm9, %v7724_v28, %v16328_v23  ;;  %v12370_v11 = vpop.permute.xlu0 %7936  ;;  %v5384_v26 = vpack.c.bf16 %v4597_v53, %v4596_v41 }
 0xbe5   : > { %16329 = vst [vmem:[#allocation65_spill] sm:$0xff] %v12370_v11  ;;  %v12372_v0 = vpop.permute.xlu1 %7886  ;;  %v5385_v13 = vpack.c.bf16 %v4593_v14, %v4592_v18 }
 0xbe6   : > { %16330 = vst [vmem:[#allocation58_spill] sm:$0xff] %v12372_v0  ;;  %8201 = vrot.lane.b32.xlu0 %v12024_v22, %s16274_s21 }
 0xbe7   : > { %8196 = vrot.lane.b32.xlu1 %v12020_v59, %s16274_s21  ;;  %5598 = vmatprep.subr.bf16.mxu1 %v5385_v13 }
 0xbe8   : > { %5599 = vmatpush1.bf16.msra.mxu1 %v5384_v26  ;;  %v12380_v39 = vpop.permute.xlu0 %7941 }
 0xbe9   : > { %16331 = vst [vmem:[#allocation59_spill] sm:$0xff] %v12380_v39  ;;  %v12382_v23 = vpop.permute.xlu1 %7896 }
 0xbea   : > { %v15625_v28 = vunpack.i.h.bf16 %v12382_v23  ;;  %v15624_v4 = vunpack.i.l.bf16 %v12382_v23  ;;  %8211 = vrot.lane.b32.xlu0 %v12024_v22, %s16281_s23 }
 0xbeb   : > { %8206 = vrot.lane.b32.xlu1 %v12020_v59, %s16281_s23  ;;  %s17101_s23 = sld [smem:[#allocation4_spill]] }
 0xbec   : > { %v12390_v18 = vpop.permute.xlu0 %7961  ;;  %v12398_v41 = vsel %vm753_vm2, %v7833_v43, %v15624_v4  ;;  %v12404_v53 = vsel %vm753_vm2, %v7834_v32, %v15625_v28 }
 0xbed   : > { %16332 = vst [vmem:[#allocation63_spill] sm:$0xff] %v12390_v18  ;;  %v12392_v14 = vpop.permute.xlu1 %7906  ;;  %16334 = vst [vmem:[#allocation64_spill] sm:$0xff] %v12398_v41 }
 0xbee   : > { %16333 = vst [vmem:[#allocation60_spill] sm:$0xff] %v12392_v14  ;;  %16335 = vst [vmem:[#allocation62_spill] sm:$0xff] %v12404_v53  ;;  %8216 = vrot.lane.b32.xlu0 %v12020_v59, %s16283_s25 }
 0xbef   : > { %8221 = vrot.lane.b32.xlu1 %v12024_v22, %s16283_s25 }
 0xbf0   : > { %v12412_v26 = vpop.permute.xlu0 %7976 }
 0xbf1   : > { %16336 = vst [vmem:[#allocation61_spill] sm:$0xff] %v12412_v26  ;;  %v12414_v33 = vpop.permute.xlu1 %7911 }
 0xbf2   : > { %v15630_v43 = vunpack.i.h.bf16 %v12414_v33  ;;  %v15629_v4 = vunpack.i.l.bf16 %v12414_v33  ;;  %8231 = vrot.lane.b32.xlu0 %v12024_v22, %s16280_s22 }
 0xbf3   : > { %8226 = vrot.lane.b32.xlu1 %v12020_v59, %s16280_s22 }
 0xbf4   : > { %v12426_v32 = vsel %vm766_vm3, %v15629_v4, %v7848_v52  ;;  %v12432_v13 = vsel %vm766_vm3, %v15630_v43, %v7849_v47  ;;  %v12434_v28 = vpop.permute.xlu0 %7991 }
 0xbf5   : > { %16337 = vst [vmem:[#allocation70_spill] sm:$0xff] %v12426_v32  ;;  %16338 = vst [vmem:[#allocation68_spill] sm:$0xff] %v12432_v13  ;;  %v12436_v30 = vpop.permute.xlu1 %7926 }
 0xbf6   : > { %16339 = vst [vmem:[#allocation66_spill] sm:$0xff] %v12434_v28  ;;  %16340 = vst [vmem:[#allocation71_spill] sm:$0xff] %v12436_v30  ;;  %8236 = vrot.lane.b32.xlu0 %v12020_v59, %s15927_s28 }
 0xbf7   : > { %8241 = vrot.lane.b32.xlu1 %v12024_v22, %s15927_s28 }
 0xbf8   : > { %v12444_v52 = vpop.permute.xlu0 %8001 }
 0xbf9   : > { %v12446_v4 = vpop.permute.xlu1 %7931 }
 0xbfa   : > { %16341 = vst [vmem:[#allocation69_spill] sm:$0xff] %v12446_v4  ;;  %8256 = vrot.lane.b32.xlu0 %v12024_v22, %s16282_s26 }
 0xbfb   : > { %8246 = vrot.lane.b32.xlu1 %v12020_v59, %s16282_s26 }
 0xbfc   : > { %v12452_v47 = vpop.permute.xlu0 %8011 }
 0xbfd   : > { %v12454_v43 = vpop.permute.xlu1 %7946 }
 0xbfe   : > { %16342 = vst [vmem:[#allocation67_spill] sm:$0xff] %v12454_v43  ;;  %8261 = vrot.lane.b32.xlu0 %v11992_v55, %s16343_s20 }
 0xbff   : > { %8251 = vrot.lane.b32.xlu1 %v11942_v58, %s16282_s26 }
 0xc00   : > { %v12460_v50 = vpop.permute.xlu0 %8016 }
 0xc01   : > { %16344 = vst [vmem:[#allocation72_spill] sm:$0xff] %v12460_v50  ;;  %v12462_v32 = vpop.permute.xlu1 %7951 }
 0xc02   : > { %16345 = vst [vmem:[#allocation105_spill] sm:$0xff] %v12462_v32  ;;  %8271 = vrot.lane.b32.xlu0 %v12024_v22, %s16286_s4 }
 0xc03   : > { %8266 = vrot.lane.b32.xlu1 %v12020_v59, %s16286_s4 }
 0xc04   : > { %v12468_v13 = vpop.permute.xlu0 %8021 }
 0xc05   : > { %v12470_v27 = vpop.permute.xlu1 %7956 }
 0xc06   : > { %16346 = vst [vmem:[#allocation106_spill] sm:$0xff] %v12470_v27  ;;  %8286 = vrot.lane.b32.xlu0 %v12024_v22, %s16285_s1 }
 0xc07   : > { %8276 = vrot.lane.b32.xlu1 %v12020_v59, %s16001_s7 }
 0xc08   : > { %v12476_v41 = vpop.permute.xlu0 %8026 }
 0xc09   : > { %v12478_v53 = vpop.permute.xlu1 %7966 }
 0xc0a   : > { %16347 = vst [vmem:[#allocation107_spill] sm:$0xff] %v12478_v53  ;;  %8301 = vrot.lane.b32.xlu0 %v12024_v22, %s16000_s5 }
 0xc0b   : > { %8281 = vrot.lane.b32.xlu1 %v12020_v59, %s16285_s1 }
 0xc0c   : > { %v12484_v50 = vpop.permute.xlu0 %8031 }
 0xc0d   : > { %16348 = vst [vmem:[#allocation108_spill] sm:$0xff] %v12484_v50  ;;  %v12486_v19 = vpop.permute.xlu1 %7971 }
 0xc0e   : > { %16349 = vst [vmem:[#allocation109_spill] sm:$0xff] %v12486_v19  ;;  %8321 = vrot.lane.b32.xlu0 %v11929_v40, %s16343_s20 }
 0xc0f   : > { %8291 = vrot.lane.b32.xlu1 %v12020_v59, %s16287_s8 }
 0xc10   : > { %v12492_v61 = vpop.permute.xlu0 %8041 }
 0xc11   : > { %16350 = vst [vmem:[#allocation110_spill] sm:$0xff] %v12492_v61  ;;  %v12494_v49 = vpop.permute.xlu1 %7981 }
 0xc12   : > { %16351 = vst [vmem:[#allocation111_spill] sm:$0xff] %v12494_v49  ;;  %8326 = vrot.lane.b32.xlu0 %v12024_v22, %s15925_s6  ;;  %v5520_v49 = vld [vmem:[%s15324_s18] sm:$0xff]  ;;  %v5521_v22 = vld [vmem:[%s15324_s18 + $0x8] sm:$0xff] }
 0xc13   : > { %8296 = vrot.lane.b32.xlu1 %v12020_v59, %s16000_s5 }
 0xc14   : > { %v12500_v9 = vpop.permute.xlu0 %8051 }
 0xc15   : > { %16352 = vst [vmem:[#allocation112_spill] sm:$0xff] %v12500_v9  ;;  %v12502_v24 = vpop.permute.xlu1 %7986  ;;  %v16376_v9 = vunpack.i.l.bf16 %v12254_v62 }
 0xc16   : > { %16353 = vst [vmem:[#allocation113_spill] sm:$0xff] %v12502_v24  ;;  %8346 = vrot.lane.b32.xlu0 %v12000_v25, %s16343_s20  ;;  %v12522_v24 = vcombine.high %v5520_v49, %v5520_v49 }
 0xc17   : > { %8306 = vrot.lane.b32.xlu1 %v12020_v59, %s16289_s29 }
 0xc18   : > { %v12508_v19 = vpop.permute.xlu0 %8061  ;;  %16357 = vst [vmem:[#allocation116_spill] sm:$0xff] %v12522_v24  ;;  %5589 = vmatprep.mubr.bf16.mxu0 %v12522_v24 }
 0xc19   : > { %16354 = vst [vmem:[#allocation114_spill] sm:$0xff] %v12508_v19  ;;  %v12510_v53 = vpop.permute.xlu1 %7996 }
 0xc1a   : > { %16355 = vst [vmem:[#allocation115_spill] sm:$0xff] %v12510_v53  ;;  %8356 = vrot.lane.b32.xlu0 %v11992_v55, %s16356_s13  ;;  %v12529_v53 = vcombine.high %v5521_v22, %v5521_v22 }
 0xc1b   : > { %8311 = vrot.lane.b32.xlu1 %v12020_v59, %s15925_s6 }
 0xc1c   : > { %v12524_v27 = vpop.permute.xlu0 %8066  ;;  %16360 = vst [vmem:[#allocation119_spill] sm:$0xff] %v12529_v53  ;;  %5630 = vmatprep.mubr.bf16.mxu1 %v12529_v53 }
 0xc1d   : > { %16358 = vst [vmem:[#allocation117_spill] sm:$0xff] %v12524_v27  ;;  %v12526_v19 = vpop.permute.xlu1 %8006  ;;  %v16379_v27 = vunpack.i.h.bf16 %v12254_v62  ;;  %v16383_v62 = vunpack.i.l.bf16 %v12272_v2 }
 0xc1e   : > { %16359 = vst [vmem:[#allocation118_spill] sm:$0xff] %v12526_v19  ;;  %8366 = vrot.lane.b32.xlu0 %v11929_v40, %s16356_s13 }
 0xc1f   : > { %8316 = vrot.lane.b32.xlu1 %v11942_v58, %s16343_s20 }
 0xc20   : > { %v12536_v3 = vpop.permute.xlu0 %8071 }
 0xc21   : > { %16361 = vst [vmem:[#allocation120_spill] sm:$0xff] %v12536_v3  ;;  %v12538_v49 = vpop.permute.xlu1 %8036 }
 0xc22   : > { %8381 = vrot.lane.b32.xlu0 %v12020_v59, %s15922_s2 }
 0xc23   : > { %8331 = vrot.lane.b32.xlu1 %v12020_v59, %s16290_s9 }
 0xc24   : > { %v12544_v22 = vpop.permute.xlu0 %8081 }
 0xc25   : > { %16362 = vst [vmem:[#allocation121_spill] sm:$0xff] %v12544_v22  ;;  %v12546_v24 = vpop.permute.xlu1 %8046 }
 0xc26   : > { %16363 = vst [vmem:[#allocation122_spill] sm:$0xff] %v12546_v24  ;;  %8386 = vrot.lane.b32.xlu0 %v12000_v25, %s16356_s13 }
 0xc27   : > { %8336 = vrot.lane.b32.xlu1 %v12008_v42, %s16282_s26 }
 0xc28   : > { %v12552_v53 = vpop.permute.xlu0 %8086 }
 0xc29   : > { %16364 = vst [vmem:[#allocation123_spill] sm:$0xff] %v12552_v53  ;;  %v12554_v19 = vpop.permute.xlu1 %8056  ;;  %v16396_v53 = vunpack.i.h.bf16 %v12144_v46 }
 0xc2a   : > { %16365 = vst [vmem:[#allocation124_spill] sm:$0xff] %v12554_v19  ;;  %8396 = vrot.lane.b32.xlu0 %v12020_v59, %s15936_s3  ;;  %v16375_v19 = vunpack.i.l.bf16 %v12134_v31 }
 0xc2b   : > { %8341 = vrot.lane.b32.xlu1 %v12008_v42, %s16343_s20 }
 0xc2c   : > { %v12560_v3 = vpop.permute.xlu0 %8096 }
 0xc2d   : > { %16366 = vst [vmem:[#allocation125_spill] sm:$0xff] %v12560_v3  ;;  %v12562_v22 = vpop.permute.xlu1 %8076  ;;  %v12635_v3 = vsel %vm16377_vm14, %v16376_v9, %v16375_v19  ;;  %v16387_v9 = vunpack.i.h.bf16 %v12152_v37 }
 0xc2e   : > { %16367 = vst [vmem:[#allocation126_spill] sm:$0xff] %v12562_v22  ;;  %8401 = vrot.lane.b32.xlu0 %v11992_v55, %s16368_s11  ;;  %v16378_v22 = vunpack.i.h.bf16 %v12134_v31 }
 0xc2f   : > { %8351 = vrot.lane.b32.xlu1 %v11942_v58, %s16286_s4 }
 0xc30   : > { %v12575_v50 = vpop.permute.xlu0 %8101  ;;  %v12643_v24 = vsel %vm16380_vm10, %v16379_v27, %v16378_v22  ;;  %vm16385_vm10 = vcmp.lt.s32.totalorder %v9086_v15, 2  ;;  %v16386_v27 = vunpack.i.h.bf16 %v12272_v2  ;;  %v16391_v2 = vunpack.i.h.bf16 %v12142_v38 }
 0xc31   : > { %16369 = vst [vmem:[#allocation127_spill] sm:$0xff] %v12575_v50  ;;  %v12577_v32 = vpop.permute.xlu1 %8091  ;;  %v12670_v19 = vsel %vm16385_vm10, %v16384_v12, %v16383_v62  ;;  %vm16388_vm14 = vmmov %vm16385_vm10  ;;  %v16390_v62 = vunpack.i.l.bf16 %v12288_v17  ;;  %vm16401_vm10 = vcmp.lt.s32.totalorder %v9086_v15, 39 }
 0xc32   : > { %16370 = vst [vmem:[#allocation128_spill] sm:$0xff] %v12577_v32  ;;  %8411 = vrot.lane.b32.xlu0 %v12020_v59, %s15938_s0  ;;  %v12678_v22 = vsel %vm16388_vm14, %v16387_v9, %v16386_v27  ;;  %v16392_v9 = vunpack.i.h.bf16 %v12288_v17  ;;  %v16393_v17 = vunpack.i.l.bf16 %v12290_v57  ;;  %vm16405_vm14 = vmmov %vm16401_vm10 }
 0xc33   : > { %8361 = vrot.lane.b32.xlu1 %v11942_v58, %s16356_s13  ;;  %v12690_v12 = vsel %vm766_vm3, %v16390_v62, %v16389_v45  ;;  %v16404_v45 = vunpack.i.h.bf16 %v12370_v11  ;;  %v16407_v62 = vunpack.i.l.bf16 %v12160_v35 }
 0xc34   : > { %v12599_v50 = vpop.permute.xlu0 %8111  ;;  %v12698_v27 = vsel %vm766_vm3, %v16392_v9, %v16391_v2  ;;  %v16395_v9 = vunpack.i.h.bf16 %v12290_v57  ;;  %v16399_v57 = vunpack.i.l.bf16 %v12150_v16 }
 0xc35   : > { %16371 = vst [vmem:[#allocation129_spill] sm:$0xff] %v12599_v50  ;;  %v12601_v32 = vpop.permute.xlu1 %8106 }
 0xc36   : > { %16372 = vst [vmem:[#allocation130_spill] sm:$0xff] %v12601_v32  ;;  %8416 = vrot.lane.b32.xlu0 %v11929_v40, %s16368_s11 }
 0xc37   : > { %8371 = vrot.lane.b32.xlu1 %v12008_v42, %s16286_s4  ;;  %s17107_s4 = sld [smem:[#allocation169_spill]] }
 0xc38   : > { %v12623_v32 = vpop.permute.xlu0 %8116 }
 0xc39   : > { %16373 = vst [vmem:[#allocation131_spill] sm:$0xff] %v12623_v32  ;;  %v12625_v50 = vpop.permute.xlu1 %8121 }
 0xc3a   : > { %16374 = vst [vmem:[#allocation132_spill] sm:$0xff] %v12625_v50  ;;  %8431 = vrot.lane.b32.xlu0 %v12020_v59, %s16291_s10  ;;  %v12722_v50 = vsel %vm753_vm2, %v16396_v53, %v16395_v9  ;;  %v16403_v9 = vunpack.i.h.bf16 %v12150_v16 }
 0xc3b   : > { %8376 = vrot.lane.b32.xlu1 %v12008_v42, %s16356_s13 }
 0xc3c   : > { %v12658_v61 = vpop.permute.xlu0 %8131 }
 0xc3d   : > { %16381 = vst [vmem:[#allocation133_spill] sm:$0xff] %v12658_v61  ;;  %v12660_v32 = vpop.permute.xlu1 %8126  ;;  %v12746_v61 = vsel %vm16405_vm14, %v16404_v45, %v16403_v9  ;;  %v16410_v45 = vunpack.i.l.bf16 %v12144_v46  ;;  %v16411_v9 = vunpack.i.l.bf16 %v12382_v23 }
 0xc3e   : > { %16382 = vst [vmem:[#allocation134_spill] sm:$0xff] %v12660_v32  ;;  %8436 = vrot.lane.b32.xlu0 %v12000_v25, %s16368_s11  ;;  %v16394_v32 = vunpack.i.l.bf16 %v12144_v46 }
 0xc3f   : > { %8391 = vrot.lane.b32.xlu1 %v11942_v58, %s16285_s1  ;;  %v12771_v6 = vsel %vm753_vm2, %v16411_v9, %v16410_v45  ;;  %v16418_v9 = vunpack.i.h.bf16 %v12144_v46  ;;  %v16425_v46 = vunpack.i.h.bf16 %v12168_v63 }
 0xc40   : > { %v12714_v2 = vsel %vm753_vm2, %v16394_v32, %v16393_v17  ;;  %v12728_v20 = vpop.permute.xlu0 %8141  ;;  %v16400_v17 = vunpack.i.l.bf16 %v12370_v11  ;;  %v16416_v11 = vunpack.i.h.bf16 %v12134_v31 }
 0xc41   : > { %16397 = vst [vmem:[#allocation135_spill] sm:$0xff] %v12728_v20  ;;  %v12730_v32 = vpop.permute.xlu1 %8136  ;;  %v16408_v20 = vunpack.i.h.bf16 %v12328_v7  ;;  %v16419_v7 = vunpack.i.h.bf16 %v12382_v23 }
 0xc42   : > { %16398 = vst [vmem:[#allocation136_spill] sm:$0xff] %v12730_v32  ;;  %v12738_v53 = vsel %vm16401_vm10, %v16400_v17, %v16399_v57  ;;  %v12754_v32 = vsel %vm883_vm11, %v16407_v62, %v16406_v29  ;;  %v16409_v57 = vunpack.i.h.bf16 %v12160_v35  ;;  %8446 = vrot.lane.b32.xlu0 %v12020_v59, %s16343_s20  ;;  %v16412_v29 = vunpack.i.l.bf16 %v12372_v0 }
 0xc43   : > { %16402 = vst [vmem:[#allocation137_spill] sm:$0xff] %v12738_v53  ;;  %8406 = vrot.lane.b32.xlu1 %v11942_v58, %s16368_s11  ;;  %vm16414_vm10 = vcmp.lt.s32.totalorder %v9086_v15, 18  ;;  %v12799_v51 = vsel %vm753_vm2, %v16419_v7, %v16418_v9  ;;  %v16428_v7 = vunpack.i.l.bf16 %v12166_v48  ;;  %v16444_v48 = vunpack.i.l.bf16 %v12182_v1 }
 0xc44   : > { %v12762_v17 = vsel %vm883_vm11, %v16409_v57, %v16408_v20  ;;  %v16413_v20 = vunpack.i.l.bf16 %v12134_v31  ;;  %v16415_v57 = vunpack.i.h.bf16 %v12372_v0  ;;  %vm16417_vm14 = vmmov %vm16414_vm10  ;;  %v16436_v0 = vunpack.i.l.bf16 %v12152_v37 }
 0xc46   : > { %v12783_v62 = vsel %vm16414_vm10, %v16413_v20, %v16412_v29  ;;  %v12791_v45 = vsel %vm16417_vm14, %v16416_v11, %v16415_v57  ;;  %v16420_v29 = vunpack.i.l.bf16 %v12380_v39  ;;  %v16421_v20 = vunpack.i.l.bf16 %v12168_v63  ;;  %8451 = vrot.lane.b32.xlu0 %v11992_v55, %s16443_s12 }
 0xc47   : > { %vm16422_vm10 = vcmp.lt.s32.totalorder %v9086_v15, 38  ;;  %v16424_v11 = vunpack.i.h.bf16 %v12380_v39  ;;  %v16429_v57 = vunpack.i.l.bf16 %v12390_v18  ;;  %v16439_v39 = vunpack.i.h.bf16 %v12152_v37  ;;  %8421 = vrot.lane.b32.xlu1 %v12008_v42, %s16285_s1 }
 0xc48   : > { %v12808_v31 = vsel %vm16422_vm10, %v16421_v20, %v16420_v29  ;;  %vm16426_vm14 = vmmov %vm16422_vm10  ;;  %v16433_v29 = vunpack.i.h.bf16 %v12390_v18  ;;  %v12850_v18 = vpop.permute.xlu0 %8156  ;;  %v16445_v37 = vunpack.i.l.bf16 %v12412_v26  ;;  %v8028_v55 = vunpack.i.l.bf16 %v12476_v41 }
 0xc49   : > { %16423 = vst [vmem:[#allocation138_spill] sm:$0xff] %v12808_v31  ;;  %v12816_v23 = vsel %vm16426_vm14, %v16425_v46, %v16424_v11  ;;  %v12824_v9 = vsel %vm16430_vm4, %v16429_v57, %v16428_v7  ;;  %vm16434_vm10 = vmmov %vm16430_vm4  ;;  %v16437_v11 = vunpack.i.l.bf16 %v12392_v14  ;;  %vm16438_vm14 = vcmp.lt.s32.totalorder %v9086_v15, 2 }
 0xc4a   : > { %16427 = vst [vmem:[#allocation139_spill] sm:$0xff] %v12816_v23  ;;  %16431 = vst [vmem:[#allocation140_spill] sm:$0xff] %v12824_v9  ;;  %v12832_v20 = vsel %vm16434_vm10, %v16433_v29, %v16432_v60  ;;  %v16440_v7 = vunpack.i.h.bf16 %v12392_v14  ;;  %v12852_v60 = vpop.permute.xlu1 %8146  ;;  %v12879_v29 = vsel %vm818_vm7, %v16445_v37, %v16444_v48  ;;  %v8024_v14 = vunpack.i.h.bf16 %v12468_v13  ;;  %8461 = vrot.lane.b32.xlu0 %v12020_v59, %s16356_s13 }
 0xc4b   : > { %16435 = vst [vmem:[#allocation141_spill] sm:$0xff] %v12832_v20  ;;  %v12840_v46 = vsel %vm16438_vm14, %v16437_v11, %v16436_v0  ;;  %vm16441_vm4 = vmmov %vm16438_vm14  ;;  %v8029_v37 = vunpack.i.h.bf16 %v12476_v41  ;;  %v16448_v11 = vunpack.i.h.bf16 %v12412_v26  ;;  %8426 = vrot.lane.b32.xlu1 %v12008_v42, %s16368_s11  ;;  %v16449_v41 = vunpack.i.l.bf16 %v12414_v33 }
 0xc4c   : > { %v12848_v57 = vsel %vm16441_vm4, %v16440_v7, %v16439_v39  ;;  %16442 = vst [vmem:[#allocation142_spill] sm:$0xff] %v12850_v18  ;;  %v8023_v18 = vunpack.i.l.bf16 %v12468_v13  ;;  %v8172_v21 = vpop.permute.xlu0 %8171  ;;  %v16447_v7 = vunpack.i.h.bf16 %v12182_v1  ;;  %v16451_v31 = vunpack.i.h.bf16 %v12414_v33 }
 0xc4d   : > { %v8174_v53 = vunpack.i.h.bf16 %v8172_v21  ;;  %v8173_v39 = vunpack.i.l.bf16 %v8172_v21  ;;  %v16450_v21 = vunpack.i.l.bf16 %v12142_v38  ;;  %v16452_v26 = vunpack.i.h.bf16 %v12142_v38 }
 0xc4e   : > { %v12891_v48 = vpop.permute.xlu1 %8151  ;;  %v12902_v0 = vsel %vm818_vm7, %v16448_v11, %v16447_v7  ;;  %v16455_v1 = vunpack.i.l.bf16 %v12198_v54  ;;  %v16456_v23 = vunpack.i.l.bf16 %v12434_v28  ;;  %v16458_v38 = vunpack.i.h.bf16 %v12434_v28  ;;  %8466 = vrot.lane.b32.xlu0 %v11929_v40, %s16443_s12 }
 0xc4f   : > { %16446 = vst [vmem:[#allocation143_spill] sm:$0xff] %v12891_v48  ;;  %v12914_v13 = vsel %vm766_vm3, %v16450_v21, %v16449_v41  ;;  %v12922_v11 = vsel %vm766_vm3, %v16452_v26, %v16451_v31  ;;  %v12926_v7 = vsel %vm740_vm1, %v8173_v39, %v8028_v55  ;;  %v12930_v48 = vsel %vm740_vm1, %v8174_v53, %v8029_v37 }
 0xc50   : > { %16453 = vst [vmem:[#allocation144_spill] sm:$0xff] %v12926_v7  ;;  %16454 = vst [vmem:[#allocation145_spill] sm:$0xff] %v12930_v48  ;;  %v4210_v41 = vsel %vm740_vm1, %v8023_v18, %v8173_v39  ;;  %v4211_v33 = vsel %vm740_vm1, %v8024_v14, %v8174_v53  ;;  %v8177_v26 = vpop.permute.xlu0 %8176  ;;  %v12948_v39 = vsel %vm831_vm8, %v16456_v23, %v16455_v1  ;;  %v16457_v53 = vunpack.i.h.bf16 %v12198_v54 }
 0xc51   : > { %v5325_v9 = vpack.c.bf16 %v4211_v33, %v4210_v41  ;;  %v8179_v41 = vunpack.i.h.bf16 %v8177_v26  ;;  %v8178_v33 = vunpack.i.l.bf16 %v8177_v26  ;;  %v8004_v20 = vunpack.i.h.bf16 %v12444_v52  ;;  %8441 = vrot.lane.b32.xlu1 %v11942_v58, %s16000_s5 }
 0xc52   : > { %v12938_v31 = vpop.permute.xlu1 %8161  ;;  %v12956_v21 = vsel %vm831_vm8, %v16458_v38, %v16457_v53  ;;  %v8003_v7 = vunpack.i.l.bf16 %v12444_v52  ;;  %v16461_v40 = vunpack.i.l.bf16 %v12160_v35  ;;  %v16462_v26 = vunpack.i.l.bf16 %v12436_v30  ;;  %8481 = vrot.lane.b32.xlu0 %v12020_v59, %s16368_s11 }
 0xc53   : > { %v4214_v1 = vsel %vm740_vm1, %v8178_v33, %v8023_v18  ;;  %v4215_v23 = vsel %vm740_vm1, %v8179_v41, %v8024_v14  ;;  %5559 = vmatprep.subr.bf16.mxu0 %v5325_v9  ;;  %v12972_v52 = vsel %vm740_vm1, %v8028_v55, %v8178_v33  ;;  %v12976_v38 = vsel %vm740_vm1, %v8029_v37, %v8179_v41 }
 0xc54   : > { %16459 = vst [vmem:[#allocation146_spill] sm:$0xff] %v12972_v52  ;;  %16460 = vst [vmem:[#allocation147_spill] sm:$0xff] %v12976_v38  ;;  %v12984_v53 = vsel %vm883_vm11, %v16462_v26, %v16461_v40  ;;  %v16463_v18 = vunpack.i.h.bf16 %v12160_v35  ;;  %v16464_v14 = vunpack.i.h.bf16 %v12436_v30  ;;  %v12994_v55 = vpop.permute.xlu0 %8181  ;;  %v5324_v41 = vpack.c.bf16 %v4215_v23, %v4214_v1 }
 0xc55   : > { %16465 = vst [vmem:[#allocation148_spill] sm:$0xff] %v12994_v55  ;;  %v8039_v48 = vunpack.i.h.bf16 %v12538_v49  ;;  %v8038_v40 = vunpack.i.l.bf16 %v12538_v49  ;;  %v15734_v35 = vunpack.i.h.bf16 %v12994_v55  ;;  %v15731_v26 = vunpack.i.l.bf16 %v12994_v55  ;;  %8456 = vrot.lane.b32.xlu1 %v11942_v58, %s16443_s12 }
 0xc56   : > { %v12992_v9 = vsel %vm883_vm11, %v16464_v14, %v16463_v18  ;;  %v12996_v37 = vpop.permute.xlu1 %8166  ;;  %v16467_v18 = vunpack.i.l.bf16 %v12214_v8  ;;  %v16468_v1 = vunpack.i.h.bf16 %v12214_v8  ;;  %5560 = vmatpush1.bf16.msra.mxu0 %v5324_v41  ;;  %v16469_v33 = vunpack.i.l.bf16 %v12446_v4  ;;  %8486 = vrot.lane.b32.xlu0 %v12000_v25, %s16443_s12 }
 0xc57   : > { %16466 = vst [vmem:[#allocation149_spill] sm:$0xff] %v12996_v37  ;;  %vm16471_vm1 = vcmp.lt.s32.totalorder %v9086_v15, 39  ;;  %v16472_v41 = vunpack.i.h.bf16 %v12446_v4  ;;  %v16473_v49 = vunpack.i.h.bf16 %v12150_v16  ;;  %v16475_v8 = vpack.c.bf16 %v12722_v50, %v12714_v2 }
 0xc58   : > { %v13009_v14 = vsel %vm935_vm6, %v16467_v18, %v8003_v7  ;;  %v13015_v23 = vsel %vm935_vm6, %v16468_v1, %v8004_v20  ;;  %v4594_v18 = vsel %vm844_vm9, %v8038_v40, %v15731_v26  ;;  %v4595_v1 = vsel %vm844_vm9, %v8039_v48, %v15734_v35  ;;  %vm16474_vm10 = vmmov %vm16471_vm1  ;;  %v13050_v35 = vpop.permute.xlu0 %8186 }
 0xc59   : > { %v13037_v30 = vsel %vm16471_vm1, %v16470_v34, %v16469_v33  ;;  %v13045_v26 = vsel %vm16474_vm10, %v16473_v49, %v16472_v41  ;;  %5561 = vmatprep.subr.bf16.mxu0 %v16475_v8  ;;  %16476 = vst [vmem:[#allocation150_spill] sm:$0xff] %v13050_v35  ;;  %v5389_v28 = vpack.c.bf16 %v4595_v1, %v4594_v18  ;;  %v16478_v8 = vunpack.i.l.bf16 %v12208_v10  ;;  %v16500_v35 = vld [vmem:[#allocation112_spill] sm:$0xff] }
 0xc5a   : > { %v13052_v55 = vpop.permute.xlu1 %8191  ;;  %v16479_v2 = vunpack.i.h.bf16 %v12208_v10  ;;  %8471 = vrot.lane.b32.xlu1 %v12008_v42, %s16000_s5  ;;  %vm16486_vm14 = vcmp.lt.s32.totalorder %v9086_v15, 38  ;;  %8496 = vrot.lane.b32.xlu0 %v12020_v59, %s16443_s12  ;;  %vm16492_vm1 = vcmp.lt.s32.totalorder %v9086_v15, 18  ;;  %v8054_v37 = vunpack.i.h.bf16 %v16500_v35 }
 0xc5b   : > { %16477 = vst [vmem:[#allocation151_spill] sm:$0xff] %v13052_v55  ;;  %v15740_v49 = vunpack.i.h.bf16 %v13052_v55  ;;  %v15739_v41 = vunpack.i.l.bf16 %v13052_v55  ;;  %v13066_v50 = vsel %vm935_vm6, %v8003_v7, %v16478_v8  ;;  %v16480_v7 = vpack.c.bf16 %v12799_v51, %v12771_v6  ;;  %5600 = vmatprep.subr.bf16.mxu1 %v5389_v28  ;;  %v16481_v8 = vld [vmem:[#allocation110_spill] sm:$0xff]  ;;  %vm16489_vm4 = vmmov %vm16486_vm14 }
 0xc5c   : > { %v13072_v18 = vsel %vm935_vm6, %v8004_v20, %v16479_v2  ;;  %v8044_v34 = vunpack.i.h.bf16 %v16481_v8  ;;  %v8043_v33 = vunpack.i.l.bf16 %v16481_v8  ;;  %v13099_v20 = vpop.permute.xlu0 %8201  ;;  %v16484_v28 = vunpack.i.l.bf16 %v12168_v63  ;;  %vm16494_vm10 = vmmov %vm16492_vm1 }
 0xc5d   : > { %v4598_v2 = vsel %vm844_vm9, %v15739_v41, %v8038_v40  ;;  %v4599_v25 = vsel %vm844_vm9, %v15740_v49, %v8039_v48  ;;  %5562 = vmatpush1.bf16.msra.mxu0 %v16480_v7  ;;  %16482 = vst [vmem:[#allocation110_spill] sm:$0xff] %v13099_v20  ;;  %v15743_v48 = vunpack.i.l.bf16 %v13099_v20  ;;  %v16485_v7 = vunpack.i.l.bf16 %v12454_v43  ;;  %v16490_v40 = vld [vmem:[#allocation105_spill] sm:$0xff]  ;;  %v16491_v41 = vld [vmem:[#allocation108_spill] sm:$0xff] }
 0xc5e   : > { %v13101_v1 = vpop.permute.xlu1 %8196  ;;  %v5388_v16 = vpack.c.bf16 %v4599_v25, %v4598_v2  ;;  %v16487_v2 = vunpack.i.h.bf16 %v12168_v63  ;;  %v16488_v25 = vunpack.i.h.bf16 %v12454_v43  ;;  %v8034_v6 = vunpack.i.h.bf16 %v16491_v41  ;;  %8476 = vrot.lane.b32.xlu1 %v12008_v42, %s16443_s12  ;;  %8501 = vrot.lane.b32.xlu0 %v11942_v58, %s15926_s27 }
 0xc5f   : > { %16483 = vst [vmem:[#allocation152_spill] sm:$0xff] %v13101_v1  ;;  %v13115_v8 = vsel %vm16486_vm14, %v16485_v7, %v16484_v28  ;;  %v4646_v63 = vsel %vm16492_vm1, %v15743_v48, %v8043_v33  ;;  %v16493_v28 = vunpack.i.h.bf16 %v13099_v20  ;;  %vm16496_vm14 = vmmov %vm16492_vm1  ;;  %v16497_v59 = vunpack.i.h.bf16 %v13101_v1 }
 0xc60   : > { %v13123_v49 = vsel %vm16489_vm4, %v16488_v25, %v16487_v2  ;;  %5601 = vmatpush1.bf16.msra.mxu1 %v5388_v16  ;;  %v16495_v2 = vunpack.i.l.bf16 %v13101_v1  ;;  %vm16498_vm4 = vmmov %vm16492_vm1  ;;  %v8033_v10 = vunpack.i.l.bf16 %v16491_v41  ;;  %v8149_v48 = vunpack.i.h.bf16 %v12852_v60  ;;  %v8212_v16 = vpop.permute.xlu0 %8211 }
 0xc61   : > { %v4647_v7 = vsel %vm16494_vm10, %v16493_v28, %v8044_v34  ;;  %v4643_v51 = vsel %vm16498_vm4, %v8044_v34, %v16497_v59  ;;  %v8148_v20 = vunpack.i.l.bf16 %v12852_v60  ;;  %v16499_v28 = vpack.c.bf16 %v12791_v45, %v12783_v62  ;;  %v16501_v34 = vld [vmem:[#allocation122_spill] sm:$0xff] }
 0xc62   : > { %v4642_v25 = vsel %vm16496_vm14, %v8043_v33, %v16495_v2  ;;  %v8207_v55 = vpop.permute.xlu1 %8206  ;;  %v8214_v4 = vunpack.i.h.bf16 %v8212_v16  ;;  %v8213_v33 = vunpack.i.l.bf16 %v8212_v16  ;;  %v8049_v59 = vunpack.i.h.bf16 %v16501_v34  ;;  %8491 = vrot.lane.b32.xlu1 %v11942_v58, %s15925_s6  ;;  %8511 = vrot.lane.b32.xlu0 %v12008_v42, %s15926_s27 }
 0xc63   : > { %5602 = vmatprep.subr.bf16.mxu1 %v16499_v28  ;;  %v5397_v43 = vpack.c.bf16 %v4643_v51, %v4642_v25  ;;  %v8209_v2 = vunpack.i.h.bf16 %v8207_v55  ;;  %v8208_v1 = vunpack.i.l.bf16 %v8207_v55  ;;  %v8048_v41 = vunpack.i.l.bf16 %v16501_v34 }
 0xc64   : > { %v5396_v62 = vpack.c.bf16 %v4647_v7, %v4646_v63  ;;  %v4262_v45 = vsel %vm753_vm2, %v8213_v33, %v8033_v10  ;;  %v4263_v60 = vsel %vm753_vm2, %v8214_v4, %v8034_v6  ;;  %v16502_v25 = vpack.c.bf16 %v12643_v24, %v12635_v3  ;;  %v13175_v63 = vpop.permute.xlu0 %8216 }
 0xc65   : > { %v13166_v55 = vsel %vm753_vm2, %v8208_v1, %v8148_v20  ;;  %v13170_v51 = vsel %vm753_vm2, %v8209_v2, %v8149_v48  ;;  %16503 = vst [vmem:[#allocation105_spill] sm:$0xff] %v13175_v63  ;;  %v4258_v28 = vsel %vm753_vm2, %v8033_v10, %v8208_v1  ;;  %v4259_v16 = vsel %vm753_vm2, %v8034_v6, %v8209_v2 }
 0xc66   : > { %5603 = vmatpush1.bf16.msra.mxu1 %v16502_v25  ;;  %v13177_v7 = vpop.permute.xlu1 %8221  ;;  %v5332_v34 = vpack.c.bf16 %v4263_v60, %v4262_v45  ;;  %v13185_v52 = vsel %vm753_vm2, %v8148_v20, %v8213_v33  ;;  %v15758_v38 = vunpack.i.h.bf16 %v13175_v63  ;;  %v15760_v24 = vunpack.i.l.bf16 %v13175_v63  ;;  %8506 = vrot.lane.b32.xlu1 %v12008_v42, %s15925_s6  ;;  %v16582_v63 = vld [vmem:[#allocation95_spill] sm:$0xff] }
 0xc67   : > { %5604 = vmatprep.subr.bf16.mxu1 %v5397_v43  ;;  %16504 = vst [vmem:[#allocation108_spill] sm:$0xff] %v13177_v7  ;;  %v15761_v3 = vunpack.i.h.bf16 %v13177_v7  ;;  %v15759_v43 = vunpack.i.l.bf16 %v13177_v7  ;;  %v8053_v25 = vunpack.i.l.bf16 %v16500_v35  ;;  %v5333_v10 = vpack.c.bf16 %v4259_v16, %v4258_v28  ;;  %8521 = vrot.lane.b32.xlu0 %v11942_v58, %s16274_s21 }
 0xc68   : > { %v13198_v1 = vsel %vm753_vm2, %v8149_v48, %v8214_v4  ;;  %v8164_v6 = vunpack.i.h.bf16 %v12938_v31  ;;  %vm16505_vm1 = vcmp.lt.s32.totalorder %v9086_v15, 2  ;;  %v8163_v48 = vunpack.i.l.bf16 %v12938_v31  ;;  %v8232_v45 = vpop.permute.xlu0 %8231 }
 0xc69   : > { %v4694_v35 = vsel %vm16505_vm1, %v15759_v43, %v8048_v41  ;;  %vm16506_vm10 = vmmov %vm16505_vm1  ;;  %5563 = vmatprep.subr.bf16.mxu0 %v5333_v10  ;;  %v8234_v16 = vunpack.i.h.bf16 %v8232_v45  ;;  %v16511_v10 = vunpack.i.l.bf16 %v12176_v36 }
 0xc6a   : > { %5605 = vmatpush1.bf16.msra.mxu1 %v5396_v62  ;;  %v4690_v33 = vsel %vm16506_vm10, %v8048_v41, %v15760_v24  ;;  %vm16507_vm2 = vmmov %vm16505_vm1  ;;  %v16509_v62 = vpack.c.bf16 %v12678_v22, %v12670_v19  ;;  %v8227_v60 = vpop.permute.xlu1 %8226  ;;  %5564 = vmatpush1.bf16.msra.mxu0 %v5332_v34  ;;  %v16512_v22 = vld [vmem:[#allocation124_spill] sm:$0xff]  ;;  %v16513_v34 = vpack.c.bf16 %v12922_v11, %v12914_v13  ;;  %v16516_v13 = vld [vmem:[#allocation75_spill] sm:$0xff] }
 0xc6b   : > { %v4691_v4 = vsel %vm16507_vm2, %v8049_v59, %v15758_v38  ;;  %vm16508_vm14 = vmmov %vm16505_vm1  ;;  %v8233_v38 = vunpack.i.l.bf16 %v8232_v45  ;;  %v8229_v31 = vunpack.i.h.bf16 %v8227_v60  ;;  %v8228_v43 = vunpack.i.l.bf16 %v8227_v60  ;;  %8516 = vrot.lane.b32.xlu1 %v16516_v13, %s15922_s2  ;;  %8526 = vrot.lane.b32.xlu0 %v12008_v42, %s16274_s21  ;;  %s17104_s21 = sld [smem:[#allocation171_spill]] }
 0xc6c   : > { %v4695_v2 = vsel %vm16508_vm14, %v15761_v3, %v8049_v59  ;;  %5606 = vmatprep.subr.bf16.mxu1 %v16509_v62  ;;  %v5405_v41 = vpack.c.bf16 %v4691_v4, %v4690_v33  ;;  %v16510_v59 = vunpack.i.l.bf16 %v16490_v40  ;;  %v8059_v33 = vunpack.i.h.bf16 %v16512_v22  ;;  %5565 = vmatprep.subr.bf16.mxu0 %v16513_v34 }
 0xc6d   : > { %v8058_v4 = vunpack.i.l.bf16 %v16512_v22  ;;  %v4310_v62 = vsel %vm766_vm3, %v8233_v38, %v8053_v25  ;;  %v4311_v45 = vsel %vm766_vm3, %v8234_v16, %v8054_v37  ;;  %v13247_v60 = vsel %vm766_vm3, %v8228_v43, %v8163_v48 }
 0xc6e   : > { %v13232_v19 = vsel %vm896_vm13, %v16511_v10, %v16510_v59  ;;  %16514 = vst [vmem:[#allocation112_spill] sm:$0xff] %v13247_v60  ;;  %v13251_v59 = vsel %vm766_vm3, %v8229_v31, %v8164_v6  ;;  %v16517_v11 = vpack.c.bf16 %v12848_v57, %v12840_v46  ;;  %v13258_v10 = vpop.permute.xlu0 %8236  ;;  %v13260_v22 = vpop.permute.xlu1 %8241  ;;  %v4306_v34 = vsel %vm766_vm3, %v8053_v25, %v8228_v43 }
 0xc6f   : > { %16515 = vst [vmem:[#allocation122_spill] sm:$0xff] %v13251_v59  ;;  %16518 = vst [vmem:[#allocation124_spill] sm:$0xff] %v13258_v10  ;;  %v4307_v3 = vsel %vm766_vm3, %v8054_v37, %v8229_v31  ;;  %v5404_v20 = vpack.c.bf16 %v4695_v2, %v4694_v35  ;;  %v5340_v28 = vpack.c.bf16 %v4311_v45, %v4310_v62  ;;  %v15764_v46 = vunpack.i.h.bf16 %v13258_v10  ;;  %v16524_v35 = vld [vmem:[#allocation106_spill] sm:$0xff]  ;;  %v16525_v2 = vld [vmem:[#allocation79_spill] sm:$0xff] }
 0xc70   : > { %5607 = vmatpush1.bf16.msra.mxu1 %v16517_v11  ;;  %16519 = vst [vmem:[#allocation75_spill] sm:$0xff] %v13260_v22  ;;  %v16520_v24 = vpack.c.bf16 %v12698_v27, %v12690_v12  ;;  %v15765_v57 = vunpack.i.l.bf16 %v13258_v10  ;;  %v15766_v11 = vunpack.i.h.bf16 %v13260_v22  ;;  %v13274_v7 = vsel %vm766_vm3, %v8163_v48, %v8233_v38  ;;  %8531 = vrot.lane.b32.xlu1 %v16525_v2, %s15922_s2  ;;  %v16528_v27 = vld [vmem:[#allocation107_spill] sm:$0xff] }
 0xc71   : > { %5608 = vmatprep.subr.bf16.mxu1 %v5405_v41  ;;  %16521 = vst [vmem:[#allocation153_spill] sm:$0xff] %v13274_v7  ;;  %v15767_v43 = vunpack.i.l.bf16 %v13260_v22  ;;  %v5341_v37 = vpack.c.bf16 %v4307_v3, %v4306_v34  ;;  %v13281_v12 = vsel %vm766_vm3, %v8164_v6, %v8234_v16  ;;  %v16523_v25 = vunpack.i.h.bf16 %v12176_v36  ;;  %v16526_v41 = vld [vmem:[#allocation114_spill] sm:$0xff]  ;;  %8541 = vrot.lane.b32.xlu0 %v11942_v58, %s16283_s25  ;;  %v16563_v36 = vld [vmem:[#allocation111_spill] sm:$0xff] }
 0xc72   : > { %5566 = vmatpush1.bf16.msra.mxu0 %v16520_v24  ;;  %v16522_v24 = vunpack.i.h.bf16 %v16490_v40  ;;  %v15773_v48 = vunpack.i.h.bf16 %v16524_v35  ;;  %v4738_v3 = vsel %vm883_vm11, %v8058_v4, %v15765_v57  ;;  %v4739_v6 = vsel %vm883_vm11, %v8059_v33, %v15764_v46  ;;  %v13306_v62 = vpop.permute.xlu0 %8256  ;;  %v13308_v45 = vpop.permute.xlu1 %8246  ;;  %v16565_v22 = vld [vmem:[#allocation138_spill] sm:$0xff] }
 0xc73   : > { %v8064_v16 = vunpack.i.h.bf16 %v16526_v41  ;;  %v8063_v31 = vunpack.i.l.bf16 %v16526_v41  ;;  %5567 = vmatprep.subr.bf16.mxu0 %v5341_v37  ;;  %v5413_v34 = vpack.c.bf16 %v4739_v6, %v4738_v3  ;;  %v15768_v46 = vunpack.i.h.bf16 %v13306_v62 }
 0xc74   : > { %v13291_v38 = vsel %vm896_vm13, %v16523_v25, %v16522_v24  ;;  %5609 = vmatpush1.bf16.msra.mxu1 %v5404_v20  ;;  %v16527_v25 = vpack.c.bf16 %v12762_v17, %v12754_v32  ;;  %v15769_v57 = vunpack.i.l.bf16 %v13306_v62  ;;  %v15770_v37 = vunpack.i.h.bf16 %v13308_v45  ;;  %8536 = vrot.lane.b32.xlu1 %v16516_v13, %s15936_s3 }
 0xc75   : > { %v15771_v20 = vunpack.i.l.bf16 %v13308_v45  ;;  %v15772_v41 = vunpack.i.l.bf16 %v16524_v35  ;;  %v7968_v3 = vunpack.i.l.bf16 %v16528_v27  ;;  %v4743_v32 = vsel %vm883_vm11, %v15766_v11, %v8059_v33  ;;  %8546 = vrot.lane.b32.xlu0 %v12008_v42, %s16283_s25  ;;  %s17148_s25 = sld [smem:[#allocation170_spill]] }
 0xc76   : > { %5568 = vmatpush1.bf16.msra.mxu0 %v5340_v28  ;;  %5610 = vmatprep.subr.bf16.mxu1 %v16527_v25  ;;  %v4742_v28 = vsel %vm883_vm11, %v15767_v43, %v8058_v4  ;;  %v16529_v17 = vpack.c.bf16 %v13045_v26, %v13037_v30  ;;  %vm16530_vm3 = vcmp.lt.s32.totalorder %v9086_v15, 39  ;;  %v16534_v33 = vunpack.i.l.bf16 %v12452_v47  ;;  %v13363_v43 = vpop.permute.xlu0 %8261 }
 0xc77   : > { %v4358_v6 = vsel %vm16530_vm3, %v15769_v57, %v8063_v31  ;;  %vm16531_vm4 = vmmov %vm16530_vm3  ;;  %v16535_v25 = vunpack.i.l.bf16 %v12230_v5  ;;  %v16536_v11 = vpack.c.bf16 %v12992_v9, %v12984_v53  ;;  %vm16550_vm2 = vcmp.lt.s32.totalorder %v9086_v15, 126 }
 0xc78   : > { %5569 = vmatprep.subr.bf16.mxu0 %v16529_v17  ;;  %v4359_v4 = vsel %vm16531_vm4, %v15768_v46, %v8064_v16  ;;  %vm16532_vm1 = vmmov %vm16530_vm3  ;;  %v16537_v46 = vunpack.i.l.bf16 %v12158_v56  ;;  %8551 = vrot.lane.b32.xlu1 %v16525_v2, %s15936_s3  ;;  %vm16553_vm14 = vcmp.lt.s32.totalorder %v9086_v15, 22  ;;  %v16611_v7 = vpack.c.bf16 %v13291_v38, %v13232_v19  ;;  %v16617_v19 = vld [vmem:[#allocation123_spill] sm:$0xff] }
 0xc79   : > { %v4354_v30 = vsel %vm16532_vm1, %v8063_v31, %v15771_v20  ;;  %vm16533_vm10 = vmmov %vm16532_vm1  ;;  %v13358_v17 = vsel %vm961_vm15, %v16535_v25, %v16534_v33  ;;  %5611 = vmatpush1.bf16.msra.mxu1 %v16536_v11  ;;  %v13365_v31 = vpop.permute.xlu1 %8251  ;;  %v16539_v33 = vunpack.i.h.bf16 %v12158_v56  ;;  %v16540_v25 = vunpack.i.h.bf16 %v16490_v40  ;;  %v16564_v56 = vld [vmem:[#allocation139_spill] sm:$0xff]  ;;  %8561 = vrot.lane.b32.xlu0 %v11942_v58, %s15927_s28 }
 0xc7a   : > { %v4355_v26 = vsel %vm16533_vm10, %v8064_v16, %v15770_v37  ;;  %v16538_v16 = vunpack.i.l.bf16 %v16490_v40  ;;  %v16541_v11 = vunpack.i.h.bf16 %v12452_v47  ;;  %5612 = vmatprep.subr.bf16.mxu1 %v5413_v34  ;;  %v5348_v40 = vpack.c.bf16 %v4359_v4, %v4358_v6  ;;  %v16548_v6 = vld [vmem:[#allocation96_spill] sm:$0xff]  ;;  %vm16555_vm3 = vmmov %vm16553_vm14  ;;  %v13440_v9 = vpop.permute.xlu0 %8271 }
 0xc7b   : > { %v5349_v24 = vpack.c.bf16 %v4355_v26, %v4354_v30  ;;  %v13381_v53 = vsel %vm896_vm13, %v16540_v25, %v16539_v33  ;;  %v16542_v30 = vunpack.i.h.bf16 %v12230_v5  ;;  %v5352_v33 = vpack.c.bf16 %v13123_v49, %v13115_v8  ;;  %vm16562_vm4 = vmmov %vm16550_vm2 }
 0xc7c   : > { %v13373_v57 = vsel %vm896_vm13, %v16538_v16, %v16537_v46  ;;  %v16543_v46 = vld [vmem:[#allocation137_spill] sm:$0xff]  ;;  %v7969_v25 = vunpack.i.h.bf16 %v16528_v27  ;;  %v5412_v37 = vpack.c.bf16 %v4743_v32, %v4742_v28  ;;  %v16549_v49 = vunpack.i.l.bf16 %v16548_v6  ;;  %vm16569_vm1 = vmmov %vm16550_vm2  ;;  %8556 = vrot.lane.b32.xlu1 %v16516_v13, %s15938_s0 }
 0xc7d   : > { %v13390_v26 = vsel %vm961_vm15, %v16542_v30, %v16541_v11  ;;  %v16544_v16 = vpack.c.bf16 %v12746_v61, %v16543_v46  ;;  %v16545_v30 = vld [vmem:[#allocation44_spill] sm:$0xff]  ;;  %v16547_v61 = vunpack.i.l.bf16 %v12452_v47  ;;  %v5425_v27 = vpack.c.bf16 %v13381_v53, %v13373_v57  ;;  %v16556_v46 = vld [vmem:[#allocation109_spill] sm:$0xff]  ;;  %vm16571_vm10 = vmmov %vm16569_vm1  ;;  %8566 = vrot.lane.b32.xlu0 %v12008_v42, %s15927_s28 }
 0xc7e   : > { %v16546_v20 = vunpack.i.l.bf16 %v16545_v30  ;;  %v13414_v8 = vsel %vm16550_vm2, %v16549_v49, %v7968_v3  ;;  %v16557_v53 = vld [vmem:[#allocation117_spill] sm:$0xff]  ;;  %5613 = vmatpush1.bf16.msra.mxu1 %v5412_v37  ;;  %vm16572_vm2 = vcmp.lt.s32.totalorder %v9086_v15, 38  ;;  %v16581_v5 = vunpack.i.l.bf16 %v16556_v46  ;;  %v16597_v42 = vld [vmem:[#allocation126_spill] sm:$0xff] }
 0xc7f   : > { %5570 = vmatpush1.bf16.msra.mxu0 %v16544_v16  ;;  %v8068_v49 = vunpack.i.l.bf16 %v16557_v53  ;;  %v15797_v60 = vunpack.i.l.bf16 %v16597_v42  ;;  %v15806_v38 = vunpack.i.h.bf16 %v16617_v19 }
 0xc80   : > { %5571 = vmatprep.subr.bf16.mxu0 %v5349_v24  ;;  %v13408_v34 = vsel %vm961_vm15, %v16547_v61, %v16546_v20  ;;  %v16551_v24 = vld [vmem:[#allocation78_spill] sm:$0xff]  ;;  %v8069_v61 = vunpack.i.h.bf16 %v16557_v53  ;;  %v16561_v53 = vunpack.i.h.bf16 %v16548_v6  ;;  %v13496_v6 = vpop.permute.xlu0 %8286  ;;  %8571 = vrot.lane.b32.xlu1 %v16525_v2, %s15938_s0 }
 0xc81   : > { %v16552_v28 = vunpack.i.l.bf16 %v16551_v24  ;;  %v16554_v32 = vunpack.i.h.bf16 %v16551_v24  ;;  %v16559_v24 = vld [vmem:[#allocation82_spill] sm:$0xff]  ;;  %8581 = vrot.lane.b32.xlu0 %v16525_v2, %s16291_s10  ;;  %v16609_v59 = vunpack.i.h.bf16 %v13496_v6 }
 0xc82   : > { %v13455_v37 = vsel %vm16562_vm4, %v16561_v53, %v7969_v25  ;;  %vm16577_vm4 = vmmov %vm16572_vm2 }
 0xc83   : > { %v13426_v20 = vsel %vm16553_vm14, %v16552_v28, %v15772_v41  ;;  %v13434_v4 = vsel %vm16555_vm3, %v16554_v32, %v15773_v48  ;;  %v13442_v28 = vpop.permute.xlu1 %8266  ;;  %5572 = vmatpush1.bf16.msra.mxu0 %v5348_v40  ;;  %v16558_v41 = vld [vmem:[#allocation81_spill] sm:$0xff]  ;;  %v15782_v32 = vunpack.i.h.bf16 %v13440_v9  ;;  %v15780_v48 = vunpack.i.l.bf16 %v13440_v9  ;;  %vm16573_vm14 = vmmov %vm16572_vm2 }
 0xc84   : > { %v16560_v11 = vpack.c.bf16 %v16558_v41, %v16559_v24  ;;  %v7983_v40 = vunpack.i.l.bf16 %v16563_v36  ;;  %v16566_v41 = vpack.c.bf16 %v16564_v56, %v16565_v22  ;;  %v16574_v22 = vunpack.i.l.bf16 %v13442_v28  ;;  %vm16575_vm3 = vmmov %vm16572_vm2  ;;  %8576 = vrot.lane.b32.xlu1 %v16516_v13, %s16291_s10 }
 0xc85   : > { %v4406_v56 = vsel %vm16572_vm2, %v15780_v48, %v8068_v49  ;;  %v4407_v58 = vsel %vm16573_vm14, %v15782_v32, %v8069_v61  ;;  %v5361_v10 = vpack.c.bf16 %v13434_v4, %v13426_v20  ;;  %vm16602_vm2 = vcmp.lt.s32.totalorder %v9086_v15, 22  ;;  %8591 = vrot.lane.b32.xlu0 %v16516_v13, %s16001_s7 }
 0xc86   : > { %5614 = vmatprep.subr.bf16.mxu1 %v16560_v11  ;;  %5573 = vmatprep.subr.bf16.mxu0 %v16566_v41  ;;  %v16567_v11 = vld [vmem:[#allocation94_spill] sm:$0xff]  ;;  %v16578_v41 = vld [vmem:[#allocation83_spill] sm:$0xff]  ;;  %vm16603_vm14 = vmmov %vm16602_vm2 }
 0xc87   : > { %v16568_v24 = vunpack.i.l.bf16 %v16567_v11  ;;  %v16570_v57 = vunpack.i.h.bf16 %v16567_v11  ;;  %v8277_v32 = vpop.permute.xlu1 %8276  ;;  %5574 = vmatpush1.bf16.msra.mxu0 %v5352_v33 }
 0xc88   : > { %v8279_v4 = vunpack.i.h.bf16 %v8277_v32  ;;  %8586 = vrot.lane.b32.xlu1 %v16516_v13, %s16343_s20 }
 0xc89   : > { %v13467_v16 = vsel %vm16569_vm1, %v7968_v3, %v16568_v24  ;;  %v13473_v53 = vsel %vm16571_vm10, %v7969_v25, %v16570_v57  ;;  %v4402_v3 = vsel %vm16575_vm3, %v8068_v49, %v16574_v22  ;;  %v16576_v25 = vunpack.i.h.bf16 %v13442_v28  ;;  %v16579_v24 = vld [vmem:[#allocation84_spill] sm:$0xff]  ;;  %8606 = vrot.lane.b32.xlu0 %v16525_v2, %s16001_s7 }
 0xc8a   : > { %v16580_v48 = vpack.c.bf16 %v16578_v41, %v16579_v24  ;;  %v16583_v49 = vunpack.i.l.bf16 %v16582_v63  ;;  %v8278_v41 = vunpack.i.l.bf16 %v8277_v32  ;;  %v5356_v24 = vpack.c.bf16 %v4407_v58, %v4406_v56  ;;  %v16591_v56 = vld [vmem:[#allocation100_spill] sm:$0xff] }
 0xc8b   : > { %v4403_v57 = vsel %vm16577_vm4, %v8069_v61, %v16576_v25  ;;  %v16584_v61 = vunpack.i.h.bf16 %v16556_v46  ;;  %v16585_v25 = vunpack.i.h.bf16 %v16582_v63  ;;  %v16589_v46 = vld [vmem:[#allocation120_spill] sm:$0xff]  ;;  %v16592_v58 = vunpack.i.l.bf16 %v16591_v56  ;;  %vm16608_vm4 = vmmov %vm16602_vm2 }
 0xc8c   : > { %5615 = vmatpush1.bf16.msra.mxu1 %v16580_v48  ;;  %v5357_v11 = vpack.c.bf16 %v4403_v57, %v4402_v3  ;;  %v13506_v22 = vsel %vm818_vm7, %v16583_v49, %v16581_v5  ;;  %v16586_v3 = vld [vmem:[#allocation93_spill] sm:$0xff]  ;;  %v7984_v49 = vunpack.i.h.bf16 %v16563_v36  ;;  %v15796_v35 = vunpack.i.h.bf16 %v16589_v46  ;;  %v13547_v5 = vpop.permute.xlu1 %8281  ;;  %8596 = vrot.lane.b32.xlu1 %v16525_v2, %s16343_s20 }
 0xc8d   : > { %v13514_v48 = vsel %vm818_vm7, %v16585_v25, %v16584_v61  ;;  %v16587_v57 = vld [vmem:[#allocation89_spill] sm:$0xff]  ;;  %v15795_v63 = vunpack.i.l.bf16 %v16589_v46  ;;  %vm16593_vm1 = vcmp.lt.s32.totalorder %v9086_v15, 110  ;;  %8611 = vrot.lane.b32.xlu0 %v16516_v13, %s16287_s8 }
 0xc8e   : > { %v16588_v20 = vpack.c.bf16 %v16586_v3, %v16587_v57  ;;  %5575 = vmatprep.subr.bf16.mxu0 %v5357_v11  ;;  %v16590_v61 = vld [vmem:[#allocation121_spill] sm:$0xff]  ;;  %v13538_v3 = vsel %vm16593_vm1, %v7983_v40, %v16592_v58  ;;  %v16594_v57 = vld [vmem:[#allocation90_spill] sm:$0xff]  ;;  %v4783_v58 = vsel %vm896_vm13, %v8279_v4, %v15796_v35  ;;  %v16599_v35 = vunpack.i.h.bf16 %v16591_v56  ;;  %vm16600_vm10 = vmmov %vm16593_vm1 }
 0xc8f   : > { %v8084_v25 = vunpack.i.h.bf16 %v16590_v61  ;;  %v8083_v32 = vunpack.i.l.bf16 %v16590_v61  ;;  %v13545_v61 = vpop.permute.xlu0 %8301  ;;  %v4782_v36 = vsel %vm896_vm13, %v8278_v41, %v15795_v63  ;;  %5576 = vmatpush1.bf16.msra.mxu0 %v5356_v24  ;;  %v16601_v24 = vunpack.i.h.bf16 %v16597_v42  ;;  %vm16606_vm3 = vmmov %vm16593_vm1 }
 0xc90   : > { %5616 = vmatprep.subr.bf16.mxu1 %v16588_v20  ;;  %v16595_v20 = vld [vmem:[#allocation88_spill] sm:$0xff]  ;;  %5577 = vmatprep.subr.bf16.mxu0 %v5361_v10  ;;  %v5429_v63 = vpack.c.bf16 %v4783_v58, %v4782_v36  ;;  %v13569_v11 = vsel %vm16600_vm10, %v7984_v49, %v16599_v35  ;;  %v16604_v58 = vld [vmem:[#allocation97_spill] sm:$0xff]  ;;  %vm16610_vm1 = vmmov %vm16602_vm2  ;;  %v8292_v56 = vpop.permute.xlu1 %8291 }
 0xc91   : > { %v16596_v33 = vpack.c.bf16 %v16594_v57, %v16595_v20  ;;  %v15798_v57 = vunpack.i.l.bf16 %v13547_v5  ;;  %v16598_v20 = vld [vmem:[#allocation113_spill] sm:$0xff]  ;;  %v4787_v10 = vsel %vm896_vm13, %v16601_v24, %v8279_v4  ;;  %v16607_v4 = vunpack.i.l.bf16 %v13496_v6  ;;  %vm16613_vm10 = vmmov %vm16606_vm3  ;;  %8601 = vrot.lane.b32.xlu1 %v16516_v13, %s16356_s13  ;;  %8626 = vrot.lane.b32.xlu0 %v16525_v2, %s16287_s8  ;;  %s17108_s8 = smov %s17107_s4 }
 0xc93   : > { %5617 = vmatpush1.bf16.msra.mxu1 %v16596_v33  ;;  %v15799_v33 = vunpack.i.h.bf16 %v13547_v5  ;;  %v4450_v36 = vsel %vm16602_vm2, %v8083_v32, %v15798_v57  ;;  %v4454_v24 = vsel %vm16608_vm4, %v16607_v4, %v8083_v32  ;;  %v4455_v57 = vsel %vm16610_vm1, %v16609_v59, %v8084_v25  ;;  %v16614_v32 = vld [vmem:[#allocation141_spill] sm:$0xff]  ;;  %v16615_v4 = vld [vmem:[#allocation140_spill] sm:$0xff]  ;;  %vm16641_vm1 = vmmov %vm16613_vm10 }
 0xc94   : > { %5618 = vmatprep.subr.bf16.mxu1 %v5425_v27  ;;  %v4786_v27 = vsel %vm896_vm13, %v15797_v60, %v8278_v41  ;;  %v16605_v41 = vunpack.i.l.bf16 %v16604_v58  ;;  %v16616_v46 = vpack.c.bf16 %v16614_v32, %v16615_v4  ;;  %v8294_v59 = vunpack.i.h.bf16 %v8292_v56 }
 0xc95   : > { %v4451_v35 = vsel %vm16603_vm14, %v8084_v25, %v15799_v33  ;;  %v13606_v33 = vpop.permute.xlu0 %8321  ;;  %v8293_v25 = vunpack.i.l.bf16 %v8292_v56  ;;  %v5364_v4 = vpack.c.bf16 %v4455_v57, %v4454_v24  ;;  %vm16623_vm2 = vcmp.lt.s32.totalorder %v9086_v15, 126  ;;  %v16625_v24 = vld [vmem:[#allocation128_spill] sm:$0xff]  ;;  %8616 = vrot.lane.b32.xlu1 %v16525_v2, %s16356_s13  ;;  %8631 = vrot.lane.b32.xlu0 %v16516_v13, %s16289_s29 }
 0xc96   : > { %v13593_v60 = vsel %vm16606_vm3, %v16605_v41, %v7983_v40  ;;  %v5365_v42 = vpack.c.bf16 %v4451_v35, %v4450_v36  ;;  %v16612_v40 = vunpack.i.h.bf16 %v16604_v58  ;;  %5578 = vmatpush1.bf16.msra.mxu0 %v16616_v46  ;;  %v15804_v36 = vunpack.i.l.bf16 %v16617_v19  ;;  %vm16624_vm14 = vmmov %vm16623_vm2  ;;  %v16627_v58 = vld [vmem:[#allocation115_spill] sm:$0xff] }
 0xc97   : > { %5619 = vmatpush1.bf16.msra.mxu1 %v16611_v7  ;;  %v16618_v35 = vunpack.i.l.bf16 %v16598_v20  ;;  %v16621_v7 = vunpack.i.h.bf16 %v16598_v20  ;;  %v7998_v19 = vunpack.i.l.bf16 %v16627_v58  ;;  %vm16629_vm3 = vmmov %vm16623_vm2 }
 0xc98   : > { %v13612_v41 = vsel %vm16613_vm10, %v16612_v40, %v7984_v49  ;;  %5620 = vmatprep.subr.bf16.mxu1 %v5429_v63  ;;  %5579 = vmatprep.subr.bf16.mxu0 %v5365_v42  ;;  %v5428_v49 = vpack.c.bf16 %v4787_v10, %v4786_v27  ;;  %v16619_v40 = vunpack.i.l.bf16 %v12198_v54  ;;  %v16620_v63 = vld [vmem:[#allocation125_spill] sm:$0xff]  ;;  %v16622_v42 = vunpack.i.h.bf16 %v12198_v54  ;;  %vm16630_vm4 = vmmov %vm16623_vm2 }
 0xc99   : > { %v8099_v56 = vunpack.i.h.bf16 %v16620_v63  ;;  %v8098_v32 = vunpack.i.l.bf16 %v16620_v63  ;;  %v13647_v63 = vpop.permute.xlu1 %8296  ;;  %v4830_v57 = vsel %vm16623_vm2, %v8293_v25, %v15804_v36  ;;  %v4831_v54 = vsel %vm16624_vm14, %v8294_v59, %v15806_v38  ;;  %vm16642_vm10 = vmmov %vm16641_vm1  ;;  %8621 = vrot.lane.b32.xlu1 %v16516_v13, %s16368_s11  ;;  %8646 = vrot.lane.b32.xlu0 %v16525_v2, %s16289_s29 }
 0xc9a   : > { %v13629_v46 = vsel %vm831_vm8, %v16619_v40, %v16618_v35  ;;  %v13641_v27 = vsel %vm831_vm8, %v16622_v42, %v16621_v7  ;;  %v13645_v40 = vpop.permute.xlu0 %8326  ;;  %v15807_v7 = vunpack.i.h.bf16 %v16625_v24  ;;  %v15808_v42 = vunpack.i.l.bf16 %v16625_v24  ;;  %5580 = vmatpush1.bf16.msra.mxu0 %v5364_v4  ;;  %vm16650_vm2 = vmmov %vm16641_vm1 }
 0xc9b   : > { %5621 = vmatpush1.bf16.msra.mxu1 %v5428_v49  ;;  %v16626_v49 = vpack.c.bf16 %v13473_v53, %v13467_v16  ;;  %v15809_v10 = vunpack.i.h.bf16 %v13647_v63  ;;  %v15810_v35 = vunpack.i.l.bf16 %v13647_v63  ;;  %v7999_v36 = vunpack.i.h.bf16 %v16627_v58  ;;  %vm16652_vm14 = vmmov %vm16641_vm1 }
 0xc9c   : > { %v16628_v38 = vpack.c.bf16 %v13514_v48, %v13506_v22  ;;  %v5437_v4 = vpack.c.bf16 %v4831_v54, %v4830_v57  ;;  %v5440_v16 = vpack.c.bf16 %v13612_v41, %v13593_v60  ;;  %v4834_v53 = vsel %vm16629_vm3, %v15808_v42, %v8293_v25  ;;  %v16634_v42 = vld [vmem:[#allocation127_spill] sm:$0xff] }
 0xc9d   : > { %5622 = vmatprep.subr.bf16.mxu1 %v16626_v49  ;;  %v4835_v58 = vsel %vm16630_vm4, %v15807_v7, %v8294_v59  ;;  %v4498_v22 = vsel %vm818_vm7, %v8098_v32, %v15810_v35  ;;  %v4499_v60 = vsel %vm818_vm7, %v8099_v56, %v15809_v10  ;;  %v16631_v48 = vunpack.i.l.bf16 %v13545_v61  ;;  %v8307_v54 = vpop.permute.xlu1 %8306  ;;  %8636 = vrot.lane.b32.xlu1 %v16525_v2, %s16368_s11  ;;  %s17102_s11 = sld [smem:[#allocation3_spill]] }
 0xc9e   : > { %5581 = vmatprep.subr.bf16.mxu0 %v16628_v38  ;;  %v16632_v59 = vunpack.i.h.bf16 %v13545_v61  ;;  %v16633_v38 = vpack.c.bf16 %v13455_v37, %v13414_v8  ;;  %v13702_v57 = vpop.permute.xlu0 %8346  ;;  %v5373_v49 = vpack.c.bf16 %v4499_v60, %v4498_v22  ;;  %v5377_v7 = vpack.c.bf16 %v13641_v27, %v13629_v46  ;;  %v16636_v8 = vld [vmem:[#allocation72_spill] sm:$0xff]  ;;  %8651 = vrot.lane.b32.xlu0 %v16516_v13, %s16290_s9 }
 0xc9f   : > { %v4502_v41 = vsel %vm818_vm7, %v16631_v48, %v8098_v32  ;;  %v15812_v10 = vunpack.i.h.bf16 %v16634_v42  ;;  %v15811_v32 = vunpack.i.l.bf16 %v16634_v42  ;;  %v16635_v48 = vpack.c.bf16 %v12902_v0, %v12879_v29  ;;  %v16640_v29 = vld [vmem:[#allocation129_spill] sm:$0xff] }
 0xca0   : > { %v4503_v25 = vsel %vm818_vm7, %v16632_v59, %v8099_v56  ;;  %5623 = vmatpush1.bf16.msra.mxu1 %v16633_v38  ;;  %v8309_v56 = vunpack.i.h.bf16 %v8307_v54  ;;  %v8308_v59 = vunpack.i.l.bf16 %v8307_v54  ;;  %v16637_v38 = vld [vmem:[#allocation99_spill] sm:$0xff]  ;;  %v5436_v60 = vpack.c.bf16 %v4835_v58, %v4834_v53  ;;  %v16643_v54 = vld [vmem:[#allocation130_spill] sm:$0xff] }
 0xca1   : > { %5582 = vmatpush1.bf16.msra.mxu0 %v16635_v48  ;;  %5624 = vmatprep.subr.bf16.mxu1 %v5437_v4  ;;  %v16638_v35 = vunpack.i.l.bf16 %v16637_v38  ;;  %v16639_v46 = vunpack.i.h.bf16 %v16637_v38  ;;  %v8114_v0 = vunpack.i.h.bf16 %v16640_v29  ;;  %v5372_v4 = vpack.c.bf16 %v4503_v25, %v4502_v41  ;;  %v16645_v48 = vld [vmem:[#allocation118_spill] sm:$0xff] }
 0xca2   : > { %5583 = vmatprep.subr.bf16.mxu0 %v5373_v49  ;;  %v4879_v53 = vsel %vm16642_vm10, %v8309_v56, %v15812_v10  ;;  %v8113_v58 = vunpack.i.l.bf16 %v16640_v29  ;;  %v13741_v25 = vpop.permute.xlu0 %8356  ;;  %v16644_v37 = vpack.c.bf16 %v13569_v11, %v13538_v3  ;;  %v8009_v38 = vunpack.i.h.bf16 %v16645_v48  ;;  %v16646_v41 = vld [vmem:[#allocation98_spill] sm:$0xff]  ;;  %8641 = vrot.lane.b32.xlu1 %v16516_v13, %s16443_s12 }
 0xca3   : > { %v13716_v22 = vsel %vm1039_vm12, %v16638_v35, %v7998_v19  ;;  %v13722_v27 = vsel %vm1039_vm12, %v16639_v46, %v7999_v36  ;;  %v4878_v35 = vsel %vm16641_vm1, %v8308_v59, %v15811_v32  ;;  %v13743_v46 = vpop.permute.xlu1 %8311  ;;  %v16647_v32 = vunpack.i.l.bf16 %v16646_v41  ;;  %8661 = vrot.lane.b32.xlu0 %v16525_v2, %s16290_s9  ;;  %s6404_s13 = sshll.u32 %s17102_s11, 7 }
 0xca4   : > { %5625 = vmatpush1.bf16.msra.mxu1 %v5436_v60  ;;  %v15815_v29 = vunpack.i.h.bf16 %v13743_v46  ;;  %v15814_v10 = vunpack.i.l.bf16 %v13743_v46  ;;  %v5445_v49 = vpack.c.bf16 %v4879_v53, %v4878_v35  ;;  %v8008_v60 = vunpack.i.l.bf16 %v16645_v48  ;;  %s15269_s1 = scalar_lea.vmem %s17148_s25, %s6404_s13 }
 0xca5   : > { %5584 = vmatpush1.bf16.msra.mxu0 %v5372_v4  ;;  %5626 = vmatprep.subr.bf16.mxu1 %v16644_v37  ;;  %v5308_v4 = vsel %vm1039_vm12, %v7998_v19, %v16647_v32  ;;  %v16648_v3 = vunpack.i.h.bf16 %v16646_v41  ;;  %v16649_v37 = vunpack.i.l.bf16 %v16643_v54  ;;  %v16653_v32 = vunpack.i.l.bf16 %v13645_v40 }
 0xca6   : > { %5585 = vmatprep.subr.bf16.mxu0 %v5377_v7  ;;  %v16651_v7 = vunpack.i.h.bf16 %v16643_v54  ;;  %v4546_v19 = vsel %vm831_vm8, %v8113_v58, %v15814_v10  ;;  %v16655_v10 = vunpack.i.h.bf16 %v16545_v30  ;;  %v16658_v42 = vunpack.i.l.bf16 %v16636_v8  ;;  %8656 = vrot.lane.b32.xlu1 %v16525_v2, %s16443_s12  ;;  %v5524_v2 = vld [vmem:[%s15325_s19] sm:$0xff]  ;;  %s17103_s12 = sshll.u32 %s17102_s11, 5 }
 0xca7   : > { %v5309_v11 = vsel %vm1039_vm12, %v7999_v36, %v16648_v3  ;;  %v4882_v35 = vsel %vm16650_vm2, %v16649_v37, %v8308_v59  ;;  %v4547_v36 = vsel %vm831_vm8, %v8114_v0, %v15815_v29  ;;  %v4550_v59 = vsel %vm831_vm8, %v16653_v32, %v8113_v58  ;;  %v13789_v3 = vpop.permute.xlu0 %8366  ;;  %v13791_v37 = vpop.permute.xlu1 %8316  ;;  %v16657_v58 = vld [vmem:[#allocation42_spill] sm:$0xff]  ;;  %s15079_s26 = scalar_lea.vmem %s17104_s21, %s17103_s12 }
 0xca8   : > { %v4883_v53 = vsel %vm16652_vm14, %v16651_v7, %v8309_v56  ;;  %v16654_v56 = vunpack.i.h.bf16 %v13645_v40  ;;  %5627 = vmatpush1.bf16.msra.mxu1 %v5440_v16  ;;  %v5381_v7 = vpack.c.bf16 %v4547_v36, %v4546_v19  ;;  %v16656_v29 = vunpack.i.h.bf16 %v12452_v47  ;;  %v8790_v47 = vld [vmem:[%s15324_s18] sm:$0xff] }
 0xca9   : > { %vm16660_vm3 = vcmp.lt.s32.totalorder %v9086_v15, 106  ;;  %v16661_v19 = vpack.c.bf16 %v12956_v21, %v12948_v39  ;;  %5628 = vmatprep.subr.bf16.mxu1 %v5445_v49  ;;  %v5513_v21 = vpack.c.bf16 %v5309_v11, %v5308_v4  ;;  %v5512_v39 = vpack.c.bf16 %v13722_v27, %v13716_v22  ;;  %v16663_v49 = vld [vmem:[#allocation103_spill] sm:$0xff]  ;;  %v16668_v27 = vld [vmem:[#allocation132_spill] sm:$0xff] }
 0xcaa   : > { %v4551_v48 = vsel %vm831_vm8, %v16654_v56, %v8114_v0  ;;  %v13799_v41 = vsel %vm961_vm15, %v16656_v29, %v16655_v10  ;;  %v16659_v0 = vunpack.i.l.bf16 %v12238_v44  ;;  %v13816_v10 = vcombine.low %v8790_v47, %v8790_v47  ;;  %v8791_v29 = vld [vmem:[%s15324_s18 + $0x8] sm:$0xff]  ;;  %vm16696_vm14 = vmmov %vm16660_vm3  ;;  %5527 = vperm.xlu1 %6744, %v5524_v2  }
 0xcab   : > { %5586 = vmatpush1.bf16.msra.mxu0 %v16661_v19  ;;  %v13821_v36 = vcombine.low %v8791_v29, %v8791_v29  ;;  %v5444_v56 = vpack.c.bf16 %v4883_v53, %v4882_v35  ;;  %v5380_v47 = vpack.c.bf16 %v4551_v48, %v4550_v59  ;;  %v16665_v29 = vld [vmem:[#allocation104_spill] sm:$0xff]  ;;  %v16669_v59 = vld [vmem:[#allocation133_spill] sm:$0xff]  ;;  %v8382_v32 = vpop.permute.xlu0 %8381  ;;  %v16670_v11 = vunpack.i.h.bf16 %v16663_v49 }
 0xcac   : > { %v13808_v16 = vsel %vm16660_vm3, %v16659_v0, %v16658_v42  ;;  %5587 = vmatprep.subr.bf16.mxu0 %v5381_v7  ;;  %v16664_v0 = vunpack.i.l.bf16 %v16663_v49  ;;  %v16666_v35 = vunpack.i.l.bf16 %v16665_v29  ;;  %v16667_v4 = vunpack.i.h.bf16 %v16665_v29  ;;  %v8332_v42 = vpop.permute.xlu1 %8331 }
 0xcad   : > { %16662 = vst [vmem:[#allocation79_spill] sm:$0xff] %v13821_v36  ;;  %5629 = vmatpush1.bf16.msra.mxu1 %v5444_v56  ;;  %v8334_v54 = vunpack.i.h.bf16 %v8332_v42  ;;  %v8333_v24 = vunpack.i.l.bf16 %v8332_v42  ;;  %v13861_v7 = vsel %vm948_vm5, %v16670_v11, %v8009_v38  ;;  %v16671_v56 = vld [vmem:[#allocation131_spill] sm:$0xff]  ;;  %v16675_v11 = vunpack.i.h.bf16 %v16669_v59 }
 0xcae   : > { %v13832_v19 = vsel %vm948_vm5, %v16664_v0, %v8008_v60  ;;  %v13840_v53 = vsel %vm948_vm5, %v8008_v60, %v16666_v35  ;;  %v13846_v22 = vsel %vm948_vm5, %v8009_v38, %v16667_v4  ;;  %5680 = vmatprep.subr.bf16.mxu1 %v5513_v21  ;;  %v8384_v60 = vunpack.i.h.bf16 %v8382_v32  ;;  %v13855_v4 = vld [vmem:[%s15324_s18 + $0x10] sm:$0xff]  ;;  %v16672_v0 = vld [vmem:[#allocation134_spill] sm:$0xff] }
 0xcaf   : > { %5588 = vmatpush1.bf16.msra.mxu0 %v5380_v47  ;;  %v8383_v35 = vunpack.i.l.bf16 %v8382_v32  ;;  %v16673_v32 = vpack.c.bf16 %v13072_v18, %v13066_v50  ;;  %v5457_v42 = vpack.c.bf16 %v13846_v22, %v13840_v53  ;;  %v16674_v21 = vunpack.i.l.bf16 %v16669_v59 }
 0xcb0   : > { %v4931_v48 = vsel %vm935_vm6, %v16675_v11, %v8384_v60  ;;  %v16676_v47 = vunpack.i.l.bf16 %v16668_v27  ;;  %v16677_v18 = vunpack.i.h.bf16 %v16668_v27  ;;  %5631 = vmatmul.mubr.bf16.vlgmr.msra.gmra.mrb[40].mxu1 %v13821_v36  ;;  %v8337_v11 = vpop.permute.xlu1 %8336  ;;  %v8019_v29 = vunpack.i.h.bf16 %v16636_v8 }
 0xcb1   : > { %5639 = vmatprep.subr.bf16.mxu0 %v16673_v32  ;;  %v4930_v38 = vsel %vm935_vm6, %v16674_v21, %v8383_v35  ;;  %v13894_v21 = vpop.permute.xlu0 %8386  ;;  %5681 = vmatpush1.bf16.msra.mxu1 %v5512_v39  ;;  %v16680_v32 = vpack.c.bf16 %v13015_v23, %v13009_v14  ;;  %v8339_v36 = vunpack.i.h.bf16 %v8337_v11  ;;  %v8338_v49 = vunpack.i.l.bf16 %v8337_v11 }
 0xcb2   : > { %v5314_v50 = vsel %vm1039_vm12, %v16676_v47, %v8333_v24  ;;  %v5315_v53 = vsel %vm1039_vm12, %v16677_v18, %v8334_v54  ;;  %5590 = vmatmul.mubr.bf16.vlgmr.msra.gmra.mrb[40].mxu0 %v13816_v10  ;;  %v16678_v47 = vunpack.i.l.bf16 %v16672_v0  ;;  %v13902_v18 = vcombine.high %v13855_v4, %v13855_v4 }
 0xcb3   : > { %v5452_v30 = vpack.c.bf16 %v4931_v48, %v4930_v38  ;;  %v5516_v22 = vpack.c.bf16 %v5315_v53, %v5314_v50  ;;  %5640 = vmatpush1.bf16.msra.mxu0 %v16680_v32  ;;  %v16682_v48 = vunpack.i.l.bf16 %v16671_v56  ;;  %v16683_v14 = vunpack.i.h.bf16 %v16671_v56  ;;  %v16709_v56 = vld [vmem:[#allocation147_spill] sm:$0xff] }
 0xcb4   : > { %v4926_v27 = vsel %vm935_vm6, %v8383_v35, %v16678_v47  ;;  %16679 = vst [vmem:[#allocation114_spill] sm:$0xff] %v13902_v18  ;;  %v16681_v35 = vunpack.i.h.bf16 %v16672_v0  ;;  %v16684_v38 = vmov 0   ;;  %v16685_v50 = vunpack.i.l.bf16 %v13308_v45  ;;  %5671 = vmatprep.mubr.bf16.mxu0 %v13902_v18 }
 0xcb5   : > { %v5310_v39 = vsel %vm1039_vm12, %v8333_v24, %v16682_v48  ;;  %v5311_v23 = vsel %vm1039_vm12, %v8334_v54, %v16683_v14  ;;  %5712 = vmatprep.mubr.bf16.mxu1 %v16684_v38  ;;  %vm16686_vm4 = vcmp.lt.s32.totalorder %v9086_v15, 39  ;;  %v16689_v54 = vld [vmem:[#allocation135_spill] sm:$0xff]  ;;  %v8397_v14 = vpop.permute.xlu0 %8396  ;;  %v13940_v38 = vpop.permute.xlu1 %8341 }
 0xcb6   : > { %v4927_v47 = vsel %vm935_vm6, %v8384_v60, %v16681_v35  ;;  %v13927_v53 = vsel %vm16686_vm4, %v16685_v50, %v8338_v49  ;;  %v16687_v60 = vunpack.i.h.bf16 %v13308_v45  ;;  %vm16688_vm1 = vmmov %vm16686_vm4  ;;  %v5517_v11 = vpack.c.bf16 %v5311_v23, %v5310_v39 }
 0xcb7   : > { %v5453_v24 = vpack.c.bf16 %v4927_v47, %v4926_v27  ;;  %v15825_v35 = vunpack.i.h.bf16 %v16689_v54  ;;  %v16690_v50 = vunpack.i.l.bf16 %v13306_v62  ;;  %vm16691_vm10 = vmmov %vm16688_vm1  ;;  %v15826_v27 = vunpack.i.l.bf16 %v16689_v54  ;;  %v16694_v47 = vld [vmem:[#allocation136_spill] sm:$0xff] }
 0xcb8   : > { %v13933_v32 = vsel %vm16688_vm1, %v16687_v60, %v8339_v36  ;;  %v16692_v60 = vunpack.i.h.bf16 %v13306_v62  ;;  %vm16693_vm2 = vmmov %vm16688_vm1  ;;  %v15827_v39 = vunpack.i.l.bf16 %v16694_v47  ;;  %5682 = vmatprep.subr.bf16.mxu1 %v5517_v11  ;;  %v8399_v23 = vunpack.i.h.bf16 %v8397_v14  ;;  %v16723_v54 = vld [vmem:[#allocation64_spill] sm:$0xff] }
 0xcb9   : > { %v13946_v45 = vsel %vm16691_vm10, %v8338_v49, %v16690_v50  ;;  %5641 = vmatprep.subr.bf16.mxu0 %v5453_v24  ;;  %v8398_v48 = vunpack.i.l.bf16 %v8397_v14  ;;  %v8781_v49 = vld [vmem:[%s15324_s18 + $0x18] ss:$0 sps:$4 sm:$0xff]   ;;  %v16695_v62 = vunpack.i.h.bf16 %v12238_v44  ;;  %5683 = vmatpush1.bf16.msra.mxu1 %v5516_v22  ;;  %v16698_v24 = vunpack.i.l.bf16 %v16636_v8  ;;  %v16699_v22 = vld [vmem:[#allocation51_spill] sm:$0xff]  ;;  %v16700_v8 = vld [vmem:[#allocation50_spill] sm:$0xff] }
 0xcba   : > { %v13952_v13 = vsel %vm16693_vm2, %v8339_v36, %v16692_v60  ;;  %5642 = vmatpush1.bf16.msra.mxu0 %v5452_v30  ;;  %v16697_v60 = vunpack.i.l.bf16 %v16657_v58  ;;  %v4979_v30 = vsel %vm948_vm5, %v15825_v35, %v8399_v23  ;;  %v16701_v50 = vpack.c.bf16 %v16699_v22, %v16700_v8  ;;  %v13998_v35 = vpop.permute.xlu0 %8401  ;;  %vm16704_vm4 = vmmov %vm16660_vm3 }
 0xcbb   : > { %v13964_v36 = vsel %vm16696_vm14, %v16695_v62, %v8019_v29  ;;  %v4978_v62 = vsel %vm948_vm5, %v15826_v27, %v8398_v48  ;;  %5643 = vmatprep.subr.bf16.mxu0 %v5457_v42  ;;  %v14000_v42 = vpop.permute.xlu1 %8351  ;;  %v16705_v27 = vld [vmem:[#allocation49_spill] sm:$0xff]  ;;  %vm16727_vm10 = vmmov %vm16688_vm1 }
 0xcbc   : > { %v13973_v11 = vsel %vm16660_vm3, %v16698_v24, %v16697_v60  ;;  %5721 = vmatprep.subr.bf16.mxu1 %v16701_v50  ;;  %v4974_v60 = vsel %vm948_vm5, %v8398_v48, %v15827_v39  ;;  %v5456_v24 = vpack.c.bf16 %v13861_v7, %v13832_v19  ;;  %v16702_v50 = vunpack.i.h.bf16 %v16694_v47  ;;  %6391 = vmatmul.mubr.msk.bf16.vlgmr.msra.gmra.mrb[44].mxu1 %vm1808_vm0, %v8781_v49  ;;  %v16706_v39 = vld [vmem:[#allocation45_spill] sm:$0xff]  ;;  %v16710_v49 = vld [vmem:[#allocation146_spill] sm:$0xff]  ;;  %vm16731_vm2 = vmmov %vm16688_vm1 }
 0xcbd   : > { %v16703_v48 = vunpack.i.h.bf16 %v16657_v58  ;;  %v8253_v19 = vunpack.i.l.bf16 %v13365_v31  ;;  %v5460_v7 = vpack.c.bf16 %v4979_v30, %v4978_v62  ;;  %v16707_v14 = vpack.c.bf16 %v16705_v27, %v16706_v39  ;;  %v16715_v27 = vld [vmem:[#allocation150_spill] sm:$0xff]  ;;  %vm16733_vm14 = vmmov %vm16688_vm1 }
 0xcbe   : > { %v4975_v22 = vsel %vm948_vm5, %v8399_v23, %v16702_v50  ;;  %5644 = vmatpush1.bf16.msra.mxu0 %v5456_v24  ;;  %v5464_v50 = vpack.c.bf16 %v13390_v26, %v13358_v17  ;;  %v16711_v44 = vpack.c.bf16 %v16709_v56, %v16710_v49  ;;  %v5465_v58 = vpack.c.bf16 %v13799_v41, %v13408_v34  ;;  %v16713_v34 = vld [vmem:[#allocation149_spill] sm:$0xff]  ;;  %v16714_v49 = vld [vmem:[#allocation116_spill] sm:$0xff] }
 0xcbf   : > { %v14010_v8 = vsel %vm16704_vm4, %v8019_v29, %v16703_v48  ;;  %5722 = vmatpush1.bf16.msra.mxu1 %v16707_v14  ;;  %v5461_v23 = vpack.c.bf16 %v4975_v22, %v4974_v60  ;;  %v16708_v29 = vld [vmem:[#allocation142_spill] sm:$0xff]  ;;  %v16712_v14 = vld [vmem:[#allocation143_spill] sm:$0xff]  ;;  %v8254_v26 = vunpack.i.h.bf16 %v13365_v31  ;;  %v14036_v56 = vpop.permute.xlu1 %8361  ;;  %5753 = vmatprep.mubr.bf16.mxu1 %v16714_v49  ;;  %v8264_v17 = vunpack.i.h.bf16 %v13363_v43  ;;  %v16716_v31 = vld [vmem:[#allocation69_spill] sm:$0xff] }
 0xcc0   : > { %5723 = vmatprep.subr.bf16.mxu1 %v16711_v44  ;;  %v15833_v39 = vunpack.i.l.bf16 %v16708_v29  ;;  %v8412_v44 = vpop.permute.xlu0 %8411  ;;  %v16717_v2 = vunpack.i.l.bf16 %v16716_v31  ;;  %v16718_v41 = vld [vmem:[#allocation145_spill] sm:$0xff]  ;;  %v16719_v48 = vld [vmem:[#allocation144_spill] sm:$0xff]  ;;  %v16721_v62 = vunpack.i.h.bf16 %v16708_v29  ;;  %vm16738_vm3 = vcmp.lt.s32.totalorder %v9086_v15, 38 }
 0xcc1   : > { %5645 = vmatprep.subr.bf16.mxu0 %v5461_v23  ;;  %v8414_v24 = vunpack.i.h.bf16 %v8412_v44  ;;  %v8413_v22 = vunpack.i.l.bf16 %v8412_v44  ;;  %v16720_v60 = vpack.c.bf16 %v16718_v41, %v16719_v48  ;;  %v8263_v44 = vunpack.i.l.bf16 %v13363_v43  ;;  %vm16740_vm4 = vmmov %vm16738_vm3 }
 0xcc2   : > { %v14048_v23 = vsel %vm16688_vm1, %v16717_v2, %v8253_v19  ;;  %5646 = vmatpush1.bf16.msra.mxu0 %v5460_v7  ;;  %v16722_v2 = vld [vmem:[#allocation62_spill] sm:$0xff]  ;;  %v16725_v48 = vunpack.i.l.bf16 %v16712_v14  ;;  %v16726_v41 = vunpack.i.h.bf16 %v16716_v31  ;;  %vm16743_vm1 = vmmov %vm16738_vm3 }
 0xcc3   : > { %5724 = vmatpush1.bf16.msra.mxu1 %v16720_v60  ;;  %v5026_v49 = vsel %vm961_vm15, %v15833_v39, %v8413_v22  ;;  %v5027_v30 = vsel %vm961_vm15, %v16721_v62, %v8414_v24  ;;  %5647 = vmatprep.subr.bf16.mxu0 %v5465_v58  ;;  %v16724_v7 = vpack.c.bf16 %v16722_v2, %v16723_v54  ;;  %v8372_v29 = vpop.permute.xlu1 %8371  ;;  %v16728_v58 = vunpack.i.h.bf16 %v16712_v14  ;;  %v16729_v62 = vld [vmem:[#allocation65_spill] sm:$0xff] }
 0xcc4   : > { %v5022_v43 = vsel %vm961_vm15, %v8413_v22, %v16725_v48  ;;  %v14073_v60 = vsel %vm16727_vm10, %v16726_v41, %v8254_v26  ;;  %v14075_v39 = vpop.permute.xlu0 %8416  ;;  %v16730_v2 = vunpack.i.l.bf16 %v16729_v62  ;;  %v16732_v22 = vunpack.i.h.bf16 %v16729_v62  ;;  %vm16745_vm10 = vmmov %vm16743_vm1 }
 0xcc5   : > { %5725 = vmatprep.subr.bf16.mxu1 %v16724_v7  ;;  %v5023_v54 = vsel %vm961_vm15, %v8414_v24, %v16728_v58  ;;  %v15839_v41 = vunpack.i.l.bf16 %v13606_v33  ;;  %v8374_v14 = vunpack.i.h.bf16 %v8372_v29  ;;  %v8373_v47 = vunpack.i.l.bf16 %v8372_v29 }
 0xcc6   : > { %v14085_v7 = vsel %vm16731_vm2, %v8253_v19, %v16730_v2  ;;  %v14091_v31 = vsel %vm16733_vm14, %v8254_v26, %v16732_v22  ;;  %v15840_v58 = vunpack.i.l.bf16 %v13789_v3  ;;  %v5468_v18 = vpack.c.bf16 %v5027_v30, %v5026_v49  ;;  %5648 = vmatpush1.bf16.msra.mxu0 %v5464_v50  ;;  %v16734_v19 = vld [vmem:[#allocation53_spill] sm:$0xff]  ;;  %v16735_v2 = vld [vmem:[#allocation52_spill] sm:$0xff] }
 0xcc7   : > { %v16736_v59 = vpack.c.bf16 %v16734_v19, %v16735_v2  ;;  %v5469_v62 = vpack.c.bf16 %v5023_v54, %v5022_v43  ;;  %v15841_v26 = vunpack.i.h.bf16 %v13789_v3  ;;  %v16737_v48 = vunpack.i.l.bf16 %v13442_v28  ;;  %v14120_v54 = vpop.permute.xlu1 %8376 }
 0xcc8   : > { %v16739_v24 = vunpack.i.h.bf16 %v13442_v28  ;;  %v15842_v30 = vunpack.i.l.bf16 %v13791_v37  ;;  %v8432_v43 = vpop.permute.xlu0 %8431  ;;  %vm16746_vm2 = vcmp.lt.s32.totalorder %v9086_v15, 90  ;;  %v16747_v19 = vunpack.i.h.bf16 %v13606_v33 }
 0xcc9   : > { %5726 = vmatpush1.bf16.msra.mxu1 %v16736_v59  ;;  %v14106_v29 = vsel %vm16738_vm3, %v16737_v48, %v8373_v47  ;;  %v16741_v59 = vpack.c.bf16 %v13198_v1, %v13185_v52  ;;  %5649 = vmatprep.subr.bf16.mxu0 %v5469_v62  ;;  %v16742_v48 = vunpack.i.l.bf16 %v13440_v9  ;;  %v14138_v1 = vsel %vm16746_vm2, %v15839_v41, %v8263_v44  ;;  %vm16748_vm14 = vmmov %vm16746_vm2 }
 0xcca   : > { %v14112_v50 = vsel %vm16740_vm4, %v16739_v24, %v8374_v14  ;;  %v16744_v24 = vunpack.i.h.bf16 %v13440_v9  ;;  %v14144_v2 = vsel %vm16748_vm14, %v16747_v19, %v8264_v17  ;;  %v8433_v62 = vunpack.i.l.bf16 %v8432_v43  ;;  %5650 = vmatpush1.bf16.msra.mxu0 %v5468_v18 }
 0xccb   : > { %5727 = vmatprep.subr.bf16.mxu1 %v16741_v59  ;;  %v14126_v28 = vsel %vm16743_vm1, %v8373_v47, %v16742_v48  ;;  %v8434_v47 = vunpack.i.h.bf16 %v8432_v43  ;;  %v8359_v9 = vunpack.i.h.bf16 %v13741_v25  ;;  %v16749_v59 = vunpack.i.l.bf16 %v13741_v25  ;;  %v14188_v22 = vpop.permute.xlu1 %8391 }
 0xccc   : > { %v14132_v52 = vsel %vm16745_vm10, %v8374_v14, %v16744_v24  ;;  %vm16750_vm3 = vcmp.lt.s32.totalorder %v9086_v15, 89  ;;  %v8354_v48 = vunpack.i.h.bf16 %v14000_v42  ;;  %v16751_v24 = vpack.c.bf16 %v13170_v51, %v13166_v55  ;;  %v16757_v55 = vld [vmem:[#allocation57_spill] sm:$0xff]  ;;  %v16758_v51 = vld [vmem:[#allocation56_spill] sm:$0xff] }
 0xccd   : > { %v14153_v14 = vsel %vm16750_vm3, %v15840_v58, %v16749_v59  ;;  %v8353_v19 = vunpack.i.l.bf16 %v14000_v42  ;;  %v16752_v41 = vunpack.i.l.bf16 %v16715_v27  ;;  %vm16753_vm4 = vcmp.lt.s32.totalorder %v9086_v15, 106  ;;  %vm16762_vm2 = vmmov %vm16750_vm3 }
 0xcce   : > { %5728 = vmatpush1.bf16.msra.mxu1 %v16751_v24  ;;  %v16754_v59 = vunpack.i.h.bf16 %v16715_v27  ;;  %vm16755_vm1 = vmmov %vm16753_vm4  ;;  %v16756_v18 = vpack.c.bf16 %v14010_v8, %v13973_v11  ;;  %v16759_v24 = vpack.c.bf16 %v16757_v55, %v16758_v51  ;;  %v16760_v42 = vunpack.i.l.bf16 %v16713_v34 }
 0xccf   : > { %v5074_v49 = vsel %vm16753_vm4, %v16752_v41, %v8433_v62  ;;  %vm16761_vm10 = vmmov %vm16755_vm1  ;;  %v14184_v41 = vsel %vm16762_vm2, %v15841_v26, %v8359_v9  ;;  %v16763_v11 = vunpack.i.h.bf16 %v16713_v34  ;;  %vm16765_vm3 = vcmp.lt.s32.totalorder %v9086_v15, 90 }
 0xcd0   : > { %v5075_v58 = vsel %vm16755_vm1, %v16754_v59, %v8434_v47  ;;  %5651 = vmatprep.subr.bf16.mxu0 %v16756_v18  ;;  %5729 = vmatprep.subr.bf16.mxu1 %v16759_v24  ;;  %v5070_v43 = vsel %vm16761_vm10, %v8433_v62, %v16760_v42  ;;  %v14186_v59 = vpop.permute.xlu0 %8436  ;;  %vm16764_vm14 = vmmov %vm16755_vm1  ;;  %v5116_v62 = vsel %vm16765_vm3, %v8263_v44, %v15842_v30  ;;  %v16766_v18 = vunpack.i.h.bf16 %v13791_v37  ;;  %v16769_v30 = vld [vmem:[#allocation68_spill] sm:$0xff] }
 0xcd1   : > { %v5071_v8 = vsel %vm16764_vm14, %v8434_v47, %v16763_v11  ;;  %vm16767_vm4 = vmmov %vm16765_vm3  ;;  %v5480_v51 = vpack.c.bf16 %v14144_v2, %v14138_v1  ;;  %v5347_v24 = vpack.c.bf16 %v14091_v31, %v14085_v7  ;;  %v5346_v42 = vpack.c.bf16 %v14073_v60, %v14048_v23  ;;  %v16772_v31 = vld [vmem:[#allocation59_spill] sm:$0xff] }
 0xcd2   : > { %v5117_v55 = vsel %vm16767_vm4, %v8264_v17, %v16766_v18  ;;  %v15843_v47 = vunpack.i.h.bf16 %v13702_v57  ;;  %v15844_v11 = vunpack.i.l.bf16 %v13702_v57  ;;  %v5476_v26 = vpack.c.bf16 %v5075_v58, %v5074_v49  ;;  %v16770_v17 = vld [vmem:[#allocation70_spill] sm:$0xff]  ;;  %vm16787_vm4 = vmmov %vm16765_vm3 }
 0xcd3   : > { %v16768_v44 = vpack.c.bf16 %v13964_v36, %v13808_v16  ;;  %v16771_v18 = vpack.c.bf16 %v16769_v30, %v16770_v17  ;;  %v5477_v1 = vpack.c.bf16 %v5071_v8, %v5070_v43  ;;  %v16773_v2 = vunpack.i.h.bf16 %v16772_v31  ;;  %v16777_v36 = vld [vmem:[#allocation153_spill] sm:$0xff]  ;;  %v16785_v8 = vld [vmem:[#allocation112_spill] sm:$0xff] }
 0xcd4   : > { %vm16774_vm1 = vcmp.lt.s32.totalorder %v9086_v15, 38  ;;  %v16775_v60 = vunpack.i.l.bf16 %v16772_v31  ;;  %v16778_v58 = vpack.c.bf16 %v13281_v12, %v16777_v36  ;;  %v5481_v30 = vpack.c.bf16 %v5117_v55, %v5116_v62  ;;  %v8447_v17 = vpop.permute.xlu0 %8446 }
 0xcd5   : > { %5652 = vmatpush1.bf16.msra.mxu0 %v16768_v44  ;;  %5730 = vmatpush1.bf16.msra.mxu1 %v16771_v18  ;;  %v14222_v23 = vsel %vm16774_vm1, %v16773_v2, %v8354_v48  ;;  %vm16776_vm10 = vmmov %vm16774_vm1  ;;  %v8343_v43 = vunpack.i.l.bf16 %v13940_v38  ;;  %v14237_v18 = vpop.permute.xlu1 %8406  ;;  %v8449_v31 = vunpack.i.h.bf16 %v8447_v17  ;;  %v8448_v2 = vunpack.i.l.bf16 %v8447_v17  ;;  %v16784_v17 = vld [vmem:[#allocation122_spill] sm:$0xff] }
 0xcd6   : > { %v14228_v16 = vsel %vm16776_vm10, %v16775_v60, %v8353_v19  ;;  %5731 = vmatprep.subr.bf16.mxu1 %v16778_v58  ;;  %5653 = vmatprep.subr.bf16.mxu0 %v5477_v1  ;;  %v16779_v60 = vld [vmem:[#allocation67_spill] sm:$0xff]  ;;  %vm16781_vm2 = vmmov %vm16774_vm1  ;;  %v15848_v36 = vunpack.i.l.bf16 %v13894_v21  ;;  %v15845_v58 = vunpack.i.h.bf16 %v13940_v38  ;;  %v8404_v1 = vunpack.i.h.bf16 %v13998_v35 }
 0xcd7   : > { %v16780_v7 = vunpack.i.l.bf16 %v16779_v60  ;;  %v16782_v62 = vunpack.i.h.bf16 %v16779_v60  ;;  %vm16783_vm14 = vmmov %vm16774_vm1  ;;  %v5354_v49 = vpack.c.bf16 %v14222_v23, %v14228_v16  ;;  %v16786_v44 = vpack.c.bf16 %v16784_v17, %v16785_v8 }
 0xcd8   : > { %vm16788_vm1 = vmmov %vm16765_vm3  ;;  %v14268_v23 = vpop.permute.xlu0 %8451  ;;  %v16790_v8 = vunpack.i.l.bf16 %v14036_v56  ;;  %v15847_v17 = vunpack.i.l.bf16 %v14075_v39 }
 0xcd9   : > { %v4392_v12 = vsel %vm16781_vm2, %v8353_v19, %v16780_v7  ;;  %v4393_v55 = vsel %vm16783_vm14, %v8354_v48, %v16782_v62  ;;  %5654 = vmatpush1.bf16.msra.mxu0 %v5476_v26  ;;  %5732 = vmatpush1.bf16.msra.mxu1 %v16786_v44  ;;  %v8403_v19 = vunpack.i.l.bf16 %v13998_v35  ;;  %v5122_v48 = vsel %vm16765_vm3, %v15844_v11, %v8448_v2  ;;  %v8422_v35 = vpop.permute.xlu1 %8421  ;;  %vm16789_vm10 = vmmov %vm16788_vm1 }
 0xcda   : > { %v5123_v7 = vsel %vm16787_vm4, %v15843_v47, %v8449_v31  ;;  %5655 = vmatprep.subr.bf16.mxu0 %v5481_v30  ;;  %5733 = vmatprep.subr.bf16.mxu1 %v5347_v24  ;;  %v5118_v26 = vsel %vm16788_vm1, %v8448_v2, %v8343_v43  ;;  %v5119_v16 = vsel %vm16789_vm10, %v8449_v31, %v15845_v58  ;;  %v16791_v44 = vunpack.i.l.bf16 %v13741_v25 }
 0xcdb   : > { %vm16792_vm2 = vcmp.lt.s32.totalorder %v9086_v15, 89  ;;  %v16793_v30 = vunpack.i.h.bf16 %v14036_v56  ;;  %v5355_v60 = vpack.c.bf16 %v4393_v55, %v4392_v12  ;;  %v15846_v62 = vunpack.i.h.bf16 %v14075_v39 }
 0xcdc   : > { %v5164_v24 = vsel %vm16792_vm2, %v16791_v44, %v16790_v8  ;;  %vm16794_vm14 = vmmov %vm16792_vm2  ;;  %v8424_v47 = vunpack.i.h.bf16 %v8422_v35  ;;  %v8423_v11 = vunpack.i.l.bf16 %v8422_v35  ;;  %v8394_v31 = vunpack.i.h.bf16 %v14188_v22 }
 0xcdd   : > { %v5165_v2 = vsel %vm16794_vm14, %v8359_v9, %v16793_v30  ;;  %v8393_v58 = vunpack.i.l.bf16 %v14188_v22  ;;  %v5484_v25 = vpack.c.bf16 %v5123_v7, %v5122_v48  ;;  %5656 = vmatpush1.bf16.msra.mxu0 %v5480_v51  ;;  %5734 = vmatpush1.bf16.msra.mxu1 %v5346_v42  ;;  %v5485_v8 = vpack.c.bf16 %v5119_v16, %v5118_v26  ;;  %v14319_v26 = vpop.permute.xlu1 %8426 }
 0xcde   : > { %v16795_v44 = vunpack.i.l.bf16 %v13547_v5  ;;  %vm16796_vm3 = vcmp.lt.s32.totalorder %v9086_v15, 22  ;;  %v16797_v12 = vunpack.i.h.bf16 %v13547_v5  ;;  %v16799_v35 = vpack.c.bf16 %v13952_v13, %v13946_v45  ;;  %v8462_v13 = vpop.permute.xlu0 %8461 }
 0xcdf   : > { %vm16798_vm4 = vmmov %vm16796_vm3  ;;  %v16800_v22 = vunpack.i.l.bf16 %v13496_v6  ;;  %v16802_v42 = vunpack.i.h.bf16 %v13496_v6  ;;  %v15850_v5 = vunpack.i.h.bf16 %v14237_v18  ;;  %v15849_v7 = vunpack.i.l.bf16 %v14237_v18  ;;  %5657 = vmatprep.subr.bf16.mxu0 %v5485_v8 }
 0xce0   : > { %v14292_v9 = vsel %vm16796_vm3, %v16795_v44, %v8423_v11  ;;  %v14298_v55 = vsel %vm16798_vm4, %v16797_v12, %v8424_v47  ;;  %5735 = vmatprep.subr.bf16.mxu1 %v16799_v35  ;;  %vm16801_vm1 = vmmov %vm16796_vm3  ;;  %v8378_v6 = vunpack.i.l.bf16 %v14120_v54  ;;  %v8464_v16 = vunpack.i.h.bf16 %v8462_v13 }
 0xce1   : > { %v14307_v51 = vsel %vm16801_vm1, %v8423_v11, %v16800_v22  ;;  %vm16803_vm10 = vmmov %vm16801_vm1  ;;  %v5366_v45 = vpack.c.bf16 %v14298_v55, %v14292_v9  ;;  %v8463_v30 = vunpack.i.l.bf16 %v8462_v13  ;;  %vm16804_vm2 = vcmp.lt.s32.totalorder %v9086_v15, 88  ;;  %5658 = vmatpush1.bf16.msra.mxu0 %v5484_v25  ;;  %v8442_v25 = vpop.permute.xlu1 %8441 }
 0xce2   : > { %v14313_v48 = vsel %vm16803_vm10, %v8424_v47, %v16802_v42  ;;  %v5489_v47 = vpack.c.bf16 %v5165_v2, %v5164_v24  ;;  %v14328_v44 = vsel %vm16804_vm2, %v15847_v17, %v8403_v19  ;;  %vm16805_vm14 = vmmov %vm16804_vm2  ;;  %v8379_v12 = vunpack.i.h.bf16 %v14120_v54  ;;  %v16807_v24 = vld [vmem:[#allocation63_spill] sm:$0xff] }
 0xce3   : > { %v5367_v11 = vpack.c.bf16 %v14313_v48, %v14307_v51  ;;  %v14334_v8 = vsel %vm16805_vm14, %v15846_v62, %v8404_v1  ;;  %v16806_v35 = vpack.c.bf16 %v13933_v32, %v13927_v53  ;;  %v16808_v2 = vunpack.i.l.bf16 %v16807_v24  ;;  %vm16809_vm3 = vmmov %vm16801_vm1  ;;  %v14356_v32 = vpop.permute.xlu0 %8466 }
 0xce4   : > { %vm16810_vm4 = vcmp.lt.s32.totalorder %v9086_v15, 89  ;;  %v16811_v13 = vunpack.i.h.bf16 %v13894_v21  ;;  %5659 = vmatprep.subr.bf16.mxu0 %v5489_v47  ;;  %v8438_v17 = vunpack.i.l.bf16 %v14186_v59  ;;  %v16845_v9 = vunpack.i.l.bf16 %v13647_v63 }
 0xce5   : > { %5736 = vmatpush1.bf16.msra.mxu1 %v16806_v35  ;;  %v4440_v22 = vsel %vm16809_vm3, %v8393_v58, %v16808_v2  ;;  %v5170_v42 = vsel %vm16810_vm4, %v15848_v36, %v8463_v30  ;;  %vm16812_vm1 = vmmov %vm16810_vm4  ;;  %v5212_v2 = vsel %vm16805_vm14, %v8403_v19, %v15849_v7  ;;  %vm16817_vm4 = vcmp.lt.s32.totalorder %v9086_v15, 22 }
 0xce6   : > { %v5171_v62 = vsel %vm16812_vm1, %v16811_v13, %v8464_v16  ;;  %5737 = vmatprep.subr.bf16.mxu1 %v5355_v60  ;;  %vm16813_vm10 = vmmov %vm16812_vm1  ;;  %v5496_v13 = vpack.c.bf16 %v14334_v8, %v14328_v44  ;;  %v16818_v19 = vpack.c.bf16 %v14184_v41, %v14153_v14  ;;  %v16824_v8 = vpack.c.bf16 %v14132_v52, %v14126_v28 }
 0xce7   : > { %v5166_v53 = vsel %vm16813_vm10, %v8463_v30, %v8378_v6  ;;  %vm16814_vm2 = vmmov %vm16812_vm1  ;;  %v16816_v30 = vunpack.i.h.bf16 %v16807_v24  ;;  %v5492_v36 = vpack.c.bf16 %v5171_v62, %v5170_v42  ;;  %v8428_v14 = vunpack.i.l.bf16 %v14319_v26 }
 0xce8   : > { %v5167_v35 = vsel %vm16814_vm2, %v8464_v16, %v8379_v12  ;;  %vm16815_vm3 = vmmov %vm16805_vm14  ;;  %v15852_v16 = vunpack.i.h.bf16 %v14186_v59  ;;  %5660 = vmatpush1.bf16.msra.mxu0 %v16818_v19  ;;  %v15851_v41 = vunpack.i.l.bf16 %v14356_v32  ;;  %v8453_v52 = vunpack.i.l.bf16 %v14268_v23 }
 0xce9   : > { %v5213_v60 = vsel %vm16815_vm3, %v8404_v1, %v15850_v5  ;;  %v4441_v47 = vsel %vm16817_vm4, %v8394_v31, %v16816_v30  ;;  %5738 = vmatpush1.bf16.msra.mxu1 %v5354_v49  ;;  %v5493_v7 = vpack.c.bf16 %v5167_v35, %v5166_v53  ;;  %v16819_v1 = vld [vmem:[#allocation106_spill] sm:$0xff]  ;;  %vm16821_vm1 = vmmov %vm16817_vm4  ;;  %v8444_v49 = vunpack.i.h.bf16 %v8442_v25  ;;  %v8482_v35 = vpop.permute.xlu0 %8481 }
 0xcea   : > { %v16820_v5 = vunpack.i.l.bf16 %v16819_v1  ;;  %v16822_v30 = vunpack.i.h.bf16 %v16819_v1  ;;  %vm16823_vm10 = vmmov %vm16821_vm1  ;;  %5739 = vmatprep.subr.bf16.mxu1 %v16824_v8  ;;  %v5497_v62 = vpack.c.bf16 %v5213_v60, %v5212_v2  ;;  %v5363_v42 = vpack.c.bf16 %v4441_v47, %v4440_v22 }
 0xceb   : > { %v8443_v53 = vunpack.i.l.bf16 %v8442_v25  ;;  %5661 = vmatprep.subr.bf16.mxu0 %v5493_v7  ;;  %v8483_v19 = vunpack.i.l.bf16 %v8482_v35  ;;  %v8429_v22 = vunpack.i.h.bf16 %v14319_v26  ;;  %v8469_v2 = vunpack.i.h.bf16 %v14356_v32  ;;  %vm16826_vm2 = vmmov %vm16815_vm3 }
 0xcec   : > { %v4444_v24 = vsel %vm16821_vm1, %v16820_v5, %v8393_v58  ;;  %v4445_v44 = vsel %vm16823_vm10, %v16822_v30, %v8394_v31  ;;  %v14394_v58 = vpop.permute.xlu1 %8456  ;;  %v8484_v5 = vunpack.i.h.bf16 %v8482_v35  ;;  %5662 = vmatpush1.bf16.msra.mxu0 %v5492_v36  ;;  %v16825_v7 = vpack.c.bf16 %v14112_v50, %v14106_v29  ;;  %vm16827_vm14 = vmmov %vm16826_vm2  ;;  %v16831_v30 = vld [vmem:[#allocation61_spill] sm:$0xff] }
 0xced   : > { %v15854_v31 = vunpack.i.h.bf16 %v14394_v58  ;;  %v15853_v1 = vunpack.i.l.bf16 %v14394_v58  ;;  %v5362_v28 = vpack.c.bf16 %v4445_v44, %v4444_v24  ;;  %v8454_v25 = vunpack.i.h.bf16 %v14268_v23  ;;  %5663 = vmatprep.subr.bf16.mxu0 %v5497_v62  ;;  %vm16828_vm3 = vmmov %vm16826_vm2  ;;  %v14421_v36 = vpop.permute.xlu0 %8486 }
 0xcee   : > { %5740 = vmatpush1.bf16.msra.mxu1 %v16825_v7  ;;  %v5218_v60 = vsel %vm16826_vm2, %v8438_v17, %v8483_v19  ;;  %v5219_v47 = vsel %vm16827_vm14, %v15852_v16, %v8484_v5  ;;  %v5214_v29 = vsel %vm16828_vm3, %v8483_v19, %v8428_v14  ;;  %vm16829_vm4 = vcmp.lt.s32.totalorder %v9086_v15, 87  ;;  %vm16830_vm1 = vmmov %vm16826_vm2 }
 0xcef   : > { %5741 = vmatprep.subr.bf16.mxu1 %v5363_v42  ;;  %v5264_v50 = vsel %vm16829_vm4, %v15851_v41, %v8453_v52  ;;  %v5215_v24 = vsel %vm16830_vm1, %v8484_v5, %v8429_v22  ;;  %v16832_v44 = vunpack.i.l.bf16 %v16831_v30  ;;  %v16833_v62 = vunpack.i.h.bf16 %v16831_v30  ;;  %vm16834_vm10 = vmmov %vm16829_vm4 }
 0xcf0   : > { %v8472_v23 = vpop.permute.xlu1 %8471  ;;  %v5260_v7 = vsel %vm16834_vm10, %v8453_v52, %v15853_v1  ;;  %vm16835_vm2 = vmmov %vm16829_vm4  ;;  %5664 = vmatpush1.bf16.msra.mxu0 %v5496_v13  ;;  %v8488_v13 = vunpack.i.l.bf16 %v14421_v36 }
 0xcf1   : > { %v4488_v8 = vsel %vm818_vm7, %v8443_v53, %v16832_v44  ;;  %v4489_v42 = vsel %vm818_vm7, %v8444_v49, %v16833_v62  ;;  %v8474_v35 = vunpack.i.h.bf16 %v8472_v23  ;;  %v8473_v19 = vunpack.i.l.bf16 %v8472_v23  ;;  %vm16836_vm14 = vmmov %vm16835_vm2  ;;  %v16837_v23 = vld [vmem:[#allocation109_spill] sm:$0xff] }
 0xcf2   : > { %v5261_v5 = vsel %vm16835_vm2, %v8454_v25, %v15854_v31  ;;  %v5265_v30 = vsel %vm16836_vm14, %v8469_v2, %v8454_v25  ;;  %v5500_v44 = vpack.c.bf16 %v5219_v47, %v5218_v60  ;;  %5742 = vmatpush1.bf16.msra.mxu1 %v5362_v28  ;;  %v5501_v62 = vpack.c.bf16 %v5215_v24, %v5214_v29  ;;  %v8497_v28 = vpop.permute.xlu0 %8496  ;;  %vm16842_vm3 = vmmov %vm16835_vm2 }
 0xcf3   : > { %v16838_v41 = vunpack.i.l.bf16 %v16837_v23  ;;  %v16839_v52 = vunpack.i.h.bf16 %v16837_v23  ;;  %v8489_v31 = vunpack.i.h.bf16 %v14421_v36  ;;  %5743 = vmatprep.subr.bf16.mxu1 %v5367_v11  ;;  %v5371_v25 = vpack.c.bf16 %v4489_v42, %v4488_v8  ;;  %vm16843_vm4 = vmmov %vm16835_vm2 }
 0xcf4   : > { %5665 = vmatprep.subr.bf16.mxu0 %v5501_v62  ;;  %v14460_v60 = vpop.permute.xlu1 %8476  ;;  %v5505_v47 = vpack.c.bf16 %v5261_v5, %v5260_v7  ;;  %v8499_v51 = vunpack.i.h.bf16 %v8497_v28  ;;  %v8498_v48 = vunpack.i.l.bf16 %v8497_v28  ;;  %v5504_v8 = vpack.c.bf16 %v5265_v30, %v5264_v50  ;;  %vm16844_vm1 = vmmov %vm16835_vm2 }
 0xcf5   : > { %v4492_v16 = vsel %vm818_vm7, %v16838_v41, %v8443_v53  ;;  %v4493_v1 = vsel %vm818_vm7, %v16839_v52, %v8444_v49  ;;  %v16840_v41 = vunpack.i.l.bf16 %v13545_v61  ;;  %v16841_v49 = vunpack.i.h.bf16 %v13545_v61  ;;  %5666 = vmatpush1.bf16.msra.mxu0 %v5500_v44  ;;  %vm16847_vm10 = vmmov %vm16844_vm1 }
 0xcf6   : > { %v8479_v11 = vunpack.i.h.bf16 %v14460_v60  ;;  %v8478_v24 = vunpack.i.l.bf16 %v14460_v60  ;;  %v5370_v42 = vpack.c.bf16 %v4493_v1, %v4492_v16  ;;  %5744 = vmatpush1.bf16.msra.mxu1 %v5366_v45  ;;  %v5266_v61 = vsel %vm16842_vm3, %v8488_v13, %v8498_v48  ;;  %5667 = vmatprep.subr.bf16.mxu0 %v5505_v47  ;;  %v8502_v50 = vpop.permute.xlu0 %8501  ;;  %v16848_v47 = vld [vmem:[#allocation55_spill] sm:$0xff] }
 0xcf7   : > { %v4490_v53 = vsel %vm818_vm7, %v8473_v19, %v16840_v41  ;;  %v4491_v29 = vsel %vm818_vm7, %v8474_v35, %v16841_v49  ;;  %v5267_v7 = vsel %vm16843_vm4, %v8489_v31, %v8499_v51  ;;  %5745 = vmatprep.subr.bf16.mxu1 %v5371_v25  ;;  %v4494_v55 = vsel %vm818_vm7, %v16845_v9, %v8473_v19 }
 0xcf8   : > { %v5262_v16 = vsel %vm16844_vm1, %v8498_v48, %v8478_v24  ;;  %v16846_v45 = vunpack.i.h.bf16 %v13647_v63  ;;  %v8492_v5 = vpop.permute.xlu1 %8491  ;;  %v5375_v30 = vpack.c.bf16 %v4491_v29, %v4490_v53  ;;  %v5263_v44 = vsel %vm16847_vm10, %v8499_v51, %v8479_v11 }
 0xcf9   : > { %v8504_v62 = vunpack.i.h.bf16 %v8502_v50  ;;  %v8503_v23 = vunpack.i.l.bf16 %v8502_v50  ;;  %v8494_v52 = vunpack.i.h.bf16 %v8492_v5  ;;  %v8493_v25 = vunpack.i.l.bf16 %v8492_v5  ;;  %5668 = vmatpush1.bf16.msra.mxu0 %v5504_v8 }
 0xcfa   : > { %v4495_v1 = vsel %vm818_vm7, %v16846_v45, %v8474_v35  ;;  %v5508_v28 = vpack.c.bf16 %v5267_v7, %v5266_v61  ;;  %5746 = vmatpush1.bf16.msra.mxu1 %v5370_v42  ;;  %v5509_v19 = vpack.c.bf16 %v5263_v44, %v5262_v16  ;;  %v14501_v63 = vcombine.low %v13855_v4, %v13855_v4  ;;  %v8512_v61 = vpop.permute.xlu0 %8511  ;;  %v16853_v16 = vld [vmem:[#allocation66_spill] sm:$0xff] }
 0xcfb   : > { %v5374_v35 = vpack.c.bf16 %v4495_v1, %v4494_v55  ;;  %v16849_v41 = vunpack.i.l.bf16 %v16848_v47  ;;  %v16850_v49 = vunpack.i.l.bf16 %v16598_v20  ;;  %v16851_v51 = vunpack.i.h.bf16 %v16598_v20  ;;  %5747 = vmatprep.subr.bf16.mxu1 %v5375_v30 }
 0xcfc   : > { %v16852_v4 = vunpack.i.h.bf16 %v16848_v47  ;;  %5669 = vmatprep.subr.bf16.mxu0 %v5509_v19  ;;  %v8507_v7 = vpop.permute.xlu1 %8506  ;;  %v16854_v9 = vunpack.i.l.bf16 %v16853_v16  ;;  %v16855_v20 = vunpack.i.h.bf16 %v16853_v16  ;;  %v8514_v1 = vunpack.i.h.bf16 %v8512_v61  ;;  %v16856_v19 = vld [vmem:[#allocation41_spill] sm:$0xff] }
 0xcfd   : > { %v4588_v53 = vsel %vm844_vm9, %v16849_v41, %v8503_v23  ;;  %v4540_v29 = vsel %vm831_vm8, %v16850_v49, %v8493_v25  ;;  %v4541_v48 = vsel %vm831_vm8, %v16851_v51, %v8494_v52  ;;  %v8513_v50 = vunpack.i.l.bf16 %v8512_v61  ;;  %5670 = vmatpush1.bf16.msra.mxu0 %v5508_v28  ;;  %v16859_v51 = vld [vmem:[#allocation148_spill] sm:$0xff] }
 0xcfe   : > { %v4589_v8 = vsel %vm844_vm9, %v16852_v4, %v8504_v62  ;;  %v5378_v42 = vpack.c.bf16 %v4541_v48, %v4540_v29  ;;  %v4536_v55 = vsel %vm831_vm8, %v8493_v25, %v16854_v9  ;;  %v4537_v45 = vsel %vm831_vm8, %v8494_v52, %v16855_v20  ;;  %5748 = vmatpush1.bf16.msra.mxu1 %v5374_v35 }
 0xcff   : > { %v8509_v5 = vunpack.i.h.bf16 %v8507_v7  ;;  %v8508_v30 = vunpack.i.l.bf16 %v8507_v7  ;;  %v5379_v44 = vpack.c.bf16 %v4537_v45, %v4536_v55  ;;  %v16857_v47 = vunpack.i.l.bf16 %v16856_v19  ;;  %v8522_v7 = vpop.permute.xlu0 %8521 }
 0xd00   : > { %v16858_v49 = vunpack.i.h.bf16 %v16856_v19  ;;  %v5386_v29 = vpack.c.bf16 %v4589_v8, %v4588_v53  ;;  %v16860_v52 = vunpack.i.l.bf16 %v16859_v51  ;;  %v16861_v28 = vunpack.i.l.bf16 %v13743_v46  ;;  %5672 = vmatmul.mubr.bf16.vlgmr.msra.gmra.mrb[44].mxu0 %v14501_v63  ;;  %v8517_v20 = vpop.permute.xlu1 %8516 }
 0xd01   : > { %v4584_v41 = vsel %vm844_vm9, %v8503_v23, %v16857_v47  ;;  %v16862_v4 = vunpack.i.h.bf16 %v13743_v46  ;;  %v16863_v61 = vunpack.i.h.bf16 %v16859_v51  ;;  %5749 = vmatprep.subr.bf16.mxu1 %v5379_v44  ;;  %v16864_v16 = vunpack.i.l.bf16 %v13645_v40  ;;  %v16866_v47 = vld [vmem:[#allocation151_spill] sm:$0xff] }
 0xd02   : > { %v4585_v25 = vsel %vm844_vm9, %v8504_v62, %v16858_v49  ;;  %v4590_v48 = vsel %vm844_vm9, %v16860_v52, %v8513_v50  ;;  %v4542_v35 = vsel %vm831_vm8, %v16861_v28, %v8508_v30  ;;  %v8524_v46 = vunpack.i.h.bf16 %v8522_v7  ;;  %5750 = vmatpush1.bf16.msra.mxu1 %v5378_v42 }
 0xd03   : > { %v4543_v23 = vsel %vm831_vm8, %v16862_v4, %v8509_v5  ;;  %v4591_v62 = vsel %vm844_vm9, %v16863_v61, %v8514_v1  ;;  %v5387_v8 = vpack.c.bf16 %v4585_v25, %v4584_v41  ;;  %v4538_v9 = vsel %vm831_vm8, %v8508_v30, %v16864_v16  ;;  %v8527_v16 = vpop.permute.xlu0 %8526 }
 0xd04   : > { %v5382_v53 = vpack.c.bf16 %v4543_v23, %v4542_v35  ;;  %v8523_v55 = vunpack.i.l.bf16 %v8522_v7  ;;  %v16865_v45 = vunpack.i.h.bf16 %v13645_v40  ;;  %v16867_v49 = vunpack.i.l.bf16 %v16866_v47  ;;  %v16869_v40 = vld [vmem:[#allocation58_spill] sm:$0xff]  ;;  %v16872_v23 = vld [vmem:[#allocation47_spill] sm:$0xff]  ;;  %v16877_v7 = vld [vmem:[#allocation101_spill] sm:$0xff] }
 0xd05   : > { %5762 = vmatprep.subr.bf16.mxu0 %v5387_v8  ;;  %v8519_v41 = vunpack.i.h.bf16 %v8517_v20  ;;  %v8518_v25 = vunpack.i.l.bf16 %v8517_v20  ;;  %v16868_v51 = vunpack.i.h.bf16 %v16866_v47  ;;  %v5390_v28 = vpack.c.bf16 %v4591_v62, %v4590_v48  ;;  %v8532_v47 = vpop.permute.xlu1 %8531 }
 0xd06   : > { %v4539_v19 = vsel %vm831_vm8, %v8509_v5, %v16865_v45  ;;  %v4586_v44 = vsel %vm844_vm9, %v8513_v50, %v16867_v49  ;;  %5763 = vmatpush1.bf16.msra.mxu0 %v5386_v29  ;;  %v16870_v35 = vunpack.i.l.bf16 %v16869_v40  ;;  %vm16871_vm2 = vcmp.lt.s32.totalorder %v9086_v15, 18 }
 0xd07   : > { %v5383_v30 = vpack.c.bf16 %v4539_v19, %v4538_v9  ;;  %v4587_v52 = vsel %vm844_vm9, %v8514_v1, %v16868_v51  ;;  %v16873_v50 = vunpack.i.l.bf16 %v16872_v23  ;;  %vm16874_vm14 = vmmov %vm16871_vm2  ;;  %v16875_v61 = vunpack.i.h.bf16 %v16869_v40  ;;  %v16883_v40 = vld [vmem:[#allocation102_spill] sm:$0xff] }
 0xd08   : > { %v4636_v5 = vsel %vm16871_vm2, %v16870_v35, %v8523_v55  ;;  %v5391_v4 = vpack.c.bf16 %v4587_v52, %v4586_v44  ;;  %vm16876_vm3 = vmmov %vm16871_vm2  ;;  %v16878_v1 = vunpack.i.l.bf16 %v16877_v7  ;;  %v16879_v48 = vunpack.i.h.bf16 %v16877_v7  ;;  %v16882_v44 = vld [vmem:[#allocation119_spill] sm:$0xff]  ;;  %v16889_v7 = vld [vmem:[#allocation110_spill] sm:$0xff] }
 0xd09   : > { %v4632_v42 = vsel %vm16874_vm14, %v8523_v55, %v16873_v50  ;;  %v4637_v8 = vsel %vm16876_vm3, %v16875_v61, %v8524_v46  ;;  %5751 = vmatprep.subr.bf16.mxu1 %v5383_v30  ;;  %v16880_v9 = vunpack.i.h.bf16 %v16872_v23  ;;  %vm16881_vm4 = vmmov %vm16871_vm2  ;;  %v8529_v45 = vunpack.i.h.bf16 %v8527_v16  ;;  %5794 = vmatprep.mubr.bf16.mxu0 %v16882_v44  ;;  %v16886_v50 = vld [vmem:[#allocation152_spill] sm:$0xff]  ;;  %v8537_v44 = vpop.permute.xlu1 %8536 }
 0xd0a   : > { %v4920_v29 = vsel %vm935_vm6, %v16878_v1, %v8518_v25  ;;  %v4921_v62 = vsel %vm935_vm6, %v16879_v48, %v8519_v41  ;;  %5764 = vmatprep.subr.bf16.mxu0 %v5391_v4  ;;  %v8528_v19 = vunpack.i.l.bf16 %v8527_v16  ;;  %5752 = vmatpush1.bf16.msra.mxu1 %v5382_v53  ;;  %v8534_v51 = vunpack.i.h.bf16 %v8532_v47  ;;  %vm16888_vm1 = vmmov %vm16871_vm2 }
 0xd0b   : > { %v4633_v55 = vsel %vm16881_vm4, %v8524_v46, %v16880_v9  ;;  %v5450_v20 = vpack.c.bf16 %v4921_v62, %v4920_v29  ;;  %v8533_v52 = vunpack.i.l.bf16 %v8532_v47  ;;  %v16884_v35 = vunpack.i.l.bf16 %v16883_v40  ;;  %5765 = vmatpush1.bf16.msra.mxu0 %v5390_v28  ;;  %vm16891_vm10 = vmmov %vm16888_vm1  ;;  %v8542_v62 = vpop.permute.xlu0 %8541 }
 0xd0c   : > { %v5395_v49 = vpack.c.bf16 %v4633_v55, %v4632_v42  ;;  %v16885_v23 = vunpack.i.h.bf16 %v16883_v40  ;;  %v5394_v4 = vpack.c.bf16 %v4637_v8, %v4636_v5  ;;  %v16887_v61 = vunpack.i.l.bf16 %v16886_v50  ;;  %vm16893_vm2 = vmmov %vm16888_vm1 }
 0xd0d   : > { %v4932_v30 = vsel %vm935_vm6, %v8518_v25, %v16884_v35  ;;  %v16890_v1 = vunpack.i.l.bf16 %v16889_v7  ;;  %v16892_v25 = vunpack.i.h.bf16 %v16886_v50  ;;  %v16895_v5 = vunpack.i.h.bf16 %v16672_v0  ;;  %vm16897_vm14 = vmmov %vm16888_vm1  ;;  %5754 = vmatmul.mubr.bf16.vlgmr.msra.gmra.mrb[48].mxu1 %v13816_v10  ;;  %v16901_v50 = vld [vmem:[#allocation114_spill] sm:$0xff] }
 0xd0e   : > { %v4933_v46 = vsel %vm935_vm6, %v8519_v41, %v16885_v23  ;;  %v4638_v42 = vsel %vm16888_vm1, %v16887_v61, %v8528_v19  ;;  %v16894_v41 = vunpack.i.l.bf16 %v16672_v0  ;;  %5766 = vmatprep.subr.bf16.mxu0 %v5395_v49  ;;  %v16896_v16 = vunpack.i.h.bf16 %v16889_v7  ;;  %5835 = vmatprep.mubr.bf16.mxu1 %v16901_v50  ;;  %v16902_v61 = vld [vmem:[#allocation48_spill] sm:$0xff] }
 0xd0f   : > { %v5451_v53 = vpack.c.bf16 %v4933_v46, %v4932_v30  ;;  %v4634_v29 = vsel %vm16891_vm10, %v8528_v19, %v16890_v1  ;;  %v4639_v48 = vsel %vm16893_vm2, %v16892_v25, %v8529_v45  ;;  %v4923_v8 = vsel %vm935_vm6, %v16895_v5, %v8534_v51  ;;  %v16898_v30 = vld [vmem:[#allocation133_spill] sm:$0xff]  ;;  %5767 = vmatpush1.bf16.msra.mxu0 %v5394_v4  ;;  %v16905_v1 = vld [vmem:[#allocation60_spill] sm:$0xff]  ;;  %v8547_v5 = vpop.permute.xlu0 %8546 }
 0xd10   : > { %v4922_v28 = vsel %vm935_vm6, %v16894_v41, %v8533_v52  ;;  %v4635_v9 = vsel %vm16897_vm14, %v8529_v45, %v16896_v16  ;;  %v8544_v19 = vunpack.i.h.bf16 %v8542_v62  ;;  %v8543_v47 = vunpack.i.l.bf16 %v8542_v62  ;;  %v16910_v41 = vld [vmem:[#allocation104_spill] sm:$0xff] }
 0xd11   : > { %v5454_v55 = vpack.c.bf16 %v4923_v8, %v4922_v28  ;;  %5803 = vmatprep.subr.bf16.mxu1 %v5451_v53  ;;  %v5399_v40 = vpack.c.bf16 %v4635_v9, %v4634_v29  ;;  %v8539_v0 = vunpack.i.h.bf16 %v8537_v44  ;;  %v8538_v35 = vunpack.i.l.bf16 %v8537_v44  ;;  %v8552_v44 = vpop.permute.xlu1 %8551 }
 0xd12   : > { %5804 = vmatpush1.bf16.msra.mxu1 %v5450_v20  ;;  %v16899_v23 = vunpack.i.l.bf16 %v16898_v30  ;;  %v16900_v46 = vunpack.i.h.bf16 %v16898_v30  ;;  %v5398_v10 = vpack.c.bf16 %v4639_v48, %v4638_v42  ;;  %v16903_v53 = vunpack.i.l.bf16 %v16902_v61 }
 0xd13   : > { %vm16904_vm3 = vcmp.lt.s32.totalorder %v9086_v15, 2  ;;  %v16906_v29 = vunpack.i.l.bf16 %v16905_v1  ;;  %v16908_v25 = vunpack.i.h.bf16 %v16902_v61  ;;  %v16911_v28 = vunpack.i.h.bf16 %v16910_v41  ;;  %5768 = vmatprep.subr.bf16.mxu0 %v5399_v40 }
 0xd14   : > { %v4934_v49 = vsel %vm935_vm6, %v8533_v52, %v16899_v23  ;;  %v4935_v45 = vsel %vm935_vm6, %v8534_v51, %v16900_v46  ;;  %v4684_v20 = vsel %vm16904_vm3, %v16903_v53, %v8543_v47  ;;  %vm16907_vm4 = vmmov %vm16904_vm3  ;;  %v16912_v42 = vunpack.i.l.bf16 %v16910_v41  ;;  %v16915_v46 = vld [vmem:[#allocation103_spill] sm:$0xff]  ;;  %5769 = vmatpush1.bf16.msra.mxu0 %v5398_v10  ;;  %v16918_v53 = vld [vmem:[#allocation105_spill] sm:$0xff] }
 0xd15   : > { %v5455_v7 = vpack.c.bf16 %v4935_v45, %v4934_v49  ;;  %v4680_v52 = vsel %vm16907_vm4, %v8543_v47, %v16906_v29  ;;  %vm16909_vm1 = vmmov %vm16904_vm3  ;;  %v4969_v4 = vsel %vm948_vm5, %v16911_v28, %v8539_v0  ;;  %v16913_v8 = vunpack.i.h.bf16 %v16905_v1  ;;  %v16921_v29 = vld [vmem:[#allocation108_spill] sm:$0xff] }
 0xd16   : > { %v4685_v51 = vsel %vm16909_vm1, %v16908_v25, %v8544_v19  ;;  %v4968_v48 = vsel %vm948_vm5, %v16912_v42, %v8538_v35  ;;  %vm16914_vm10 = vmmov %vm16909_vm1  ;;  %v8549_v9 = vunpack.i.h.bf16 %v8547_v5  ;;  %v8548_v47 = vunpack.i.l.bf16 %v8547_v5  ;;  %v16926_v28 = vld [vmem:[#allocation136_spill] sm:$0xff] }
 0xd17   : > { %v4681_v62 = vsel %vm16914_vm10, %v8544_v19, %v16913_v8  ;;  %v5458_v16 = vpack.c.bf16 %v4969_v4, %v4968_v48  ;;  %5805 = vmatprep.subr.bf16.mxu1 %v5455_v7  ;;  %v8554_v23 = vunpack.i.h.bf16 %v8552_v44  ;;  %v8553_v49 = vunpack.i.l.bf16 %v8552_v44  ;;  %vm16920_vm2 = vmmov %vm16909_vm1  ;;  %v8562_v4 = vpop.permute.xlu0 %8561 }
 0xd18   : > { %v5403_v30 = vpack.c.bf16 %v4681_v62, %v4680_v52  ;;  %5806 = vmatpush1.bf16.msra.mxu1 %v5454_v55  ;;  %v16916_v45 = vunpack.i.l.bf16 %v16915_v46  ;;  %v16917_v50 = vunpack.i.h.bf16 %v16915_v46  ;;  %v5402_v19 = vpack.c.bf16 %v4685_v51, %v4684_v20  ;;  %vm16923_vm14 = vmmov %vm16909_vm1 }
 0xd19   : > { %v16919_v7 = vunpack.i.l.bf16 %v16918_v53  ;;  %v16922_v52 = vunpack.i.l.bf16 %v16921_v29  ;;  %vm16925_vm3 = vmmov %vm16909_vm1  ;;  %v16928_v20 = vunpack.i.h.bf16 %v16926_v28  ;;  %v16929_v42 = vunpack.i.h.bf16 %v16921_v29 }
 0xd1a   : > { %v4980_v40 = vsel %vm948_vm5, %v8538_v35, %v16916_v45  ;;  %v4981_v61 = vsel %vm948_vm5, %v8539_v0, %v16917_v50  ;;  %v16924_v35 = vunpack.i.h.bf16 %v16918_v53  ;;  %v16927_v0 = vunpack.i.l.bf16 %v16926_v28  ;;  %5770 = vmatprep.subr.bf16.mxu0 %v5403_v30  ;;  %vm16930_vm4 = vmmov %vm16909_vm1 }
 0xd1b   : > { %v4686_v1 = vsel %vm16920_vm2, %v16919_v7, %v8548_v47  ;;  %v5459_v55 = vpack.c.bf16 %v4981_v61, %v4980_v40  ;;  %v4682_v25 = vsel %vm16923_vm14, %v8548_v47, %v16922_v52  ;;  %v4971_v51 = vsel %vm948_vm5, %v16928_v20, %v8554_v23  ;;  %v8557_v47 = vpop.permute.xlu1 %8556  ;;  %v16931_v40 = vld [vmem:[#allocation135_spill] sm:$0xff]  ;;  %5771 = vmatpush1.bf16.msra.mxu0 %v5402_v19  ;;  %v16934_v7 = vld [vmem:[#allocation54_spill] sm:$0xff] }
 0xd1c   : > { %v4687_v41 = vsel %vm16925_vm3, %v16924_v35, %v8549_v9  ;;  %v4970_v10 = vsel %vm948_vm5, %v16927_v0, %v8553_v49  ;;  %v4683_v48 = vsel %vm16930_vm4, %v8549_v9, %v16929_v42  ;;  %v8564_v8 = vunpack.i.h.bf16 %v8562_v4  ;;  %v16936_v52 = vld [vmem:[#allocation71_spill] sm:$0xff]  ;;  %v16939_v0 = vld [vmem:[#allocation44_spill] sm:$0xff] }
 0xd1d   : > { %v5462_v5 = vpack.c.bf16 %v4971_v51, %v4970_v10  ;;  %5807 = vmatprep.subr.bf16.mxu1 %v5459_v55  ;;  %v8563_v62 = vunpack.i.l.bf16 %v8562_v4  ;;  %v5407_v44 = vpack.c.bf16 %v4683_v48, %v4682_v25  ;;  %v8559_v46 = vunpack.i.h.bf16 %v8557_v47  ;;  %v8567_v10 = vpop.permute.xlu0 %8566 }
 0xd1e   : > { %5808 = vmatpush1.bf16.msra.mxu1 %v5458_v16  ;;  %v8558_v45 = vunpack.i.l.bf16 %v8557_v47  ;;  %v16932_v50 = vunpack.i.l.bf16 %v16931_v40  ;;  %v16933_v61 = vunpack.i.h.bf16 %v16931_v40  ;;  %v5406_v9 = vpack.c.bf16 %v4687_v41, %v4686_v1 }
 0xd1f   : > { %v16935_v55 = vunpack.i.l.bf16 %v16934_v7  ;;  %v16937_v25 = vunpack.i.l.bf16 %v16936_v52  ;;  %v16941_v1 = vunpack.i.h.bf16 %v16939_v0  ;;  %5772 = vmatprep.subr.bf16.mxu0 %v5407_v44  ;;  %v16942_v20 = vunpack.i.h.bf16 %v16936_v52 }
 0xd20   : > { %v4982_v30 = vsel %vm948_vm5, %v8553_v49, %v16932_v50  ;;  %v4983_v53 = vsel %vm948_vm5, %v8554_v23, %v16933_v61  ;;  %v16938_v49 = vunpack.i.h.bf16 %v16934_v7  ;;  %v16940_v23 = vunpack.i.l.bf16 %v16939_v0  ;;  %5773 = vmatpush1.bf16.msra.mxu0 %v5406_v9 }
 0xd21   : > { %v4732_v29 = vsel %vm883_vm11, %v16935_v55, %v8563_v62  ;;  %v5463_v16 = vpack.c.bf16 %v4983_v53, %v4982_v30  ;;  %v4728_v35 = vsel %vm883_vm11, %v8563_v62, %v16937_v25  ;;  %v5017_v41 = vsel %vm961_vm15, %v16941_v1, %v8559_v46  ;;  %v8572_v62 = vpop.permute.xlu1 %8571  ;;  %v16943_v30 = vld [vmem:[#allocation39_spill] sm:$0xff]  ;;  %v16946_v55 = vld [vmem:[#allocation124_spill] sm:$0xff] }
 0xd22   : > { %v4733_v28 = vsel %vm883_vm11, %v16938_v49, %v8564_v8  ;;  %v5016_v19 = vsel %vm961_vm15, %v16940_v23, %v8558_v45  ;;  %v4729_v51 = vsel %vm883_vm11, %v8564_v8, %v16942_v20  ;;  %v8569_v42 = vunpack.i.h.bf16 %v8567_v10  ;;  %v16948_v25 = vld [vmem:[#allocation75_spill] sm:$0xff] }
 0xd23   : > { %v5466_v4 = vpack.c.bf16 %v5017_v41, %v5016_v19  ;;  %5809 = vmatprep.subr.bf16.mxu1 %v5463_v16  ;;  %v8568_v48 = vunpack.i.l.bf16 %v8567_v10  ;;  %v5411_v47 = vpack.c.bf16 %v4729_v51, %v4728_v35  ;;  %v8574_v40 = vunpack.i.h.bf16 %v8572_v62  ;;  %v16951_v23 = vld [vmem:[#allocation143_spill] sm:$0xff]  ;;  %v8582_v19 = vpop.permute.xlu0 %8581 }
 0xd24   : > { %5810 = vmatpush1.bf16.msra.mxu1 %v5462_v5  ;;  %v8573_v50 = vunpack.i.l.bf16 %v8572_v62  ;;  %v16944_v61 = vunpack.i.l.bf16 %v16943_v30  ;;  %v16945_v53 = vunpack.i.h.bf16 %v16943_v30  ;;  %v5410_v8 = vpack.c.bf16 %v4733_v28, %v4732_v29 }
 0xd25   : > { %v16947_v16 = vunpack.i.l.bf16 %v16946_v55  ;;  %v16949_v35 = vunpack.i.l.bf16 %v16948_v25  ;;  %v16953_v29 = vunpack.i.h.bf16 %v16951_v23  ;;  %5774 = vmatprep.subr.bf16.mxu0 %v5411_v47  ;;  %v16954_v1 = vunpack.i.h.bf16 %v16948_v25 }
 0xd26   : > { %v5028_v44 = vsel %vm961_vm15, %v8558_v45, %v16944_v61  ;;  %v5029_v7 = vsel %vm961_vm15, %v8559_v46, %v16945_v53  ;;  %v16950_v45 = vunpack.i.h.bf16 %v16946_v55  ;;  %v16952_v46 = vunpack.i.l.bf16 %v16951_v23  ;;  %5775 = vmatpush1.bf16.msra.mxu0 %v5410_v8 }
 0xd27   : > { %v4734_v52 = vsel %vm883_vm11, %v16947_v16, %v8568_v48  ;;  %v5467_v5 = vpack.c.bf16 %v5029_v7, %v5028_v44  ;;  %v4730_v49 = vsel %vm883_vm11, %v8568_v48, %v16949_v35  ;;  %v5019_v28 = vsel %vm961_vm15, %v16953_v29, %v8574_v40  ;;  %v8577_v48 = vpop.permute.xlu1 %8576  ;;  %v16955_v44 = vld [vmem:[#allocation142_spill] sm:$0xff] }
 0xd28   : > { %v4735_v0 = vsel %vm883_vm11, %v16950_v45, %v8569_v42  ;;  %v5018_v9 = vsel %vm961_vm15, %v16952_v46, %v8573_v50  ;;  %v4731_v41 = vsel %vm883_vm11, %v8569_v42, %v16954_v1  ;;  %v8584_v20 = vunpack.i.h.bf16 %v8582_v19  ;;  %v16963_v45 = vld [vmem:[#allocation40_spill] sm:$0xff] }
 0xd29   : > { %v5470_v10 = vpack.c.bf16 %v5019_v28, %v5018_v9  ;;  %5811 = vmatprep.subr.bf16.mxu1 %v5467_v5  ;;  %v8583_v51 = vunpack.i.l.bf16 %v8582_v19  ;;  %v5415_v62 = vpack.c.bf16 %v4731_v41, %v4730_v49  ;;  %v8579_v30 = vunpack.i.h.bf16 %v8577_v48  ;;  %v16958_v5 = vld [vmem:[#allocation42_spill] sm:$0xff] }
 0xd2a   : > { %5812 = vmatpush1.bf16.msra.mxu1 %v5466_v4  ;;  %v8578_v61 = vunpack.i.l.bf16 %v8577_v48  ;;  %v16956_v53 = vunpack.i.l.bf16 %v16955_v44  ;;  %v16957_v7 = vunpack.i.h.bf16 %v16955_v44  ;;  %v5414_v42 = vpack.c.bf16 %v4735_v0, %v4734_v52 }
 0xd2b   : > { %v16959_v25 = vunpack.i.l.bf16 %v16958_v5  ;;  %vm16960_vm1 = vcmp.lt.s32.totalorder %v9086_v15, 106  ;;  %v16961_v35 = vunpack.i.h.bf16 %v16958_v5  ;;  %5776 = vmatprep.subr.bf16.mxu0 %v5415_v62  ;;  %v16964_v23 = vunpack.i.l.bf16 %v16963_v45  ;;  %v8587_v0 = vpop.permute.xlu1 %8586  ;;  %v16978_v5 = vld [vmem:[#allocation87_spill] sm:$0xff] }
 0xd2c   : > { %v5030_v47 = vsel %vm961_vm15, %v8573_v50, %v16956_v53  ;;  %v5031_v55 = vsel %vm961_vm15, %v8574_v40, %v16957_v7  ;;  %vm16962_vm10 = vmmov %vm16960_vm1  ;;  %v8592_v50 = vpop.permute.xlu0 %8591  ;;  %v16966_v46 = vunpack.i.h.bf16 %v16963_v45  ;;  %v16968_v29 = vunpack.i.l.bf16 %v16715_v27  ;;  %5777 = vmatpush1.bf16.msra.mxu0 %v5414_v42 }
 0xd2d   : > { %v5471_v16 = vpack.c.bf16 %v5031_v55, %v5030_v47  ;;  %v5064_v4 = vsel %vm16960_vm1, %v16959_v25, %v8578_v61  ;;  %v5065_v49 = vsel %vm16962_vm10, %v16961_v35, %v8579_v30  ;;  %vm16965_vm2 = vmmov %vm16960_vm1  ;;  %v8594_v8 = vunpack.i.h.bf16 %v8592_v50  ;;  %v16979_v25 = vld [vmem:[#allocation85_spill] sm:$0xff] }
 0xd2e   : > { %v5076_v40 = vsel %vm16965_vm2, %v8578_v61, %v16964_v23  ;;  %v8593_v52 = vunpack.i.l.bf16 %v8592_v50  ;;  %vm16967_vm14 = vmmov %vm16960_vm1  ;;  %v5474_v19 = vpack.c.bf16 %v5065_v49, %v5064_v4  ;;  %v8588_v1 = vunpack.i.l.bf16 %v8587_v0  ;;  %v16981_v49 = vld [vmem:[#allocation92_spill] sm:$0xff] }
 0xd2f   : > { %5813 = vmatprep.subr.bf16.mxu1 %v5471_v16  ;;  %v5077_v9 = vsel %vm16967_vm14, %v8579_v30, %v16966_v46  ;;  %vm16969_vm3 = vmmov %vm16960_vm1  ;;  %v16970_v48 = vunpack.i.h.bf16 %v16715_v27  ;;  %v16972_v61 = vunpack.i.l.bf16 %v16713_v34  ;;  %v8589_v30 = vunpack.i.h.bf16 %v8587_v0  ;;  %v8597_v35 = vpop.permute.xlu1 %8596 }
 0xd30   : > { %v5078_v28 = vsel %vm16969_vm3, %v8583_v51, %v16968_v29  ;;  %5814 = vmatpush1.bf16.msra.mxu1 %v5470_v10  ;;  %v5475_v41 = vpack.c.bf16 %v5077_v9, %v5076_v40  ;;  %vm16971_vm4 = vmmov %vm16960_vm1  ;;  %v16973_v53 = vunpack.i.h.bf16 %v16713_v34  ;;  %v16975_v10 = vld [vmem:[#allocation77_spill] sm:$0xff]  ;;  %v8607_v42 = vpop.permute.xlu0 %8606  ;;  %v16982_v50 = vunpack.i.l.bf16 %v16981_v49 }
 0xd31   : > { %v5079_v62 = vsel %vm16971_vm4, %v8584_v20, %v16970_v48  ;;  %v5066_v44 = vsel %vm16960_vm1, %v16972_v61, %v8583_v51  ;;  %vm16974_vm10 = vmmov %vm16960_vm1  ;;  %v16976_v7 = vunpack.i.l.bf16 %v16975_v10  ;;  %v16977_v55 = vunpack.i.h.bf16 %v16975_v10  ;;  %v16993_v10 = vld [vmem:[#allocation76_spill] sm:$0xff] }
 0xd32   : > { %v5067_v47 = vsel %vm16974_vm10, %v16973_v53, %v8584_v20  ;;  %v16980_v51 = vpack.c.bf16 %v16978_v5, %v16979_v25  ;;  %5815 = vmatprep.subr.bf16.mxu1 %v5475_v41  ;;  %v8609_v34 = vunpack.i.h.bf16 %v8607_v42  ;;  %v8608_v4 = vunpack.i.l.bf16 %v8607_v42  ;;  %v16986_v41 = vld [vmem:[#allocation86_spill] sm:$0xff] }
 0xd33   : > { %v4776_v27 = vsel %vm896_vm13, %v16976_v7, %v8593_v52  ;;  %v4777_v16 = vsel %vm896_vm13, %v16977_v55, %v8594_v8  ;;  %v5479_v20 = vpack.c.bf16 %v5079_v62, %v5078_v28  ;;  %v4788_v45 = vsel %vm896_vm13, %v8593_v52, %v16982_v50  ;;  %v16987_v28 = vld [vmem:[#allocation80_spill] sm:$0xff]  ;;  %v16994_v7 = vld [vmem:[#allocation73_spill] sm:$0xff] }
 0xd34   : > { %5778 = vmatprep.subr.bf16.mxu0 %v16980_v51  ;;  %5816 = vmatpush1.bf16.msra.mxu1 %v5474_v19  ;;  %v8599_v23 = vunpack.i.h.bf16 %v8597_v35  ;;  %v8598_v40 = vunpack.i.l.bf16 %v8597_v35  ;;  %v16983_v0 = vunpack.i.h.bf16 %v16981_v49  ;;  %v16984_v9 = vunpack.i.l.bf16 %v13606_v33  ;;  %v8612_v5 = vpop.permute.xlu0 %8611  ;;  %v16998_v51 = vld [vmem:[#allocation120_spill] sm:$0xff] }
 0xd35   : > { %vm16985_vm2 = vcmp.lt.s32.totalorder %v9086_v15, 90  ;;  %v16988_v48 = vpack.c.bf16 %v16986_v41, %v16987_v28  ;;  %5817 = vmatprep.subr.bf16.mxu1 %v5479_v20  ;;  %v16989_v52 = vunpack.i.h.bf16 %v13606_v33  ;;  %v5478_v62 = vpack.c.bf16 %v5067_v47, %v5066_v44  ;;  %v8602_v47 = vpop.permute.xlu1 %8601  ;;  %v17009_v41 = vld [vmem:[#allocation126_spill] sm:$0xff] }
 0xd36   : > { %v4789_v46 = vsel %vm896_vm13, %v8594_v8, %v16983_v0  ;;  %v5124_v29 = vsel %vm16985_vm2, %v8588_v1, %v16984_v9  ;;  %vm16990_vm14 = vmmov %vm16985_vm2  ;;  %v5426_v61 = vpack.c.bf16 %v4777_v16, %v4776_v27  ;;  %v16991_v53 = vunpack.i.l.bf16 %v13791_v37  ;;  %v17007_v0 = vld [vmem:[#allocation91_spill] sm:$0xff] }
 0xd37   : > { %5779 = vmatpush1.bf16.msra.mxu0 %v16988_v48  ;;  %v5125_v19 = vsel %vm16990_vm14, %v8589_v30, %v16989_v52  ;;  %vm16992_vm3 = vmmov %vm16985_vm2  ;;  %v16995_v55 = vpack.c.bf16 %v16993_v10, %v16994_v7  ;;  %v16996_v25 = vunpack.i.h.bf16 %v13791_v37  ;;  %v16999_v42 = vunpack.i.l.bf16 %v16998_v51 }
 0xd38   : > { %v5112_v8 = vsel %vm16992_vm3, %v16991_v53, %v8588_v1  ;;  %vm16997_vm4 = vmmov %vm16985_vm2  ;;  %v5427_v27 = vpack.c.bf16 %v4789_v46, %v4788_v45  ;;  %v5483_v16 = vpack.c.bf16 %v5125_v19, %v5124_v29  ;;  %v17000_v1 = vunpack.i.h.bf16 %v16998_v51  ;;  %5818 = vmatpush1.bf16.msra.mxu1 %v5478_v62  ;;  %v17006_v45 = vld [vmem:[#allocation74_spill] sm:$0xff]  ;;  %v8627_v62 = vpop.permute.xlu0 %8626 }
 0xd39   : > { %5780 = vmatprep.subr.bf16.mxu0 %v16995_v55  ;;  %v5113_v33 = vsel %vm16997_vm4, %v16996_v25, %v8589_v30  ;;  %v4778_v44 = vsel %vm896_vm13, %v16999_v42, %v8608_v4  ;;  %vm17001_vm1 = vmmov %vm16985_vm2  ;;  %v17002_v30 = vunpack.i.h.bf16 %v13940_v38  ;;  %v17004_v49 = vunpack.i.l.bf16 %v13702_v57  ;;  %v8617_v25 = vpop.permute.xlu1 %8616 }
 0xd3a   : > { %v4779_v35 = vsel %vm896_vm13, %v17000_v1, %v8609_v34  ;;  %v5114_v37 = vsel %vm17001_vm1, %v8343_v43, %v8598_v40  ;;  %vm17003_vm10 = vmmov %vm17001_vm1  ;;  %v17008_v46 = vpack.c.bf16 %v17006_v45, %v17007_v0  ;;  %v8614_v9 = vunpack.i.h.bf16 %v8612_v5  ;;  %5819 = vmatprep.subr.bf16.mxu1 %v5483_v16 }
 0xd3b   : > { %v5115_v20 = vsel %vm17003_vm10, %v17002_v30, %v8599_v23  ;;  %vm17005_vm2 = vmmov %vm17001_vm1  ;;  %v8613_v29 = vunpack.i.l.bf16 %v8612_v5  ;;  %v17010_v43 = vunpack.i.l.bf16 %v17009_v41  ;;  %v17011_v28 = vunpack.i.h.bf16 %v17009_v41 }
 0xd3c   : > { %v5126_v50 = vsel %vm17005_vm2, %v8598_v40, %v17004_v49  ;;  %5781 = vmatpush1.bf16.msra.mxu0 %v17008_v46  ;;  %v5482_v52 = vpack.c.bf16 %v5113_v33, %v5112_v8  ;;  %v8604_v19 = vunpack.i.h.bf16 %v8602_v47  ;;  %v8603_v40 = vunpack.i.l.bf16 %v8602_v47  ;;  %vm17013_vm14 = vmmov %vm17001_vm1  ;;  %v17014_v8 = vld [vmem:[#allocation94_spill] sm:$0xff]  ;;  %v17030_v46 = vld [vmem:[#allocation123_spill] sm:$0xff] }
 0xd3d   : > { %v4790_v38 = vsel %vm896_vm13, %v8608_v4, %v17010_v43  ;;  %v4791_v48 = vsel %vm896_vm13, %v8609_v34, %v17011_v28  ;;  %5782 = vmatprep.subr.bf16.mxu0 %v5427_v27  ;;  %v17012_v53 = vunpack.i.h.bf16 %v13702_v57  ;;  %v5430_v7 = vpack.c.bf16 %v4779_v35, %v4778_v44  ;;  %v17017_v57 = vld [vmem:[#allocation96_spill] sm:$0xff] }
 0xd3e   : > { %v8629_v55 = vunpack.i.h.bf16 %v8627_v62  ;;  %v8628_v5 = vunpack.i.l.bf16 %v8627_v62  ;;  %v5486_v51 = vpack.c.bf16 %v5115_v20, %v5114_v37  ;;  %5820 = vmatpush1.bf16.msra.mxu1 %v5482_v52  ;;  %v8619_v42 = vunpack.i.h.bf16 %v8617_v25 }
 0xd3f   : > { %v5127_v10 = vsel %vm17013_vm14, %v8599_v23, %v17012_v53  ;;  %v8618_v16 = vunpack.i.l.bf16 %v8617_v25  ;;  %v5431_v34 = vpack.c.bf16 %v4791_v48, %v4790_v38  ;;  %v17015_v33 = vunpack.i.l.bf16 %v17014_v8  ;;  %v8622_v38 = vpop.permute.xlu1 %8621  ;;  %v17037_v25 = vld [vmem:[#allocation128_spill] sm:$0xff] }
 0xd40   : > { %v5487_v4 = vpack.c.bf16 %v5127_v10, %v5126_v50  ;;  %vm17016_vm3 = vcmp.lt.s32.totalorder %v9086_v15, 126  ;;  %5783 = vmatpush1.bf16.msra.mxu0 %v5426_v61  ;;  %v17018_v27 = vunpack.i.l.bf16 %v17017_v57  ;;  %v17020_v44 = vunpack.i.h.bf16 %v17017_v57  ;;  %v8632_v50 = vpop.permute.xlu0 %8631 }
 0xd41   : > { %v4824_v47 = vsel %vm17016_vm3, %v17015_v33, %v8613_v29  ;;  %vm17019_vm4 = vmmov %vm17016_vm3  ;;  %v17022_v35 = vunpack.i.h.bf16 %v17014_v8  ;;  %v17024_v30 = vunpack.i.l.bf16 %v14036_v56  ;;  %vm17025_vm2 = vcmp.lt.s32.totalorder %v9086_v15, 89  ;;  %5784 = vmatprep.subr.bf16.mxu0 %v5431_v34 }
 0xd42   : > { %5821 = vmatprep.subr.bf16.mxu1 %v5487_v4  ;;  %v4836_v23 = vsel %vm17019_vm4, %v8613_v29, %v17018_v27  ;;  %vm17021_vm1 = vmmov %vm17016_vm3  ;;  %v17026_v20 = vunpack.i.h.bf16 %v14036_v56  ;;  %v17028_v45 = vunpack.i.l.bf16 %v13789_v3  ;;  %v17031_v29 = vunpack.i.l.bf16 %v17030_v46 }
 0xd43   : > { %v4837_v1 = vsel %vm17021_vm1, %v8614_v9, %v17020_v44  ;;  %vm17023_vm10 = vmmov %vm17021_vm1  ;;  %v5160_v61 = vsel %vm17025_vm2, %v17024_v30, %v8603_v40  ;;  %v17033_v41 = vunpack.i.h.bf16 %v17030_v46  ;;  %v8633_v43 = vunpack.i.l.bf16 %v8632_v50  ;;  %5822 = vmatpush1.bf16.msra.mxu1 %v5486_v51 }
 0xd44   : > { %v4825_v37 = vsel %vm17023_vm10, %v17022_v35, %v8614_v9  ;;  %vm17027_vm14 = vmmov %vm17025_vm2  ;;  %v17034_v28 = vunpack.i.h.bf16 %v13789_v3  ;;  %v5162_v52 = vsel %vm17025_vm2, %v8378_v6, %v8618_v16  ;;  %v5435_v62 = vpack.c.bf16 %v4837_v1, %v4836_v23  ;;  %5785 = vmatpush1.bf16.msra.mxu0 %v5430_v7 }
 0xd45   : > { %v5161_v49 = vsel %vm17027_vm14, %v17026_v20, %v8604_v19  ;;  %vm17029_vm3 = vmmov %vm17025_vm2  ;;  %v4827_v56 = vsel %vm17021_vm1, %v17033_v41, %v8629_v55  ;;  %v8634_v10 = vunpack.i.h.bf16 %v8632_v50  ;;  %v17038_v3 = vunpack.i.l.bf16 %v17037_v25  ;;  %v17049_v20 = vld [vmem:[#allocation97_spill] sm:$0xff] }
 0xd46   : > { %v5172_v0 = vsel %vm17029_vm3, %v8603_v40, %v17028_v45  ;;  %vm17032_vm4 = vmmov %vm17021_vm1  ;;  %v17040_v4 = vunpack.i.h.bf16 %v17037_v25  ;;  %v5490_v34 = vpack.c.bf16 %v5161_v49, %v5160_v61  ;;  %v8624_v54 = vunpack.i.h.bf16 %v8622_v38  ;;  %5786 = vmatprep.subr.bf16.mxu0 %v5435_v62 }
 0xd47   : > { %v4826_v9 = vsel %vm17032_vm4, %v17031_v29, %v8628_v5  ;;  %vm17035_vm10 = vmmov %vm17025_vm2  ;;  %v8623_v8 = vunpack.i.l.bf16 %v8622_v38  ;;  %v17042_v51 = vunpack.i.l.bf16 %v13894_v21  ;;  %v5434_v33 = vpack.c.bf16 %v4825_v37, %v4824_v47 }
 0xd48   : > { %v5173_v48 = vsel %vm17035_vm10, %v8604_v19, %v17034_v28  ;;  %vm17036_vm14 = vmmov %vm17025_vm2  ;;  %v5438_v57 = vpack.c.bf16 %v4827_v56, %v4826_v9  ;;  %vm17046_vm10 = vcmp.lt.s32.totalorder %v9086_v15, 110  ;;  %v17047_v30 = vunpack.i.h.bf16 %v13894_v21 }
 0xd49   : > { %v5163_v40 = vsel %vm17036_vm14, %v8379_v12, %v8619_v42  ;;  %v5491_v53 = vpack.c.bf16 %v5173_v48, %v5172_v0  ;;  %vm17039_vm3 = vmmov %vm17021_vm1  ;;  %v8647_v12 = vpop.permute.xlu0 %8646  ;;  %v17050_v49 = vunpack.i.l.bf16 %v17049_v20  ;;  %5787 = vmatpush1.bf16.msra.mxu0 %v5434_v33  ;;  %v17054_v0 = vunpack.i.h.bf16 %v17049_v20 }
 0xd4a   : > { %v4838_v19 = vsel %vm17039_vm3, %v8628_v5, %v17038_v3  ;;  %vm17041_vm4 = vmmov %vm17021_vm1  ;;  %v5494_v27 = vpack.c.bf16 %v5163_v40, %v5162_v52  ;;  %v17044_v5 = vld [vmem:[#allocation100_spill] sm:$0xff]  ;;  %v8648_v1 = vunpack.i.l.bf16 %v8647_v12  ;;  %v8649_v50 = vunpack.i.h.bf16 %v8647_v12  ;;  %v17064_v3 = vld [vmem:[#allocation130_spill] sm:$0xff] }
 0xd4b   : > { %v4839_v6 = vsel %vm17041_vm4, %v8629_v55, %v17040_v4  ;;  %5823 = vmatprep.subr.bf16.mxu1 %v5491_v53  ;;  %vm17043_vm1 = vmmov %vm17025_vm2  ;;  %v17045_v23 = vunpack.i.l.bf16 %v17044_v5  ;;  %v8637_v55 = vpop.permute.xlu1 %8636  ;;  %v17052_v47 = vunpack.i.h.bf16 %v17044_v5  ;;  %v17058_v29 = vunpack.i.h.bf16 %v14237_v18 }
 0xd4c   : > { %v5174_v7 = vsel %vm17043_vm1, %v8618_v16, %v17042_v51  ;;  %5824 = vmatpush1.bf16.msra.mxu1 %v5490_v34  ;;  %v5439_v35 = vpack.c.bf16 %v4839_v6, %v4838_v19  ;;  %vm17048_vm2 = vmmov %vm17043_vm1  ;;  %vm17057_vm1 = vcmp.lt.s32.totalorder %v9086_v15, 88  ;;  %v8639_v41 = vunpack.i.h.bf16 %v8637_v55 }
 0xd4d   : > { %v4872_v44 = vsel %vm17046_vm10, %v17045_v23, %v8633_v43  ;;  %v5175_v61 = vsel %vm17048_vm2, %v8619_v42, %v17047_v30  ;;  %vm17051_vm14 = vmmov %vm17046_vm10  ;;  %v17056_v42 = vunpack.i.l.bf16 %v14237_v18  ;;  %v8638_v56 = vunpack.i.l.bf16 %v8637_v55 }
 0xd4e   : > { %v4884_v16 = vsel %vm17051_vm14, %v8633_v43, %v17050_v49  ;;  %vm17053_vm3 = vmmov %vm17046_vm10  ;;  %v5495_v45 = vpack.c.bf16 %v5175_v61, %v5174_v7  ;;  %5788 = vmatprep.subr.bf16.mxu0 %v5439_v35  ;;  %v8652_v43 = vpop.permute.xlu0 %8651  ;;  %v17060_v40 = vunpack.i.l.bf16 %v14075_v39  ;;  %v17065_v19 = vunpack.i.l.bf16 %v17064_v3  ;;  %v17068_v7 = vld [vmem:[#allocation127_spill] sm:$0xff] }
 0xd4f   : > { %v4873_v37 = vsel %vm17053_vm3, %v17052_v47, %v8634_v10  ;;  %vm17055_vm4 = vmmov %vm17053_vm3  ;;  %v5208_v46 = vsel %vm17057_vm1, %v17056_v42, %v8623_v8  ;;  %v8654_v38 = vunpack.i.h.bf16 %v8652_v43  ;;  %v8653_v28 = vunpack.i.l.bf16 %v8652_v43  ;;  %v8642_v48 = vpop.permute.xlu1 %8641  ;;  %5789 = vmatpush1.bf16.msra.mxu0 %v5438_v57 }
 0xd50   : > { %v4885_v21 = vsel %vm17055_vm4, %v8634_v10, %v17054_v0  ;;  %vm17059_vm10 = vmmov %vm17057_vm1  ;;  %5825 = vmatprep.subr.bf16.mxu1 %v5495_v45  ;;  %v8644_v53 = vunpack.i.h.bf16 %v8642_v48  ;;  %v8643_v18 = vunpack.i.l.bf16 %v8642_v48  ;;  %v17062_v10 = vunpack.i.h.bf16 %v14075_v39 }
 0xd51   : > { %v5209_v9 = vsel %vm17059_vm10, %v17058_v29, %v8624_v54  ;;  %v5443_v52 = vpack.c.bf16 %v4885_v21, %v4884_v16  ;;  %vm17061_vm2 = vmmov %vm17057_vm1  ;;  %5826 = vmatpush1.bf16.msra.mxu1 %v5494_v27  ;;  %v4886_v4 = vsel %vm17053_vm3, %v8648_v1, %v17065_v19  ;;  %v5442_v6 = vpack.c.bf16 %v4873_v37, %v4872_v44 }
 0xd52   : > { %v5220_v62 = vsel %vm17061_vm2, %v8623_v8, %v17060_v40  ;;  %vm17063_vm14 = vmmov %vm17057_vm1  ;;  %v5498_v34 = vpack.c.bf16 %v5209_v9, %v5208_v46  ;;  %v17066_v51 = vunpack.i.h.bf16 %v17064_v3  ;;  %v17069_v33 = vunpack.i.l.bf16 %v17068_v7  ;;  %v17092_v40 = vld [vmem:[#allocation132_spill] sm:$0xff]  ;;  %v17096_v3 = vld [vmem:[#allocation131_spill] sm:$0xff] }
 0xd53   : > { %v5221_v25 = vsel %vm17063_vm14, %v8624_v54, %v17062_v10  ;;  %vm17067_vm4 = vmmov %vm17053_vm3  ;;  %v17071_v54 = vunpack.i.h.bf16 %v17068_v7  ;;  %v5210_v57 = vsel %vm17061_vm2, %v8428_v14, %v8638_v56  ;;  %5790 = vmatprep.subr.bf16.mxu0 %v5443_v52  ;;  %v17075_v55 = vunpack.i.h.bf16 %v14186_v59  ;;  %v8657_v35 = vpop.permute.xlu1 %8656 }
 0xd54   : > { %v5499_v12 = vpack.c.bf16 %v5221_v25, %v5220_v62  ;;  %v4887_v8 = vsel %vm17067_vm4, %v8649_v50, %v17066_v51  ;;  %vm17070_vm1 = vmmov %vm17053_vm3  ;;  %v17077_v14 = vunpack.i.l.bf16 %v14356_v32  ;;  %5791 = vmatpush1.bf16.msra.mxu0 %v5442_v6  ;;  %v8658_v45 = vunpack.i.l.bf16 %v8657_v35 }
 0xd55   : > { %v4874_v39 = vsel %vm17070_vm1, %v17069_v33, %v8648_v1  ;;  %vm17072_vm10 = vmmov %vm17070_vm1  ;;  %v5447_v23 = vpack.c.bf16 %v4887_v8, %v4886_v4  ;;  %vm17078_vm1 = vcmp.lt.s32.totalorder %v9086_v15, 87  ;;  %v17085_v46 = vunpack.i.l.bf16 %v14394_v58  ;;  %v8792_v8 = vld [vmem:[%s15324_s18 + $0x18] ss:$0 sps:$4 sm:$0xff]  }
 0xd56   : > { %v4875_v27 = vsel %vm17072_vm10, %v17071_v54, %v8649_v50  ;;  %vm17073_vm14 = vmmov %vm17061_vm2  ;;  %5827 = vmatprep.subr.bf16.mxu1 %v5499_v12  ;;  %v5268_v26 = vsel %vm17078_vm1, %v8643_v18, %v17077_v14  ;;  %v8659_v50 = vunpack.i.h.bf16 %v8657_v35  ;;  %v17087_v9 = vunpack.i.h.bf16 %v14394_v58  ;;  %v17099_v12 = vld [vmem:[#allocation79_spill] sm:$0xff] }
 0xd57   : > { %v5211_v5 = vsel %vm17073_vm14, %v8429_v22, %v8639_v41  ;;  %vm17074_vm3 = vmmov %vm17061_vm2  ;;  %5828 = vmatpush1.bf16.msra.mxu1 %v5498_v34  ;;  %v8662_v22 = vpop.permute.xlu0 %8661  ;;  %v5446_v0 = vpack.c.bf16 %v4875_v27, %v4874_v39  ;;  %5792 = vmatprep.subr.bf16.mxu0 %v5447_v23  ;;  %v17093_v62 = vunpack.i.l.bf16 %v17092_v40  ;;  %v17097_v19 = vunpack.i.l.bf16 %v17096_v3  ;;  %v5528_v7 = vpop.permute.xlu1 %5527 }
 0xd58   : > { %v5222_v44 = vsel %vm17074_vm3, %v8638_v56, %v8438_v17  ;;  %vm17076_vm4 = vmmov %vm17061_vm2  ;;  %v17080_v17 = vld [vmem:[#allocation99_spill] sm:$0xff]  ;;  %v8664_v47 = vunpack.i.h.bf16 %v8662_v22  ;;  %v8663_v37 = vunpack.i.l.bf16 %v8662_v22  ;;  %v5502_v32 = vpack.c.bf16 %v5211_v5, %v5210_v57 }
 0xd59   : > { %v5223_v1 = vsel %vm17076_vm4, %v8639_v41, %v17075_v55  ;;  %vm17079_vm10 = vmmov %vm17078_vm1  ;;  %v17081_v20 = vunpack.i.l.bf16 %v17080_v17  ;;  %v17082_v49 = vunpack.i.h.bf16 %v17080_v17  ;;  %5793 = vmatpush1.bf16.msra.mxu0 %v5446_v0  ;;  %v17098_v6 = vunpack.i.h.bf16 %v17096_v3  ;;  %v15082_v0 = vld [vmem:[%s17101_s23 + $0x8] sm:$0xff] }
 0xd5a   : > { %v5503_v30 = vpack.c.bf16 %v5223_v1, %v5222_v44  ;;  %v5269_v61 = vsel %vm17079_vm10, %v8644_v53, %v8469_v2  ;;  %v17083_v2 = vld [vmem:[#allocation98_spill] sm:$0xff]  ;;  %vm17086_vm2 = vmmov %vm17078_vm1  ;;  %v5306_v4 = vsel %vm1039_vm12, %v17097_v19, %v8663_v37 }
 0xd5b   : > { %v5316_v59 = vsel %vm1039_vm12, %v8653_v28, %v17081_v20  ;;  %v5317_v16 = vsel %vm1039_vm12, %v8654_v38, %v17082_v49  ;;  %v17084_v21 = vunpack.i.l.bf16 %v17083_v2  ;;  %v5256_v29 = vsel %vm17086_vm2, %v17085_v46, %v8643_v18  ;;  %vm17088_vm14 = vmmov %vm17078_vm1 }
 0xd5c   : > { %5829 = vmatprep.subr.bf16.mxu1 %v5503_v30  ;;  %v5257_v41 = vsel %vm17088_vm14, %v17087_v9, %v8644_v53  ;;  %v5507_v56 = vpack.c.bf16 %v5269_v61, %v5268_v26  ;;  %v17089_v43 = vunpack.i.h.bf16 %v17083_v2  ;;  %v5515_v52 = vpack.c.bf16 %v5317_v16, %v5316_v59  ;;  %vm17090_vm3 = vmmov %vm17078_vm1  ;;  %5795 = vmatmul.mubr.bf16.vlgmr.msra.gmra.mrb[48].mxu0 %v17099_v12  ;;  %v17105_v2 = vld [vmem:[#allocation37_spill] sm:$0xff] }
 0xd5d   : > { %v5304_v42 = vsel %vm1039_vm12, %v17084_v21, %v8653_v28  ;;  %5830 = vmatpush1.bf16.msra.mxu1 %v5502_v32  ;;  %v5270_v28 = vsel %vm17090_vm3, %v8658_v45, %v8488_v13  ;;  %vm17091_vm4 = vmmov %vm17078_vm1  ;;  %v5318_v53 = vsel %vm1039_vm12, %v8663_v37, %v17093_v62  ;;  %v5506_v10 = vpack.c.bf16 %v5257_v41, %v5256_v29 }
 0xd5e   : > { %v5305_v48 = vsel %vm1039_vm12, %v17089_v43, %v8654_v38  ;;  %v5271_v58 = vsel %vm17091_vm4, %v8659_v50, %v8489_v31  ;;  %5831 = vmatprep.subr.bf16.mxu1 %v5507_v56  ;;  %v17094_v38 = vunpack.i.h.bf16 %v17092_v40  ;;  %5844 = vmatprep.subr.bf16.mxu0 %v5515_v52  ;;  %v5258_v31 = vsel %vm17078_vm1, %v8478_v24, %v8658_v45  ;;  %vm17095_vm10 = vmmov %vm17078_vm1  ;;  %v6031_v52 = vld [vmem:[%s17108_s8 + $0x10] sm:$0xff] }
 0xd5f   : > { %v5514_v13 = vpack.c.bf16 %v5305_v48, %v5304_v42  ;;  %v5259_v36 = vsel %vm17095_vm10, %v8479_v11, %v8659_v50  ;;  %v5511_v25 = vpack.c.bf16 %v5271_v58, %v5270_v28  ;;  %v5307_v34 = vsel %vm1039_vm12, %v17098_v6, %v8664_v47  ;;  %v15071_v50 = vld [vmem:[%s17101_s23] sm:$0xff]  ;;  %v17106_v42 = vld [vmem:[#allocation43_spill] sm:$0xff] }
 0xd60   : > { %v5319_v18 = vsel %vm1039_vm12, %v8664_v47, %v17094_v38  ;;  %v5510_v60 = vpack.c.bf16 %v5259_v36, %v5258_v31  ;;  %v17100_v11 = vmov 0   ;;  %v5518_v51 = vpack.c.bf16 %v5307_v34, %v5306_v4  ;;  %v6029_v48 = vld [vmem:[%s17107_s4] sm:$0xff] }
 0xd61   : > { %5832 = vmatpush1.bf16.msra.mxu1 %v5506_v10  ;;  %v5519_v24 = vpack.c.bf16 %v5319_v18, %v5318_v53  ;;  %5845 = vmatpush1.bf16.msra.mxu0 %v5514_v13  ;;  %vm17112_vm12 = vcmask 130048  }
 0xd62   : > { %5833 = vmatprep.subr.bf16.mxu1 %v5511_v25  ;;  %5876 = vmatprep.mubr.bf16.mxu0 %v17100_v11  ;;  %v15112_v11 = vld [vmem:[%s17101_s23 + $0x10] sm:$0xff] }
 0xd63   : > { %5846 = vmatprep.subr.bf16.mxu0 %v5519_v24 }
 0xd65   : > { %5834 = vmatpush1.bf16.msra.mxu1 %v5510_v60  ;;  %5847 = vmatpush1.bf16.msra.mxu0 %v5518_v51 }
 0xd68   : > { %5836 = vmatmul.mubr.bf16.vlgmr.msra.gmra.mrb[52].mxu1 %v14501_v63  ;;  %6392 = vmatmul.mubr.msk.bf16.vlgmr.msra.gmra.mrb[52].mxu0 %vm1808_vm0, %v8792_v8  ;;  %v15116_v8 = vld [vmem:[%s17101_s23 + $0x18] sm:$0xff]  ;;  %s17111_s23 = sld [smem:[#allocation168_spill]]  ;;  %vm17113_vm0 = vmmov %vm17112_vm12 }
 0xd6e   : > { %v8787_v15 = vld [vmem:[%s17111_s23 + $0x14] ss:$8 sps:$4 sm:$0xff]  }
 0xd83   : > { %v5632_v39 = vpop.f32.mrb[40].mxu1 }
 0xd84   : > { %v5634_v57 = vpop.f32.mrb[41].mxu1 }
 0xd85   : > { %v5591_v33 = vpop.f32.mrb[40].mxu0  ;;  %v5636_v23 = vpop.f32.mrb[42].mxu1 }
 0xd86   : > { %v5592_v54 = vadd.f32 %v5591_v33, %v5528_v7  ;;  %v5593_v27 = vpop.f32.mrb[41].mxu0  ;;  %v5637_v1 = vpop.f32.mrb[43].mxu1  ;;  %v17109_v33 = vld [vmem:[#allocation38_spill] sm:$0xff] }
 0xd87   : > { %v5594_v5 = vadd.f32 %v5593_v27, %v5528_v7  ;;  %v5595_v44 = vpop.f32.mrb[42].mxu0  ;;  %v6030_v23 = vld [vmem:[%s17108_s8 + $0x8] sm:$0xff] }
 0xd88   : > { %v5633_v55 = vadd.f32 %v5632_v39, %v5592_v54  ;;  %v5596_v14 = vpop.f32.mrb[43].mxu0  ;;  %v17110_v54 = vld [vmem:[#allocation46_spill] sm:$0xff]  ;;  %v6032_v44 = vld [vmem:[%s17108_s8 + $0x18] sm:$0xff] }
 0xd89   : > { %v5635_v63 = vadd.f32 %v5634_v57, %v5594_v5  ;;  %v8784_v5 = vld [vmem:[%s17111_s23 + $0x4] ss:$8 sps:$4 sm:$0xff]  }
 0xd8a   : > { %6397 = vmatprep.mubr.msk.bf16.mxu0 %vm17112_vm12, %v8784_v5  ;;  %6399 = vmatprep.mubr.msk.bf16.mxu1 %vm17113_vm0, %v8784_v5 }
 0xd8f   : > { %v5714_v26 = vpop.f32.mrb[44].mxu1 }
 0xd90   : > { %v5716_v22 = vpop.f32.mrb[45].mxu1 }
 0xd91   : > { %v5718_v35 = vpop.f32.mrb[46].mxu1 }
 0xd92   : > { %v5719_v30 = vpop.f32.mrb[47].mxu1 }
 0xdd3   : > { %v5673_v61 = vpop.f32.mrb[44].mxu0 }
 0xdd4   : > { %v5674_v17 = vadd.f32 %v5673_v61, %v5633_v55  ;;  %v5675_v20 = vpop.f32.mrb[45].mxu0 }
 0xdd5   : > { %v5676_v59 = vadd.f32 %v5675_v20, %v5635_v63  ;;  %v5677_v49 = vpop.f32.mrb[46].mxu0 }
 0xdd6   : > { %v5715_v16 = vadd.f32 %v5714_v26, %v5674_v17  ;;  %v5678_v47 = vpop.f32.mrb[47].mxu0  ;;  %v17114_v26 = vld [vmem:[#allocation6_spill] sm:$0xff] }
 0xdd7   : > { %v5717_v37 = vadd.f32 %v5716_v22, %v5676_v59 }
 0xdd8   : > { %v5885_v45 = vadd.f32 %v15071_v50, %v5715_v16 }
 0xdd9   : > { %v5886_v32 = vadd.f32 %v15082_v0, %v5717_v37 }
 0xdda   : > { %v15086_v21 = vmul.f32 %v5885_v45, %v17105_v2 }
 0xddb   : > { %v15089_v46 = vmul.f32 %v5886_v32, %v17106_v42 }
 0xddc   : > { %6231 = vst [vmem:[%s15079_s26] sm:$0xff] %v15086_v21 }
 0xddd   : > { %6232 = vst [vmem:[%s15079_s26 + $0x8] sm:$0xff] %v15089_v46  ;;  %v8665_v56 = vpack.i.bf16 %v15089_v46, %v15086_v21 }
 0xddf   : > { %8666 = vrot.lane.b32.xlu0 %v8665_v56, %s16000_s5 }
 0xde0   : > { %v5755_v29 = vpop.f32.mrb[48].mxu1 }
 0xde1   : > { %v5757_v9 = vpop.f32.mrb[49].mxu1  ;;  %v5756_v28 = vadd.f32 %v5755_v29, %v5528_v7 }
 0xde2   : > { %v5759_v41 = vpop.f32.mrb[50].mxu1  ;;  %v5758_v58 = vadd.f32 %v5757_v9, %v5528_v7 }
 0xde3   : > { %v5760_v43 = vpop.f32.mrb[51].mxu1  ;;  %8671 = vrot.lane.b32.xlu0 %v8665_v56, %s15925_s6  ;;  %v17115_v41 = vld [vmem:[#allocation10_spill] sm:$0xff] }
 0xde4   : > { %v17116_v43 = vld [vmem:[#allocation12_spill] sm:$0xff] }
 0xde7   : > { %8676 = vrot.lane.b32.xlu0 %v8665_v56, %s15926_s27 }
 0xdeb   : > { %8681 = vrot.lane.b32.xlu0 %v8665_v56, %s15927_s28 }
 0xdef   : > { %8706 = vrot.lane.b32.xlu0 %v8665_v56, %s16001_s7 }
 0xdf3   : > { %8711 = vrot.lane.b32.xlu0 %v8665_v56, %s15922_s2 }
 0xdf7   : > { %8716 = vrot.lane.b32.xlu0 %v8665_v56, %s15936_s3 }
 0xdfb   : > { %8721 = vrot.lane.b32.xlu0 %v8665_v56, %s15938_s0 }
 0xdff   : > { %6035 = vperm.xlu0 %6743, %v6029_v48  }
 0xe03   : > { %6045 = vperm.xlu0 %6743, %v6031_v52  }
 0xe2f   : > { %v5796_v40 = vpop.f32.mrb[48].mxu0 }
 0xe30   : > { %v5797_v62 = vadd.f32 %v5796_v40, %v5756_v28  ;;  %v5798_v53 = vpop.f32.mrb[49].mxu0  ;;  %v17117_v28 = vld [vmem:[#allocation11_spill] sm:$0xff] }
 0xe31   : > { %v5799_v38 = vadd.f32 %v5798_v53, %v5758_v58  ;;  %v5800_v18 = vpop.f32.mrb[50].mxu0  ;;  %v17118_v53 = vld [vmem:[#allocation5_spill] sm:$0xff] }
 0xe32   : > { %v5801_v10 = vpop.f32.mrb[51].mxu0 }
 0xe3b   : > { %v5837_v13 = vpop.f32.mrb[52].mxu1  ;;  %v5878_v25 = vpop.f32.mrb[52].mxu0 }
 0xe3c   : > { %v5838_v31 = vadd.f32 %v5837_v13, %v5797_v62  ;;  %v5839_v36 = vpop.f32.mrb[53].mxu1  ;;  %v5880_v4 = vpop.f32.mrb[53].mxu0 }
 0xe3d   : > { %v5840_v3 = vadd.f32 %v5839_v36, %v5799_v38  ;;  %v5841_v19 = vpop.f32.mrb[54].mxu1  ;;  %v5882_v12 = vpop.f32.mrb[54].mxu0 }
 0xe3e   : > { %v5879_v6 = vadd.f32 %v5878_v25, %v5838_v31  ;;  %v5842_v34 = vpop.f32.mrb[55].mxu1  ;;  %v5883_v60 = vpop.f32.mrb[55].mxu0  ;;  %v17119_v19 = vld [vmem:[#allocation7_spill] sm:$0xff] }
 0xe3f   : > { %v5881_v24 = vadd.f32 %v5880_v4, %v5840_v3 }
 0xe40   : > { %v5887_v51 = vadd.f32 %v15112_v11, %v5879_v6  ;;  %v17120_v6 = vld [vmem:[#allocation9_spill] sm:$0xff] }
 0xe41   : > { %v5888_v7 = vadd.f32 %v15116_v8, %v5881_v24  ;;  %v17121_v24 = vld [vmem:[#allocation8_spill] sm:$0xff] }
 0xe42   : > { %v15120_v39 = vmul.f32 %v5887_v51, %v17109_v33 }
 0xe43   : > { %v15123_v27 = vmul.f32 %v5888_v7, %v17110_v54 }
 0xe44   : > { %6233 = vst [vmem:[%s15079_s26 + $0x10] sm:$0xff] %v15120_v39 }
 0xe45   : > { %6234 = vst [vmem:[%s15079_s26 + $0x18] sm:$0xff] %v15123_v27  ;;  %v8685_v57 = vpack.i.bf16 %v15123_v27, %v15120_v39 }
 0xe47   : > { %8686 = vrot.lane.b32.xlu1 %v8685_v57, %s16000_s5 }
 0xe4b   : > { %8691 = vrot.lane.b32.xlu1 %v8685_v57, %s15925_s6 }
 0xe4f   : > { %8696 = vrot.lane.b32.xlu1 %v8685_v57, %s15926_s27 }
 0xe51   : > { %v8667_v55 = vpop.permute.xlu0 %8666 }
 0xe52   : > { %v8669_v1 = vunpack.i.h.bf16 %v8667_v55  ;;  %v8668_v14 = vunpack.i.l.bf16 %v8667_v55 }
 0xe53   : > { %8701 = vrot.lane.b32.xlu1 %v8685_v57, %s15927_s28 }
 0xe54   : > { %v5903_v63 = vsel %vm818_vm7, %v8668_v14, %v8669_v1 }
 0xe55   : > { %v5990_v22 = vpack.c.bf16 %v17114_v26, %v5903_v63  ;;  %v8672_v35 = vpop.permute.xlu0 %8671  ;;  %v17124_v26 = vld [vmem:[#allocation16_spill] sm:$0xff] }
 0xe56   : > { %v8674_v61 = vunpack.i.h.bf16 %v8672_v35  ;;  %v8673_v17 = vunpack.i.l.bf16 %v8672_v35 }
 0xe57   : > { %8726 = vrot.lane.b32.xlu1 %v8685_v57, %s16001_s7  ;;  %6077 = vmatprep.subr.bf16.mxu0 %v5990_v22 }
 0xe58   : > { %v5915_v45 = vsel %vm831_vm8, %v8673_v17, %v8674_v61 }
 0xe59   : > { %v8677_v30 = vpop.permute.xlu0 %8676  ;;  %v5994_v38 = vpack.c.bf16 %v17118_v53, %v5915_v45  ;;  %v6008_v53 = vpack.c.bf16 %v15116_v8, %v15123_v27  ;;  %v6007_v8 = vpack.c.bf16 %v15112_v11, %v15120_v39 }
 0xe5a   : > { %v8679_v47 = vunpack.i.h.bf16 %v8677_v30  ;;  %v8678_v37 = vunpack.i.l.bf16 %v8677_v30  ;;  %v17125_v30 = vld [vmem:[#allocation15_spill] sm:$0xff] }
 0xe5b   : > { %8731 = vrot.lane.b32.xlu1 %v8685_v57, %s15922_s2 }
 0xe5c   : > { %v5927_v13 = vsel %vm844_vm9, %v8678_v37, %v8679_v47 }
 0xe5d   : > { %v8682_v59 = vpop.permute.xlu0 %8681 }
 0xe5e   : > { %v8684_v18 = vunpack.i.h.bf16 %v8682_v59  ;;  %v8683_v10 = vunpack.i.l.bf16 %v8682_v59 }
 0xe5f   : > { %8736 = vrot.lane.b32.xlu1 %v8685_v57, %s15936_s3 }
 0xe61   : > { %v8707_v31 = vpop.permute.xlu0 %8706 }
 0xe63   : > { %8741 = vrot.lane.b32.xlu1 %v8685_v57, %s15938_s0  ;;  %v17122_v57 = vld [vmem:[#allocation13_spill] sm:$0xff] }
 0xe64   : > { %v5998_v5 = vpack.c.bf16 %v17122_v57, %v5927_v13 }
 0xe67   : > { %6040 = vperm.xlu1 %6744, %v6030_v23   ;;  %v5939_v23 = vsel %vm883_vm11, %v8683_v10, %v8684_v18 }
 0xe6b   : > { %6050 = vperm.xlu1 %6744, %v6032_v44  }
 0xeb9   : > { %v8687_v20 = vpop.permute.xlu1 %8686 }
 0xeba   : > { %v8689_v49 = vunpack.i.h.bf16 %v8687_v20  ;;  %v8688_v16 = vunpack.i.l.bf16 %v8687_v20 }
 0xebc   : > { %v5902_v32 = vsel %vm818_vm7, %v8669_v1, %v8688_v16  ;;  %v5904_v29 = vsel %vm818_vm7, %v8689_v49, %v8668_v14  ;;  %v5901_v9 = vsel %vm818_vm7, %v8688_v16, %v8689_v49  ;;  %v17123_v14 = vld [vmem:[#allocation14_spill] sm:$0xff]  ;;  %v17126_v49 = vld [vmem:[#allocation17_spill] sm:$0xff] }
 0xebd   : > { %v5989_v56 = vpack.c.bf16 %v17115_v41, %v5904_v29  ;;  %v5991_v48 = vpack.c.bf16 %v17116_v43, %v5902_v32  ;;  %v8692_v52 = vpop.permute.xlu1 %8691  ;;  %v5992_v58 = vpack.c.bf16 %v17117_v28, %v5901_v9  ;;  %v6002_v16 = vpack.c.bf16 %v17126_v49, %v5939_v23  ;;  %v17127_v9 = vld [vmem:[#allocation18_spill] sm:$0xff]  ;;  %v17134_v23 = vld [vmem:[#allocation24_spill] sm:$0xff]  ;;  %v17137_v49 = vld [vmem:[#allocation25_spill] sm:$0xff] }
 0xebe   : > { %v8694_v40 = vunpack.i.h.bf16 %v8692_v52  ;;  %v8693_v62 = vunpack.i.l.bf16 %v8692_v52  ;;  %v8708_v29 = vunpack.i.l.bf16 %v8707_v31  ;;  %v17129_v52 = vld [vmem:[#allocation19_spill] sm:$0xff] }
 0xebf   : > { %6078 = vmatpush1.bf16.msra.mxu0 %v5989_v56  ;;  %6130 = vmatprep.subr.bf16.mxu1 %v5992_v58  ;;  %v17128_v56 = vld [vmem:[#allocation20_spill] sm:$0xff] }
 0xec0   : > { %v5914_v36 = vsel %vm831_vm8, %v8674_v61, %v8693_v62  ;;  %v5916_v25 = vsel %vm831_vm8, %v8694_v40, %v8673_v17  ;;  %6079 = vmatprep.subr.bf16.mxu0 %v5994_v38  ;;  %6131 = vmatpush1.bf16.msra.mxu1 %v5991_v48  ;;  %v5913_v3 = vsel %vm831_vm8, %v8693_v62, %v8694_v40  ;;  %v8712_v17 = vpop.permute.xlu0 %8711 }
 0xec1   : > { %v5993_v4 = vpack.c.bf16 %v17119_v19, %v5916_v25  ;;  %v5995_v34 = vpack.c.bf16 %v17120_v6, %v5914_v36  ;;  %v8697_v12 = vpop.permute.xlu1 %8696  ;;  %v5996_v60 = vpack.c.bf16 %v17121_v24, %v5913_v3  ;;  %v6006_v62 = vpack.c.bf16 %v15082_v0, %v15089_v46  ;;  %v17130_v46 = vld [vmem:[#allocation22_spill] sm:$0xff]  ;;  %v17131_v6 = vld [vmem:[#allocation21_spill] sm:$0xff] }
 0xec2   : > { %v8699_v51 = vunpack.i.h.bf16 %v8697_v12  ;;  %v8698_v7 = vunpack.i.l.bf16 %v8697_v12  ;;  %v6005_v0 = vpack.c.bf16 %v15071_v50, %v15086_v21  ;;  %v8714_v27 = vunpack.i.h.bf16 %v8712_v17  ;;  %v17132_v12 = vld [vmem:[#allocation23_spill] sm:$0xff] }
 0xec3   : > { %6080 = vmatpush1.bf16.msra.mxu0 %v5993_v4  ;;  %6132 = vmatprep.subr.bf16.mxu1 %v5996_v60  ;;  %v8713_v25 = vunpack.i.l.bf16 %v8712_v17 }
 0xec4   : > { %v5926_v44 = vsel %vm844_vm9, %v8679_v47, %v8698_v7  ;;  %v5928_v55 = vsel %vm844_vm9, %v8699_v51, %v8678_v37  ;;  %6081 = vmatprep.subr.bf16.mxu0 %v5998_v5  ;;  %6133 = vmatpush1.bf16.msra.mxu1 %v5995_v34  ;;  %v5925_v1 = vsel %vm844_vm9, %v8698_v7, %v8699_v51  ;;  %v8709_v47 = vunpack.i.h.bf16 %v8707_v31  ;;  %v8717_v38 = vpop.permute.xlu0 %8716  ;;  %v17133_v51 = vld [vmem:[#allocation26_spill] sm:$0xff] }
 0xec5   : > { %v5997_v63 = vpack.c.bf16 %v17123_v14, %v5928_v55  ;;  %v5999_v22 = vpack.c.bf16 %v17124_v26, %v5926_v44  ;;  %v8702_v35 = vpop.permute.xlu1 %8701  ;;  %v6000_v61 = vpack.c.bf16 %v17125_v30, %v5925_v1  ;;  %v8719_v39 = vunpack.i.h.bf16 %v8717_v38  ;;  %v17136_v30 = vld [vmem:[#allocation30_spill] sm:$0xff] }
 0xec6   : > { %v8704_v20 = vunpack.i.h.bf16 %v8702_v35  ;;  %v8703_v59 = vunpack.i.l.bf16 %v8702_v35  ;;  %v5951_v13 = vsel %vm896_vm13, %v8708_v29, %v8709_v47  ;;  %v8718_v24 = vunpack.i.l.bf16 %v8717_v38 }
 0xec7   : > { %6082 = vmatpush1.bf16.msra.mxu0 %v5997_v63  ;;  %6134 = vmatprep.subr.bf16.mxu1 %v6000_v61  ;;  %v6009_v11 = vpack.c.bf16 %v17132_v12, %v5951_v13  ;;  %v5963_v57 = vsel %vm935_vm6, %v8713_v25, %v8714_v27  ;;  %v17135_v63 = vld [vmem:[#allocation31_spill] sm:$0xff] }
 0xec8   : > { %v5938_v37 = vsel %vm883_vm11, %v8684_v18, %v8703_v59  ;;  %v5940_v45 = vsel %vm883_vm11, %v8704_v20, %v8683_v10  ;;  %6083 = vmatprep.subr.bf16.mxu0 %v6002_v16  ;;  %6135 = vmatpush1.bf16.msra.mxu1 %v5999_v22  ;;  %v5937_v32 = vsel %vm883_vm11, %v8703_v59, %v8704_v20  ;;  %v8722_v5 = vpop.permute.xlu0 %8721 }
 0xec9   : > { %v6001_v41 = vpack.c.bf16 %v17127_v9, %v5940_v45  ;;  %v6003_v43 = vpack.c.bf16 %v17128_v56, %v5938_v37  ;;  %v8727_v48 = vpop.permute.xlu1 %8726  ;;  %v6004_v28 = vpack.c.bf16 %v17129_v52, %v5937_v32  ;;  %v6013_v61 = vpack.c.bf16 %v17136_v30, %v5963_v57  ;;  %v17138_v37 = vld [vmem:[#allocation32_spill] sm:$0xff]  ;;  %v17140_v52 = vld [vmem:[#allocation27_spill] sm:$0xff] }
 0xeca   : > { %v8729_v58 = vunpack.i.h.bf16 %v8727_v48  ;;  %v8728_v40 = vunpack.i.l.bf16 %v8727_v48  ;;  %v5975_v17 = vsel %vm948_vm5, %v8718_v24, %v8719_v39  ;;  %v8724_v20 = vunpack.i.h.bf16 %v8722_v5 }
 0xecb   : > { %6084 = vmatpush1.bf16.msra.mxu0 %v6001_v41  ;;  %6136 = vmatprep.subr.bf16.mxu1 %v6004_v28  ;;  %v17139_v41 = vld [vmem:[#allocation28_spill] sm:$0xff]  ;;  %v6017_v28 = vpack.c.bf16 %v17140_v52, %v5975_v17 }
 0xecc   : > { %6085 = vmatprep.subr.bf16.mxu0 %v6006_v62  ;;  %6137 = vmatpush1.bf16.msra.mxu1 %v6003_v43  ;;  %v5950_v18 = vsel %vm896_vm13, %v8709_v47, %v8728_v40  ;;  %v5952_v10 = vsel %vm896_vm13, %v8729_v58, %v8708_v29  ;;  %v5949_v4 = vsel %vm896_vm13, %v8728_v40, %v8729_v58  ;;  %v8723_v47 = vunpack.i.l.bf16 %v8722_v5  ;;  %v17141_v58 = vld [vmem:[#allocation33_spill] sm:$0xff] }
 0xecd   : > { %v8732_v31 = vpop.permute.xlu1 %8731  ;;  %6138 = vmatprep.subr.bf16.mxu1 %v6008_v53  ;;  %v6010_v36 = vpack.c.bf16 %v17130_v46, %v5950_v18  ;;  %v6012_v34 = vpack.c.bf16 %v17131_v6, %v5952_v10  ;;  %v6011_v44 = vpack.c.bf16 %v17134_v23, %v5949_v4  ;;  %v17142_v53 = vld [vmem:[#allocation29_spill] sm:$0xff]  ;;  %v17143_v10 = vld [vmem:[#allocation35_spill] sm:$0xff]  ;;  %v17145_v46 = vld [vmem:[#allocation36_spill] sm:$0xff] }
 0xece   : > { %v8734_v3 = vunpack.i.h.bf16 %v8732_v31  ;;  %v8733_v19 = vunpack.i.l.bf16 %v8732_v31  ;;  %v5987_v62 = vsel %vm961_vm15, %v8723_v47, %v8724_v20  ;;  %v17144_v31 = vld [vmem:[#allocation34_spill] sm:$0xff] }
 0xecf   : > { %6086 = vmatpush1.bf16.msra.mxu0 %v6005_v0  ;;  %v6021_v0 = vpack.c.bf16 %v17144_v31, %v5987_v62 }
 0xed0   : > { %6087 = vmatprep.subr.bf16.mxu0 %v6010_v36  ;;  %6139 = vmatpush1.bf16.msra.mxu1 %v6007_v8  ;;  %v5962_v50 = vsel %vm935_vm6, %v8714_v27, %v8733_v19  ;;  %v5964_v21 = vsel %vm935_vm6, %v8734_v3, %v8713_v25  ;;  %v5961_v14 = vsel %vm935_vm6, %v8733_v19, %v8734_v3  ;;  %v8786_v8 = vld [vmem:[%s17111_s23] ss:$8 sps:$4 sm:$0xff]   ;;  %vm17147_vm6 = vmmov %vm17113_vm0  ;;  %v8789_v27 = vld [vmem:[%s17111_s23 + $0x10] ss:$8 sps:$4 sm:$0xff]   ;;  %v6036_v25 = vpop.permute.xlu0 %6035 }
 0xed1   : > { %v8737_v60 = vpop.permute.xlu1 %8736  ;;  %6140 = vmatprep.subr.bf16.mxu1 %v6012_v34  ;;  %v6014_v7 = vpack.c.bf16 %v17133_v51, %v5962_v50  ;;  %v6016_v26 = vpack.c.bf16 %v17135_v63, %v5964_v21  ;;  %v6015_v45 = vpack.c.bf16 %v17138_v37, %v5961_v14 }
 0xed2   : > { %v8739_v55 = vunpack.i.h.bf16 %v8737_v60  ;;  %v8738_v1 = vunpack.i.l.bf16 %v8737_v60 }
 0xed3   : > { %6088 = vmatpush1.bf16.msra.mxu0 %v6009_v11 }
 0xed4   : > { %6089 = vmatprep.subr.bf16.mxu0 %v6014_v7  ;;  %6141 = vmatpush1.bf16.msra.mxu1 %v6011_v44  ;;  %v5974_v22 = vsel %vm948_vm5, %v8719_v39, %v8738_v1  ;;  %v5976_v35 = vsel %vm948_vm5, %v8739_v55, %v8718_v24  ;;  %v5973_v9 = vsel %vm948_vm5, %v8738_v1, %v8739_v55  ;;  %vm17146_vm5 = vmmov %vm17113_vm0  ;;  %v6046_v17 = vpop.permute.xlu0 %6045 }
 0xed5   : > { %v8742_v59 = vpop.permute.xlu1 %8741  ;;  %6142 = vmatprep.subr.bf16.mxu1 %v6016_v26  ;;  %v6018_v16 = vpack.c.bf16 %v17137_v49, %v5974_v22  ;;  %v6020_v56 = vpack.c.bf16 %v17139_v41, %v5976_v35  ;;  %v6019_v38 = vpack.c.bf16 %v17142_v53, %v5973_v9 }
 0xed6   : > { %v8744_v32 = vunpack.i.h.bf16 %v8742_v59  ;;  %v8743_v29 = vunpack.i.l.bf16 %v8742_v59 }
 0xed7   : > { %6090 = vmatpush1.bf16.msra.mxu0 %v6013_v61 }
 0xed8   : > { %6091 = vmatprep.subr.bf16.mxu0 %v6018_v16  ;;  %6143 = vmatpush1.bf16.msra.mxu1 %v6015_v45  ;;  %v5986_v43 = vsel %vm961_vm15, %v8724_v20, %v8743_v29  ;;  %v5988_v48 = vsel %vm961_vm15, %v8744_v32, %v8723_v47  ;;  %v5985_v18 = vsel %vm961_vm15, %v8743_v29, %v8744_v32 }
 0xed9   : > { %6144 = vmatprep.subr.bf16.mxu1 %v6020_v56  ;;  %v6022_v40 = vpack.c.bf16 %v17141_v58, %v5986_v43  ;;  %v6024_v13 = vpack.c.bf16 %v17143_v10, %v5988_v48  ;;  %v6023_v36 = vpack.c.bf16 %v17145_v46, %v5985_v18 }
 0xedb   : > { %6092 = vmatpush1.bf16.msra.mxu0 %v6017_v28 }
 0xedc   : > { %6093 = vmatprep.subr.bf16.mxu0 %v6022_v40  ;;  %6145 = vmatpush1.bf16.msra.mxu1 %v6019_v38 }
 0xedd   : > { %6146 = vmatprep.subr.bf16.mxu1 %v6024_v13 }
 0xedf   : > { %6094 = vmatpush1.bf16.msra.mxu0 %v6021_v0 }
 0xee0   : > { %6147 = vmatpush1.bf16.msra.mxu1 %v6023_v36 }
 0xee2   : > { %6110 = vmatmul.mubr.bf16.vlgmr.msra.gmra.mrb[56].mxu0 %v8786_v8 }
 0xee3   : > { %6163 = vmatmul.mubr.bf16.vlgmr.msra.gmra.mrb[56].mxu1 %v8786_v8  ;;  %6398 = vmatprep.mubr.msk.bf16.mxu0 %vm17146_vm5, %v8787_v15 }
 0xee4   : > { %6400 = vmatprep.mubr.msk.bf16.mxu1 %vm17147_vm6, %v8787_v15 }
 0xee6   : > { %v6041_v3 = vpop.permute.xlu1 %6040 }
 0xeea   : > { %6120 = vmatmul.mubr.bf16.gmra.mrb[60].mxu0 %v8789_v27  ;;  %v6051_v16 = vpop.permute.xlu1 %6050 }
 0xeeb   : > { %6173 = vmatmul.mubr.bf16.gmra.mrb[60].mxu1 %v8789_v27 }
 0xfb5   : > { %v6111_v19 = vpop.f32.mrb[56].mxu0 }
 0xfb6   : > { %v6112_v4 = vadd.f32 %v6111_v19, %v6036_v25  ;;  %v6113_v6 = vpop.f32.mrb[57].mxu0  ;;  %v6164_v34 = vpop.f32.mrb[56].mxu1 }
 0xfb7   : > { %v6114_v50 = vadd.f32 %v6113_v6, %v6036_v25  ;;  %v6165_v21 = vadd.f32 %v6164_v34, %v6036_v25  ;;  %v6115_v12 = vpop.f32.mrb[58].mxu0  ;;  %v6166_v11 = vpop.f32.mrb[57].mxu1 }
 0xfb8   : > { %v6183_v39 = vmax.f32 %v6112_v4, 0.0  ;;  %v6116_v24 = vadd.f32 %v6115_v12, %v6041_v3  ;;  %v6167_v60 = vadd.f32 %v6166_v11, %v6036_v25  ;;  %v6117_v51 = vpop.f32.mrb[59].mxu0  ;;  %v6168_v7 = vpop.f32.mrb[58].mxu1 }
 0xfb9   : > { %v6184_v57 = vmax.f32 %v6114_v50, 0.0  ;;  %v6185_v5 = vmax.f32 %v6165_v21, 0.0  ;;  %v6118_v23 = vadd.f32 %v6117_v51, %v6041_v3  ;;  %v6169_v44 = vadd.f32 %v6168_v7, %v6041_v3  ;;  %v6170_v55 = vpop.f32.mrb[59].mxu1 }
 0xfba   : > { %v6199_v1 = vmul.f32 %v6183_v39, %v17105_v2  ;;  %v6187_v14 = vmax.f32 %v6116_v24, 0.0  ;;  %v6186_v63 = vmax.f32 %v6167_v60, 0.0  ;;  %v6171_v26 = vadd.f32 %v6170_v55, %v6041_v3 }
 0xfbb   : > { %v6200_v22 = vmul.f32 %v6184_v57, %v17106_v42  ;;  %v6201_v35 = vmul.f32 %v6185_v5, %v17109_v33  ;;  %v6188_v30 = vmax.f32 %v6118_v23, 0.0  ;;  %v6189_v61 = vmax.f32 %v6169_v44, 0.0 }
 0xfbc   : > { %6215 = vst [vmem:[%s15269_s1] sm:$0xff] %v6199_v1  ;;  %v6203_v20 = vmul.f32 %v6187_v14, %v17105_v2  ;;  %v6202_v59 = vmul.f32 %v6186_v63, %v17110_v54  ;;  %v6190_v49 = vmax.f32 %v6171_v26, 0.0 }
 0xfbd   : > { %6216 = vst [vmem:[%s15269_s1 + $0x8] sm:$0xff] %v6200_v22  ;;  %6217 = vst [vmem:[%s15269_s1 + $0x10] sm:$0xff] %v6201_v35  ;;  %v6204_v47 = vmul.f32 %v6188_v30, %v17106_v42  ;;  %v6205_v37 = vmul.f32 %v6189_v61, %v17109_v33  ;;  %v6121_v45 = vpop.f32.mrb[60].mxu0 }
 0xfbe   : > { %6219 = vst [vmem:[%s15269_s1 + $0x20] sm:$0xff] %v6203_v20  ;;  %6218 = vst [vmem:[%s15269_s1 + $0x18] sm:$0xff] %v6202_v59  ;;  %v6206_v32 = vmul.f32 %v6190_v49, %v17110_v54  ;;  %v6122_v29 = vadd.f32 %v6121_v45, %v6046_v17  ;;  %v6123_v9 = vpop.f32.mrb[61].mxu0  ;;  %v6174_v41 = vpop.f32.mrb[60].mxu1 }
 0xfbf   : > { %6220 = vst [vmem:[%s15269_s1 + $0x28] sm:$0xff] %v6204_v47  ;;  %6221 = vst [vmem:[%s15269_s1 + $0x30] sm:$0xff] %v6205_v37  ;;  %v6124_v56 = vadd.f32 %v6123_v9, %v6046_v17  ;;  %v6175_v43 = vadd.f32 %v6174_v41, %v6046_v17  ;;  %v6125_v48 = vpop.f32.mrb[62].mxu0  ;;  %v6176_v52 = vpop.f32.mrb[61].mxu1 }
 0xfc0   : > { %6222 = vst [vmem:[%s15269_s1 + $0x38] sm:$0xff] %v6206_v32  ;;  %v6191_v28 = vmax.f32 %v6122_v29, 0.0  ;;  %v6126_v58 = vadd.f32 %v6125_v48, %v6051_v16  ;;  %v6177_v40 = vadd.f32 %v6176_v52, %v6046_v17  ;;  %v6127_v62 = vpop.f32.mrb[63].mxu0  ;;  %v6178_v53 = vpop.f32.mrb[62].mxu1 }
 0xfc1   : > { %v6192_v38 = vmax.f32 %v6124_v56, 0.0  ;;  %v6193_v18 = vmax.f32 %v6175_v43, 0.0  ;;  %v6128_v10 = vadd.f32 %v6127_v62, %v6051_v16  ;;  %v6179_v13 = vadd.f32 %v6178_v53, %v6051_v16  ;;  %v6180_v31 = vpop.f32.mrb[63].mxu1 }
 0xfc2   : > { %v6207_v0 = vmul.f32 %v6191_v28, %v17105_v2  ;;  %v6195_v46 = vmax.f32 %v6126_v58, 0.0  ;;  %v6194_v36 = vmax.f32 %v6177_v40, 0.0  ;;  %v6181_v8 = vadd.f32 %v6180_v31, %v6051_v16 }
 0xfc3   : > { %v6208_v15 = vmul.f32 %v6192_v38, %v17106_v42  ;;  %v6209_v27 = vmul.f32 %v6193_v18, %v17109_v33  ;;  %v6196_v25 = vmax.f32 %v6128_v10, 0.0  ;;  %v6197_v3 = vmax.f32 %v6179_v13, 0.0 }
 0xfc4   : > { %6223 = vst [vmem:[%s15269_s1 + $0x40] sm:$0xff] %v6207_v0  ;;  %v6211_v19 = vmul.f32 %v6195_v46, %v17105_v2  ;;  %v6210_v4 = vmul.f32 %v6194_v36, %v17110_v54  ;;  %v6198_v6 = vmax.f32 %v6181_v8, 0.0 }
 0xfc5   : > { %6224 = vst [vmem:[%s15269_s1 + $0x48] sm:$0xff] %v6208_v15  ;;  %6225 = vst [vmem:[%s15269_s1 + $0x50] sm:$0xff] %v6209_v27  ;;  %v6212_v34 = vmul.f32 %v6196_v25, %v17106_v42  ;;  %v6213_v50 = vmul.f32 %v6197_v3, %v17109_v33 }
 0xfc6   : > { %6227 = vst [vmem:[%s15269_s1 + $0x60] sm:$0xff] %v6211_v19  ;;  %6226 = vst [vmem:[%s15269_s1 + $0x58] sm:$0xff] %v6210_v4  ;;  %v6214_v21 = vmul.f32 %v6198_v6, %v17110_v54 }
 0xfc7   : > { %6228 = vst [vmem:[%s15269_s1 + $0x68] sm:$0xff] %v6212_v34  ;;  %6229 = vst [vmem:[%s15269_s1 + $0x70] sm:$0xff] %v6213_v50 }
 0xfc8   : > { %6230 = vst [vmem:[%s15269_s1 + $0x78] sm:$0xff] %v6214_v21 }
 0xfc9 PF: > { %s17149_s11 = sld [smem:[#allocation2_spill]] }
 0xfcf   : > { %s34_s4 = sadd.s32 1, %s17149_s11  }
 0xfd0   : > { %p31_p4 = scmp.ge.s32.totalorder %s34_s4, 4  }
 0xfd2   :  { %33 = sbr.rel (!%p31_p4) target bundleno = 19 (0x13), region = 150 }

</bundles_post_ra>
